<compile_context>
chip_gen: v6e
topology: v6e:2x2x1
jax: 0.10.0
libtpu: 0.0.40
codegen_flags: <defaults>
</compile_context>

<pallas_src>
import math

import jax
import jax.numpy as jnp
from jax.experimental import pallas as pl
from jax.experimental.pallas import tpu as pltpu

# ----------------------------- model hyper-params -----------------------------
OUTPUT_SIZE = 50     # vocab size
EMB_SIZE    = 32     # d_model (divisible by nhead)
HIDDEN_SIZE = 64     # dim_feedforward
NUM_LAYER   = 2
NHEAD       = 8
HEAD_DIM    = EMB_SIZE // NHEAD
MAX_LEN     = 64
T, B, S     = 8, 2, 10   # target len, batch, memory (encoder) len
LN_EPS      = 1e-5
V_PAD       = 64         # classifier padded 50 -> 64 lanes (sliced back outside)

# per-layer parameter ordering (kernel layout: weights (K,N), biases/gains (1,N))
LAYER_PARAM_KEYS = (
    "sa_wqkv", "sa_bqkv", "sa_wo", "sa_bo",
    "ca_wq", "ca_bq", "ca_wkv", "ca_bkv", "ca_wo", "ca_bo",
    "ln1_g", "ln1_b", "ln2_g", "ln2_b", "ln3_g", "ln3_b",
    "w1", "b1", "w2", "b2",
)
N_LAYER_PARAMS = len(LAYER_PARAM_KEYS)      # 20


# ------------------------- in-kernel helper functions --------------------------
def _layernorm(y, g, b):
    # PyTorch LayerNorm: biased variance, eps inside sqrt.
    mu = jnp.mean(y, axis=-1, keepdims=True)
    var = jnp.mean(jnp.square(y - mu), axis=-1, keepdims=True)
    return (y - mu) * jax.lax.rsqrt(var + LN_EPS) * g + b


def _erf(z):
    # TODO(synk): use lax.erf directly if/when erf_p lowers in Mosaic; this is the
    # A&S 7.1.26 polynomial (max abs err ~1.5e-7 ~= f32 eps), built from exp/mul/add.
    az = jnp.abs(z)
    t = 1.0 / (1.0 + 0.3275911 * az)
    poly = ((((1.061405429 * t - 1.453152027) * t + 1.421413741) * t
             - 0.284496736) * t + 0.254829592) * t
    e = 1.0 - poly * jnp.exp(-az * az)
    return jnp.where(z >= 0.0, e, -e)


def _gelu(x):
    # exact-erf GELU (matches F.gelu default) to float32 precision
    return 0.5 * x * (1.0 + _erf(x * 0.7071067811865476))


def _mha(q, k, v, bias, head_mask, scale):
    """q:(Tq,E), k/v:(Tk,E), bias:(Tq,Tk) additive (-inf = masked) or None,
    head_mask:(H,1,E) 0/1 lane mask per head.  Returns concat-by-head (Tq,E)."""
    tk = k.shape[0]
    qm = q[None, :, :] * (head_mask * scale)                       # (H, Tq, E)
    km = jnp.broadcast_to(k[None, :, :], (NHEAD, tk, EMB_SIZE))    # (H, Tk, E)
    vm = v[None, :, :] * head_mask                                 # (H, Tk, E)
    # per-head scores: masked-q contraction over the full E is exactly the
    # per-head d=4 contraction (other heads' lanes are zeroed).
    s = jnp.einsum("hte,hse->hts", qm, km, preferred_element_type=jnp.float32)
    if bias is not None:
        s = s + bias[None, :, :]
    m = jnp.max(s, axis=-1, keepdims=True)
    p = jnp.exp(s - m)
    p = p / jnp.sum(p, axis=-1, keepdims=True)
    o = jnp.einsum("hts,hse->hte", p, vm, preferred_element_type=jnp.float32)
    # head h's output only occupies head-h lanes -> summing over heads re-assembles
    # the PyTorch head-concatenated (Tq, E) output.
    return jnp.sum(o, axis=0)


# ------------------------------ fused decoder kernel ---------------------------
def _decoder_kernel(x_ref, mem_ref, bias_ref, *rest):
    o_ref = rest[-1]
    prm = rest[:-1]
    n_layers = (len(prm) - 4) // N_LAYER_PARAMS
    layer_refs = [prm[l * N_LAYER_PARAMS:(l + 1) * N_LAYER_PARAMS]
                  for l in range(n_layers)]
    norm_g_r, norm_b_r, fc_w_r, fc_b_r = prm[n_layers * N_LAYER_PARAMS:]

    E = EMB_SIZE
    scale = 1.0 / math.sqrt(HEAD_DIM)

    # per-head 0/1 lane masks, built natively in 3-D (H, 1, E)
    h_ids = jax.lax.broadcasted_iota(jnp.int32, (NHEAD, 1, E), 0)
    l_ids = jax.lax.broadcasted_iota(jnp.int32, (NHEAD, 1, E), 2)
    lo = h_ids * HEAD_DIM
    head_mask = ((l_ids >= lo) & (l_ids < lo + HEAD_DIM)).astype(jnp.float32)

    # hoist all parameter loads (VMEM -> values) once
    layer_vals = [tuple(r[...] for r in lrefs) for lrefs in layer_refs]
    norm_g, norm_b = norm_g_r[...], norm_b_r[...]
    fc_w, fc_b = fc_w_r[...], fc_b_r[...]

    n_batch = x_ref.shape[0]
    for b in range(n_batch):            # batch rows are independent; B is tiny/static
        xb = x_ref[b]                   # (T, E)
        memb = mem_ref[b]               # (S, E)
        biasb = bias_ref[b]             # (T, T) additive self-attn mask

        for lp in layer_vals:
            (sa_wqkv, sa_bqkv, sa_wo, sa_bo,
             ca_wq, ca_bq, ca_wkv, ca_bkv, ca_wo, ca_bo,
             ln1_g, ln1_b, ln2_g, ln2_b, ln3_g, ln3_b,
             w1, b1, w2, b2) = lp

            # ---- self attention (merged QKV matmul), post-norm residual ----
            qkv = jnp.dot(xb, sa_wqkv, preferred_element_type=jnp.float32) + sa_bqkv
            sa = _mha(qkv[:, :E], qkv[:, E:2 * E], qkv[:, 2 * E:],
                      biasb, head_mask, scale)
            sa = jnp.dot(sa, sa_wo, preferred_element_type=jnp.float32) + sa_bo
            xb = _layernorm(xb + sa, ln1_g, ln1_b)

            # ---- cross attention (merged KV matmul on memory), no mask ----
            qc = jnp.dot(xb, ca_wq, preferred_element_type=jnp.float32) + ca_bq
            kvc = jnp.dot(memb, ca_wkv, preferred_element_type=jnp.float32) + ca_bkv
            ca = _mha(qc, kvc[:, :E], kvc[:, E:], None, head_mask, scale)
            ca = jnp.dot(ca, ca_wo, preferred_element_type=jnp.float32) + ca_bo
            xb = _layernorm(xb + ca, ln2_g, ln2_b)

            # ---- feed forward with fused exact-erf GELU epilogue ----
            h = jnp.dot(xb, w1, preferred_element_type=jnp.float32) + b1
            h = _gelu(h)
            ff = jnp.dot(h, w2, preferred_element_type=jnp.float32) + b2
            xb = _layernorm(xb + ff, ln3_g, ln3_b)

        # final decoder LayerNorm (no residual) + lane-padded classifier
        xn = _layernorm(xb, norm_g, norm_b)
        logits = jnp.dot(xn, fc_w, preferred_element_type=jnp.float32) + fc_b
        o_ref[b] = logits.astype(o_ref.dtype)


def _block(shape):
    return pl.BlockSpec(shape, lambda *_: (0,) * len(shape))


def fused_decoder(x, mem, self_bias, flat_params):
    """x:(B,T,E) batch-first, mem:(B,S,E), self_bias:(B,T,T). Returns (B,T,V_PAD)."""
    Bb, Tt, _ = x.shape
    inputs = [x, mem, self_bias, *flat_params]
    return pl.pallas_call(
        _decoder_kernel,
        grid=(1,),
        in_specs=[_block(a.shape) for a in inputs],
        out_specs=_block((Bb, Tt, V_PAD)),
        out_shape=jax.ShapeDtypeStruct((Bb, Tt, V_PAD), jnp.float32),
        compiler_params=pltpu.CompilerParams(dimension_semantics=("arbitrary",)),
    )(*inputs)


# ------------------------------- full forward pass ------------------------------
@jax.jit
def transformer_decoder_forward(params, trg, enc_output, sub_mask, mask):
    Tt, Bb = trg.shape
    # TODO(synk): token-id embedding gather stays in XLA; a Pallas dynamic gather
    # would need per-token DMA and is not worth it at this size.
    x = params["emb"][trg.T] * math.sqrt(EMB_SIZE)            # (B, T, E) batch-first
    x = x + params["pe"][:Tt][None, :, :]                     # pos-enc (dropout = id)
    mem = jnp.transpose(enc_output, (1, 0, 2))                # (B, S, E)
    # combined additive self-attn bias: float causal mask + bool key-padding mask
    self_bias = (sub_mask[None, :, :]
                 + jnp.where(mask, -jnp.inf, 0.0)[:, None, :]).astype(jnp.float32)

    flat = []
    for lp in params["layers"]:
        flat.extend(lp[k] for k in LAYER_PARAM_KEYS)
    flat.extend([params["norm_g"], params["norm_b"], params["fc_w"], params["fc_b"]])

    out = fused_decoder(x.astype(jnp.float32), mem.astype(jnp.float32),
                        self_bias, flat)                      # (B, T, V_PAD)
    # back to PyTorch's (T, B, vocab) layout, un-pad the classifier dim
    return jnp.transpose(out, (1, 0, 2))[:, :, :OUTPUT_SIZE]


# ------------------------------- parameter init ---------------------------------
def make_pos_encoding(max_len, E):
    position = jnp.arange(max_len, dtype=jnp.float32)[:, None]
    div_term = jnp.exp(jnp.arange(0, E, 2, dtype=jnp.float32)
                       * (-math.log(10000.0) / E))
    pe = jnp.zeros((max_len, E), jnp.float32)
    pe = pe.at[:, 0::2].set(jnp.sin(position * div_term))
    pe = pe.at[:, 1::2].set(jnp.cos(position * div_term))
    return pe                                                 # (max_len, E)


def init_params(key):
    keys = iter(jax.random.split(key, 256))

    def nrm(shape, s=0.05):
        return (s * jax.random.normal(next(keys), shape)).astype(jnp.float32)

    E, H, V = EMB_SIZE, HIDDEN_SIZE, OUTPUT_SIZE
    layers = []
    for _ in range(NUM_LAYER):
        # PyTorch-layout raw weights ...
        sa_in_w, sa_in_b = nrm((3 * E, E)), nrm((3 * E,))
        sa_out_w, sa_out_b = nrm((E, E)), nrm((E,))
        ca_in_w, ca_in_b = nrm((3 * E, E)), nrm((3 * E,))
        ca_out_w, ca_out_b = nrm((E, E)), nrm((E,))
        l1_w, l1_b = nrm((H, E)), nrm((H,))
        l2_w, l2_b = nrm((E, H)), nrm((E,))

        def ln():
            return (jnp.ones((E,), jnp.float32) + nrm((E,), 0.01), nrm((E,), 0.01))
        ln1_g, ln1_b = ln(); ln2_g, ln2_b = ln(); ln3_g, ln3_b = ln()

        # ... pre-baked once into kernel layout: weights (K,N), biases/gains (1,N)
        layers.append(dict(
            sa_wqkv=sa_in_w.T,           sa_bqkv=sa_in_b.reshape(1, 3 * E),
            sa_wo=sa_out_w.T,            sa_bo=sa_out_b.reshape(1, E),
            ca_wq=ca_in_w[:E].T,         ca_bq=ca_in_b[:E].reshape(1, E),
            ca_wkv=ca_in_w[E:].T,        ca_bkv=ca_in_b[E:].reshape(1, 2 * E),
            ca_wo=ca_out_w.T,            ca_bo=ca_out_b.reshape(1, E),
            ln1_g=ln1_g.reshape(1, E),   ln1_b=ln1_b.reshape(1, E),
            ln2_g=ln2_g.reshape(1, E),   ln2_b=ln2_b.reshape(1, E),
            ln3_g=ln3_g.reshape(1, E),   ln3_b=ln3_b.reshape(1, E),
            w1=l1_w.T,                   b1=l1_b.reshape(1, H),
            w2=l2_w.T,                   b2=l2_b.reshape(1, E),
        ))

    norm_g = jnp.ones((E,), jnp.float32) + nrm((E,), 0.01)
    norm_b = nrm((E,), 0.01)
    fc_w, fc_b = nrm((V, E)), nrm((V,))
    # classifier padded 50 -> 64 output lanes (zeros); sliced back after the kernel
    fc_w_pad = jnp.zeros((E, V_PAD), jnp.float32).at[:, :V].set(fc_w.T)
    fc_b_pad = jnp.zeros((1, V_PAD), jnp.float32).at[0, :V].set(fc_b)

    return dict(
        emb=nrm((V, E), 0.1),
        pe=make_pos_encoding(MAX_LEN + 10, E),
        layers=layers,
        norm_g=norm_g.reshape(1, E), norm_b=norm_b.reshape(1, E),
        fc_w=fc_w_pad, fc_b=fc_b_pad,
    )


# ------------------------------------ main ---------------------------------------
if __name__ == "__main__":
    root = jax.random.PRNGKey(0)
    k_p, k_trg, k_enc = jax.random.split(root, 3)

    params = init_params(k_p)

    # target token ids, (T, B) seq-first like PyTorch default transformer
    trg = jax.random.randint(k_trg, (T, B), 0, OUTPUT_SIZE, dtype=jnp.int32)
    # encoder memory, (S, B, E)
    enc_output = jax.random.normal(k_enc, (S, B, EMB_SIZE), dtype=jnp.float32)
    # causal (subsequent) mask: 0 on/below diag, -inf above (float, like PyTorch)
    sub_mask = jnp.where(jnp.arange(T)[:, None] >= jnp.arange(T)[None, :],
                         0.0, -jnp.inf).astype(jnp.float32)
    # key padding mask (B, T), True = padded position; keep rows non-fully-masked
    mask = jnp.zeros((B, T), dtype=bool).at[1, T - 1].set(True)

    out = transformer_decoder_forward(params, trg, enc_output, sub_mask, mask)
    out = jax.block_until_ready(out)
    assert out.shape == (T, B, OUTPUT_SIZE)
    assert bool(jnp.all(jnp.isfinite(out)))
    print("KERNEL_OK")
</pallas_src>

<mosaic_0001>
module attributes {stable_mosaic.version = 11 : i64} {
  func.func @_decoder_kernel(%arg0: i32, %arg1: memref<2x8x32xf32, #tpu.memory_space<vmem>>, %arg2: memref<2x10x32xf32, #tpu.memory_space<vmem>>, %arg3: memref<2x8x8xf32, #tpu.memory_space<vmem>>, %arg4: memref<32x96xf32, #tpu.memory_space<vmem>>, %arg5: memref<1x96xf32, #tpu.memory_space<vmem>>, %arg6: memref<32x32xf32, #tpu.memory_space<vmem>>, %arg7: memref<1x32xf32, #tpu.memory_space<vmem>>, %arg8: memref<32x32xf32, #tpu.memory_space<vmem>>, %arg9: memref<1x32xf32, #tpu.memory_space<vmem>>, %arg10: memref<32x64xf32, #tpu.memory_space<vmem>>, %arg11: memref<1x64xf32, #tpu.memory_space<vmem>>, %arg12: memref<32x32xf32, #tpu.memory_space<vmem>>, %arg13: memref<1x32xf32, #tpu.memory_space<vmem>>, %arg14: memref<1x32xf32, #tpu.memory_space<vmem>>, %arg15: memref<1x32xf32, #tpu.memory_space<vmem>>, %arg16: memref<1x32xf32, #tpu.memory_space<vmem>>, %arg17: memref<1x32xf32, #tpu.memory_space<vmem>>, %arg18: memref<1x32xf32, #tpu.memory_space<vmem>>, %arg19: memref<1x32xf32, #tpu.memory_space<vmem>>, %arg20: memref<32x64xf32, #tpu.memory_space<vmem>>, %arg21: memref<1x64xf32, #tpu.memory_space<vmem>>, %arg22: memref<64x32xf32, #tpu.memory_space<vmem>>, %arg23: memref<1x32xf32, #tpu.memory_space<vmem>>, %arg24: memref<32x96xf32, #tpu.memory_space<vmem>>, %arg25: memref<1x96xf32, #tpu.memory_space<vmem>>, %arg26: memref<32x32xf32, #tpu.memory_space<vmem>>, %arg27: memref<1x32xf32, #tpu.memory_space<vmem>>, %arg28: memref<32x32xf32, #tpu.memory_space<vmem>>, %arg29: memref<1x32xf32, #tpu.memory_space<vmem>>, %arg30: memref<32x64xf32, #tpu.memory_space<vmem>>, %arg31: memref<1x64xf32, #tpu.memory_space<vmem>>, %arg32: memref<32x32xf32, #tpu.memory_space<vmem>>, %arg33: memref<1x32xf32, #tpu.memory_space<vmem>>, %arg34: memref<1x32xf32, #tpu.memory_space<vmem>>, %arg35: memref<1x32xf32, #tpu.memory_space<vmem>>, %arg36: memref<1x32xf32, #tpu.memory_space<vmem>>, %arg37: memref<1x32xf32, #tpu.memory_space<vmem>>, %arg38: memref<1x32xf32, #tpu.memory_space<vmem>>, %arg39: memref<1x32xf32, #tpu.memory_space<vmem>>, %arg40: memref<32x64xf32, #tpu.memory_space<vmem>>, %arg41: memref<1x64xf32, #tpu.memory_space<vmem>>, %arg42: memref<64x32xf32, #tpu.memory_space<vmem>>, %arg43: memref<1x32xf32, #tpu.memory_space<vmem>>, %arg44: memref<1x32xf32, #tpu.memory_space<vmem>>, %arg45: memref<1x32xf32, #tpu.memory_space<vmem>>, %arg46: memref<32x64xf32, #tpu.memory_space<vmem>>, %arg47: memref<1x64xf32, #tpu.memory_space<vmem>>, %arg48: memref<2x8x64xf32, #tpu.memory_space<vmem>>) attributes {dimension_semantics = [#tpu.dimension_semantics<arbitrary>], iteration_bounds = array<i64: 1>, scalar_prefetch = 0 : i64, scratch_operands = 0 : i64, tpu.core_type = #tpu.core_type<tc>, window_params = [{pipeline_mode = #tpu.pipeline_mode<synchronous>, transform_indices = @transform_0, window_bounds = array<i64: 2, 8, 32>}, {pipeline_mode = #tpu.pipeline_mode<synchronous>, transform_indices = @transform_1, window_bounds = array<i64: 2, 10, 32>}, {pipeline_mode = #tpu.pipeline_mode<synchronous>, transform_indices = @transform_2, window_bounds = array<i64: 2, 8, 8>}, {pipeline_mode = #tpu.pipeline_mode<synchronous>, transform_indices = @transform_3, window_bounds = array<i64: 32, 96>}, {pipeline_mode = #tpu.pipeline_mode<synchronous>, transform_indices = @transform_4, window_bounds = array<i64: 1, 96>}, {pipeline_mode = #tpu.pipeline_mode<synchronous>, transform_indices = @transform_5, window_bounds = array<i64: 32, 32>}, {pipeline_mode = #tpu.pipeline_mode<synchronous>, transform_indices = @transform_6, window_bounds = array<i64: 1, 32>}, {pipeline_mode = #tpu.pipeline_mode<synchronous>, transform_indices = @transform_7, window_bounds = array<i64: 32, 32>}, {pipeline_mode = #tpu.pipeline_mode<synchronous>, transform_indices = @transform_8, window_bounds = array<i64: 1, 32>}, {pipeline_mode = #tpu.pipeline_mode<synchronous>, transform_indices = @transform_9, window_bounds = array<i64: 32, 64>}, {pipeline_mode = #tpu.pipeline_mode<synchronous>, transform_indices = @transform_10, window_bounds = array<i64: 1, 64>}, {pipeline_mode = #tpu.pipeline_mode<synchronous>, transform_indices = @transform_11, window_bounds = array<i64: 32, 32>}, {pipeline_mode = #tpu.pipeline_mode<synchronous>, transform_indices = @transform_12, window_bounds = array<i64: 1, 32>}, {pipeline_mode = #tpu.pipeline_mode<synchronous>, transform_indices = @transform_13, window_bounds = array<i64: 1, 32>}, {pipeline_mode = #tpu.pipeline_mode<synchronous>, transform_indices = @transform_14, window_bounds = array<i64: 1, 32>}, {pipeline_mode = #tpu.pipeline_mode<synchronous>, transform_indices = @transform_15, window_bounds = array<i64: 1, 32>}, {pipeline_mode = #tpu.pipeline_mode<synchronous>, transform_indices = @transform_16, window_bounds = array<i64: 1, 32>}, {pipeline_mode = #tpu.pipeline_mode<synchronous>, transform_indices = @transform_17, window_bounds = array<i64: 1, 32>}, {pipeline_mode = #tpu.pipeline_mode<synchronous>, transform_indices = @transform_18, window_bounds = array<i64: 1, 32>}, {pipeline_mode = #tpu.pipeline_mode<synchronous>, transform_indices = @transform_19, window_bounds = array<i64: 32, 64>}, {pipeline_mode = #tpu.pipeline_mode<synchronous>, transform_indices = @transform_20, window_bounds = array<i64: 1, 64>}, {pipeline_mode = #tpu.pipeline_mode<synchronous>, transform_indices = @transform_21, window_bounds = array<i64: 64, 32>}, {pipeline_mode = #tpu.pipeline_mode<synchronous>, transform_indices = @transform_22, window_bounds = array<i64: 1, 32>}, {pipeline_mode = #tpu.pipeline_mode<synchronous>, transform_indices = @transform_23, window_bounds = array<i64: 32, 96>}, {pipeline_mode = #tpu.pipeline_mode<synchronous>, transform_indices = @transform_24, window_bounds = array<i64: 1, 96>}, {pipeline_mode = #tpu.pipeline_mode<synchronous>, transform_indices = @transform_25, window_bounds = array<i64: 32, 32>}, {pipeline_mode = #tpu.pipeline_mode<synchronous>, transform_indices = @transform_26, window_bounds = array<i64: 1, 32>}, {pipeline_mode = #tpu.pipeline_mode<synchronous>, transform_indices = @transform_27, window_bounds = array<i64: 32, 32>}, {pipeline_mode = #tpu.pipeline_mode<synchronous>, transform_indices = @transform_28, window_bounds = array<i64: 1, 32>}, {pipeline_mode = #tpu.pipeline_mode<synchronous>, transform_indices = @transform_29, window_bounds = array<i64: 32, 64>}, {pipeline_mode = #tpu.pipeline_mode<synchronous>, transform_indices = @transform_30, window_bounds = array<i64: 1, 64>}, {pipeline_mode = #tpu.pipeline_mode<synchronous>, transform_indices = @transform_31, window_bounds = array<i64: 32, 32>}, {pipeline_mode = #tpu.pipeline_mode<synchronous>, transform_indices = @transform_32, window_bounds = array<i64: 1, 32>}, {pipeline_mode = #tpu.pipeline_mode<synchronous>, transform_indices = @transform_33, window_bounds = array<i64: 1, 32>}, {pipeline_mode = #tpu.pipeline_mode<synchronous>, transform_indices = @transform_34, window_bounds = array<i64: 1, 32>}, {pipeline_mode = #tpu.pipeline_mode<synchronous>, transform_indices = @transform_35, window_bounds = array<i64: 1, 32>}, {pipeline_mode = #tpu.pipeline_mode<synchronous>, transform_indices = @transform_36, window_bounds = array<i64: 1, 32>}, {pipeline_mode = #tpu.pipeline_mode<synchronous>, transform_indices = @transform_37, window_bounds = array<i64: 1, 32>}, {pipeline_mode = #tpu.pipeline_mode<synchronous>, transform_indices = @transform_38, window_bounds = array<i64: 1, 32>}, {pipeline_mode = #tpu.pipeline_mode<synchronous>, transform_indices = @transform_39, window_bounds = array<i64: 32, 64>}, {pipeline_mode = #tpu.pipeline_mode<synchronous>, transform_indices = @transform_40, window_bounds = array<i64: 1, 64>}, {pipeline_mode = #tpu.pipeline_mode<synchronous>, transform_indices = @transform_41, window_bounds = array<i64: 64, 32>}, {pipeline_mode = #tpu.pipeline_mode<synchronous>, transform_indices = @transform_42, window_bounds = array<i64: 1, 32>}, {pipeline_mode = #tpu.pipeline_mode<synchronous>, transform_indices = @transform_43, window_bounds = array<i64: 1, 32>}, {pipeline_mode = #tpu.pipeline_mode<synchronous>, transform_indices = @transform_44, window_bounds = array<i64: 1, 32>}, {pipeline_mode = #tpu.pipeline_mode<synchronous>, transform_indices = @transform_45, window_bounds = array<i64: 32, 64>}, {pipeline_mode = #tpu.pipeline_mode<synchronous>, transform_indices = @transform_46, window_bounds = array<i64: 1, 64>}, {pipeline_mode = #tpu.pipeline_mode<synchronous>, transform_indices = @transform_47, window_bounds = array<i64: 2, 8, 64>}]} {
    %0 = tpu.iota {dimensions = array<i32: 0>} : vector<8x1x32xi32>
    %1 = tpu.iota {dimensions = array<i32: 2>} : vector<8x1x32xi32>
    %c4_i32 = arith.constant 4 : i32
    %2 = vector.broadcast %c4_i32 : i32 to vector<8x1x32xi32>
    %3 = arith.muli %0, %2 : vector<8x1x32xi32>
    %4 = arith.cmpi sge, %1, %3 : vector<8x1x32xi32>
    %c4_i32_0 = arith.constant 4 : i32
    %5 = vector.broadcast %c4_i32_0 : i32 to vector<8x1x32xi32>
    %6 = arith.addi %3, %5 : vector<8x1x32xi32>
    %7 = arith.cmpi slt, %1, %6 : vector<8x1x32xi32>
    %8 = arith.andi %4, %7 : vector<8x1x32xi1>
    %9 = arith.extui %8 : vector<8x1x32xi1> to vector<8x1x32xi32>
    %10 = arith.sitofp %9 : vector<8x1x32xi32> to vector<8x1x32xf32>
    %c0 = arith.constant 0 : index
    %c0_1 = arith.constant 0 : index
    %11 = vector.load %arg4[%c0, %c0_1] : memref<32x96xf32, #tpu.memory_space<vmem>>, vector<32x96xf32>
    %c0_2 = arith.constant 0 : index
    %c0_3 = arith.constant 0 : index
    %12 = vector.load %arg5[%c0_2, %c0_3] : memref<1x96xf32, #tpu.memory_space<vmem>>, vector<1x96xf32>
    %c0_4 = arith.constant 0 : index
    %c0_5 = arith.constant 0 : index
    %13 = vector.load %arg6[%c0_4, %c0_5] : memref<32x32xf32, #tpu.memory_space<vmem>>, vector<32x32xf32>
    %c0_6 = arith.constant 0 : index
    %c0_7 = arith.constant 0 : index
    %14 = vector.load %arg7[%c0_6, %c0_7] : memref<1x32xf32, #tpu.memory_space<vmem>>, vector<1x32xf32>
    %c0_8 = arith.constant 0 : index
    %c0_9 = arith.constant 0 : index
    %15 = vector.load %arg8[%c0_8, %c0_9] : memref<32x32xf32, #tpu.memory_space<vmem>>, vector<32x32xf32>
    %c0_10 = arith.constant 0 : index
    %c0_11 = arith.constant 0 : index
    %16 = vector.load %arg9[%c0_10, %c0_11] : memref<1x32xf32, #tpu.memory_space<vmem>>, vector<1x32xf32>
    %c0_12 = arith.constant 0 : index
    %c0_13 = arith.constant 0 : index
    %17 = vector.load %arg10[%c0_12, %c0_13] : memref<32x64xf32, #tpu.memory_space<vmem>>, vector<32x64xf32>
    %c0_14 = arith.constant 0 : index
    %c0_15 = arith.constant 0 : index
    %18 = vector.load %arg11[%c0_14, %c0_15] : memref<1x64xf32, #tpu.memory_space<vmem>>, vector<1x64xf32>
    %c0_16 = arith.constant 0 : index
    %c0_17 = arith.constant 0 : index
    %19 = vector.load %arg12[%c0_16, %c0_17] : memref<32x32xf32, #tpu.memory_space<vmem>>, vector<32x32xf32>
    %c0_18 = arith.constant 0 : index
    %c0_19 = arith.constant 0 : index
    %20 = vector.load %arg13[%c0_18, %c0_19] : memref<1x32xf32, #tpu.memory_space<vmem>>, vector<1x32xf32>
    %c0_20 = arith.constant 0 : index
    %c0_21 = arith.constant 0 : index
    %21 = vector.load %arg14[%c0_20, %c0_21] : memref<1x32xf32, #tpu.memory_space<vmem>>, vector<1x32xf32>
    %c0_22 = arith.constant 0 : index
    %c0_23 = arith.constant 0 : index
    %22 = vector.load %arg15[%c0_22, %c0_23] : memref<1x32xf32, #tpu.memory_space<vmem>>, vector<1x32xf32>
    %c0_24 = arith.constant 0 : index
    %c0_25 = arith.constant 0 : index
    %23 = vector.load %arg16[%c0_24, %c0_25] : memref<1x32xf32, #tpu.memory_space<vmem>>, vector<1x32xf32>
    %c0_26 = arith.constant 0 : index
    %c0_27 = arith.constant 0 : index
    %24 = vector.load %arg17[%c0_26, %c0_27] : memref<1x32xf32, #tpu.memory_space<vmem>>, vector<1x32xf32>
    %c0_28 = arith.constant 0 : index
    %c0_29 = arith.constant 0 : index
    %25 = vector.load %arg18[%c0_28, %c0_29] : memref<1x32xf32, #tpu.memory_space<vmem>>, vector<1x32xf32>
    %c0_30 = arith.constant 0 : index
    %c0_31 = arith.constant 0 : index
    %26 = vector.load %arg19[%c0_30, %c0_31] : memref<1x32xf32, #tpu.memory_space<vmem>>, vector<1x32xf32>
    %c0_32 = arith.constant 0 : index
    %c0_33 = arith.constant 0 : index
    %27 = vector.load %arg20[%c0_32, %c0_33] : memref<32x64xf32, #tpu.memory_space<vmem>>, vector<32x64xf32>
    %c0_34 = arith.constant 0 : index
    %c0_35 = arith.constant 0 : index
    %28 = vector.load %arg21[%c0_34, %c0_35] : memref<1x64xf32, #tpu.memory_space<vmem>>, vector<1x64xf32>
    %c0_36 = arith.constant 0 : index
    %c0_37 = arith.constant 0 : index
    %29 = vector.load %arg22[%c0_36, %c0_37] : memref<64x32xf32, #tpu.memory_space<vmem>>, vector<64x32xf32>
    %c0_38 = arith.constant 0 : index
    %c0_39 = arith.constant 0 : index
    %30 = vector.load %arg23[%c0_38, %c0_39] : memref<1x32xf32, #tpu.memory_space<vmem>>, vector<1x32xf32>
    %c0_40 = arith.constant 0 : index
    %c0_41 = arith.constant 0 : index
    %31 = vector.load %arg24[%c0_40, %c0_41] : memref<32x96xf32, #tpu.memory_space<vmem>>, vector<32x96xf32>
    %c0_42 = arith.constant 0 : index
    %c0_43 = arith.constant 0 : index
    %32 = vector.load %arg25[%c0_42, %c0_43] : memref<1x96xf32, #tpu.memory_space<vmem>>, vector<1x96xf32>
    %c0_44 = arith.constant 0 : index
    %c0_45 = arith.constant 0 : index
    %33 = vector.load %arg26[%c0_44, %c0_45] : memref<32x32xf32, #tpu.memory_space<vmem>>, vector<32x32xf32>
    %c0_46 = arith.constant 0 : index
    %c0_47 = arith.constant 0 : index
    %34 = vector.load %arg27[%c0_46, %c0_47] : memref<1x32xf32, #tpu.memory_space<vmem>>, vector<1x32xf32>
    %c0_48 = arith.constant 0 : index
    %c0_49 = arith.constant 0 : index
    %35 = vector.load %arg28[%c0_48, %c0_49] : memref<32x32xf32, #tpu.memory_space<vmem>>, vector<32x32xf32>
    %c0_50 = arith.constant 0 : index
    %c0_51 = arith.constant 0 : index
    %36 = vector.load %arg29[%c0_50, %c0_51] : memref<1x32xf32, #tpu.memory_space<vmem>>, vector<1x32xf32>
    %c0_52 = arith.constant 0 : index
    %c0_53 = arith.constant 0 : index
    %37 = vector.load %arg30[%c0_52, %c0_53] : memref<32x64xf32, #tpu.memory_space<vmem>>, vector<32x64xf32>
    %c0_54 = arith.constant 0 : index
    %c0_55 = arith.constant 0 : index
    %38 = vector.load %arg31[%c0_54, %c0_55] : memref<1x64xf32, #tpu.memory_space<vmem>>, vector<1x64xf32>
    %c0_56 = arith.constant 0 : index
    %c0_57 = arith.constant 0 : index
    %39 = vector.load %arg32[%c0_56, %c0_57] : memref<32x32xf32, #tpu.memory_space<vmem>>, vector<32x32xf32>
    %c0_58 = arith.constant 0 : index
    %c0_59 = arith.constant 0 : index
    %40 = vector.load %arg33[%c0_58, %c0_59] : memref<1x32xf32, #tpu.memory_space<vmem>>, vector<1x32xf32>
    %c0_60 = arith.constant 0 : index
    %c0_61 = arith.constant 0 : index
    %41 = vector.load %arg34[%c0_60, %c0_61] : memref<1x32xf32, #tpu.memory_space<vmem>>, vector<1x32xf32>
    %c0_62 = arith.constant 0 : index
    %c0_63 = arith.constant 0 : index
    %42 = vector.load %arg35[%c0_62, %c0_63] : memref<1x32xf32, #tpu.memory_space<vmem>>, vector<1x32xf32>
    %c0_64 = arith.constant 0 : index
    %c0_65 = arith.constant 0 : index
    %43 = vector.load %arg36[%c0_64, %c0_65] : memref<1x32xf32, #tpu.memory_space<vmem>>, vector<1x32xf32>
    %c0_66 = arith.constant 0 : index
    %c0_67 = arith.constant 0 : index
    %44 = vector.load %arg37[%c0_66, %c0_67] : memref<1x32xf32, #tpu.memory_space<vmem>>, vector<1x32xf32>
    %c0_68 = arith.constant 0 : index
    %c0_69 = arith.constant 0 : index
    %45 = vector.load %arg38[%c0_68, %c0_69] : memref<1x32xf32, #tpu.memory_space<vmem>>, vector<1x32xf32>
    %c0_70 = arith.constant 0 : index
    %c0_71 = arith.constant 0 : index
    %46 = vector.load %arg39[%c0_70, %c0_71] : memref<1x32xf32, #tpu.memory_space<vmem>>, vector<1x32xf32>
    %c0_72 = arith.constant 0 : index
    %c0_73 = arith.constant 0 : index
    %47 = vector.load %arg40[%c0_72, %c0_73] : memref<32x64xf32, #tpu.memory_space<vmem>>, vector<32x64xf32>
    %c0_74 = arith.constant 0 : index
    %c0_75 = arith.constant 0 : index
    %48 = vector.load %arg41[%c0_74, %c0_75] : memref<1x64xf32, #tpu.memory_space<vmem>>, vector<1x64xf32>
    %c0_76 = arith.constant 0 : index
    %c0_77 = arith.constant 0 : index
    %49 = vector.load %arg42[%c0_76, %c0_77] : memref<64x32xf32, #tpu.memory_space<vmem>>, vector<64x32xf32>
    %c0_78 = arith.constant 0 : index
    %c0_79 = arith.constant 0 : index
    %50 = vector.load %arg43[%c0_78, %c0_79] : memref<1x32xf32, #tpu.memory_space<vmem>>, vector<1x32xf32>
    %c0_80 = arith.constant 0 : index
    %c0_81 = arith.constant 0 : index
    %51 = vector.load %arg44[%c0_80, %c0_81] : memref<1x32xf32, #tpu.memory_space<vmem>>, vector<1x32xf32>
    %c0_82 = arith.constant 0 : index
    %c0_83 = arith.constant 0 : index
    %52 = vector.load %arg45[%c0_82, %c0_83] : memref<1x32xf32, #tpu.memory_space<vmem>>, vector<1x32xf32>
    %c0_84 = arith.constant 0 : index
    %c0_85 = arith.constant 0 : index
    %53 = vector.load %arg46[%c0_84, %c0_85] : memref<32x64xf32, #tpu.memory_space<vmem>>, vector<32x64xf32>
    %c0_86 = arith.constant 0 : index
    %c0_87 = arith.constant 0 : index
    %54 = vector.load %arg47[%c0_86, %c0_87] : memref<1x64xf32, #tpu.memory_space<vmem>>, vector<1x64xf32>
    %c0_88 = arith.constant 0 : index
    %c0_89 = arith.constant 0 : index
    %c0_90 = arith.constant 0 : index
    %55 = vector.load %arg1[%c0_88, %c0_89, %c0_90] : memref<2x8x32xf32, #tpu.memory_space<vmem>>, vector<1x8x32xf32>
    %56 = vector.shape_cast %55 : vector<1x8x32xf32> to vector<8x32xf32>
    %c0_91 = arith.constant 0 : index
    %c0_92 = arith.constant 0 : index
    %c0_93 = arith.constant 0 : index
    %57 = vector.load %arg2[%c0_91, %c0_92, %c0_93] : memref<2x10x32xf32, #tpu.memory_space<vmem>>, vector<1x10x32xf32>
    %58 = vector.shape_cast %57 : vector<1x10x32xf32> to vector<10x32xf32>
    %c0_94 = arith.constant 0 : index
    %c0_95 = arith.constant 0 : index
    %c0_96 = arith.constant 0 : index
    %59 = vector.load %arg3[%c0_94, %c0_95, %c0_96] : memref<2x8x8xf32, #tpu.memory_space<vmem>>, vector<1x8x8xf32>
    %60 = vector.shape_cast %59 : vector<1x8x8xf32> to vector<8x8xf32>
    %cst = arith.constant dense<0.000000e+00> : vector<8x96xf32>
    %61 = tpu.matmul %56, %11, %cst {dimension_numbers = #tpu.dot_dimension_numbers<[1], [0], [0], [1], [0, 0, 1, 1], [], []>} : vector<8x32xf32>, vector<32x96xf32>, vector<8x96xf32> -> vector<8x96xf32>
    %62 = vector.broadcast %12 : vector<1x96xf32> to vector<8x96xf32>
    %63 = arith.addf %61, %62 : vector<8x96xf32>
    %64 = vector.extract_strided_slice %63 {offsets = [0, 0], sizes = [8, 32], strides = [1, 1]} : vector<8x96xf32> to vector<8x32xf32>
    %65 = vector.extract_strided_slice %63 {offsets = [0, 32], sizes = [8, 32], strides = [1, 1]} : vector<8x96xf32> to vector<8x32xf32>
    %66 = vector.extract_strided_slice %63 {offsets = [0, 64], sizes = [8, 32], strides = [1, 1]} : vector<8x96xf32> to vector<8x32xf32>
    %67 = vector.shape_cast %64 : vector<8x32xf32> to vector<1x8x32xf32>
    %cst_97 = arith.constant 5.000000e-01 : f32
    %68 = vector.broadcast %cst_97 : f32 to vector<8x1x32xf32>
    %69 = arith.mulf %10, %68 : vector<8x1x32xf32>
    %70 = vector.broadcast %67 : vector<1x8x32xf32> to vector<8x8x32xf32>
    %71 = vector.broadcast %69 : vector<8x1x32xf32> to vector<8x8x32xf32>
    %72 = arith.mulf %70, %71 : vector<8x8x32xf32>
    %73 = vector.shape_cast %65 : vector<8x32xf32> to vector<1x8x32xf32>
    %74 = vector.shape_cast %73 : vector<1x8x32xf32> to vector<1x8x32xf32>
    %75 = vector.broadcast %74 : vector<1x8x32xf32> to vector<8x8x32xf32>
    %76 = vector.shape_cast %66 : vector<8x32xf32> to vector<1x8x32xf32>
    %77 = vector.broadcast %76 : vector<1x8x32xf32> to vector<8x8x32xf32>
    %78 = vector.broadcast %10 : vector<8x1x32xf32> to vector<8x8x32xf32>
    %79 = arith.mulf %77, %78 : vector<8x8x32xf32>
    "tpu.trace_start"() <{level = 10 : i32, message = "hte,hse->hts"}> : () -> ()
    %cst_98 = arith.constant dense<0.000000e+00> : vector<8x8x8xf32>
    %80 = tpu.matmul %72, %75, %cst_98 {dimension_numbers = #tpu.dot_dimension_numbers<[2], [2], [1], [1], [0, 0, 0, 1, 1, 1], [0], [0]>} : vector<8x8x32xf32>, vector<8x8x32xf32>, vector<8x8x8xf32> -> vector<8x8x8xf32>
    "tpu.trace_stop"() : () -> ()
    %81 = vector.shape_cast %60 : vector<8x8xf32> to vector<1x8x8xf32>
    %82 = vector.broadcast %81 : vector<1x8x8xf32> to vector<8x8x8xf32>
    %83 = arith.addf %80, %82 : vector<8x8x8xf32>
    %cst_99 = arith.constant dense<0xFF800000> : vector<8x8xf32>
    %84 = vector.multi_reduction <maximumf>, %83, %cst_99 [2] : vector<8x8x8xf32> to vector<8x8xf32>
    %85 = vector.shape_cast %84 : vector<8x8xf32> to vector<8x8x1xf32>
    %86 = vector.broadcast %85 : vector<8x8x1xf32> to vector<8x8x8xf32>
    %87 = arith.subf %83, %86 : vector<8x8x8xf32>
    %88 = math.exp %87 : vector<8x8x8xf32>
    %cst_100 = arith.constant dense<0.000000e+00> : vector<8x8xf32>
    %89 = vector.multi_reduction <add>, %88, %cst_100 [2] : vector<8x8x8xf32> to vector<8x8xf32>
    %90 = vector.shape_cast %89 : vector<8x8xf32> to vector<8x8x1xf32>
    %91 = vector.broadcast %90 : vector<8x8x1xf32> to vector<8x8x8xf32>
    %92 = arith.divf %88, %91 : vector<8x8x8xf32>
    "tpu.trace_start"() <{level = 10 : i32, message = "hts,hse->hte"}> : () -> ()
    %cst_101 = arith.constant dense<0.000000e+00> : vector<8x8x32xf32>
    %93 = tpu.matmul %92, %79, %cst_101 {dimension_numbers = #tpu.dot_dimension_numbers<[2], [1], [1], [2], [0, 0, 0, 1, 1, 2], [0], [0]>} : vector<8x8x8xf32>, vector<8x8x32xf32>, vector<8x8x32xf32> -> vector<8x8x32xf32>
    "tpu.trace_stop"() : () -> ()
    %cst_102 = arith.constant dense<0.000000e+00> : vector<8x32xf32>
    %94 = vector.multi_reduction <add>, %93, %cst_102 [0] : vector<8x8x32xf32> to vector<8x32xf32>
    %cst_103 = arith.constant dense<0.000000e+00> : vector<8x32xf32>
    %95 = tpu.matmul %94, %13, %cst_103 {dimension_numbers = #tpu.dot_dimension_numbers<[1], [0], [0], [1], [0, 0, 1, 1], [], []>} : vector<8x32xf32>, vector<32x32xf32>, vector<8x32xf32> -> vector<8x32xf32>
    %96 = vector.broadcast %14 : vector<1x32xf32> to vector<8x32xf32>
    %97 = arith.addf %95, %96 : vector<8x32xf32>
    %98 = arith.addf %56, %97 : vector<8x32xf32>
    %cst_104 = arith.constant dense<0.000000e+00> : vector<8xf32>
    %99 = vector.multi_reduction <add>, %98, %cst_104 [1] : vector<8x32xf32> to vector<8xf32>
    %100 = vector.shape_cast %99 : vector<8xf32> to vector<8x1xf32>
    %cst_105 = arith.constant 3.200000e+01 : f32
    %101 = vector.broadcast %cst_105 : f32 to vector<8x1xf32>
    %102 = arith.divf %100, %101 : vector<8x1xf32>
    %103 = vector.broadcast %102 : vector<8x1xf32> to vector<8x32xf32>
    %104 = arith.subf %98, %103 : vector<8x32xf32>
    %105 = arith.mulf %104, %104 : vector<8x32xf32>
    %cst_106 = arith.constant dense<0.000000e+00> : vector<8xf32>
    %106 = vector.multi_reduction <add>, %105, %cst_106 [1] : vector<8x32xf32> to vector<8xf32>
    %107 = vector.shape_cast %106 : vector<8xf32> to vector<8x1xf32>
    %cst_107 = arith.constant 3.200000e+01 : f32
    %108 = vector.broadcast %cst_107 : f32 to vector<8x1xf32>
    %109 = arith.divf %107, %108 : vector<8x1xf32>
    %110 = vector.broadcast %102 : vector<8x1xf32> to vector<8x32xf32>
    %111 = arith.subf %98, %110 : vector<8x32xf32>
    %cst_108 = arith.constant 9.99999974E-6 : f32
    %112 = vector.broadcast %cst_108 : f32 to vector<8x1xf32>
    %113 = arith.addf %109, %112 : vector<8x1xf32>
    %114 = math.rsqrt %113 : vector<8x1xf32>
    %115 = vector.broadcast %114 : vector<8x1xf32> to vector<8x32xf32>
    %116 = arith.mulf %111, %115 : vector<8x32xf32>
    %117 = vector.broadcast %21 : vector<1x32xf32> to vector<8x32xf32>
    %118 = arith.mulf %116, %117 : vector<8x32xf32>
    %119 = vector.broadcast %22 : vector<1x32xf32> to vector<8x32xf32>
    %120 = arith.addf %118, %119 : vector<8x32xf32>
    %cst_109 = arith.constant dense<0.000000e+00> : vector<8x32xf32>
    %121 = tpu.matmul %120, %15, %cst_109 {dimension_numbers = #tpu.dot_dimension_numbers<[1], [0], [0], [1], [0, 0, 1, 1], [], []>} : vector<8x32xf32>, vector<32x32xf32>, vector<8x32xf32> -> vector<8x32xf32>
    %122 = vector.broadcast %16 : vector<1x32xf32> to vector<8x32xf32>
    %123 = arith.addf %121, %122 : vector<8x32xf32>
    %cst_110 = arith.constant dense<0.000000e+00> : vector<10x64xf32>
    %124 = tpu.matmul %58, %17, %cst_110 {dimension_numbers = #tpu.dot_dimension_numbers<[1], [0], [0], [1], [0, 0, 1, 1], [], []>} : vector<10x32xf32>, vector<32x64xf32>, vector<10x64xf32> -> vector<10x64xf32>
    %125 = vector.broadcast %18 : vector<1x64xf32> to vector<10x64xf32>
    %126 = arith.addf %124, %125 : vector<10x64xf32>
    %127 = vector.extract_strided_slice %126 {offsets = [0, 0], sizes = [10, 32], strides = [1, 1]} : vector<10x64xf32> to vector<10x32xf32>
    %128 = vector.extract_strided_slice %126 {offsets = [0, 32], sizes = [10, 32], strides = [1, 1]} : vector<10x64xf32> to vector<10x32xf32>
    %129 = vector.shape_cast %123 : vector<8x32xf32> to vector<1x8x32xf32>
    %cst_111 = arith.constant 5.000000e-01 : f32
    %130 = vector.broadcast %cst_111 : f32 to vector<8x1x32xf32>
    %131 = arith.mulf %10, %130 : vector<8x1x32xf32>
    %132 = vector.broadcast %129 : vector<1x8x32xf32> to vector<8x8x32xf32>
    %133 = vector.broadcast %131 : vector<8x1x32xf32> to vector<8x8x32xf32>
    %134 = arith.mulf %132, %133 : vector<8x8x32xf32>
    %135 = vector.shape_cast %127 : vector<10x32xf32> to vector<1x10x32xf32>
    %136 = vector.shape_cast %135 : vector<1x10x32xf32> to vector<1x10x32xf32>
    %137 = vector.broadcast %136 : vector<1x10x32xf32> to vector<8x10x32xf32>
    %138 = vector.shape_cast %128 : vector<10x32xf32> to vector<1x10x32xf32>
    %139 = vector.broadcast %138 : vector<1x10x32xf32> to vector<8x10x32xf32>
    %140 = vector.broadcast %10 : vector<8x1x32xf32> to vector<8x10x32xf32>
    %141 = arith.mulf %139, %140 : vector<8x10x32xf32>
    "tpu.trace_start"() <{level = 10 : i32, message = "hte,hse->hts"}> : () -> ()
    %cst_112 = arith.constant dense<0.000000e+00> : vector<8x8x10xf32>
    %142 = tpu.matmul %134, %137, %cst_112 {dimension_numbers = #tpu.dot_dimension_numbers<[2], [2], [1], [1], [0, 0, 0, 1, 1, 1], [0], [0]>} : vector<8x8x32xf32>, vector<8x10x32xf32>, vector<8x8x10xf32> -> vector<8x8x10xf32>
    "tpu.trace_stop"() : () -> ()
    %cst_113 = arith.constant dense<0xFF800000> : vector<8x8xf32>
    %143 = vector.multi_reduction <maximumf>, %142, %cst_113 [2] : vector<8x8x10xf32> to vector<8x8xf32>
    %144 = vector.shape_cast %143 : vector<8x8xf32> to vector<8x8x1xf32>
    %145 = vector.broadcast %144 : vector<8x8x1xf32> to vector<8x8x10xf32>
    %146 = arith.subf %142, %145 : vector<8x8x10xf32>
    %147 = math.exp %146 : vector<8x8x10xf32>
    %cst_114 = arith.constant dense<0.000000e+00> : vector<8x8xf32>
    %148 = vector.multi_reduction <add>, %147, %cst_114 [2] : vector<8x8x10xf32> to vector<8x8xf32>
    %149 = vector.shape_cast %148 : vector<8x8xf32> to vector<8x8x1xf32>
    %150 = vector.broadcast %149 : vector<8x8x1xf32> to vector<8x8x10xf32>
    %151 = arith.divf %147, %150 : vector<8x8x10xf32>
    "tpu.trace_start"() <{level = 10 : i32, message = "hts,hse->hte"}> : () -> ()
    %cst_115 = arith.constant dense<0.000000e+00> : vector<8x8x32xf32>
    %152 = tpu.matmul %151, %141, %cst_115 {dimension_numbers = #tpu.dot_dimension_numbers<[2], [1], [1], [2], [0, 0, 0, 1, 1, 2], [0], [0]>} : vector<8x8x10xf32>, vector<8x10x32xf32>, vector<8x8x32xf32> -> vector<8x8x32xf32>
    "tpu.trace_stop"() : () -> ()
    %cst_116 = arith.constant dense<0.000000e+00> : vector<8x32xf32>
    %153 = vector.multi_reduction <add>, %152, %cst_116 [0] : vector<8x8x32xf32> to vector<8x32xf32>
    %cst_117 = arith.constant dense<0.000000e+00> : vector<8x32xf32>
    %154 = tpu.matmul %153, %19, %cst_117 {dimension_numbers = #tpu.dot_dimension_numbers<[1], [0], [0], [1], [0, 0, 1, 1], [], []>} : vector<8x32xf32>, vector<32x32xf32>, vector<8x32xf32> -> vector<8x32xf32>
    %155 = vector.broadcast %20 : vector<1x32xf32> to vector<8x32xf32>
    %156 = arith.addf %154, %155 : vector<8x32xf32>
    %157 = arith.addf %120, %156 : vector<8x32xf32>
    %cst_118 = arith.constant dense<0.000000e+00> : vector<8xf32>
    %158 = vector.multi_reduction <add>, %157, %cst_118 [1] : vector<8x32xf32> to vector<8xf32>
    %159 = vector.shape_cast %158 : vector<8xf32> to vector<8x1xf32>
    %cst_119 = arith.constant 3.200000e+01 : f32
    %160 = vector.broadcast %cst_119 : f32 to vector<8x1xf32>
    %161 = arith.divf %159, %160 : vector<8x1xf32>
    %162 = vector.broadcast %161 : vector<8x1xf32> to vector<8x32xf32>
    %163 = arith.subf %157, %162 : vector<8x32xf32>
    %164 = arith.mulf %163, %163 : vector<8x32xf32>
    %cst_120 = arith.constant dense<0.000000e+00> : vector<8xf32>
    %165 = vector.multi_reduction <add>, %164, %cst_120 [1] : vector<8x32xf32> to vector<8xf32>
    %166 = vector.shape_cast %165 : vector<8xf32> to vector<8x1xf32>
    %cst_121 = arith.constant 3.200000e+01 : f32
    %167 = vector.broadcast %cst_121 : f32 to vector<8x1xf32>
    %168 = arith.divf %166, %167 : vector<8x1xf32>
    %169 = vector.broadcast %161 : vector<8x1xf32> to vector<8x32xf32>
    %170 = arith.subf %157, %169 : vector<8x32xf32>
    %cst_122 = arith.constant 9.99999974E-6 : f32
    %171 = vector.broadcast %cst_122 : f32 to vector<8x1xf32>
    %172 = arith.addf %168, %171 : vector<8x1xf32>
    %173 = math.rsqrt %172 : vector<8x1xf32>
    %174 = vector.broadcast %173 : vector<8x1xf32> to vector<8x32xf32>
    %175 = arith.mulf %170, %174 : vector<8x32xf32>
    %176 = vector.broadcast %23 : vector<1x32xf32> to vector<8x32xf32>
    %177 = arith.mulf %175, %176 : vector<8x32xf32>
    %178 = vector.broadcast %24 : vector<1x32xf32> to vector<8x32xf32>
    %179 = arith.addf %177, %178 : vector<8x32xf32>
    %cst_123 = arith.constant dense<0.000000e+00> : vector<8x64xf32>
    %180 = tpu.matmul %179, %27, %cst_123 {dimension_numbers = #tpu.dot_dimension_numbers<[1], [0], [0], [1], [0, 0, 1, 1], [], []>} : vector<8x32xf32>, vector<32x64xf32>, vector<8x64xf32> -> vector<8x64xf32>
    %181 = vector.broadcast %28 : vector<1x64xf32> to vector<8x64xf32>
    %182 = arith.addf %180, %181 : vector<8x64xf32>
    %cst_124 = arith.constant 5.000000e-01 : f32
    %183 = vector.broadcast %cst_124 : f32 to vector<8x64xf32>
    %184 = arith.mulf %183, %182 : vector<8x64xf32>
    %cst_125 = arith.constant 0.707106769 : f32
    %185 = vector.broadcast %cst_125 : f32 to vector<8x64xf32>
    %186 = arith.mulf %182, %185 : vector<8x64xf32>
    %187 = math.absf %186 : vector<8x64xf32>
    %cst_126 = arith.constant 0.327591091 : f32
    %188 = vector.broadcast %cst_126 : f32 to vector<8x64xf32>
    %189 = arith.mulf %188, %187 : vector<8x64xf32>
    %cst_127 = arith.constant 1.000000e+00 : f32
    %190 = vector.broadcast %cst_127 : f32 to vector<8x64xf32>
    %191 = arith.addf %190, %189 : vector<8x64xf32>
    %cst_128 = arith.constant 1.000000e+00 : f32
    %192 = vector.broadcast %cst_128 : f32 to vector<8x64xf32>
    %193 = arith.divf %192, %191 : vector<8x64xf32>
    %cst_129 = arith.constant 1.06140542 : f32
    %194 = vector.broadcast %cst_129 : f32 to vector<8x64xf32>
    %195 = arith.mulf %194, %193 : vector<8x64xf32>
    %cst_130 = arith.constant 1.45315206 : f32
    %196 = vector.broadcast %cst_130 : f32 to vector<8x64xf32>
    %197 = arith.subf %195, %196 : vector<8x64xf32>
    %198 = arith.mulf %197, %193 : vector<8x64xf32>
    %cst_131 = arith.constant 1.42141378 : f32
    %199 = vector.broadcast %cst_131 : f32 to vector<8x64xf32>
    %200 = arith.addf %198, %199 : vector<8x64xf32>
    %201 = arith.mulf %200, %193 : vector<8x64xf32>
    %cst_132 = arith.constant 0.284496725 : f32
    %202 = vector.broadcast %cst_132 : f32 to vector<8x64xf32>
    %203 = arith.subf %201, %202 : vector<8x64xf32>
    %204 = arith.mulf %203, %193 : vector<8x64xf32>
    %cst_133 = arith.constant 0.254829586 : f32
    %205 = vector.broadcast %cst_133 : f32 to vector<8x64xf32>
    %206 = arith.addf %204, %205 : vector<8x64xf32>
    %207 = arith.mulf %206, %193 : vector<8x64xf32>
    %cst_134 = arith.constant 0.000000e+00 : f32
    %208 = vector.broadcast %cst_134 : f32 to vector<8x64xf32>
    %209 = arith.subf %208, %187 : vector<8x64xf32>
    %210 = arith.mulf %209, %187 : vector<8x64xf32>
    %211 = math.exp %210 : vector<8x64xf32>
    %212 = arith.mulf %207, %211 : vector<8x64xf32>
    %cst_135 = arith.constant 1.000000e+00 : f32
    %213 = vector.broadcast %cst_135 : f32 to vector<8x64xf32>
    %214 = arith.subf %213, %212 : vector<8x64xf32>
    %cst_136 = arith.constant 0.000000e+00 : f32
    %215 = vector.broadcast %cst_136 : f32 to vector<8x64xf32>
    %216 = arith.cmpf oge, %186, %215 : vector<8x64xf32>
    %cst_137 = arith.constant 0.000000e+00 : f32
    %217 = vector.broadcast %cst_137 : f32 to vector<8x64xf32>
    %218 = arith.subf %217, %214 : vector<8x64xf32>
    %219 = arith.select %216, %214, %218 : vector<8x64xi1>, vector<8x64xf32>
    %cst_138 = arith.constant 1.000000e+00 : f32
    %220 = vector.broadcast %cst_138 : f32 to vector<8x64xf32>
    %221 = arith.addf %220, %219 : vector<8x64xf32>
    %222 = arith.mulf %184, %221 : vector<8x64xf32>
    %cst_139 = arith.constant dense<0.000000e+00> : vector<8x32xf32>
    %223 = tpu.matmul %222, %29, %cst_139 {dimension_numbers = #tpu.dot_dimension_numbers<[1], [0], [0], [1], [0, 0, 1, 1], [], []>} : vector<8x64xf32>, vector<64x32xf32>, vector<8x32xf32> -> vector<8x32xf32>
    %224 = vector.broadcast %30 : vector<1x32xf32> to vector<8x32xf32>
    %225 = arith.addf %223, %224 : vector<8x32xf32>
    %226 = arith.addf %179, %225 : vector<8x32xf32>
    %cst_140 = arith.constant dense<0.000000e+00> : vector<8xf32>
    %227 = vector.multi_reduction <add>, %226, %cst_140 [1] : vector<8x32xf32> to vector<8xf32>
    %228 = vector.shape_cast %227 : vector<8xf32> to vector<8x1xf32>
    %cst_141 = arith.constant 3.200000e+01 : f32
    %229 = vector.broadcast %cst_141 : f32 to vector<8x1xf32>
    %230 = arith.divf %228, %229 : vector<8x1xf32>
    %231 = vector.broadcast %230 : vector<8x1xf32> to vector<8x32xf32>
    %232 = arith.subf %226, %231 : vector<8x32xf32>
    %233 = arith.mulf %232, %232 : vector<8x32xf32>
    %cst_142 = arith.constant dense<0.000000e+00> : vector<8xf32>
    %234 = vector.multi_reduction <add>, %233, %cst_142 [1] : vector<8x32xf32> to vector<8xf32>
    %235 = vector.shape_cast %234 : vector<8xf32> to vector<8x1xf32>
    %cst_143 = arith.constant 3.200000e+01 : f32
    %236 = vector.broadcast %cst_143 : f32 to vector<8x1xf32>
    %237 = arith.divf %235, %236 : vector<8x1xf32>
    %238 = vector.broadcast %230 : vector<8x1xf32> to vector<8x32xf32>
    %239 = arith.subf %226, %238 : vector<8x32xf32>
    %cst_144 = arith.constant 9.99999974E-6 : f32
    %240 = vector.broadcast %cst_144 : f32 to vector<8x1xf32>
    %241 = arith.addf %237, %240 : vector<8x1xf32>
    %242 = math.rsqrt %241 : vector<8x1xf32>
    %243 = vector.broadcast %242 : vector<8x1xf32> to vector<8x32xf32>
    %244 = arith.mulf %239, %243 : vector<8x32xf32>
    %245 = vector.broadcast %25 : vector<1x32xf32> to vector<8x32xf32>
    %246 = arith.mulf %244, %245 : vector<8x32xf32>
    %247 = vector.broadcast %26 : vector<1x32xf32> to vector<8x32xf32>
    %248 = arith.addf %246, %247 : vector<8x32xf32>
    %cst_145 = arith.constant dense<0.000000e+00> : vector<8x96xf32>
    %249 = tpu.matmul %248, %31, %cst_145 {dimension_numbers = #tpu.dot_dimension_numbers<[1], [0], [0], [1], [0, 0, 1, 1], [], []>} : vector<8x32xf32>, vector<32x96xf32>, vector<8x96xf32> -> vector<8x96xf32>
    %250 = vector.broadcast %32 : vector<1x96xf32> to vector<8x96xf32>
    %251 = arith.addf %249, %250 : vector<8x96xf32>
    %252 = vector.extract_strided_slice %251 {offsets = [0, 0], sizes = [8, 32], strides = [1, 1]} : vector<8x96xf32> to vector<8x32xf32>
    %253 = vector.extract_strided_slice %251 {offsets = [0, 32], sizes = [8, 32], strides = [1, 1]} : vector<8x96xf32> to vector<8x32xf32>
    %254 = vector.extract_strided_slice %251 {offsets = [0, 64], sizes = [8, 32], strides = [1, 1]} : vector<8x96xf32> to vector<8x32xf32>
    %255 = vector.shape_cast %252 : vector<8x32xf32> to vector<1x8x32xf32>
    %cst_146 = arith.constant 5.000000e-01 : f32
    %256 = vector.broadcast %cst_146 : f32 to vector<8x1x32xf32>
    %257 = arith.mulf %10, %256 : vector<8x1x32xf32>
    %258 = vector.broadcast %255 : vector<1x8x32xf32> to vector<8x8x32xf32>
    %259 = vector.broadcast %257 : vector<8x1x32xf32> to vector<8x8x32xf32>
    %260 = arith.mulf %258, %259 : vector<8x8x32xf32>
    %261 = vector.shape_cast %253 : vector<8x32xf32> to vector<1x8x32xf32>
    %262 = vector.shape_cast %261 : vector<1x8x32xf32> to vector<1x8x32xf32>
    %263 = vector.broadcast %262 : vector<1x8x32xf32> to vector<8x8x32xf32>
    %264 = vector.shape_cast %254 : vector<8x32xf32> to vector<1x8x32xf32>
    %265 = vector.broadcast %264 : vector<1x8x32xf32> to vector<8x8x32xf32>
    %266 = vector.broadcast %10 : vector<8x1x32xf32> to vector<8x8x32xf32>
    %267 = arith.mulf %265, %266 : vector<8x8x32xf32>
    "tpu.trace_start"() <{level = 10 : i32, message = "hte,hse->hts"}> : () -> ()
    %cst_147 = arith.constant dense<0.000000e+00> : vector<8x8x8xf32>
    %268 = tpu.matmul %260, %263, %cst_147 {dimension_numbers = #tpu.dot_dimension_numbers<[2], [2], [1], [1], [0, 0, 0, 1, 1, 1], [0], [0]>} : vector<8x8x32xf32>, vector<8x8x32xf32>, vector<8x8x8xf32> -> vector<8x8x8xf32>
    "tpu.trace_stop"() : () -> ()
    %269 = vector.shape_cast %60 : vector<8x8xf32> to vector<1x8x8xf32>
    %270 = vector.broadcast %269 : vector<1x8x8xf32> to vector<8x8x8xf32>
    %271 = arith.addf %268, %270 : vector<8x8x8xf32>
    %cst_148 = arith.constant dense<0xFF800000> : vector<8x8xf32>
    %272 = vector.multi_reduction <maximumf>, %271, %cst_148 [2] : vector<8x8x8xf32> to vector<8x8xf32>
    %273 = vector.shape_cast %272 : vector<8x8xf32> to vector<8x8x1xf32>
    %274 = vector.broadcast %273 : vector<8x8x1xf32> to vector<8x8x8xf32>
    %275 = arith.subf %271, %274 : vector<8x8x8xf32>
    %276 = math.exp %275 : vector<8x8x8xf32>
    %cst_149 = arith.constant dense<0.000000e+00> : vector<8x8xf32>
    %277 = vector.multi_reduction <add>, %276, %cst_149 [2] : vector<8x8x8xf32> to vector<8x8xf32>
    %278 = vector.shape_cast %277 : vector<8x8xf32> to vector<8x8x1xf32>
    %279 = vector.broadcast %278 : vector<8x8x1xf32> to vector<8x8x8xf32>
    %280 = arith.divf %276, %279 : vector<8x8x8xf32>
    "tpu.trace_start"() <{level = 10 : i32, message = "hts,hse->hte"}> : () -> ()
    %cst_150 = arith.constant dense<0.000000e+00> : vector<8x8x32xf32>
    %281 = tpu.matmul %280, %267, %cst_150 {dimension_numbers = #tpu.dot_dimension_numbers<[2], [1], [1], [2], [0, 0, 0, 1, 1, 2], [0], [0]>} : vector<8x8x8xf32>, vector<8x8x32xf32>, vector<8x8x32xf32> -> vector<8x8x32xf32>
    "tpu.trace_stop"() : () -> ()
    %cst_151 = arith.constant dense<0.000000e+00> : vector<8x32xf32>
    %282 = vector.multi_reduction <add>, %281, %cst_151 [0] : vector<8x8x32xf32> to vector<8x32xf32>
    %cst_152 = arith.constant dense<0.000000e+00> : vector<8x32xf32>
    %283 = tpu.matmul %282, %33, %cst_152 {dimension_numbers = #tpu.dot_dimension_numbers<[1], [0], [0], [1], [0, 0, 1, 1], [], []>} : vector<8x32xf32>, vector<32x32xf32>, vector<8x32xf32> -> vector<8x32xf32>
    %284 = vector.broadcast %34 : vector<1x32xf32> to vector<8x32xf32>
    %285 = arith.addf %283, %284 : vector<8x32xf32>
    %286 = arith.addf %248, %285 : vector<8x32xf32>
    %cst_153 = arith.constant dense<0.000000e+00> : vector<8xf32>
    %287 = vector.multi_reduction <add>, %286, %cst_153 [1] : vector<8x32xf32> to vector<8xf32>
    %288 = vector.shape_cast %287 : vector<8xf32> to vector<8x1xf32>
    %cst_154 = arith.constant 3.200000e+01 : f32
    %289 = vector.broadcast %cst_154 : f32 to vector<8x1xf32>
    %290 = arith.divf %288, %289 : vector<8x1xf32>
    %291 = vector.broadcast %290 : vector<8x1xf32> to vector<8x32xf32>
    %292 = arith.subf %286, %291 : vector<8x32xf32>
    %293 = arith.mulf %292, %292 : vector<8x32xf32>
    %cst_155 = arith.constant dense<0.000000e+00> : vector<8xf32>
    %294 = vector.multi_reduction <add>, %293, %cst_155 [1] : vector<8x32xf32> to vector<8xf32>
    %295 = vector.shape_cast %294 : vector<8xf32> to vector<8x1xf32>
    %cst_156 = arith.constant 3.200000e+01 : f32
    %296 = vector.broadcast %cst_156 : f32 to vector<8x1xf32>
    %297 = arith.divf %295, %296 : vector<8x1xf32>
    %298 = vector.broadcast %290 : vector<8x1xf32> to vector<8x32xf32>
    %299 = arith.subf %286, %298 : vector<8x32xf32>
    %cst_157 = arith.constant 9.99999974E-6 : f32
    %300 = vector.broadcast %cst_157 : f32 to vector<8x1xf32>
    %301 = arith.addf %297, %300 : vector<8x1xf32>
    %302 = math.rsqrt %301 : vector<8x1xf32>
    %303 = vector.broadcast %302 : vector<8x1xf32> to vector<8x32xf32>
    %304 = arith.mulf %299, %303 : vector<8x32xf32>
    %305 = vector.broadcast %41 : vector<1x32xf32> to vector<8x32xf32>
    %306 = arith.mulf %304, %305 : vector<8x32xf32>
    %307 = vector.broadcast %42 : vector<1x32xf32> to vector<8x32xf32>
    %308 = arith.addf %306, %307 : vector<8x32xf32>
    %cst_158 = arith.constant dense<0.000000e+00> : vector<8x32xf32>
    %309 = tpu.matmul %308, %35, %cst_158 {dimension_numbers = #tpu.dot_dimension_numbers<[1], [0], [0], [1], [0, 0, 1, 1], [], []>} : vector<8x32xf32>, vector<32x32xf32>, vector<8x32xf32> -> vector<8x32xf32>
    %310 = vector.broadcast %36 : vector<1x32xf32> to vector<8x32xf32>
    %311 = arith.addf %309, %310 : vector<8x32xf32>
    %cst_159 = arith.constant dense<0.000000e+00> : vector<10x64xf32>
    %312 = tpu.matmul %58, %37, %cst_159 {dimension_numbers = #tpu.dot_dimension_numbers<[1], [0], [0], [1], [0, 0, 1, 1], [], []>} : vector<10x32xf32>, vector<32x64xf32>, vector<10x64xf32> -> vector<10x64xf32>
    %313 = vector.broadcast %38 : vector<1x64xf32> to vector<10x64xf32>
    %314 = arith.addf %312, %313 : vector<10x64xf32>
    %315 = vector.extract_strided_slice %314 {offsets = [0, 0], sizes = [10, 32], strides = [1, 1]} : vector<10x64xf32> to vector<10x32xf32>
    %316 = vector.extract_strided_slice %314 {offsets = [0, 32], sizes = [10, 32], strides = [1, 1]} : vector<10x64xf32> to vector<10x32xf32>
    %317 = vector.shape_cast %311 : vector<8x32xf32> to vector<1x8x32xf32>
    %cst_160 = arith.constant 5.000000e-01 : f32
    %318 = vector.broadcast %cst_160 : f32 to vector<8x1x32xf32>
    %319 = arith.mulf %10, %318 : vector<8x1x32xf32>
    %320 = vector.broadcast %317 : vector<1x8x32xf32> to vector<8x8x32xf32>
    %321 = vector.broadcast %319 : vector<8x1x32xf32> to vector<8x8x32xf32>
    %322 = arith.mulf %320, %321 : vector<8x8x32xf32>
    %323 = vector.shape_cast %315 : vector<10x32xf32> to vector<1x10x32xf32>
    %324 = vector.shape_cast %323 : vector<1x10x32xf32> to vector<1x10x32xf32>
    %325 = vector.broadcast %324 : vector<1x10x32xf32> to vector<8x10x32xf32>
    %326 = vector.shape_cast %316 : vector<10x32xf32> to vector<1x10x32xf32>
    %327 = vector.broadcast %326 : vector<1x10x32xf32> to vector<8x10x32xf32>
    %328 = vector.broadcast %10 : vector<8x1x32xf32> to vector<8x10x32xf32>
    %329 = arith.mulf %327, %328 : vector<8x10x32xf32>
    "tpu.trace_start"() <{level = 10 : i32, message = "hte,hse->hts"}> : () -> ()
    %cst_161 = arith.constant dense<0.000000e+00> : vector<8x8x10xf32>
    %330 = tpu.matmul %322, %325, %cst_161 {dimension_numbers = #tpu.dot_dimension_numbers<[2], [2], [1], [1], [0, 0, 0, 1, 1, 1], [0], [0]>} : vector<8x8x32xf32>, vector<8x10x32xf32>, vector<8x8x10xf32> -> vector<8x8x10xf32>
    "tpu.trace_stop"() : () -> ()
    %cst_162 = arith.constant dense<0xFF800000> : vector<8x8xf32>
    %331 = vector.multi_reduction <maximumf>, %330, %cst_162 [2] : vector<8x8x10xf32> to vector<8x8xf32>
    %332 = vector.shape_cast %331 : vector<8x8xf32> to vector<8x8x1xf32>
    %333 = vector.broadcast %332 : vector<8x8x1xf32> to vector<8x8x10xf32>
    %334 = arith.subf %330, %333 : vector<8x8x10xf32>
    %335 = math.exp %334 : vector<8x8x10xf32>
    %cst_163 = arith.constant dense<0.000000e+00> : vector<8x8xf32>
    %336 = vector.multi_reduction <add>, %335, %cst_163 [2] : vector<8x8x10xf32> to vector<8x8xf32>
    %337 = vector.shape_cast %336 : vector<8x8xf32> to vector<8x8x1xf32>
    %338 = vector.broadcast %337 : vector<8x8x1xf32> to vector<8x8x10xf32>
    %339 = arith.divf %335, %338 : vector<8x8x10xf32>
    "tpu.trace_start"() <{level = 10 : i32, message = "hts,hse->hte"}> : () -> ()
    %cst_164 = arith.constant dense<0.000000e+00> : vector<8x8x32xf32>
    %340 = tpu.matmul %339, %329, %cst_164 {dimension_numbers = #tpu.dot_dimension_numbers<[2], [1], [1], [2], [0, 0, 0, 1, 1, 2], [0], [0]>} : vector<8x8x10xf32>, vector<8x10x32xf32>, vector<8x8x32xf32> -> vector<8x8x32xf32>
    "tpu.trace_stop"() : () -> ()
    %cst_165 = arith.constant dense<0.000000e+00> : vector<8x32xf32>
    %341 = vector.multi_reduction <add>, %340, %cst_165 [0] : vector<8x8x32xf32> to vector<8x32xf32>
    %cst_166 = arith.constant dense<0.000000e+00> : vector<8x32xf32>
    %342 = tpu.matmul %341, %39, %cst_166 {dimension_numbers = #tpu.dot_dimension_numbers<[1], [0], [0], [1], [0, 0, 1, 1], [], []>} : vector<8x32xf32>, vector<32x32xf32>, vector<8x32xf32> -> vector<8x32xf32>
    %343 = vector.broadcast %40 : vector<1x32xf32> to vector<8x32xf32>
    %344 = arith.addf %342, %343 : vector<8x32xf32>
    %345 = arith.addf %308, %344 : vector<8x32xf32>
    %cst_167 = arith.constant dense<0.000000e+00> : vector<8xf32>
    %346 = vector.multi_reduction <add>, %345, %cst_167 [1] : vector<8x32xf32> to vector<8xf32>
    %347 = vector.shape_cast %346 : vector<8xf32> to vector<8x1xf32>
    %cst_168 = arith.constant 3.200000e+01 : f32
    %348 = vector.broadcast %cst_168 : f32 to vector<8x1xf32>
    %349 = arith.divf %347, %348 : vector<8x1xf32>
    %350 = vector.broadcast %349 : vector<8x1xf32> to vector<8x32xf32>
    %351 = arith.subf %345, %350 : vector<8x32xf32>
    %352 = arith.mulf %351, %351 : vector<8x32xf32>
    %cst_169 = arith.constant dense<0.000000e+00> : vector<8xf32>
    %353 = vector.multi_reduction <add>, %352, %cst_169 [1] : vector<8x32xf32> to vector<8xf32>
    %354 = vector.shape_cast %353 : vector<8xf32> to vector<8x1xf32>
    %cst_170 = arith.constant 3.200000e+01 : f32
    %355 = vector.broadcast %cst_170 : f32 to vector<8x1xf32>
    %356 = arith.divf %354, %355 : vector<8x1xf32>
    %357 = vector.broadcast %349 : vector<8x1xf32> to vector<8x32xf32>
    %358 = arith.subf %345, %357 : vector<8x32xf32>
    %cst_171 = arith.constant 9.99999974E-6 : f32
    %359 = vector.broadcast %cst_171 : f32 to vector<8x1xf32>
    %360 = arith.addf %356, %359 : vector<8x1xf32>
    %361 = math.rsqrt %360 : vector<8x1xf32>
    %362 = vector.broadcast %361 : vector<8x1xf32> to vector<8x32xf32>
    %363 = arith.mulf %358, %362 : vector<8x32xf32>
    %364 = vector.broadcast %43 : vector<1x32xf32> to vector<8x32xf32>
    %365 = arith.mulf %363, %364 : vector<8x32xf32>
    %366 = vector.broadcast %44 : vector<1x32xf32> to vector<8x32xf32>
    %367 = arith.addf %365, %366 : vector<8x32xf32>
    %cst_172 = arith.constant dense<0.000000e+00> : vector<8x64xf32>
    %368 = tpu.matmul %367, %47, %cst_172 {dimension_numbers = #tpu.dot_dimension_numbers<[1], [0], [0], [1], [0, 0, 1, 1], [], []>} : vector<8x32xf32>, vector<32x64xf32>, vector<8x64xf32> -> vector<8x64xf32>
    %369 = vector.broadcast %48 : vector<1x64xf32> to vector<8x64xf32>
    %370 = arith.addf %368, %369 : vector<8x64xf32>
    %cst_173 = arith.constant 5.000000e-01 : f32
    %371 = vector.broadcast %cst_173 : f32 to vector<8x64xf32>
    %372 = arith.mulf %371, %370 : vector<8x64xf32>
    %cst_174 = arith.constant 0.707106769 : f32
    %373 = vector.broadcast %cst_174 : f32 to vector<8x64xf32>
    %374 = arith.mulf %370, %373 : vector<8x64xf32>
    %375 = math.absf %374 : vector<8x64xf32>
    %cst_175 = arith.constant 0.327591091 : f32
    %376 = vector.broadcast %cst_175 : f32 to vector<8x64xf32>
    %377 = arith.mulf %376, %375 : vector<8x64xf32>
    %cst_176 = arith.constant 1.000000e+00 : f32
    %378 = vector.broadcast %cst_176 : f32 to vector<8x64xf32>
    %379 = arith.addf %378, %377 : vector<8x64xf32>
    %cst_177 = arith.constant 1.000000e+00 : f32
    %380 = vector.broadcast %cst_177 : f32 to vector<8x64xf32>
    %381 = arith.divf %380, %379 : vector<8x64xf32>
    %cst_178 = arith.constant 1.06140542 : f32
    %382 = vector.broadcast %cst_178 : f32 to vector<8x64xf32>
    %383 = arith.mulf %382, %381 : vector<8x64xf32>
    %cst_179 = arith.constant 1.45315206 : f32
    %384 = vector.broadcast %cst_179 : f32 to vector<8x64xf32>
    %385 = arith.subf %383, %384 : vector<8x64xf32>
    %386 = arith.mulf %385, %381 : vector<8x64xf32>
    %cst_180 = arith.constant 1.42141378 : f32
    %387 = vector.broadcast %cst_180 : f32 to vector<8x64xf32>
    %388 = arith.addf %386, %387 : vector<8x64xf32>
    %389 = arith.mulf %388, %381 : vector<8x64xf32>
    %cst_181 = arith.constant 0.284496725 : f32
    %390 = vector.broadcast %cst_181 : f32 to vector<8x64xf32>
    %391 = arith.subf %389, %390 : vector<8x64xf32>
    %392 = arith.mulf %391, %381 : vector<8x64xf32>
    %cst_182 = arith.constant 0.254829586 : f32
    %393 = vector.broadcast %cst_182 : f32 to vector<8x64xf32>
    %394 = arith.addf %392, %393 : vector<8x64xf32>
    %395 = arith.mulf %394, %381 : vector<8x64xf32>
    %cst_183 = arith.constant 0.000000e+00 : f32
    %396 = vector.broadcast %cst_183 : f32 to vector<8x64xf32>
    %397 = arith.subf %396, %375 : vector<8x64xf32>
    %398 = arith.mulf %397, %375 : vector<8x64xf32>
    %399 = math.exp %398 : vector<8x64xf32>
    %400 = arith.mulf %395, %399 : vector<8x64xf32>
    %cst_184 = arith.constant 1.000000e+00 : f32
    %401 = vector.broadcast %cst_184 : f32 to vector<8x64xf32>
    %402 = arith.subf %401, %400 : vector<8x64xf32>
    %cst_185 = arith.constant 0.000000e+00 : f32
    %403 = vector.broadcast %cst_185 : f32 to vector<8x64xf32>
    %404 = arith.cmpf oge, %374, %403 : vector<8x64xf32>
    %cst_186 = arith.constant 0.000000e+00 : f32
    %405 = vector.broadcast %cst_186 : f32 to vector<8x64xf32>
    %406 = arith.subf %405, %402 : vector<8x64xf32>
    %407 = arith.select %404, %402, %406 : vector<8x64xi1>, vector<8x64xf32>
    %cst_187 = arith.constant 1.000000e+00 : f32
    %408 = vector.broadcast %cst_187 : f32 to vector<8x64xf32>
    %409 = arith.addf %408, %407 : vector<8x64xf32>
    %410 = arith.mulf %372, %409 : vector<8x64xf32>
    %cst_188 = arith.constant dense<0.000000e+00> : vector<8x32xf32>
    %411 = tpu.matmul %410, %49, %cst_188 {dimension_numbers = #tpu.dot_dimension_numbers<[1], [0], [0], [1], [0, 0, 1, 1], [], []>} : vector<8x64xf32>, vector<64x32xf32>, vector<8x32xf32> -> vector<8x32xf32>
    %412 = vector.broadcast %50 : vector<1x32xf32> to vector<8x32xf32>
    %413 = arith.addf %411, %412 : vector<8x32xf32>
    %414 = arith.addf %367, %413 : vector<8x32xf32>
    %cst_189 = arith.constant dense<0.000000e+00> : vector<8xf32>
    %415 = vector.multi_reduction <add>, %414, %cst_189 [1] : vector<8x32xf32> to vector<8xf32>
    %416 = vector.shape_cast %415 : vector<8xf32> to vector<8x1xf32>
    %cst_190 = arith.constant 3.200000e+01 : f32
    %417 = vector.broadcast %cst_190 : f32 to vector<8x1xf32>
    %418 = arith.divf %416, %417 : vector<8x1xf32>
    %419 = vector.broadcast %418 : vector<8x1xf32> to vector<8x32xf32>
    %420 = arith.subf %414, %419 : vector<8x32xf32>
    %421 = arith.mulf %420, %420 : vector<8x32xf32>
    %cst_191 = arith.constant dense<0.000000e+00> : vector<8xf32>
    %422 = vector.multi_reduction <add>, %421, %cst_191 [1] : vector<8x32xf32> to vector<8xf32>
    %423 = vector.shape_cast %422 : vector<8xf32> to vector<8x1xf32>
    %cst_192 = arith.constant 3.200000e+01 : f32
    %424 = vector.broadcast %cst_192 : f32 to vector<8x1xf32>
    %425 = arith.divf %423, %424 : vector<8x1xf32>
    %426 = vector.broadcast %418 : vector<8x1xf32> to vector<8x32xf32>
    %427 = arith.subf %414, %426 : vector<8x32xf32>
    %cst_193 = arith.constant 9.99999974E-6 : f32
    %428 = vector.broadcast %cst_193 : f32 to vector<8x1xf32>
    %429 = arith.addf %425, %428 : vector<8x1xf32>
    %430 = math.rsqrt %429 : vector<8x1xf32>
    %431 = vector.broadcast %430 : vector<8x1xf32> to vector<8x32xf32>
    %432 = arith.mulf %427, %431 : vector<8x32xf32>
    %433 = vector.broadcast %45 : vector<1x32xf32> to vector<8x32xf32>
    %434 = arith.mulf %432, %433 : vector<8x32xf32>
    %435 = vector.broadcast %46 : vector<1x32xf32> to vector<8x32xf32>
    %436 = arith.addf %434, %435 : vector<8x32xf32>
    %cst_194 = arith.constant dense<0.000000e+00> : vector<8xf32>
    %437 = vector.multi_reduction <add>, %436, %cst_194 [1] : vector<8x32xf32> to vector<8xf32>
    %438 = vector.shape_cast %437 : vector<8xf32> to vector<8x1xf32>
    %cst_195 = arith.constant 3.200000e+01 : f32
    %439 = vector.broadcast %cst_195 : f32 to vector<8x1xf32>
    %440 = arith.divf %438, %439 : vector<8x1xf32>
    %441 = vector.broadcast %440 : vector<8x1xf32> to vector<8x32xf32>
    %442 = arith.subf %436, %441 : vector<8x32xf32>
    %443 = arith.mulf %442, %442 : vector<8x32xf32>
    %cst_196 = arith.constant dense<0.000000e+00> : vector<8xf32>
    %444 = vector.multi_reduction <add>, %443, %cst_196 [1] : vector<8x32xf32> to vector<8xf32>
    %445 = vector.shape_cast %444 : vector<8xf32> to vector<8x1xf32>
    %cst_197 = arith.constant 3.200000e+01 : f32
    %446 = vector.broadcast %cst_197 : f32 to vector<8x1xf32>
    %447 = arith.divf %445, %446 : vector<8x1xf32>
    %448 = vector.broadcast %440 : vector<8x1xf32> to vector<8x32xf32>
    %449 = arith.subf %436, %448 : vector<8x32xf32>
    %cst_198 = arith.constant 9.99999974E-6 : f32
    %450 = vector.broadcast %cst_198 : f32 to vector<8x1xf32>
    %451 = arith.addf %447, %450 : vector<8x1xf32>
    %452 = math.rsqrt %451 : vector<8x1xf32>
    %453 = vector.broadcast %452 : vector<8x1xf32> to vector<8x32xf32>
    %454 = arith.mulf %449, %453 : vector<8x32xf32>
    %455 = vector.broadcast %51 : vector<1x32xf32> to vector<8x32xf32>
    %456 = arith.mulf %454, %455 : vector<8x32xf32>
    %457 = vector.broadcast %52 : vector<1x32xf32> to vector<8x32xf32>
    %458 = arith.addf %456, %457 : vector<8x32xf32>
    %cst_199 = arith.constant dense<0.000000e+00> : vector<8x64xf32>
    %459 = tpu.matmul %458, %53, %cst_199 {dimension_numbers = #tpu.dot_dimension_numbers<[1], [0], [0], [1], [0, 0, 1, 1], [], []>} : vector<8x32xf32>, vector<32x64xf32>, vector<8x64xf32> -> vector<8x64xf32>
    %460 = vector.broadcast %54 : vector<1x64xf32> to vector<8x64xf32>
    %461 = arith.addf %459, %460 : vector<8x64xf32>
    %c0_200 = arith.constant 0 : index
    %c0_201 = arith.constant 0 : index
    %c0_202 = arith.constant 0 : index
    %462 = vector.load %arg48[%c0_200, %c0_201, %c0_202] : memref<2x8x64xf32, #tpu.memory_space<vmem>>, vector<1x8x64xf32>
    %463 = vector.shape_cast %462 : vector<1x8x64xf32> to vector<8x64xf32>
    %464 = vector.shape_cast %461 : vector<8x64xf32> to vector<1x8x64xf32>
    tpu.vector_store %arg48[%c0_200, %c0_201, %c0_202], %464 {strides = array<i32>} : memref<2x8x64xf32, #tpu.memory_space<vmem>>, vector<1x8x64xf32>,
    %c1 = arith.constant 1 : index
    %c0_203 = arith.constant 0 : index
    %c0_204 = arith.constant 0 : index
    %465 = vector.load %arg1[%c1, %c0_203, %c0_204] : memref<2x8x32xf32, #tpu.memory_space<vmem>>, vector<1x8x32xf32>
    %466 = vector.shape_cast %465 : vector<1x8x32xf32> to vector<8x32xf32>
    %c1_205 = arith.constant 1 : index
    %c0_206 = arith.constant 0 : index
    %c0_207 = arith.constant 0 : index
    %467 = vector.load %arg2[%c1_205, %c0_206, %c0_207] : memref<2x10x32xf32, #tpu.memory_space<vmem>>, vector<1x10x32xf32>
    %468 = vector.shape_cast %467 : vector<1x10x32xf32> to vector<10x32xf32>
    %c1_208 = arith.constant 1 : index
    %c0_209 = arith.constant 0 : index
    %c0_210 = arith.constant 0 : index
    %469 = vector.load %arg3[%c1_208, %c0_209, %c0_210] : memref<2x8x8xf32, #tpu.memory_space<vmem>>, vector<1x8x8xf32>
    %470 = vector.shape_cast %469 : vector<1x8x8xf32> to vector<8x8xf32>
    %cst_211 = arith.constant dense<0.000000e+00> : vector<8x96xf32>
    %471 = tpu.matmul %466, %11, %cst_211 {dimension_numbers = #tpu.dot_dimension_numbers<[1], [0], [0], [1], [0, 0, 1, 1], [], []>} : vector<8x32xf32>, vector<32x96xf32>, vector<8x96xf32> -> vector<8x96xf32>
    %472 = vector.broadcast %12 : vector<1x96xf32> to vector<8x96xf32>
    %473 = arith.addf %471, %472 : vector<8x96xf32>
    %474 = vector.extract_strided_slice %473 {offsets = [0, 0], sizes = [8, 32], strides = [1, 1]} : vector<8x96xf32> to vector<8x32xf32>
    %475 = vector.extract_strided_slice %473 {offsets = [0, 32], sizes = [8, 32], strides = [1, 1]} : vector<8x96xf32> to vector<8x32xf32>
    %476 = vector.extract_strided_slice %473 {offsets = [0, 64], sizes = [8, 32], strides = [1, 1]} : vector<8x96xf32> to vector<8x32xf32>
    %477 = vector.shape_cast %474 : vector<8x32xf32> to vector<1x8x32xf32>
    %cst_212 = arith.constant 5.000000e-01 : f32
    %478 = vector.broadcast %cst_212 : f32 to vector<8x1x32xf32>
    %479 = arith.mulf %10, %478 : vector<8x1x32xf32>
    %480 = vector.broadcast %477 : vector<1x8x32xf32> to vector<8x8x32xf32>
    %481 = vector.broadcast %479 : vector<8x1x32xf32> to vector<8x8x32xf32>
    %482 = arith.mulf %480, %481 : vector<8x8x32xf32>
    %483 = vector.shape_cast %475 : vector<8x32xf32> to vector<1x8x32xf32>
    %484 = vector.shape_cast %483 : vector<1x8x32xf32> to vector<1x8x32xf32>
    %485 = vector.broadcast %484 : vector<1x8x32xf32> to vector<8x8x32xf32>
    %486 = vector.shape_cast %476 : vector<8x32xf32> to vector<1x8x32xf32>
    %487 = vector.broadcast %486 : vector<1x8x32xf32> to vector<8x8x32xf32>
    %488 = vector.broadcast %10 : vector<8x1x32xf32> to vector<8x8x32xf32>
    %489 = arith.mulf %487, %488 : vector<8x8x32xf32>
    "tpu.trace_start"() <{level = 10 : i32, message = "hte,hse->hts"}> : () -> ()
    %cst_213 = arith.constant dense<0.000000e+00> : vector<8x8x8xf32>
    %490 = tpu.matmul %482, %485, %cst_213 {dimension_numbers = #tpu.dot_dimension_numbers<[2], [2], [1], [1], [0, 0, 0, 1, 1, 1], [0], [0]>} : vector<8x8x32xf32>, vector<8x8x32xf32>, vector<8x8x8xf32> -> vector<8x8x8xf32>
    "tpu.trace_stop"() : () -> ()
    %491 = vector.shape_cast %470 : vector<8x8xf32> to vector<1x8x8xf32>
    %492 = vector.broadcast %491 : vector<1x8x8xf32> to vector<8x8x8xf32>
    %493 = arith.addf %490, %492 : vector<8x8x8xf32>
    %cst_214 = arith.constant dense<0xFF800000> : vector<8x8xf32>
    %494 = vector.multi_reduction <maximumf>, %493, %cst_214 [2] : vector<8x8x8xf32> to vector<8x8xf32>
    %495 = vector.shape_cast %494 : vector<8x8xf32> to vector<8x8x1xf32>
    %496 = vector.broadcast %495 : vector<8x8x1xf32> to vector<8x8x8xf32>
    %497 = arith.subf %493, %496 : vector<8x8x8xf32>
    %498 = math.exp %497 : vector<8x8x8xf32>
    %cst_215 = arith.constant dense<0.000000e+00> : vector<8x8xf32>
    %499 = vector.multi_reduction <add>, %498, %cst_215 [2] : vector<8x8x8xf32> to vector<8x8xf32>
    %500 = vector.shape_cast %499 : vector<8x8xf32> to vector<8x8x1xf32>
    %501 = vector.broadcast %500 : vector<8x8x1xf32> to vector<8x8x8xf32>
    %502 = arith.divf %498, %501 : vector<8x8x8xf32>
    "tpu.trace_start"() <{level = 10 : i32, message = "hts,hse->hte"}> : () -> ()
    %cst_216 = arith.constant dense<0.000000e+00> : vector<8x8x32xf32>
    %503 = tpu.matmul %502, %489, %cst_216 {dimension_numbers = #tpu.dot_dimension_numbers<[2], [1], [1], [2], [0, 0, 0, 1, 1, 2], [0], [0]>} : vector<8x8x8xf32>, vector<8x8x32xf32>, vector<8x8x32xf32> -> vector<8x8x32xf32>
    "tpu.trace_stop"() : () -> ()
    %cst_217 = arith.constant dense<0.000000e+00> : vector<8x32xf32>
    %504 = vector.multi_reduction <add>, %503, %cst_217 [0] : vector<8x8x32xf32> to vector<8x32xf32>
    %cst_218 = arith.constant dense<0.000000e+00> : vector<8x32xf32>
    %505 = tpu.matmul %504, %13, %cst_218 {dimension_numbers = #tpu.dot_dimension_numbers<[1], [0], [0], [1], [0, 0, 1, 1], [], []>} : vector<8x32xf32>, vector<32x32xf32>, vector<8x32xf32> -> vector<8x32xf32>
    %506 = vector.broadcast %14 : vector<1x32xf32> to vector<8x32xf32>
    %507 = arith.addf %505, %506 : vector<8x32xf32>
    %508 = arith.addf %466, %507 : vector<8x32xf32>
    %cst_219 = arith.constant dense<0.000000e+00> : vector<8xf32>
    %509 = vector.multi_reduction <add>, %508, %cst_219 [1] : vector<8x32xf32> to vector<8xf32>
    %510 = vector.shape_cast %509 : vector<8xf32> to vector<8x1xf32>
    %cst_220 = arith.constant 3.200000e+01 : f32
    %511 = vector.broadcast %cst_220 : f32 to vector<8x1xf32>
    %512 = arith.divf %510, %511 : vector<8x1xf32>
    %513 = vector.broadcast %512 : vector<8x1xf32> to vector<8x32xf32>
    %514 = arith.subf %508, %513 : vector<8x32xf32>
    %515 = arith.mulf %514, %514 : vector<8x32xf32>
    %cst_221 = arith.constant dense<0.000000e+00> : vector<8xf32>
    %516 = vector.multi_reduction <add>, %515, %cst_221 [1] : vector<8x32xf32> to vector<8xf32>
    %517 = vector.shape_cast %516 : vector<8xf32> to vector<8x1xf32>
    %cst_222 = arith.constant 3.200000e+01 : f32
    %518 = vector.broadcast %cst_222 : f32 to vector<8x1xf32>
    %519 = arith.divf %517, %518 : vector<8x1xf32>
    %520 = vector.broadcast %512 : vector<8x1xf32> to vector<8x32xf32>
    %521 = arith.subf %508, %520 : vector<8x32xf32>
    %cst_223 = arith.constant 9.99999974E-6 : f32
    %522 = vector.broadcast %cst_223 : f32 to vector<8x1xf32>
    %523 = arith.addf %519, %522 : vector<8x1xf32>
    %524 = math.rsqrt %523 : vector<8x1xf32>
    %525 = vector.broadcast %524 : vector<8x1xf32> to vector<8x32xf32>
    %526 = arith.mulf %521, %525 : vector<8x32xf32>
    %527 = vector.broadcast %21 : vector<1x32xf32> to vector<8x32xf32>
    %528 = arith.mulf %526, %527 : vector<8x32xf32>
    %529 = vector.broadcast %22 : vector<1x32xf32> to vector<8x32xf32>
    %530 = arith.addf %528, %529 : vector<8x32xf32>
    %cst_224 = arith.constant dense<0.000000e+00> : vector<8x32xf32>
    %531 = tpu.matmul %530, %15, %cst_224 {dimension_numbers = #tpu.dot_dimension_numbers<[1], [0], [0], [1], [0, 0, 1, 1], [], []>} : vector<8x32xf32>, vector<32x32xf32>, vector<8x32xf32> -> vector<8x32xf32>
    %532 = vector.broadcast %16 : vector<1x32xf32> to vector<8x32xf32>
    %533 = arith.addf %531, %532 : vector<8x32xf32>
    %cst_225 = arith.constant dense<0.000000e+00> : vector<10x64xf32>
    %534 = tpu.matmul %468, %17, %cst_225 {dimension_numbers = #tpu.dot_dimension_numbers<[1], [0], [0], [1], [0, 0, 1, 1], [], []>} : vector<10x32xf32>, vector<32x64xf32>, vector<10x64xf32> -> vector<10x64xf32>
    %535 = vector.broadcast %18 : vector<1x64xf32> to vector<10x64xf32>
    %536 = arith.addf %534, %535 : vector<10x64xf32>
    %537 = vector.extract_strided_slice %536 {offsets = [0, 0], sizes = [10, 32], strides = [1, 1]} : vector<10x64xf32> to vector<10x32xf32>
    %538 = vector.extract_strided_slice %536 {offsets = [0, 32], sizes = [10, 32], strides = [1, 1]} : vector<10x64xf32> to vector<10x32xf32>
    %539 = vector.shape_cast %533 : vector<8x32xf32> to vector<1x8x32xf32>
    %cst_226 = arith.constant 5.000000e-01 : f32
    %540 = vector.broadcast %cst_226 : f32 to vector<8x1x32xf32>
    %541 = arith.mulf %10, %540 : vector<8x1x32xf32>
    %542 = vector.broadcast %539 : vector<1x8x32xf32> to vector<8x8x32xf32>
    %543 = vector.broadcast %541 : vector<8x1x32xf32> to vector<8x8x32xf32>
    %544 = arith.mulf %542, %543 : vector<8x8x32xf32>
    %545 = vector.shape_cast %537 : vector<10x32xf32> to vector<1x10x32xf32>
    %546 = vector.shape_cast %545 : vector<1x10x32xf32> to vector<1x10x32xf32>
    %547 = vector.broadcast %546 : vector<1x10x32xf32> to vector<8x10x32xf32>
    %548 = vector.shape_cast %538 : vector<10x32xf32> to vector<1x10x32xf32>
    %549 = vector.broadcast %548 : vector<1x10x32xf32> to vector<8x10x32xf32>
    %550 = vector.broadcast %10 : vector<8x1x32xf32> to vector<8x10x32xf32>
    %551 = arith.mulf %549, %550 : vector<8x10x32xf32>
    "tpu.trace_start"() <{level = 10 : i32, message = "hte,hse->hts"}> : () -> ()
    %cst_227 = arith.constant dense<0.000000e+00> : vector<8x8x10xf32>
    %552 = tpu.matmul %544, %547, %cst_227 {dimension_numbers = #tpu.dot_dimension_numbers<[2], [2], [1], [1], [0, 0, 0, 1, 1, 1], [0], [0]>} : vector<8x8x32xf32>, vector<8x10x32xf32>, vector<8x8x10xf32> -> vector<8x8x10xf32>
    "tpu.trace_stop"() : () -> ()
    %cst_228 = arith.constant dense<0xFF800000> : vector<8x8xf32>
    %553 = vector.multi_reduction <maximumf>, %552, %cst_228 [2] : vector<8x8x10xf32> to vector<8x8xf32>
    %554 = vector.shape_cast %553 : vector<8x8xf32> to vector<8x8x1xf32>
    %555 = vector.broadcast %554 : vector<8x8x1xf32> to vector<8x8x10xf32>
    %556 = arith.subf %552, %555 : vector<8x8x10xf32>
    %557 = math.exp %556 : vector<8x8x10xf32>
    %cst_229 = arith.constant dense<0.000000e+00> : vector<8x8xf32>
    %558 = vector.multi_reduction <add>, %557, %cst_229 [2] : vector<8x8x10xf32> to vector<8x8xf32>
    %559 = vector.shape_cast %558 : vector<8x8xf32> to vector<8x8x1xf32>
    %560 = vector.broadcast %559 : vector<8x8x1xf32> to vector<8x8x10xf32>
    %561 = arith.divf %557, %560 : vector<8x8x10xf32>
    "tpu.trace_start"() <{level = 10 : i32, message = "hts,hse->hte"}> : () -> ()
    %cst_230 = arith.constant dense<0.000000e+00> : vector<8x8x32xf32>
    %562 = tpu.matmul %561, %551, %cst_230 {dimension_numbers = #tpu.dot_dimension_numbers<[2], [1], [1], [2], [0, 0, 0, 1, 1, 2], [0], [0]>} : vector<8x8x10xf32>, vector<8x10x32xf32>, vector<8x8x32xf32> -> vector<8x8x32xf32>
    "tpu.trace_stop"() : () -> ()
    %cst_231 = arith.constant dense<0.000000e+00> : vector<8x32xf32>
    %563 = vector.multi_reduction <add>, %562, %cst_231 [0] : vector<8x8x32xf32> to vector<8x32xf32>
    %cst_232 = arith.constant dense<0.000000e+00> : vector<8x32xf32>
    %564 = tpu.matmul %563, %19, %cst_232 {dimension_numbers = #tpu.dot_dimension_numbers<[1], [0], [0], [1], [0, 0, 1, 1], [], []>} : vector<8x32xf32>, vector<32x32xf32>, vector<8x32xf32> -> vector<8x32xf32>
    %565 = vector.broadcast %20 : vector<1x32xf32> to vector<8x32xf32>
    %566 = arith.addf %564, %565 : vector<8x32xf32>
    %567 = arith.addf %530, %566 : vector<8x32xf32>
    %cst_233 = arith.constant dense<0.000000e+00> : vector<8xf32>
    %568 = vector.multi_reduction <add>, %567, %cst_233 [1] : vector<8x32xf32> to vector<8xf32>
    %569 = vector.shape_cast %568 : vector<8xf32> to vector<8x1xf32>
    %cst_234 = arith.constant 3.200000e+01 : f32
    %570 = vector.broadcast %cst_234 : f32 to vector<8x1xf32>
    %571 = arith.divf %569, %570 : vector<8x1xf32>
    %572 = vector.broadcast %571 : vector<8x1xf32> to vector<8x32xf32>
    %573 = arith.subf %567, %572 : vector<8x32xf32>
    %574 = arith.mulf %573, %573 : vector<8x32xf32>
    %cst_235 = arith.constant dense<0.000000e+00> : vector<8xf32>
    %575 = vector.multi_reduction <add>, %574, %cst_235 [1] : vector<8x32xf32> to vector<8xf32>
    %576 = vector.shape_cast %575 : vector<8xf32> to vector<8x1xf32>
    %cst_236 = arith.constant 3.200000e+01 : f32
    %577 = vector.broadcast %cst_236 : f32 to vector<8x1xf32>
    %578 = arith.divf %576, %577 : vector<8x1xf32>
    %579 = vector.broadcast %571 : vector<8x1xf32> to vector<8x32xf32>
    %580 = arith.subf %567, %579 : vector<8x32xf32>
    %cst_237 = arith.constant 9.99999974E-6 : f32
    %581 = vector.broadcast %cst_237 : f32 to vector<8x1xf32>
    %582 = arith.addf %578, %581 : vector<8x1xf32>
    %583 = math.rsqrt %582 : vector<8x1xf32>
    %584 = vector.broadcast %583 : vector<8x1xf32> to vector<8x32xf32>
    %585 = arith.mulf %580, %584 : vector<8x32xf32>
    %586 = vector.broadcast %23 : vector<1x32xf32> to vector<8x32xf32>
    %587 = arith.mulf %585, %586 : vector<8x32xf32>
    %588 = vector.broadcast %24 : vector<1x32xf32> to vector<8x32xf32>
    %589 = arith.addf %587, %588 : vector<8x32xf32>
    %cst_238 = arith.constant dense<0.000000e+00> : vector<8x64xf32>
    %590 = tpu.matmul %589, %27, %cst_238 {dimension_numbers = #tpu.dot_dimension_numbers<[1], [0], [0], [1], [0, 0, 1, 1], [], []>} : vector<8x32xf32>, vector<32x64xf32>, vector<8x64xf32> -> vector<8x64xf32>
    %591 = vector.broadcast %28 : vector<1x64xf32> to vector<8x64xf32>
    %592 = arith.addf %590, %591 : vector<8x64xf32>
    %cst_239 = arith.constant 5.000000e-01 : f32
    %593 = vector.broadcast %cst_239 : f32 to vector<8x64xf32>
    %594 = arith.mulf %593, %592 : vector<8x64xf32>
    %cst_240 = arith.constant 0.707106769 : f32
    %595 = vector.broadcast %cst_240 : f32 to vector<8x64xf32>
    %596 = arith.mulf %592, %595 : vector<8x64xf32>
    %597 = math.absf %596 : vector<8x64xf32>
    %cst_241 = arith.constant 0.327591091 : f32
    %598 = vector.broadcast %cst_241 : f32 to vector<8x64xf32>
    %599 = arith.mulf %598, %597 : vector<8x64xf32>
    %cst_242 = arith.constant 1.000000e+00 : f32
    %600 = vector.broadcast %cst_242 : f32 to vector<8x64xf32>
    %601 = arith.addf %600, %599 : vector<8x64xf32>
    %cst_243 = arith.constant 1.000000e+00 : f32
    %602 = vector.broadcast %cst_243 : f32 to vector<8x64xf32>
    %603 = arith.divf %602, %601 : vector<8x64xf32>
    %cst_244 = arith.constant 1.06140542 : f32
    %604 = vector.broadcast %cst_244 : f32 to vector<8x64xf32>
    %605 = arith.mulf %604, %603 : vector<8x64xf32>
    %cst_245 = arith.constant 1.45315206 : f32
    %606 = vector.broadcast %cst_245 : f32 to vector<8x64xf32>
    %607 = arith.subf %605, %606 : vector<8x64xf32>
    %608 = arith.mulf %607, %603 : vector<8x64xf32>
    %cst_246 = arith.constant 1.42141378 : f32
    %609 = vector.broadcast %cst_246 : f32 to vector<8x64xf32>
    %610 = arith.addf %608, %609 : vector<8x64xf32>
    %611 = arith.mulf %610, %603 : vector<8x64xf32>
    %cst_247 = arith.constant 0.284496725 : f32
    %612 = vector.broadcast %cst_247 : f32 to vector<8x64xf32>
    %613 = arith.subf %611, %612 : vector<8x64xf32>
    %614 = arith.mulf %613, %603 : vector<8x64xf32>
    %cst_248 = arith.constant 0.254829586 : f32
    %615 = vector.broadcast %cst_248 : f32 to vector<8x64xf32>
    %616 = arith.addf %614, %615 : vector<8x64xf32>
    %617 = arith.mulf %616, %603 : vector<8x64xf32>
    %cst_249 = arith.constant 0.000000e+00 : f32
    %618 = vector.broadcast %cst_249 : f32 to vector<8x64xf32>
    %619 = arith.subf %618, %597 : vector<8x64xf32>
    %620 = arith.mulf %619, %597 : vector<8x64xf32>
    %621 = math.exp %620 : vector<8x64xf32>
    %622 = arith.mulf %617, %621 : vector<8x64xf32>
    %cst_250 = arith.constant 1.000000e+00 : f32
    %623 = vector.broadcast %cst_250 : f32 to vector<8x64xf32>
    %624 = arith.subf %623, %622 : vector<8x64xf32>
    %cst_251 = arith.constant 0.000000e+00 : f32
    %625 = vector.broadcast %cst_251 : f32 to vector<8x64xf32>
    %626 = arith.cmpf oge, %596, %625 : vector<8x64xf32>
    %cst_252 = arith.constant 0.000000e+00 : f32
    %627 = vector.broadcast %cst_252 : f32 to vector<8x64xf32>
    %628 = arith.subf %627, %624 : vector<8x64xf32>
    %629 = arith.select %626, %624, %628 : vector<8x64xi1>, vector<8x64xf32>
    %cst_253 = arith.constant 1.000000e+00 : f32
    %630 = vector.broadcast %cst_253 : f32 to vector<8x64xf32>
    %631 = arith.addf %630, %629 : vector<8x64xf32>
    %632 = arith.mulf %594, %631 : vector<8x64xf32>
    %cst_254 = arith.constant dense<0.000000e+00> : vector<8x32xf32>
    %633 = tpu.matmul %632, %29, %cst_254 {dimension_numbers = #tpu.dot_dimension_numbers<[1], [0], [0], [1], [0, 0, 1, 1], [], []>} : vector<8x64xf32>, vector<64x32xf32>, vector<8x32xf32> -> vector<8x32xf32>
    %634 = vector.broadcast %30 : vector<1x32xf32> to vector<8x32xf32>
    %635 = arith.addf %633, %634 : vector<8x32xf32>
    %636 = arith.addf %589, %635 : vector<8x32xf32>
    %cst_255 = arith.constant dense<0.000000e+00> : vector<8xf32>
    %637 = vector.multi_reduction <add>, %636, %cst_255 [1] : vector<8x32xf32> to vector<8xf32>
    %638 = vector.shape_cast %637 : vector<8xf32> to vector<8x1xf32>
    %cst_256 = arith.constant 3.200000e+01 : f32
    %639 = vector.broadcast %cst_256 : f32 to vector<8x1xf32>
    %640 = arith.divf %638, %639 : vector<8x1xf32>
    %641 = vector.broadcast %640 : vector<8x1xf32> to vector<8x32xf32>
    %642 = arith.subf %636, %641 : vector<8x32xf32>
    %643 = arith.mulf %642, %642 : vector<8x32xf32>
    %cst_257 = arith.constant dense<0.000000e+00> : vector<8xf32>
    %644 = vector.multi_reduction <add>, %643, %cst_257 [1] : vector<8x32xf32> to vector<8xf32>
    %645 = vector.shape_cast %644 : vector<8xf32> to vector<8x1xf32>
    %cst_258 = arith.constant 3.200000e+01 : f32
    %646 = vector.broadcast %cst_258 : f32 to vector<8x1xf32>
    %647 = arith.divf %645, %646 : vector<8x1xf32>
    %648 = vector.broadcast %640 : vector<8x1xf32> to vector<8x32xf32>
    %649 = arith.subf %636, %648 : vector<8x32xf32>
    %cst_259 = arith.constant 9.99999974E-6 : f32
    %650 = vector.broadcast %cst_259 : f32 to vector<8x1xf32>
    %651 = arith.addf %647, %650 : vector<8x1xf32>
    %652 = math.rsqrt %651 : vector<8x1xf32>
    %653 = vector.broadcast %652 : vector<8x1xf32> to vector<8x32xf32>
    %654 = arith.mulf %649, %653 : vector<8x32xf32>
    %655 = vector.broadcast %25 : vector<1x32xf32> to vector<8x32xf32>
    %656 = arith.mulf %654, %655 : vector<8x32xf32>
    %657 = vector.broadcast %26 : vector<1x32xf32> to vector<8x32xf32>
    %658 = arith.addf %656, %657 : vector<8x32xf32>
    %cst_260 = arith.constant dense<0.000000e+00> : vector<8x96xf32>
    %659 = tpu.matmul %658, %31, %cst_260 {dimension_numbers = #tpu.dot_dimension_numbers<[1], [0], [0], [1], [0, 0, 1, 1], [], []>} : vector<8x32xf32>, vector<32x96xf32>, vector<8x96xf32> -> vector<8x96xf32>
    %660 = vector.broadcast %32 : vector<1x96xf32> to vector<8x96xf32>
    %661 = arith.addf %659, %660 : vector<8x96xf32>
    %662 = vector.extract_strided_slice %661 {offsets = [0, 0], sizes = [8, 32], strides = [1, 1]} : vector<8x96xf32> to vector<8x32xf32>
    %663 = vector.extract_strided_slice %661 {offsets = [0, 32], sizes = [8, 32], strides = [1, 1]} : vector<8x96xf32> to vector<8x32xf32>
    %664 = vector.extract_strided_slice %661 {offsets = [0, 64], sizes = [8, 32], strides = [1, 1]} : vector<8x96xf32> to vector<8x32xf32>
    %665 = vector.shape_cast %662 : vector<8x32xf32> to vector<1x8x32xf32>
    %cst_261 = arith.constant 5.000000e-01 : f32
    %666 = vector.broadcast %cst_261 : f32 to vector<8x1x32xf32>
    %667 = arith.mulf %10, %666 : vector<8x1x32xf32>
    %668 = vector.broadcast %665 : vector<1x8x32xf32> to vector<8x8x32xf32>
    %669 = vector.broadcast %667 : vector<8x1x32xf32> to vector<8x8x32xf32>
    %670 = arith.mulf %668, %669 : vector<8x8x32xf32>
    %671 = vector.shape_cast %663 : vector<8x32xf32> to vector<1x8x32xf32>
    %672 = vector.shape_cast %671 : vector<1x8x32xf32> to vector<1x8x32xf32>
    %673 = vector.broadcast %672 : vector<1x8x32xf32> to vector<8x8x32xf32>
    %674 = vector.shape_cast %664 : vector<8x32xf32> to vector<1x8x32xf32>
    %675 = vector.broadcast %674 : vector<1x8x32xf32> to vector<8x8x32xf32>
    %676 = vector.broadcast %10 : vector<8x1x32xf32> to vector<8x8x32xf32>
    %677 = arith.mulf %675, %676 : vector<8x8x32xf32>
    "tpu.trace_start"() <{level = 10 : i32, message = "hte,hse->hts"}> : () -> ()
    %cst_262 = arith.constant dense<0.000000e+00> : vector<8x8x8xf32>
    %678 = tpu.matmul %670, %673, %cst_262 {dimension_numbers = #tpu.dot_dimension_numbers<[2], [2], [1], [1], [0, 0, 0, 1, 1, 1], [0], [0]>} : vector<8x8x32xf32>, vector<8x8x32xf32>, vector<8x8x8xf32> -> vector<8x8x8xf32>
    "tpu.trace_stop"() : () -> ()
    %679 = vector.shape_cast %470 : vector<8x8xf32> to vector<1x8x8xf32>
    %680 = vector.broadcast %679 : vector<1x8x8xf32> to vector<8x8x8xf32>
    %681 = arith.addf %678, %680 : vector<8x8x8xf32>
    %cst_263 = arith.constant dense<0xFF800000> : vector<8x8xf32>
    %682 = vector.multi_reduction <maximumf>, %681, %cst_263 [2] : vector<8x8x8xf32> to vector<8x8xf32>
    %683 = vector.shape_cast %682 : vector<8x8xf32> to vector<8x8x1xf32>
    %684 = vector.broadcast %683 : vector<8x8x1xf32> to vector<8x8x8xf32>
    %685 = arith.subf %681, %684 : vector<8x8x8xf32>
    %686 = math.exp %685 : vector<8x8x8xf32>
    %cst_264 = arith.constant dense<0.000000e+00> : vector<8x8xf32>
    %687 = vector.multi_reduction <add>, %686, %cst_264 [2] : vector<8x8x8xf32> to vector<8x8xf32>
    %688 = vector.shape_cast %687 : vector<8x8xf32> to vector<8x8x1xf32>
    %689 = vector.broadcast %688 : vector<8x8x1xf32> to vector<8x8x8xf32>
    %690 = arith.divf %686, %689 : vector<8x8x8xf32>
    "tpu.trace_start"() <{level = 10 : i32, message = "hts,hse->hte"}> : () -> ()
    %cst_265 = arith.constant dense<0.000000e+00> : vector<8x8x32xf32>
    %691 = tpu.matmul %690, %677, %cst_265 {dimension_numbers = #tpu.dot_dimension_numbers<[2], [1], [1], [2], [0, 0, 0, 1, 1, 2], [0], [0]>} : vector<8x8x8xf32>, vector<8x8x32xf32>, vector<8x8x32xf32> -> vector<8x8x32xf32>
    "tpu.trace_stop"() : () -> ()
    %cst_266 = arith.constant dense<0.000000e+00> : vector<8x32xf32>
    %692 = vector.multi_reduction <add>, %691, %cst_266 [0] : vector<8x8x32xf32> to vector<8x32xf32>
    %cst_267 = arith.constant dense<0.000000e+00> : vector<8x32xf32>
    %693 = tpu.matmul %692, %33, %cst_267 {dimension_numbers = #tpu.dot_dimension_numbers<[1], [0], [0], [1], [0, 0, 1, 1], [], []>} : vector<8x32xf32>, vector<32x32xf32>, vector<8x32xf32> -> vector<8x32xf32>
    %694 = vector.broadcast %34 : vector<1x32xf32> to vector<8x32xf32>
    %695 = arith.addf %693, %694 : vector<8x32xf32>
    %696 = arith.addf %658, %695 : vector<8x32xf32>
    %cst_268 = arith.constant dense<0.000000e+00> : vector<8xf32>
    %697 = vector.multi_reduction <add>, %696, %cst_268 [1] : vector<8x32xf32> to vector<8xf32>
    %698 = vector.shape_cast %697 : vector<8xf32> to vector<8x1xf32>
    %cst_269 = arith.constant 3.200000e+01 : f32
    %699 = vector.broadcast %cst_269 : f32 to vector<8x1xf32>
    %700 = arith.divf %698, %699 : vector<8x1xf32>
    %701 = vector.broadcast %700 : vector<8x1xf32> to vector<8x32xf32>
    %702 = arith.subf %696, %701 : vector<8x32xf32>
    %703 = arith.mulf %702, %702 : vector<8x32xf32>
    %cst_270 = arith.constant dense<0.000000e+00> : vector<8xf32>
    %704 = vector.multi_reduction <add>, %703, %cst_270 [1] : vector<8x32xf32> to vector<8xf32>
    %705 = vector.shape_cast %704 : vector<8xf32> to vector<8x1xf32>
    %cst_271 = arith.constant 3.200000e+01 : f32
    %706 = vector.broadcast %cst_271 : f32 to vector<8x1xf32>
    %707 = arith.divf %705, %706 : vector<8x1xf32>
    %708 = vector.broadcast %700 : vector<8x1xf32> to vector<8x32xf32>
    %709 = arith.subf %696, %708 : vector<8x32xf32>
    %cst_272 = arith.constant 9.99999974E-6 : f32
    %710 = vector.broadcast %cst_272 : f32 to vector<8x1xf32>
    %711 = arith.addf %707, %710 : vector<8x1xf32>
    %712 = math.rsqrt %711 : vector<8x1xf32>
    %713 = vector.broadcast %712 : vector<8x1xf32> to vector<8x32xf32>
    %714 = arith.mulf %709, %713 : vector<8x32xf32>
    %715 = vector.broadcast %41 : vector<1x32xf32> to vector<8x32xf32>
    %716 = arith.mulf %714, %715 : vector<8x32xf32>
    %717 = vector.broadcast %42 : vector<1x32xf32> to vector<8x32xf32>
    %718 = arith.addf %716, %717 : vector<8x32xf32>
    %cst_273 = arith.constant dense<0.000000e+00> : vector<8x32xf32>
    %719 = tpu.matmul %718, %35, %cst_273 {dimension_numbers = #tpu.dot_dimension_numbers<[1], [0], [0], [1], [0, 0, 1, 1], [], []>} : vector<8x32xf32>, vector<32x32xf32>, vector<8x32xf32> -> vector<8x32xf32>
    %720 = vector.broadcast %36 : vector<1x32xf32> to vector<8x32xf32>
    %721 = arith.addf %719, %720 : vector<8x32xf32>
    %cst_274 = arith.constant dense<0.000000e+00> : vector<10x64xf32>
    %722 = tpu.matmul %468, %37, %cst_274 {dimension_numbers = #tpu.dot_dimension_numbers<[1], [0], [0], [1], [0, 0, 1, 1], [], []>} : vector<10x32xf32>, vector<32x64xf32>, vector<10x64xf32> -> vector<10x64xf32>
    %723 = vector.broadcast %38 : vector<1x64xf32> to vector<10x64xf32>
    %724 = arith.addf %722, %723 : vector<10x64xf32>
    %725 = vector.extract_strided_slice %724 {offsets = [0, 0], sizes = [10, 32], strides = [1, 1]} : vector<10x64xf32> to vector<10x32xf32>
    %726 = vector.extract_strided_slice %724 {offsets = [0, 32], sizes = [10, 32], strides = [1, 1]} : vector<10x64xf32> to vector<10x32xf32>
    %727 = vector.shape_cast %721 : vector<8x32xf32> to vector<1x8x32xf32>
    %cst_275 = arith.constant 5.000000e-01 : f32
    %728 = vector.broadcast %cst_275 : f32 to vector<8x1x32xf32>
    %729 = arith.mulf %10, %728 : vector<8x1x32xf32>
    %730 = vector.broadcast %727 : vector<1x8x32xf32> to vector<8x8x32xf32>
    %731 = vector.broadcast %729 : vector<8x1x32xf32> to vector<8x8x32xf32>
    %732 = arith.mulf %730, %731 : vector<8x8x32xf32>
    %733 = vector.shape_cast %725 : vector<10x32xf32> to vector<1x10x32xf32>
    %734 = vector.shape_cast %733 : vector<1x10x32xf32> to vector<1x10x32xf32>
    %735 = vector.broadcast %734 : vector<1x10x32xf32> to vector<8x10x32xf32>
    %736 = vector.shape_cast %726 : vector<10x32xf32> to vector<1x10x32xf32>
    %737 = vector.broadcast %736 : vector<1x10x32xf32> to vector<8x10x32xf32>
    %738 = vector.broadcast %10 : vector<8x1x32xf32> to vector<8x10x32xf32>
    %739 = arith.mulf %737, %738 : vector<8x10x32xf32>
    "tpu.trace_start"() <{level = 10 : i32, message = "hte,hse->hts"}> : () -> ()
    %cst_276 = arith.constant dense<0.000000e+00> : vector<8x8x10xf32>
    %740 = tpu.matmul %732, %735, %cst_276 {dimension_numbers = #tpu.dot_dimension_numbers<[2], [2], [1], [1], [0, 0, 0, 1, 1, 1], [0], [0]>} : vector<8x8x32xf32>, vector<8x10x32xf32>, vector<8x8x10xf32> -> vector<8x8x10xf32>
    "tpu.trace_stop"() : () -> ()
    %cst_277 = arith.constant dense<0xFF800000> : vector<8x8xf32>
    %741 = vector.multi_reduction <maximumf>, %740, %cst_277 [2] : vector<8x8x10xf32> to vector<8x8xf32>
    %742 = vector.shape_cast %741 : vector<8x8xf32> to vector<8x8x1xf32>
    %743 = vector.broadcast %742 : vector<8x8x1xf32> to vector<8x8x10xf32>
    %744 = arith.subf %740, %743 : vector<8x8x10xf32>
    %745 = math.exp %744 : vector<8x8x10xf32>
    %cst_278 = arith.constant dense<0.000000e+00> : vector<8x8xf32>
    %746 = vector.multi_reduction <add>, %745, %cst_278 [2] : vector<8x8x10xf32> to vector<8x8xf32>
    %747 = vector.shape_cast %746 : vector<8x8xf32> to vector<8x8x1xf32>
    %748 = vector.broadcast %747 : vector<8x8x1xf32> to vector<8x8x10xf32>
    %749 = arith.divf %745, %748 : vector<8x8x10xf32>
    "tpu.trace_start"() <{level = 10 : i32, message = "hts,hse->hte"}> : () -> ()
    %cst_279 = arith.constant dense<0.000000e+00> : vector<8x8x32xf32>
    %750 = tpu.matmul %749, %739, %cst_279 {dimension_numbers = #tpu.dot_dimension_numbers<[2], [1], [1], [2], [0, 0, 0, 1, 1, 2], [0], [0]>} : vector<8x8x10xf32>, vector<8x10x32xf32>, vector<8x8x32xf32> -> vector<8x8x32xf32>
    "tpu.trace_stop"() : () -> ()
    %cst_280 = arith.constant dense<0.000000e+00> : vector<8x32xf32>
    %751 = vector.multi_reduction <add>, %750, %cst_280 [0] : vector<8x8x32xf32> to vector<8x32xf32>
    %cst_281 = arith.constant dense<0.000000e+00> : vector<8x32xf32>
    %752 = tpu.matmul %751, %39, %cst_281 {dimension_numbers = #tpu.dot_dimension_numbers<[1], [0], [0], [1], [0, 0, 1, 1], [], []>} : vector<8x32xf32>, vector<32x32xf32>, vector<8x32xf32> -> vector<8x32xf32>
    %753 = vector.broadcast %40 : vector<1x32xf32> to vector<8x32xf32>
    %754 = arith.addf %752, %753 : vector<8x32xf32>
    %755 = arith.addf %718, %754 : vector<8x32xf32>
    %cst_282 = arith.constant dense<0.000000e+00> : vector<8xf32>
    %756 = vector.multi_reduction <add>, %755, %cst_282 [1] : vector<8x32xf32> to vector<8xf32>
    %757 = vector.shape_cast %756 : vector<8xf32> to vector<8x1xf32>
    %cst_283 = arith.constant 3.200000e+01 : f32
    %758 = vector.broadcast %cst_283 : f32 to vector<8x1xf32>
    %759 = arith.divf %757, %758 : vector<8x1xf32>
    %760 = vector.broadcast %759 : vector<8x1xf32> to vector<8x32xf32>
    %761 = arith.subf %755, %760 : vector<8x32xf32>
    %762 = arith.mulf %761, %761 : vector<8x32xf32>
    %cst_284 = arith.constant dense<0.000000e+00> : vector<8xf32>
    %763 = vector.multi_reduction <add>, %762, %cst_284 [1] : vector<8x32xf32> to vector<8xf32>
    %764 = vector.shape_cast %763 : vector<8xf32> to vector<8x1xf32>
    %cst_285 = arith.constant 3.200000e+01 : f32
    %765 = vector.broadcast %cst_285 : f32 to vector<8x1xf32>
    %766 = arith.divf %764, %765 : vector<8x1xf32>
    %767 = vector.broadcast %759 : vector<8x1xf32> to vector<8x32xf32>
    %768 = arith.subf %755, %767 : vector<8x32xf32>
    %cst_286 = arith.constant 9.99999974E-6 : f32
    %769 = vector.broadcast %cst_286 : f32 to vector<8x1xf32>
    %770 = arith.addf %766, %769 : vector<8x1xf32>
    %771 = math.rsqrt %770 : vector<8x1xf32>
    %772 = vector.broadcast %771 : vector<8x1xf32> to vector<8x32xf32>
    %773 = arith.mulf %768, %772 : vector<8x32xf32>
    %774 = vector.broadcast %43 : vector<1x32xf32> to vector<8x32xf32>
    %775 = arith.mulf %773, %774 : vector<8x32xf32>
    %776 = vector.broadcast %44 : vector<1x32xf32> to vector<8x32xf32>
    %777 = arith.addf %775, %776 : vector<8x32xf32>
    %cst_287 = arith.constant dense<0.000000e+00> : vector<8x64xf32>
    %778 = tpu.matmul %777, %47, %cst_287 {dimension_numbers = #tpu.dot_dimension_numbers<[1], [0], [0], [1], [0, 0, 1, 1], [], []>} : vector<8x32xf32>, vector<32x64xf32>, vector<8x64xf32> -> vector<8x64xf32>
    %779 = vector.broadcast %48 : vector<1x64xf32> to vector<8x64xf32>
    %780 = arith.addf %778, %779 : vector<8x64xf32>
    %cst_288 = arith.constant 5.000000e-01 : f32
    %781 = vector.broadcast %cst_288 : f32 to vector<8x64xf32>
    %782 = arith.mulf %781, %780 : vector<8x64xf32>
    %cst_289 = arith.constant 0.707106769 : f32
    %783 = vector.broadcast %cst_289 : f32 to vector<8x64xf32>
    %784 = arith.mulf %780, %783 : vector<8x64xf32>
    %785 = math.absf %784 : vector<8x64xf32>
    %cst_290 = arith.constant 0.327591091 : f32
    %786 = vector.broadcast %cst_290 : f32 to vector<8x64xf32>
    %787 = arith.mulf %786, %785 : vector<8x64xf32>
    %cst_291 = arith.constant 1.000000e+00 : f32
    %788 = vector.broadcast %cst_291 : f32 to vector<8x64xf32>
    %789 = arith.addf %788, %787 : vector<8x64xf32>
    %cst_292 = arith.constant 1.000000e+00 : f32
    %790 = vector.broadcast %cst_292 : f32 to vector<8x64xf32>
    %791 = arith.divf %790, %789 : vector<8x64xf32>
    %cst_293 = arith.constant 1.06140542 : f32
    %792 = vector.broadcast %cst_293 : f32 to vector<8x64xf32>
    %793 = arith.mulf %792, %791 : vector<8x64xf32>
    %cst_294 = arith.constant 1.45315206 : f32
    %794 = vector.broadcast %cst_294 : f32 to vector<8x64xf32>
    %795 = arith.subf %793, %794 : vector<8x64xf32>
    %796 = arith.mulf %795, %791 : vector<8x64xf32>
    %cst_295 = arith.constant 1.42141378 : f32
    %797 = vector.broadcast %cst_295 : f32 to vector<8x64xf32>
    %798 = arith.addf %796, %797 : vector<8x64xf32>
    %799 = arith.mulf %798, %791 : vector<8x64xf32>
    %cst_296 = arith.constant 0.284496725 : f32
    %800 = vector.broadcast %cst_296 : f32 to vector<8x64xf32>
    %801 = arith.subf %799, %800 : vector<8x64xf32>
    %802 = arith.mulf %801, %791 : vector<8x64xf32>
    %cst_297 = arith.constant 0.254829586 : f32
    %803 = vector.broadcast %cst_297 : f32 to vector<8x64xf32>
    %804 = arith.addf %802, %803 : vector<8x64xf32>
    %805 = arith.mulf %804, %791 : vector<8x64xf32>
    %cst_298 = arith.constant 0.000000e+00 : f32
    %806 = vector.broadcast %cst_298 : f32 to vector<8x64xf32>
    %807 = arith.subf %806, %785 : vector<8x64xf32>
    %808 = arith.mulf %807, %785 : vector<8x64xf32>
    %809 = math.exp %808 : vector<8x64xf32>
    %810 = arith.mulf %805, %809 : vector<8x64xf32>
    %cst_299 = arith.constant 1.000000e+00 : f32
    %811 = vector.broadcast %cst_299 : f32 to vector<8x64xf32>
    %812 = arith.subf %811, %810 : vector<8x64xf32>
    %cst_300 = arith.constant 0.000000e+00 : f32
    %813 = vector.broadcast %cst_300 : f32 to vector<8x64xf32>
    %814 = arith.cmpf oge, %784, %813 : vector<8x64xf32>
    %cst_301 = arith.constant 0.000000e+00 : f32
    %815 = vector.broadcast %cst_301 : f32 to vector<8x64xf32>
    %816 = arith.subf %815, %812 : vector<8x64xf32>
    %817 = arith.select %814, %812, %816 : vector<8x64xi1>, vector<8x64xf32>
    %cst_302 = arith.constant 1.000000e+00 : f32
    %818 = vector.broadcast %cst_302 : f32 to vector<8x64xf32>
    %819 = arith.addf %818, %817 : vector<8x64xf32>
    %820 = arith.mulf %782, %819 : vector<8x64xf32>
    %cst_303 = arith.constant dense<0.000000e+00> : vector<8x32xf32>
    %821 = tpu.matmul %820, %49, %cst_303 {dimension_numbers = #tpu.dot_dimension_numbers<[1], [0], [0], [1], [0, 0, 1, 1], [], []>} : vector<8x64xf32>, vector<64x32xf32>, vector<8x32xf32> -> vector<8x32xf32>
    %822 = vector.broadcast %50 : vector<1x32xf32> to vector<8x32xf32>
    %823 = arith.addf %821, %822 : vector<8x32xf32>
    %824 = arith.addf %777, %823 : vector<8x32xf32>
    %cst_304 = arith.constant dense<0.000000e+00> : vector<8xf32>
    %825 = vector.multi_reduction <add>, %824, %cst_304 [1] : vector<8x32xf32> to vector<8xf32>
    %826 = vector.shape_cast %825 : vector<8xf32> to vector<8x1xf32>
    %cst_305 = arith.constant 3.200000e+01 : f32
    %827 = vector.broadcast %cst_305 : f32 to vector<8x1xf32>
    %828 = arith.divf %826, %827 : vector<8x1xf32>
    %829 = vector.broadcast %828 : vector<8x1xf32> to vector<8x32xf32>
    %830 = arith.subf %824, %829 : vector<8x32xf32>
    %831 = arith.mulf %830, %830 : vector<8x32xf32>
    %cst_306 = arith.constant dense<0.000000e+00> : vector<8xf32>
    %832 = vector.multi_reduction <add>, %831, %cst_306 [1] : vector<8x32xf32> to vector<8xf32>
    %833 = vector.shape_cast %832 : vector<8xf32> to vector<8x1xf32>
    %cst_307 = arith.constant 3.200000e+01 : f32
    %834 = vector.broadcast %cst_307 : f32 to vector<8x1xf32>
    %835 = arith.divf %833, %834 : vector<8x1xf32>
    %836 = vector.broadcast %828 : vector<8x1xf32> to vector<8x32xf32>
    %837 = arith.subf %824, %836 : vector<8x32xf32>
    %cst_308 = arith.constant 9.99999974E-6 : f32
    %838 = vector.broadcast %cst_308 : f32 to vector<8x1xf32>
    %839 = arith.addf %835, %838 : vector<8x1xf32>
    %840 = math.rsqrt %839 : vector<8x1xf32>
    %841 = vector.broadcast %840 : vector<8x1xf32> to vector<8x32xf32>
    %842 = arith.mulf %837, %841 : vector<8x32xf32>
    %843 = vector.broadcast %45 : vector<1x32xf32> to vector<8x32xf32>
    %844 = arith.mulf %842, %843 : vector<8x32xf32>
    %845 = vector.broadcast %46 : vector<1x32xf32> to vector<8x32xf32>
    %846 = arith.addf %844, %845 : vector<8x32xf32>
    %cst_309 = arith.constant dense<0.000000e+00> : vector<8xf32>
    %847 = vector.multi_reduction <add>, %846, %cst_309 [1] : vector<8x32xf32> to vector<8xf32>
    %848 = vector.shape_cast %847 : vector<8xf32> to vector<8x1xf32>
    %cst_310 = arith.constant 3.200000e+01 : f32
    %849 = vector.broadcast %cst_310 : f32 to vector<8x1xf32>
    %850 = arith.divf %848, %849 : vector<8x1xf32>
    %851 = vector.broadcast %850 : vector<8x1xf32> to vector<8x32xf32>
    %852 = arith.subf %846, %851 : vector<8x32xf32>
    %853 = arith.mulf %852, %852 : vector<8x32xf32>
    %cst_311 = arith.constant dense<0.000000e+00> : vector<8xf32>
    %854 = vector.multi_reduction <add>, %853, %cst_311 [1] : vector<8x32xf32> to vector<8xf32>
    %855 = vector.shape_cast %854 : vector<8xf32> to vector<8x1xf32>
    %cst_312 = arith.constant 3.200000e+01 : f32
    %856 = vector.broadcast %cst_312 : f32 to vector<8x1xf32>
    %857 = arith.divf %855, %856 : vector<8x1xf32>
    %858 = vector.broadcast %850 : vector<8x1xf32> to vector<8x32xf32>
    %859 = arith.subf %846, %858 : vector<8x32xf32>
    %cst_313 = arith.constant 9.99999974E-6 : f32
    %860 = vector.broadcast %cst_313 : f32 to vector<8x1xf32>
    %861 = arith.addf %857, %860 : vector<8x1xf32>
    %862 = math.rsqrt %861 : vector<8x1xf32>
    %863 = vector.broadcast %862 : vector<8x1xf32> to vector<8x32xf32>
    %864 = arith.mulf %859, %863 : vector<8x32xf32>
    %865 = vector.broadcast %51 : vector<1x32xf32> to vector<8x32xf32>
    %866 = arith.mulf %864, %865 : vector<8x32xf32>
    %867 = vector.broadcast %52 : vector<1x32xf32> to vector<8x32xf32>
    %868 = arith.addf %866, %867 : vector<8x32xf32>
    %cst_314 = arith.constant dense<0.000000e+00> : vector<8x64xf32>
    %869 = tpu.matmul %868, %53, %cst_314 {dimension_numbers = #tpu.dot_dimension_numbers<[1], [0], [0], [1], [0, 0, 1, 1], [], []>} : vector<8x32xf32>, vector<32x64xf32>, vector<8x64xf32> -> vector<8x64xf32>
    %870 = vector.broadcast %54 : vector<1x64xf32> to vector<8x64xf32>
    %871 = arith.addf %869, %870 : vector<8x64xf32>
    %c1_315 = arith.constant 1 : index
    %c0_316 = arith.constant 0 : index
    %c0_317 = arith.constant 0 : index
    %872 = vector.load %arg48[%c1_315, %c0_316, %c0_317] : memref<2x8x64xf32, #tpu.memory_space<vmem>>, vector<1x8x64xf32>
    %873 = vector.shape_cast %872 : vector<1x8x64xf32> to vector<8x64xf32>
    %874 = vector.shape_cast %871 : vector<8x64xf32> to vector<1x8x64xf32>
    tpu.vector_store %arg48[%c1_315, %c0_316, %c0_317], %874 {strides = array<i32>} : memref<2x8x64xf32, #tpu.memory_space<vmem>>, vector<1x8x64xf32>,
    return
  }
  func.func @transform_0(%arg0: i32) -> (i32, i32, i32) {
    %c0_i32 = arith.constant 0 : i32
    %c0_i32_0 = arith.constant 0 : i32
    %c0_i32_1 = arith.constant 0 : i32
    %c0_i32_2 = arith.constant 0 : i32
    return %c0_i32, %c0_i32_0, %c0_i32_1 : i32, i32, i32
  }
  func.func @transform_1(%arg0: i32) -> (i32, i32, i32) {
    %c0_i32 = arith.constant 0 : i32
    %c0_i32_0 = arith.constant 0 : i32
    %c0_i32_1 = arith.constant 0 : i32
    %c0_i32_2 = arith.constant 0 : i32
    return %c0_i32, %c0_i32_0, %c0_i32_1 : i32, i32, i32
  }
  func.func @transform_2(%arg0: i32) -> (i32, i32, i32) {
    %c0_i32 = arith.constant 0 : i32
    %c0_i32_0 = arith.constant 0 : i32
    %c0_i32_1 = arith.constant 0 : i32
    %c0_i32_2 = arith.constant 0 : i32
    return %c0_i32, %c0_i32_0, %c0_i32_1 : i32, i32, i32
  }
  func.func @transform_3(%arg0: i32) -> (i32, i32) {
    %c0_i32 = arith.constant 0 : i32
    %c0_i32_0 = arith.constant 0 : i32
    %c0_i32_1 = arith.constant 0 : i32
    return %c0_i32, %c0_i32_0 : i32, i32
  }
  func.func @transform_4(%arg0: i32) -> (i32, i32) {
    %c0_i32 = arith.constant 0 : i32
    %c0_i32_0 = arith.constant 0 : i32
    %c0_i32_1 = arith.constant 0 : i32
    return %c0_i32, %c0_i32_0 : i32, i32
  }
  func.func @transform_5(%arg0: i32) -> (i32, i32) {
    %c0_i32 = arith.constant 0 : i32
    %c0_i32_0 = arith.constant 0 : i32
    %c0_i32_1 = arith.constant 0 : i32
    return %c0_i32, %c0_i32_0 : i32, i32
  }
  func.func @transform_6(%arg0: i32) -> (i32, i32) {
    %c0_i32 = arith.constant 0 : i32
    %c0_i32_0 = arith.constant 0 : i32
    %c0_i32_1 = arith.constant 0 : i32
    return %c0_i32, %c0_i32_0 : i32, i32
  }
  func.func @transform_7(%arg0: i32) -> (i32, i32) {
    %c0_i32 = arith.constant 0 : i32
    %c0_i32_0 = arith.constant 0 : i32
    %c0_i32_1 = arith.constant 0 : i32
    return %c0_i32, %c0_i32_0 : i32, i32
  }
  func.func @transform_8(%arg0: i32) -> (i32, i32) {
    %c0_i32 = arith.constant 0 : i32
    %c0_i32_0 = arith.constant 0 : i32
    %c0_i32_1 = arith.constant 0 : i32
    return %c0_i32, %c0_i32_0 : i32, i32
  }
  func.func @transform_9(%arg0: i32) -> (i32, i32) {
    %c0_i32 = arith.constant 0 : i32
    %c0_i32_0 = arith.constant 0 : i32
    %c0_i32_1 = arith.constant 0 : i32
    return %c0_i32, %c0_i32_0 : i32, i32
  }
  func.func @transform_10(%arg0: i32) -> (i32, i32) {
    %c0_i32 = arith.constant 0 : i32
    %c0_i32_0 = arith.constant 0 : i32
    %c0_i32_1 = arith.constant 0 : i32
    return %c0_i32, %c0_i32_0 : i32, i32
  }
  func.func @transform_11(%arg0: i32) -> (i32, i32) {
    %c0_i32 = arith.constant 0 : i32
    %c0_i32_0 = arith.constant 0 : i32
    %c0_i32_1 = arith.constant 0 : i32
    return %c0_i32, %c0_i32_0 : i32, i32
  }
  func.func @transform_12(%arg0: i32) -> (i32, i32) {
    %c0_i32 = arith.constant 0 : i32
    %c0_i32_0 = arith.constant 0 : i32
    %c0_i32_1 = arith.constant 0 : i32
    return %c0_i32, %c0_i32_0 : i32, i32
  }
  func.func @transform_13(%arg0: i32) -> (i32, i32) {
    %c0_i32 = arith.constant 0 : i32
    %c0_i32_0 = arith.constant 0 : i32
    %c0_i32_1 = arith.constant 0 : i32
    return %c0_i32, %c0_i32_0 : i32, i32
  }
  func.func @transform_14(%arg0: i32) -> (i32, i32) {
    %c0_i32 = arith.constant 0 : i32
    %c0_i32_0 = arith.constant 0 : i32
    %c0_i32_1 = arith.constant 0 : i32
    return %c0_i32, %c0_i32_0 : i32, i32
  }
  func.func @transform_15(%arg0: i32) -> (i32, i32) {
    %c0_i32 = arith.constant 0 : i32
    %c0_i32_0 = arith.constant 0 : i32
    %c0_i32_1 = arith.constant 0 : i32
    return %c0_i32, %c0_i32_0 : i32, i32
  }
  func.func @transform_16(%arg0: i32) -> (i32, i32) {
    %c0_i32 = arith.constant 0 : i32
    %c0_i32_0 = arith.constant 0 : i32
    %c0_i32_1 = arith.constant 0 : i32
    return %c0_i32, %c0_i32_0 : i32, i32
  }
  func.func @transform_17(%arg0: i32) -> (i32, i32) {
    %c0_i32 = arith.constant 0 : i32
    %c0_i32_0 = arith.constant 0 : i32
    %c0_i32_1 = arith.constant 0 : i32
    return %c0_i32, %c0_i32_0 : i32, i32
  }
  func.func @transform_18(%arg0: i32) -> (i32, i32) {
    %c0_i32 = arith.constant 0 : i32
    %c0_i32_0 = arith.constant 0 : i32
    %c0_i32_1 = arith.constant 0 : i32
    return %c0_i32, %c0_i32_0 : i32, i32
  }
  func.func @transform_19(%arg0: i32) -> (i32, i32) {
    %c0_i32 = arith.constant 0 : i32
    %c0_i32_0 = arith.constant 0 : i32
    %c0_i32_1 = arith.constant 0 : i32
    return %c0_i32, %c0_i32_0 : i32, i32
  }
  func.func @transform_20(%arg0: i32) -> (i32, i32) {
    %c0_i32 = arith.constant 0 : i32
    %c0_i32_0 = arith.constant 0 : i32
    %c0_i32_1 = arith.constant 0 : i32
    return %c0_i32, %c0_i32_0 : i32, i32
  }
  func.func @transform_21(%arg0: i32) -> (i32, i32) {
    %c0_i32 = arith.constant 0 : i32
    %c0_i32_0 = arith.constant 0 : i32
    %c0_i32_1 = arith.constant 0 : i32
    return %c0_i32, %c0_i32_0 : i32, i32
  }
  func.func @transform_22(%arg0: i32) -> (i32, i32) {
    %c0_i32 = arith.constant 0 : i32
    %c0_i32_0 = arith.constant 0 : i32
    %c0_i32_1 = arith.constant 0 : i32
    return %c0_i32, %c0_i32_0 : i32, i32
  }
  func.func @transform_23(%arg0: i32) -> (i32, i32) {
    %c0_i32 = arith.constant 0 : i32
    %c0_i32_0 = arith.constant 0 : i32
    %c0_i32_1 = arith.constant 0 : i32
    return %c0_i32, %c0_i32_0 : i32, i32
  }
  func.func @transform_24(%arg0: i32) -> (i32, i32) {
    %c0_i32 = arith.constant 0 : i32
    %c0_i32_0 = arith.constant 0 : i32
    %c0_i32_1 = arith.constant 0 : i32
    return %c0_i32, %c0_i32_0 : i32, i32
  }
  func.func @transform_25(%arg0: i32) -> (i32, i32) {
    %c0_i32 = arith.constant 0 : i32
    %c0_i32_0 = arith.constant 0 : i32
    %c0_i32_1 = arith.constant 0 : i32
    return %c0_i32, %c0_i32_0 : i32, i32
  }
  func.func @transform_26(%arg0: i32) -> (i32, i32) {
    %c0_i32 = arith.constant 0 : i32
    %c0_i32_0 = arith.constant 0 : i32
    %c0_i32_1 = arith.constant 0 : i32
    return %c0_i32, %c0_i32_0 : i32, i32
  }
  func.func @transform_27(%arg0: i32) -> (i32, i32) {
    %c0_i32 = arith.constant 0 : i32
    %c0_i32_0 = arith.constant 0 : i32
    %c0_i32_1 = arith.constant 0 : i32
    return %c0_i32, %c0_i32_0 : i32, i32
  }
  func.func @transform_28(%arg0: i32) -> (i32, i32) {
    %c0_i32 = arith.constant 0 : i32
    %c0_i32_0 = arith.constant 0 : i32
    %c0_i32_1 = arith.constant 0 : i32
    return %c0_i32, %c0_i32_0 : i32, i32
  }
  func.func @transform_29(%arg0: i32) -> (i32, i32) {
    %c0_i32 = arith.constant 0 : i32
    %c0_i32_0 = arith.constant 0 : i32
    %c0_i32_1 = arith.constant 0 : i32
    return %c0_i32, %c0_i32_0 : i32, i32
  }
  func.func @transform_30(%arg0: i32) -> (i32, i32) {
    %c0_i32 = arith.constant 0 : i32
    %c0_i32_0 = arith.constant 0 : i32
    %c0_i32_1 = arith.constant 0 : i32
    return %c0_i32, %c0_i32_0 : i32, i32
  }
  func.func @transform_31(%arg0: i32) -> (i32, i32) {
    %c0_i32 = arith.constant 0 : i32
    %c0_i32_0 = arith.constant 0 : i32
    %c0_i32_1 = arith.constant 0 : i32
    return %c0_i32, %c0_i32_0 : i32, i32
  }
  func.func @transform_32(%arg0: i32) -> (i32, i32) {
    %c0_i32 = arith.constant 0 : i32
    %c0_i32_0 = arith.constant 0 : i32
    %c0_i32_1 = arith.constant 0 : i32
    return %c0_i32, %c0_i32_0 : i32, i32
  }
  func.func @transform_33(%arg0: i32) -> (i32, i32) {
    %c0_i32 = arith.constant 0 : i32
    %c0_i32_0 = arith.constant 0 : i32
    %c0_i32_1 = arith.constant 0 : i32
    return %c0_i32, %c0_i32_0 : i32, i32
  }
  func.func @transform_34(%arg0: i32) -> (i32, i32) {
    %c0_i32 = arith.constant 0 : i32
    %c0_i32_0 = arith.constant 0 : i32
    %c0_i32_1 = arith.constant 0 : i32
    return %c0_i32, %c0_i32_0 : i32, i32
  }
  func.func @transform_35(%arg0: i32) -> (i32, i32) {
    %c0_i32 = arith.constant 0 : i32
    %c0_i32_0 = arith.constant 0 : i32
    %c0_i32_1 = arith.constant 0 : i32
    return %c0_i32, %c0_i32_0 : i32, i32
  }
  func.func @transform_36(%arg0: i32) -> (i32, i32) {
    %c0_i32 = arith.constant 0 : i32
    %c0_i32_0 = arith.constant 0 : i32
    %c0_i32_1 = arith.constant 0 : i32
    return %c0_i32, %c0_i32_0 : i32, i32
  }
  func.func @transform_37(%arg0: i32) -> (i32, i32) {
    %c0_i32 = arith.constant 0 : i32
    %c0_i32_0 = arith.constant 0 : i32
    %c0_i32_1 = arith.constant 0 : i32
    return %c0_i32, %c0_i32_0 : i32, i32
  }
  func.func @transform_38(%arg0: i32) -> (i32, i32) {
    %c0_i32 = arith.constant 0 : i32
    %c0_i32_0 = arith.constant 0 : i32
    %c0_i32_1 = arith.constant 0 : i32
    return %c0_i32, %c0_i32_0 : i32, i32
  }
  func.func @transform_39(%arg0: i32) -> (i32, i32) {
    %c0_i32 = arith.constant 0 : i32
    %c0_i32_0 = arith.constant 0 : i32
    %c0_i32_1 = arith.constant 0 : i32
    return %c0_i32, %c0_i32_0 : i32, i32
  }
  func.func @transform_40(%arg0: i32) -> (i32, i32) {
    %c0_i32 = arith.constant 0 : i32
    %c0_i32_0 = arith.constant 0 : i32
    %c0_i32_1 = arith.constant 0 : i32
    return %c0_i32, %c0_i32_0 : i32, i32
  }
  func.func @transform_41(%arg0: i32) -> (i32, i32) {
    %c0_i32 = arith.constant 0 : i32
    %c0_i32_0 = arith.constant 0 : i32
    %c0_i32_1 = arith.constant 0 : i32
    return %c0_i32, %c0_i32_0 : i32, i32
  }
  func.func @transform_42(%arg0: i32) -> (i32, i32) {
    %c0_i32 = arith.constant 0 : i32
    %c0_i32_0 = arith.constant 0 : i32
    %c0_i32_1 = arith.constant 0 : i32
    return %c0_i32, %c0_i32_0 : i32, i32
  }
  func.func @transform_43(%arg0: i32) -> (i32, i32) {
    %c0_i32 = arith.constant 0 : i32
    %c0_i32_0 = arith.constant 0 : i32
    %c0_i32_1 = arith.constant 0 : i32
    return %c0_i32, %c0_i32_0 : i32, i32
  }
  func.func @transform_44(%arg0: i32) -> (i32, i32) {
    %c0_i32 = arith.constant 0 : i32
    %c0_i32_0 = arith.constant 0 : i32
    %c0_i32_1 = arith.constant 0 : i32
    return %c0_i32, %c0_i32_0 : i32, i32
  }
  func.func @transform_45(%arg0: i32) -> (i32, i32) {
    %c0_i32 = arith.constant 0 : i32
    %c0_i32_0 = arith.constant 0 : i32
    %c0_i32_1 = arith.constant 0 : i32
    return %c0_i32, %c0_i32_0 : i32, i32
  }
  func.func @transform_46(%arg0: i32) -> (i32, i32) {
    %c0_i32 = arith.constant 0 : i32
    %c0_i32_0 = arith.constant 0 : i32
    %c0_i32_1 = arith.constant 0 : i32
    return %c0_i32, %c0_i32_0 : i32, i32
  }
  func.func @transform_47(%arg0: i32) -> (i32, i32, i32) {
    %c0_i32 = arith.constant 0 : i32
    %c0_i32_0 = arith.constant 0 : i32
    %c0_i32_1 = arith.constant 0 : i32
    %c0_i32_2 = arith.constant 0 : i32
    return %c0_i32, %c0_i32_0, %c0_i32_1 : i32, i32, i32
  }
}

</mosaic_0001>

<bundles_post_ra>
// kernel: transformer_decoder_forward.1
= control target key start
LH: loop header
LB: loop body
LE: loop exit
PB: predicated region body
PF: predicated region fallthrough
CT: control target
= control target key end

     0   :  { %s16681_s6 = smov 1   ;;  %s16682_s10 = smov 2   ;;  %s19269_s0 = inlined_call_operand.smem [shape: u32[48], index: -1, kind: input, shape index: {}] }
   0x1   :  { %s16749_s5 = sld [smem:[%s19269_s0]]   ;;  %s16683_s14 = smov 3  }
   0x2   :  { %s16754_s9 = sld [smem:[%s19269_s0 + %s16681_s6]]   ;;  %s16684_s18 = smov 4  }
   0x3   :  { %s16759_s13 = sld [smem:[%s19269_s0 + %s16682_s10]]   ;;  %s16685_s22 = smov 5  }
   0x4   :  { %s16764_s17 = sld [smem:[%s19269_s0 + %s16683_s14]]   ;;  %s16686_s26 = smov 6  }
   0x5   :  { %s16769_s21 = sld [smem:[%s19269_s0 + %s16684_s18]]   ;;  %s16687_s30 = smov 7  }
   0x6   :  { %s16774_s25 = sld [smem:[%s19269_s0 + %s16685_s22]]   ;;  %s16688_s4 = smov 8  }
   0x7   :  { %s16779_s29 = sld [smem:[%s19269_s0 + %s16686_s26]]   ;;  %s16689_s10 = smov 9  }
   0x8   :  { %s16784_s3 = sld [smem:[%s19269_s0 + %s16687_s30]]   ;;  %s16690_s15 = smov 10  }
   0x9   :  { %s16789_s8 = sld [smem:[%s19269_s0 + %s16688_s4]]   ;;  %s16691_s20 = smov 11  }
   0xa   :  { %s16794_s14 = sld [smem:[%s19269_s0 + %s16689_s10]]   ;;  %s16692_s26 = smov 12  }
   0xb   :  { %s16799_s19 = sld [smem:[%s19269_s0 + %s16690_s15]]   ;;  %s16693_s1 = smov 13  }
   0xc   :  { %s16804_s24 = sld [smem:[%s19269_s0 + %s16691_s20]]   ;;  %s16694_s7 = smov 14  }
   0xd   :  { %s16809_s30 = sld [smem:[%s19269_s0 + %s16692_s26]]   ;;  %s16695_s15 = smov 15  }
   0xe   :  { %19308 = sst [smem:[#allocation20_spill]] %s16784_s3  ;;  %s16696_s22 = smov 16  }
   0xf   :  { %19309 = sst [smem:[#allocation21_spill]] %s16789_s8  ;;  %s16697_s28 = smov 17  }
  0x10   :  { %s16814_s6 = sld [smem:[%s19269_s0 + %s16693_s1]]  }
  0x11   :  { %19310 = sst [smem:[#allocation22_spill]] %s16799_s19 }
  0x12   :  { %19311 = sst [smem:[#allocation23_spill]] %s16804_s24 }
  0x13   :  { %19312 = sst [smem:[#allocation24_spill]] %s16809_s30 }
  0x14   :  { %s16819_s12 = sld [smem:[%s19269_s0 + %s16694_s7]]   ;;  %s16698_s7 = smov 18  }
  0x15   :  { %s16824_s20 = sld [smem:[%s19269_s0 + %s16695_s15]]   ;;  %s16699_s15 = smov 19  }
  0x16   :  { %19313 = sst [smem:[#allocation25_spill]] %s16814_s6 }
  0x17   :  { %s16829_s27 = sld [smem:[%s19269_s0 + %s16696_s22]]   ;;  %s16700_s22 = smov 20  }
  0x18   :  { %s16834_s4 = sld [smem:[%s19269_s0 + %s16697_s28]]   ;;  %s16701_s28 = smov 21  }
  0x19   :  { %s16839_s30 = sld [smem:[%s19269_s0 + %s16698_s7]]   ;;  %s16702_s7 = smov 22  }
  0x1a   :  { %19314 = sst [smem:[#allocation26_spill]] %s16819_s12 }
  0x1b   :  { %19315 = sst [smem:[#allocation27_spill]] %s16824_s20 }
  0x1c   :  { %s16844_s20 = sld [smem:[%s19269_s0 + %s16699_s15]]   ;;  %s16703_s15 = smov 23  }
  0x1d   :  { %19316 = sst [smem:[#allocation28_spill]] %s16829_s27 }
  0x1e   :  { %19317 = sst [smem:[#allocation29_spill]] %s16834_s4 }
  0x1f   :  { %19318 = sst [smem:[#allocation30_spill]] %s16839_s30 }
  0x20   :  { %s16849_s27 = sld [smem:[%s19269_s0 + %s16700_s22]]   ;;  %s16704_s22 = smov 24  }
  0x21   :  { %s16854_s4 = sld [smem:[%s19269_s0 + %s16701_s28]]   ;;  %s16705_s28 = smov 25  }
  0x22   :  { %19319 = sst [smem:[#allocation31_spill]] %s16844_s20 }
  0x23   :  { %s16859_s30 = sld [smem:[%s19269_s0 + %s16702_s7]]   ;;  %s16706_s7 = smov 26  }
  0x24   :  { %s16864_s20 = sld [smem:[%s19269_s0 + %s16703_s15]]   ;;  %s16707_s15 = smov 27  }
  0x26   :  { %19320 = sst [smem:[#allocation32_spill]] %s16849_s27 }
  0x27   :  { %19321 = sst [smem:[#allocation33_spill]] %s16854_s4 }
  0x28   :  { %s16869_s27 = sld [smem:[%s19269_s0 + %s16704_s22]]   ;;  %s16708_s22 = smov 28  }
  0x29   :  { %19322 = sst [smem:[#allocation34_spill]] %s16859_s30 }
  0x2a   :  { %19323 = sst [smem:[#allocation35_spill]] %s16864_s20 }
  0x2b   :  { %s16874_s4 = sld [smem:[%s19269_s0 + %s16705_s28]]   ;;  %s16709_s28 = smov 29  }
  0x2c   :  { %s16879_s30 = sld [smem:[%s19269_s0 + %s16706_s7]]   ;;  %s16710_s7 = smov 30  }
  0x2d   :  { %s16884_s20 = sld [smem:[%s19269_s0 + %s16707_s15]]   ;;  %s16711_s15 = smov 31  }
  0x2e   :  { %19324 = sst [smem:[#allocation36_spill]] %s16869_s27 }
  0x2f   :  { %s16889_s27 = sld [smem:[%s19269_s0 + %s16708_s22]]   ;;  %s16712_s22 = smov 32  }
  0x31   :  { %19325 = sst [smem:[#allocation37_spill]] %s16874_s4 }
  0x32   :  { %19326 = sst [smem:[#allocation38_spill]] %s16879_s30 }
  0x33   :  { %19327 = sst [smem:[#allocation39_spill]] %s16884_s20 }
  0x34   :  { %s16894_s4 = sld [smem:[%s19269_s0 + %s16709_s28]]   ;;  %s16713_s28 = smov 33  }
  0x35   :  { %19328 = sst [smem:[#allocation40_spill]] %s16889_s27 }
  0x36   :  { %s16899_s30 = sld [smem:[%s19269_s0 + %s16710_s7]]   ;;  %s16714_s7 = smov 34  }
  0x37   :  { %s16904_s20 = sld [smem:[%s19269_s0 + %s16711_s15]]   ;;  %s16715_s15 = smov 35  }
  0x38   :  { %s16909_s27 = sld [smem:[%s19269_s0 + %s16712_s22]]   ;;  %s16716_s22 = smov 36  }
  0x3a   :  { %19329 = sst [smem:[#allocation41_spill]] %s16894_s4 }
  0x3b   :  { %s16914_s4 = sld [smem:[%s19269_s0 + %s16713_s28]]   ;;  %s16717_s28 = smov 37  }
  0x3c   :  { %19330 = sst [smem:[#allocation42_spill]] %s16899_s30 }
  0x3d   :  { %19331 = sst [smem:[#allocation43_spill]] %s16904_s20 }
  0x3e   :  { %19332 = sst [smem:[#allocation44_spill]] %s16909_s27 }
  0x3f   :  { %s16919_s30 = sld [smem:[%s19269_s0 + %s16714_s7]]   ;;  %s16718_s7 = smov 38  }
  0x40   :  { %s16924_s20 = sld [smem:[%s19269_s0 + %s16715_s15]]   ;;  %s16719_s15 = smov 39  }
  0x41   :  { %19333 = sst [smem:[#allocation45_spill]] %s16914_s4 }
  0x42   :  { %s16929_s27 = sld [smem:[%s19269_s0 + %s16716_s22]]   ;;  %s16720_s22 = smov 40  }
  0x43   :  { %s16934_s4 = sld [smem:[%s19269_s0 + %s16717_s28]]   ;;  %s16721_s28 = smov 41  }
  0x44   :  { %s16949_s24 = sld [smem:[%s19269_s0 + %s16720_s22]]   ;;  %s16724_s22 = smov 44  }
  0x45   :  { %19334 = sst [smem:[#allocation46_spill]] %s16919_s30 }
  0x46   :  { %19335 = sst [smem:[#allocation47_spill]] %s16924_s20 }
  0x47   :  { %s16939_s30 = sld [smem:[%s19269_s0 + %s16718_s7]]   ;;  %s16722_s7 = smov 42  }
  0x48   :  { %s16944_s20 = sld [smem:[%s19269_s0 + %s16719_s15]]   ;;  %s16723_s15 = smov 43  }
  0x49   :  { %s16954_s8 = sld [smem:[%s19269_s0 + %s16721_s28]]   ;;  %s16725_s28 = smov 45  }
  0x4a   :  { %s16959_s19 = sld [smem:[%s19269_s0 + %s16722_s7]]   ;;  %s16726_s7 = smov 46  }
  0x4b   :  { %s16969_s12 = sld [smem:[%s19269_s0 + %s16724_s22]]  }
  0x4c   :  { %s16979_s6 = sld [smem:[%s19269_s0 + %s16726_s7]]  }
  0x4e   :  { %19336 = sst [smem:[#allocation48_spill]] %s16944_s20 }
  0x4f   :  { %19337 = sst [smem:[#allocation49_spill]] %s16954_s8 }
  0x50   :  { %s16964_s20 = sld [smem:[%s19269_s0 + %s16723_s15]]   ;;  %s16727_s15 = smov 47  }
  0x51   :  { %s16974_s8 = sld [smem:[%s19269_s0 + %s16725_s28]]  }
  0x52   :  { %s16984_s3 = sld [smem:[%s19269_s0 + %s16727_s15]]  }
  0x53   :  { %100 = vsyncpa [#allocation3], 0 }
  0x54   :  { %101 = vsyncpa [#allocation5], 0 }
  0x55   :  { %102 = vsyncpa [#allocation8], 0 }
  0x56   :  { %103 = vsyncpa [#allocation11], 0 }
  0x57   :  { %104 = vsyncpa [#allocation14], 0  ;;  %s16728_s22 = smov [#allocation4]   ;;  %s16729_s26 = smov [#allocation7]  }
  0x58   :  { %s193_s23 = sshll.u32 %s16728_s22, 4  ;;  %s215_s28 = sshll.u32 %s16729_s26, 4  ;;  %s194_s23 = int_to_ptr.vmem [resolvable:$true] %s193_s23  ;;  %s216_s28 = int_to_ptr.vmem [resolvable:$true] %s215_s28 }
  0x59   :  { %s16519_s1 = scalar_lea.vmem %s194_s23, 16  ;;  %s16523_s2 = scalar_lea.vmem %s194_s23, 32 }
  0x5a   :  { %p16520_p0 = scmp.ne.s32.totalorder %s194_s23, %s16519_s1  ;;  %p16524_p1 = scmp.lt.s32.totalorder %s194_s23, %s194_s23 }
  0x5b   :  { %p16525_p2 = scmp.lt.s32.totalorder %s16523_s2, %s16519_s1 }
  0x5d   :  { %p16526_p3 = por %p16525_p2, %p16524_p1 }
  0x5f   :  { %p16527_p4 = pnand %p16526_p3, %p16520_p0 }
  0x61   :  { %16530 = shalt.err (!%p16527_p4)
}
  0x62   :  { %196 = dma.hbm_to_vmem [thread:$0]  %s16934_s4, 16, %s194_s23, [#allocation5]  }
  0x63   :  { %s16539_s0 = scalar_lea.vmem %s216_s28, 16  ;;  %s16543_s7 = scalar_lea.vmem %s216_s28, 32 }
  0x64   :  { %p16540_p5 = scmp.ne.s32.totalorder %s216_s28, %s16539_s0  ;;  %p16544_p6 = scmp.lt.s32.totalorder %s216_s28, %s216_s28 }
  0x65   :  { %p16545_p7 = scmp.lt.s32.totalorder %s16543_s7, %s16539_s0 }
  0x67   :  { %p16546_p8 = por %p16545_p7, %p16544_p6 }
  0x69   :  { %p16547_p9 = pnand %p16546_p8, %p16540_p5 }
  0x6b   :  { %16550 = shalt.err (!%p16547_p9)
}
  0x6c   :  { %218 = dma.hbm_to_vmem [thread:$0]  %s16949_s24, 16, %s216_s28, [#allocation8]  }
  0x6d   :  { %s16730_s10 = smov [#allocation10]   ;;  %s16731_s15 = smov [#allocation2]  }
  0x6e   :  { %s237_s11 = sshll.u32 %s16730_s10, 4  ;;  %s183_s16 = sshll.u32 %s16731_s15, 4  ;;  %s238_s11 = int_to_ptr.vmem [resolvable:$true] %s237_s11  ;;  %s184_s16 = int_to_ptr.vmem [resolvable:$true] %s183_s16 }
  0x6f   :  { %s16559_s18 = scalar_lea.vmem %s238_s11, 16  ;;  %s16563_s22 = scalar_lea.vmem %s238_s11, 32 }
  0x70   :  { %p16560_p10 = scmp.ne.s32.totalorder %s238_s11, %s16559_s18  ;;  %p16564_p11 = scmp.lt.s32.totalorder %s238_s11, %s238_s11 }
  0x71   :  { %p16565_p12 = scmp.lt.s32.totalorder %s16563_s22, %s16559_s18 }
  0x73   :  { %p16566_p13 = por %p16565_p12, %p16564_p11 }
  0x75   :  { %p16567_p0 = pnand %p16566_p13, %p16560_p10 }
  0x77   :  { %16570 = shalt.err (!%p16567_p0)
}
  0x78   :  { %240 = dma.hbm_to_vmem [thread:$0]  %s16964_s20, 16, %s238_s11, [#allocation11]  }
  0x79   :  { %s16579_s4 = scalar_lea.vmem %s184_s16, 16  ;;  %s16583_s23 = scalar_lea.vmem %s184_s16, 32 }
  0x7a   :  { %p16580_p1 = scmp.ne.s32.totalorder %s184_s16, %s16579_s4  ;;  %p16584_p2 = scmp.lt.s32.totalorder %s184_s16, %s184_s16 }
  0x7b   :  { %p16585_p3 = scmp.lt.s32.totalorder %s16583_s23, %s16579_s4 }
  0x7d   :  { %p16586_p4 = por %p16585_p3, %p16584_p2 }
  0x7f   :  { %p16587_p5 = pnand %p16586_p4, %p16580_p1 }
  0x81   :  { %16590 = shalt.err (!%p16587_p5)
}
  0x82   :  { %186 = dma.hbm_to_vmem [thread:$0]  %s16929_s27, 16, %s184_s16, [#allocation3]  }
  0x83   :  { %s16732_s24 = smov [#allocation6]   ;;  %s16733_s28 = smov [#allocation9]  }
  0x84   :  { %s203_s26 = sshll.u32 %s16732_s24, 4  ;;  %s227_s1 = sshll.u32 %s16733_s28, 4  ;;  %s204_s26 = int_to_ptr.vmem [resolvable:$true] %s203_s26  ;;  %s228_s1 = int_to_ptr.vmem [resolvable:$true] %s227_s1 }
  0x85   :  { %s16599_s2 = scalar_lea.vmem %s204_s26, 16  ;;  %s16603_s0 = scalar_lea.vmem %s204_s26, 32 }
  0x86   :  { %p16600_p6 = scmp.ne.s32.totalorder %s204_s26, %s16599_s2  ;;  %p16604_p7 = scmp.lt.s32.totalorder %s204_s26, %s204_s26 }
  0x87   :  { %p16605_p8 = scmp.lt.s32.totalorder %s16603_s0, %s16599_s2 }
  0x89   :  { %p16606_p9 = por %p16605_p8, %p16604_p7 }
  0x8b   :  { %p16607_p10 = pnand %p16606_p9, %p16600_p6 }
  0x8d   :  { %16610 = shalt.err (!%p16607_p10)
}
  0x8e   :  { %206 = dma.hbm_to_vmem [thread:$0]  %s16939_s30, 16, %s204_s26, [#allocation5]  }
  0x8f   :  { %s16619_s20 = scalar_lea.vmem %s228_s1, 16  ;;  %s16623_s7 = scalar_lea.vmem %s228_s1, 32 }
  0x90   :  { %p16620_p11 = scmp.ne.s32.totalorder %s228_s1, %s16619_s20  ;;  %p16624_p12 = scmp.lt.s32.totalorder %s228_s1, %s228_s1 }
  0x91   :  { %p16625_p13 = scmp.lt.s32.totalorder %s16623_s7, %s16619_s20 }
  0x93   :  { %p16626_p0 = por %p16625_p13, %p16624_p12 }
  0x95   :  { %p16627_p1 = pnand %p16626_p0, %p16620_p11 }
  0x97   :  { %16630 = shalt.err (!%p16627_p1)
}
  0x98   :  { %230 = dma.hbm_to_vmem [thread:$0]  %s16959_s19, 16, %s228_s1, [#allocation8]  }
  0x99   :  { %s16734_s27 = smov [#allocation12]   ;;  %s16735_s11 = smov [#allocation13]  }
  0x9a   :  { %s247_s10 = sshll.u32 %s16734_s27, 4  ;;  %s259_s15 = sshll.u32 %s16735_s11, 4  ;;  %s248_s10 = int_to_ptr.vmem [resolvable:$true] %s247_s10  ;;  %s260_s15 = int_to_ptr.vmem [resolvable:$true] %s259_s15 }
  0x9b   :  { %s16639_s16 = scalar_lea.vmem %s248_s10, 16  ;;  %s16643_s18 = scalar_lea.vmem %s248_s10, 32 }
  0x9c   :  { %p16640_p2 = scmp.ne.s32.totalorder %s248_s10, %s16639_s16  ;;  %p16644_p3 = scmp.lt.s32.totalorder %s248_s10, %s248_s10 }
  0x9d   :  { %p16645_p4 = scmp.lt.s32.totalorder %s16643_s18, %s16639_s16 }
  0x9f   :  { %p16646_p5 = por %p16645_p4, %p16644_p3 }
  0xa1   :  { %p16647_p6 = pnand %p16646_p5, %p16640_p2 }
  0xa3   :  { %16650 = shalt.err (!%p16647_p6)
}
  0xa4   :  { %250 = dma.hbm_to_vmem [thread:$0]  %s16969_s12, 16, %s248_s10, [#allocation11]  }
  0xa5   :  { %s16659_s30 = scalar_lea.vmem %s260_s15, 16  ;;  %s16663_s22 = scalar_lea.vmem %s260_s15, 32 }
  0xa6   :  { %p16660_p7 = scmp.ne.s32.totalorder %s260_s15, %s16659_s30  ;;  %p16664_p8 = scmp.lt.s32.totalorder %s260_s15, %s260_s15 }
  0xa7   :  { %p16665_p9 = scmp.lt.s32.totalorder %s16663_s22, %s16659_s30 }
  0xa9   :  { %p16666_p10 = por %p16665_p9, %p16664_p8 }
  0xab   :  { %p16667_p11 = pnand %p16666_p10, %p16660_p7 }
  0xad   :  { %16670 = shalt.err (!%p16667_p11)
}
  0xae   :  { %262 = dma.hbm_to_vmem [thread:$0]  %s16979_s6, 16, %s260_s15, [#allocation14]  }
  0xaf   :  { %16671 = dma.done.wait [#allocation3], 16  }
  0xb0   :  { %16672 = vsyncadd [#allocation3], 4294967280 }
  0xb1   :  { %16673 = dma.done.wait [#allocation5], 32  }
  0xb2   :  { %16674 = vsyncadd [#allocation5], 4294967264 }
  0xb3   :  { %16675 = dma.done.wait [#allocation8], 32  }
  0xb4   :  { %16676 = vsyncadd [#allocation8], 4294967264 }
  0xb5   :  { %16677 = dma.done.wait [#allocation11], 32  }
  0xb6   :  { %16678 = vsyncadd [#allocation11], 4294967264 }
  0xb7   :  { %16679 = dma.done.wait [#allocation14], 16  }
  0xb8   :  { %16680 = vsyncadd [#allocation14], 4294967280  ;;  %v287_v0 = vlaneseq  ;;  %v16736_v1 = vmov 0.0   ;;  %vm16737_vm0 = vmmov 0   ;;  %s19300_s19 = smov 64   ;;  %v332_v4 = vld [vmem:[%s16764_s17 + $0x18] sm:$0xff] }
  0xb9   :  { %14898 = vmatprep.subr.mxu0 %v16736_v1  ;;  %14906 = vmatprep.mubr.msk.f32.mxu0 %vm16737_vm0, %v16736_v1  ;;  %v331_v5 = vld [vmem:[%s16764_s17 + $0x10] sm:$0xff]  ;;  %v330_v7 = vld [vmem:[%s16764_s17 + $0x8] sm:$0xff]  ;;  %v329_v8 = vld [vmem:[%s16764_s17] sm:$0xff]  ;;  %vm436_vm10 = vcmask 261120   ;;  %s19302_s6 = smov 96   ;;  %s19338_s12 = sld [smem:[#allocation20_spill]] }
  0xba   :  { %v16997_v2 = vand.u32 127, %v287_v0  ;;  %14909 = vmatprep.subr.mxu1 %v16736_v1  ;;  %14911 = vmatprep.mubr.msk.f32.mxu1 %vm16737_vm0, %v16736_v1  ;;  %v17029_v10 = vld [vmem:[%s16749_s5] sm:$0xff]  ;;  %s19339_s4 = sld [smem:[#allocation25_spill]]  ;;  %s16740_s24 = smov 32  }
  0xbb   :  { %14899 = vmatpush3.msra.mxu0 %v332_v4  ;;  %v14076_v13 = vld [vmem:[%s16769_s21] ss:$0 sm:$0xff]  ;;  %s19340_s23 = sld [smem:[#allocation26_spill]] }
  0xbc   :  { %vm297_vm1 = vcmp.lt.s32.totalorder %v16997_v2, 4  ;;  %vm291_vm2 = vcmp.ge.s32.totalorder %v16997_v2, 8  ;;  %vm299_vm3 = vcmp.lt.s32.totalorder %v16997_v2, 12  ;;  %vm292_vm5 = vcmp.ge.s32.totalorder %v16997_v2, 12  ;;  %14900 = vmatprep.subr.mxu0 %v16736_v1  ;;  %v429_v37 = vld [vmem:[%s16759_s13] sm:$0xff]  ;;  %s19341_s26 = sld [smem:[#allocation22_spill]] }
  0xbd   :  { %v17006_v3 = vsel %vm297_vm1, 1.0, %v16736_v1  ;;  %vm307_vm4 = vmand %vm291_vm2, %vm299_vm3  ;;  %vm300_vm6 = vcmp.lt.s32.totalorder %v16997_v2, 16  ;;  %vm293_vm8 = vcmp.ge.s32.totalorder %v16997_v2, 16  ;;  %vm301_vm9 = vcmp.lt.s32.totalorder %v16997_v2, 20  ;;  %14901 = vmatpush3.msra.mxu0 %v331_v5  ;;  %s19342_s28 = sld [smem:[#allocation21_spill]] }
  0xbe   :  { %534 = vrot.lane.b32.xlu1 %v17006_v3, %s19300_s19  ;;  %v17015_v6 = vsel %vm307_vm4, 1.0, %v16736_v1  ;;  %vm308_vm7 = vmand %vm292_vm5, %vm300_vm6  ;;  %14902 = vmatprep.subr.mxu0 %v16736_v1  ;;  %vm295_vm12 = vcmp.ge.s32.totalorder %v16997_v2, 24  ;;  %vm303_vm13 = vcmp.lt.s32.totalorder %v16997_v2, 28  ;;  %vm290_vm15 = vcmp.ge.s32.totalorder %v16997_v2, 4  ;;  %s19343_s1 = sld [smem:[#allocation23_spill]] }
  0xbf   :  { %v17026_v9 = vsel %vm308_vm7, 1.0, %v16736_v1  ;;  %14903 = vmatpush3.msra.mxu0 %v330_v7  ;;  %vm309_vm11 = vmand %vm293_vm8, %vm301_vm9  ;;  %vm298_vm1 = vcmp.lt.s32.totalorder %v16997_v2, 8  ;;  %v17059_v17 = vmul.f32 0.5, %v17006_v3  ;;  %vm294_vm3 = vcmp.ge.s32.totalorder %v16997_v2, 20  ;;  %s19344_s2 = sld [smem:[#allocation24_spill]] }
  0xc0   :  { %14904 = vmatprep.subr.mxu0 %v16736_v1  ;;  %v17039_v11 = vsel %vm309_vm11, 1.0, %v16736_v1  ;;  %vm311_vm14 = vmand %vm295_vm12, %vm303_vm13  ;;  %vm302_vm4 = vcmp.lt.s32.totalorder %v16997_v2, 24  ;;  %v17088_v25 = vmul.f32 0.5, %v17015_v6  ;;  %vm296_vm6 = vcmp.ge.s32.totalorder %v16997_v2, 28  ;;  %s19345_s0 = sld [smem:[#allocation31_spill]] }
  0xc1   :  { %14905 = vmatpush3.msra.mxu0 %v329_v8  ;;  %v17047_v12 = vsel %vm311_vm14, 1.0, %v16736_v1  ;;  %vm306_vm2 = vmand %vm290_vm15, %vm298_vm1  ;;  %v17062_v18 = vmul.f32 0.5, %v17039_v11  ;;  %vm304_vm7 = vcmp.lt.s32.totalorder %v16997_v2, 32  ;;  %v17108_v28 = vmul.f32 0.5, %v17026_v9  ;;  %s19346_s20 = sld [smem:[#allocation27_spill]] }
  0xc2   :  { %538 = vrot.lane.b32.xlu1 %v17015_v6, %s19300_s19  ;;  %14907 = vmatmul.mubr.msk.f32.vlgmr.msra.gmra.mxu0 %vm436_vm10, %v17029_v10  ;;  %v17065_v19 = vsel %vm306_vm2, 1.0, %v16736_v1  ;;  %v17070_v21 = vmul.f32 0.5, %v17047_v12  ;;  %vm310_vm5 = vmand %vm294_vm3, %vm302_vm4  ;;  %vm1155_vm9 = vcmask 64512   ;;  %vm2787_vm11 = vcmask 80896   ;;  %s19347_s7 = sld [smem:[#allocation28_spill]] }
  0xc3   :  { %14929 = vmatprep.subr.mxu0 %v16736_v1  ;;  %14931 = vmatprep.mubr.msk.f32.mxu0 %vm16737_vm0, %v16736_v1  ;;  %v17079_v24 = vmul.f32 0.5, %v17065_v19  ;;  %v17116_v30 = vsel %vm310_vm5, 1.0, %v16736_v1  ;;  %vm312_vm8 = vmand %vm296_vm6, %vm304_vm7  ;;  %vm2886_vm12 = vcmask 1041408   ;;  %s19348_s27 = sld [smem:[#allocation33_spill]]  ;;  %vm3767_vm14 = vcmask 523264  }
  0xc4   :  { %v17126_v32 = vmul.f32 0.5, %v17116_v30  ;;  %v17129_v33 = vsel %vm312_vm8, 1.0, %v16736_v1  ;;  %s19349_s10 = sld [smem:[#allocation32_spill]] }
  0xc5   :  { %v17139_v35 = vmul.f32 0.5, %v17129_v33  ;;  %s19350_s11 = sld [smem:[#allocation34_spill]] }
  0xc6   :  { %540 = vrot.lane.b32.xlu1 %v17026_v9, %s19300_s19  ;;  %s19351_s15 = sld [smem:[#allocation35_spill]] }
  0xc7   :  { %s19352_s16 = sld [smem:[#allocation29_spill]] }
  0xc8   :  { %s19353_s18 = sld [smem:[#allocation30_spill]] }
  0xc9   :  { %s19354_s30 = sld [smem:[#allocation36_spill]] }
  0xca   :  { %542 = vrot.lane.b32.xlu1 %v17039_v11, %s19300_s19  ;;  %s19355_s22 = sld [smem:[#allocation37_spill]] }
  0xce   :  { %546 = vrot.lane.b32.xlu1 %v17047_v12, %s19300_s19 }
 0x130   :  { %v17159_v56 = vpop.permute.xlu1 %534 }
 0x182   :  { %v506_v14 = vpop.f32.mrf.mxu0 }
 0x183   :  { %v17052_v15 = vadd.f32 %v14076_v13, %v506_v14 }
 0x184   :  { %v14908_v16 = vpop.f32.mrf.mxu0 }
 0x185   :  { %567 = vrot.lane.b32.xlu0 %v17052_v15, %s19302_s6  ;;  %v518_v22 = vmul.f32 %v17059_v17, %v17052_v15  ;;  %v522_v23 = vmul.f32 %v17062_v18, %v17052_v15  ;;  %v519_v26 = vmul.f32 %v17079_v24, %v17052_v15  ;;  %v524_v27 = vmul.f32 %v17070_v21, %v17052_v15 }
 0x186   :  { %v520_v29 = vmul.f32 %v17088_v25, %v17052_v15  ;;  %v521_v31 = vmul.f32 %v17108_v28, %v17052_v15  ;;  %v523_v34 = vmul.f32 %v17126_v32, %v17052_v15  ;;  %v525_v36 = vmul.f32 %v17139_v35, %v17052_v15 }
 0x187   :  { %v558_v57 = vmul.f32 %v17159_v56, %v17052_v15 }
 0x1f7   :  { %v568_v20 = vpop.permute.xlu0 %567 }
 0x1f8   :  { %14910 = vmatpush3.xpose.msk.msra.mxu1 %vm436_vm10, %v568_v20  ;;  %14930 = vmatpush3.xpose.msk.msra.mxu0 %vm436_vm10, %v568_v20 }
 0x1f9   :  { %14914 = vmatprep.subr.mxu1 %v16736_v1  ;;  %14939 = vmatprep.subr.mxu0 %v16736_v1 }
 0x1fb   :  { %14912 = vmatmul.mubr.msk.f32.vlgmr.msra.gmra.mxu1 %vm436_vm10, %v518_v22  ;;  %14932 = vmatmul.mubr.msk.f32.vlgmr.msra.gmra.mxu0 %vm436_vm10, %v522_v23 }
 0x1fc   :  { %14915 = vmatpush3.xpose.msk.msra.mxu1 %vm436_vm10, %v568_v20  ;;  %14940 = vmatpush3.xpose.msk.msra.mxu0 %vm436_vm10, %v568_v20 }
 0x1fd   :  { %14916 = vmatprep.mubr.msk.f32.mxu1 %vm16737_vm0, %v16736_v1  ;;  %14941 = vmatprep.mubr.msk.f32.mxu0 %vm16737_vm0, %v16736_v1 }
 0x1fe   :  { %14919 = vmatprep.subr.mxu1 %v16736_v1  ;;  %14949 = vmatprep.subr.mxu0 %v16736_v1 }
 0x1ff   :  { %14917 = vmatmul.mubr.msk.f32.vlgmr.msra.gmra.mxu1 %vm436_vm10, %v519_v26  ;;  %14942 = vmatmul.mubr.msk.f32.vlgmr.msra.gmra.mxu0 %vm436_vm10, %v524_v27 }
 0x200   :  { %14920 = vmatpush3.xpose.msk.msra.mxu1 %vm436_vm10, %v568_v20  ;;  %14921 = vmatprep.mubr.msk.f32.mxu1 %vm16737_vm0, %v16736_v1 }
 0x201   :  { %14924 = vmatprep.subr.mxu1 %v16736_v1  ;;  %14951 = vmatprep.mubr.msk.f32.mxu0 %vm16737_vm0, %v16736_v1 }
 0x203   :  { %14922 = vmatmul.mubr.msk.f32.vlgmr.msra.gmra.mxu1 %vm436_vm10, %v520_v29  ;;  %v17181_v29 = vpop.permute.xlu1 %538 }
 0x204   :  { %14925 = vmatpush3.xpose.msk.msra.mxu1 %vm436_vm10, %v568_v20  ;;  %14926 = vmatprep.mubr.msk.f32.mxu1 %vm16737_vm0, %v16736_v1 }
 0x205   :  { %14934 = vmatprep.subr.mxu1 %v16736_v1 }
 0x207   :  { %14927 = vmatmul.mubr.msk.f32.vlgmr.msra.gmra.mxu1 %vm436_vm10, %v521_v31  ;;  %v560_v31 = vmul.f32 %v17181_v29, %v17052_v15 }
 0x208   :  { %14935 = vmatpush3.xpose.msk.msra.mxu1 %vm436_vm10, %v568_v20  ;;  %14936 = vmatprep.mubr.msk.f32.mxu1 %vm16737_vm0, %v16736_v1 }
 0x209   :  { %14944 = vmatprep.subr.mxu1 %v16736_v1 }
 0x20b   :  { %14937 = vmatmul.mubr.msk.f32.vlgmr.msra.gmra.mxu1 %vm436_vm10, %v523_v34 }
 0x20c   :  { %14945 = vmatpush3.xpose.msk.msra.mxu1 %vm436_vm10, %v568_v20  ;;  %14946 = vmatprep.mubr.msk.f32.mxu1 %vm16737_vm0, %v16736_v1 }
 0x20d   :  { %14954 = vmatprep.subr.mxu1 %v16736_v1 }
 0x20f   :  { %14947 = vmatmul.mubr.msk.f32.vlgmr.msra.gmra.mxu1 %vm436_vm10, %v525_v36 }
 0x210   :  { %14956 = vmatprep.mubr.msk.f32.mxu1 %vm16737_vm0, %v16736_v1 }
 0x2bb   :  { %v640_v38 = vpop.f32.mrf.mxu1  ;;  %v932_v39 = vpop.f32.mrf.mxu0 }
 0x2bc   :  { %v641_v40 = vadd.f32 %v640_v38, %v429_v37  ;;  %v933_v0 = vadd.f32 %v932_v39, %v429_v37  ;;  %v17186_v38 = vpop.permute.xlu1 %540 }
 0x2bd   :  { %v14913_v41 = vpop.f32.mrf.mxu1  ;;  %v14933_v42 = vpop.f32.mrf.mxu0 }
 0x2be   :  { %v1156_v43 = vsel %vm1155_vm9, %v641_v40, -inf  ;;  %v1168_v4 = vsel %vm1155_vm9, %v933_v0, -inf }
 0x2bf   :  { %1157 = vmax.xlane.f32.xlu0 %v1156_v43  ;;  %v713_v44 = vpop.f32.mrf.mxu1  ;;  %v1078_v45 = vpop.f32.mrf.mxu0 }
 0x2c0   :  { %v714_v2 = vadd.f32 %v713_v44, %v429_v37  ;;  %v1079_v5 = vadd.f32 %v1078_v45, %v429_v37  ;;  %v17188_v39 = vpop.permute.xlu1 %542 }
 0x2c1   :  { %v14918_v46 = vpop.f32.mrf.mxu1  ;;  %v14943_v47 = vpop.f32.mrf.mxu0 }
 0x2c2   :  { %v1159_v7 = vsel %vm1155_vm9, %v714_v2, -inf  ;;  %v1174_v13 = vsel %vm1155_vm9, %v1079_v5, -inf }
 0x2c3   :  { %v786_v48 = vpop.f32.mrf.mxu1 }
 0x2c4   :  { %v787_v8 = vadd.f32 %v786_v48, %v429_v37  ;;  %v17192_v41 = vpop.permute.xlu1 %546 }
 0x2c5   :  { %v14923_v49 = vpop.f32.mrf.mxu1 }
 0x2c6   :  { %v1162_v16 = vsel %vm1155_vm9, %v787_v8, -inf }
 0x2c7   :  { %v859_v50 = vpop.f32.mrf.mxu1 }
 0x2c8   :  { %v860_v14 = vadd.f32 %v859_v50, %v429_v37 }
 0x2c9   :  { %v14928_v51 = vpop.f32.mrf.mxu1 }
 0x2ca   :  { %v1165_v22 = vsel %vm1155_vm9, %v860_v14, -inf }
 0x2cb   :  { %v1005_v52 = vpop.f32.mrf.mxu1 }
 0x2cc   :  { %v1006_v20 = vadd.f32 %v1005_v52, %v429_v37 }
 0x2cd   :  { %v14938_v53 = vpop.f32.mrf.mxu1 }
 0x2ce   :  { %v1171_v26 = vsel %vm1155_vm9, %v1006_v20, -inf }
 0x2cf   :  { %v1151_v54 = vpop.f32.mrf.mxu1 }
 0x2d0   :  { %v1152_v23 = vadd.f32 %v1151_v54, %v429_v37 }
 0x2d1   :  { %v14948_v55 = vpop.f32.mrf.mxu1 }
 0x2d2   :  { %v1177_v27 = vsel %vm1155_vm9, %v1152_v23, -inf }
 0x2d5   :  { %536 = vrot.lane.b32.xlu0 %v17065_v19, %s19300_s19 }
 0x2d9   :  { %544 = vrot.lane.b32.xlu0 %v17116_v30, %s19300_s19 }
 0x2dd   :  { %548 = vrot.lane.b32.xlu0 %v17129_v33, %s19300_s19 }
 0x2e1   :  { %1245 = vrot.lane.b32.xlu0 %v558_v57, %s19300_s19 }
 0x348   :  { %v1158_v58 = vpop.xlane.xlu0 %1157 }
 0x349   :  { %v1180_v34 = vsub.f32 %v641_v40, %v1158_v58  ;;  %v562_v40 = vmul.f32 %v17188_v39, %v17052_v15 }
 0x34b   :  { %v1188_v36 = vmul.f32 1.442695, %v1180_v34 }
 0x34c   :  { %v17164_v59 = vpop.permute.xlu0 %536 }
 0x34d   :  { %v559_v60 = vmul.f32 %v17164_v59, %v17052_v15  ;;  %16108 = vpow2.f32 %v1188_v36 }
 0x34f   :  { %1322 = vrot.lane.b32.xlu1 %v559_v60, %s19300_s19 }
 0x350   :  { %v17169_v61 = vpop.permute.xlu0 %544 }
 0x354   :  { %v17171_v62 = vpop.permute.xlu0 %548 }
 0x358   :  { %v1246_v63 = vpop.permute.xlu0 %1245 }
 0x359   :  { %14950 = vmatpush3.msra.mxu0 %v1246_v63 }
 0x35a   :  { %14959 = vmatprep.subr.mxu0 %v16736_v1  ;;  %v17190_v37 = vpop.eup %16108 }
 0x35b   :  { %v1204_v42 = vsel %vm1155_vm9, %v17190_v37, 0.0 }
 0x373   :  { %1169 = vmax.xlane.f32.xlu1 %v1168_v4 }
 0x377   :  { %1160 = vmax.xlane.f32.xlu1 %v1159_v7 }
 0x37b   :  { %1175 = vmax.xlane.f32.xlu1 %v1174_v13 }
 0x37f   :  { %1163 = vmax.xlane.f32.xlu1 %v1162_v16 }
 0x383   :  { %1166 = vmax.xlane.f32.xlu1 %v1165_v22 }
 0x387   :  { %1172 = vmax.xlane.f32.xlu1 %v1171_v26 }
 0x38b   :  { %1178 = vmax.xlane.f32.xlu1 %v1177_v27 }
 0x39c   :  { %1399 = vrot.lane.b32.xlu1 %v560_v31, %s19300_s19 }
 0x3c0   :  { %1205 = vadd.xlane.f32.xlu1 %v1204_v42 }
 0x3c1   :  { %v1323_v43 = vpop.permute.xlu1 %1322 }
 0x3c2   :  { %14955 = vmatpush3.msra.mxu1 %v1323_v43 }
 0x3c3   :  { %14964 = vmatprep.subr.mxu1 %v16736_v1 }
 0x3d1   :  { %1553 = vrot.lane.b32.xlu1 %v562_v40, %s19300_s19  ;;  %v561_v40 = vmul.f32 %v17186_v38, %v17052_v15 }
 0x3fc   :  { %v1170_v44 = vpop.xlane.xlu1 %1169 }
 0x3fd   :  { %v1184_v45 = vsub.f32 %v933_v0, %v1170_v44  ;;  %v563_v44 = vmul.f32 %v17169_v61, %v17052_v15 }
 0x3ff   :  { %v1196_v46 = vmul.f32 1.442695, %v1184_v45  ;;  %v564_v45 = vmul.f32 %v17192_v41, %v17052_v15 }
 0x400   :  { %v1161_v47 = vpop.xlane.xlu1 %1160 }
 0x401   :  { %16110 = vpow2.f32 %v1196_v46  ;;  %v1181_v48 = vsub.f32 %v714_v2, %v1161_v47  ;;  %v565_v46 = vmul.f32 %v17171_v62, %v17052_v15 }
 0x403   :  { %v1190_v49 = vmul.f32 1.442695, %v1181_v48 }
 0x404   :  { %v1176_v50 = vpop.xlane.xlu1 %1175 }
 0x405   :  { %16112 = vpow2.f32 %v1190_v49  ;;  %v1186_v51 = vsub.f32 %v1079_v5, %v1176_v50 }
 0x407   :  { %v1200_v52 = vmul.f32 1.442695, %v1186_v51 }
 0x408   :  { %v1164_v53 = vpop.xlane.xlu1 %1163 }
 0x409   :  { %16114 = vpow2.f32 %v1200_v52  ;;  %v1182_v54 = vsub.f32 %v787_v8, %v1164_v53 }
 0x40b   :  { %v1192_v55 = vmul.f32 1.442695, %v1182_v54 }
 0x40c   :  { %v1167_v57 = vpop.xlane.xlu1 %1166 }
 0x40d   :  { %16116 = vpow2.f32 %v1192_v55  ;;  %v1183_v58 = vsub.f32 %v860_v14, %v1167_v57 }
 0x40e   :  { %v17200_v60 = vpop.eup %16110 }
 0x40f   :  { %v1194_v63 = vmul.f32 1.442695, %v1183_v58  ;;  %v1216_v0 = vsel %vm1155_vm9, %v17200_v60, 0.0 }
 0x410   :  { %1217 = vadd.xlane.f32.xlu0 %v1216_v0  ;;  %v1173_v2 = vpop.xlane.xlu1 %1172 }
 0x411   :  { %16118 = vpow2.f32 %v1194_v63  ;;  %v1185_v4 = vsub.f32 %v1006_v20, %v1173_v2 }
 0x412   :  { %v16113_v7 = vpop.eup %16112 }
 0x413   :  { %v1198_v5 = vmul.f32 1.442695, %v1185_v4  ;;  %v1207_v13 = vsel %vm1155_vm9, %v16113_v7, 0.0 }
 0x414   :  { %1208 = vadd.xlane.f32.xlu0 %v1207_v13  ;;  %v1179_v8 = vpop.xlane.xlu1 %1178 }
 0x415   :  { %16120 = vpow2.f32 %v1198_v5  ;;  %v1187_v16 = vsub.f32 %v1152_v23, %v1179_v8 }
 0x416   :  { %v17205_v22 = vpop.eup %16114 }
 0x417   :  { %v1202_v14 = vmul.f32 1.442695, %v1187_v16  ;;  %v1222_v26 = vsel %vm1155_vm9, %v17205_v22, 0.0 }
 0x418   :  { %1223 = vadd.xlane.f32.xlu0 %v1222_v26  ;;  %v1400_v47 = vpop.permute.xlu1 %1399 }
 0x419   :  { %16122 = vpow2.f32 %v1202_v14 }
 0x41a   :  { %v16117_v27 = vpop.eup %16116 }
 0x41b   :  { %v1210_v31 = vsel %vm1155_vm9, %v16117_v27, 0.0 }
 0x41c   :  { %1211 = vadd.xlane.f32.xlu0 %v1210_v31 }
 0x41e   :  { %v16119_v20 = vpop.eup %16118 }
 0x41f   :  { %v1213_v34 = vsel %vm1155_vm9, %v16119_v20, 0.0 }
 0x420   :  { %1214 = vadd.xlane.f32.xlu1 %v1213_v34 }
 0x422   :  { %v17211_v36 = vpop.eup %16120 }
 0x423   :  { %v1219_v23 = vsel %vm1155_vm9, %v17211_v36, 0.0 }
 0x424   :  { %1220 = vadd.xlane.f32.xlu1 %v1219_v23  ;;  %v336_v23 = vld [vmem:[%s16774_s25 + $0x10] sm:$0xff] }
 0x426   :  { %v17215_v42 = vpop.eup %16122 }
 0x427   :  { %v1225_v43 = vsel %vm1155_vm9, %v17215_v42, 0.0 }
 0x428   :  { %1226 = vadd.xlane.f32.xlu1 %v1225_v43  ;;  %v335_v43 = vld [vmem:[%s16774_s25 + $0x8] sm:$0xff] }
 0x432   :  { %1476 = vrot.lane.b32.xlu0 %v561_v40, %s19300_s19 }
 0x436   :  { %1630 = vrot.lane.b32.xlu0 %v563_v44, %s19300_s19 }
 0x439   :  { %1707 = vrot.lane.b32.xlu1 %v564_v45, %s19300_s19 }
 0x43a   :  { %1784 = vrot.lane.b32.xlu0 %v565_v46, %s19300_s19 }
 0x449   :  { %v1206_v48 = vpop.xlane.xlu1 %1205 }
 0x44a   :  { %16124 = vrcp.f32 %v1206_v48 }
 0x44d   :  { %v1554_v53 = vpop.permute.xlu1 %1553 }
 0x457   :  { %v16125_v49 = vpop.eup %16124 }
 0x458   :  { %v1229_v50 = vmul.f32 %v16125_v49, %v17190_v37 }
 0x45a   :  { %14952 = vmatmul.mubr.msk.f32.vlgmr.msra.gmra.mxu0 %vm1155_vm9, %v1229_v50 }
 0x45b   :  { %14960 = vmatpush3.msra.mxu0 %v1400_v47  ;;  %14961 = vmatprep.mubr.msk.f32.mxu0 %vm16737_vm0, %v16736_v1 }
 0x45c   :  { %14969 = vmatprep.subr.mxu0 %v16736_v1 }
 0x499   :  { %v1218_v51 = vpop.xlane.xlu0 %1217 }
 0x49d   :  { %v1209_v15 = vpop.xlane.xlu0 %1208 }
 0x49e   :  { %16126 = vrcp.f32 %v1209_v15 }
 0x4a1   :  { %v1224_v52 = vpop.xlane.xlu0 %1223 }
 0x4a5   :  { %v1212_v54 = vpop.xlane.xlu0 %1211 }
 0x4a6   :  { %16128 = vrcp.f32 %v1212_v54 }
 0x4a7   :  { %16130 = vrcp.f32 %v1218_v51 }
 0x4a9   :  { %v1215_v55 = vpop.xlane.xlu1 %1214  ;;  %v1477_v63 = vpop.permute.xlu0 %1476 }
 0x4aa   :  { %16132 = vrcp.f32 %v1215_v55 }
 0x4ab   :  { %v16127_v57 = vpop.eup %16126  ;;  %16134 = vrcp.f32 %v1224_v52 }
 0x4ac   :  { %v1231_v37 = vmul.f32 %v16127_v57, %v16113_v7 }
 0x4ad   :  { %v1221_v58 = vpop.xlane.xlu1 %1220  ;;  %v1631_v7 = vpop.permute.xlu0 %1630 }
 0x4ae   :  { %16136 = vrcp.f32 %v1221_v58  ;;  %14957 = vmatmul.mubr.msk.f32.vlgmr.msra.gmra.mxu1 %vm1155_vm9, %v1231_v37 }
 0x4af   :  { %14965 = vmatpush3.msra.mxu1 %v1477_v63  ;;  %14966 = vmatprep.mubr.msk.f32.mxu1 %vm16737_vm0, %v16736_v1 }
 0x4b0   :  { %14974 = vmatprep.subr.mxu1 %v16736_v1 }
 0x4b1   :  { %v1227_v0 = vpop.xlane.xlu1 %1226 }
 0x4b2   :  { %16138 = vrcp.f32 %v1227_v0 }
 0x4b3   :  { %v16129_v2 = vpop.eup %16128 }
 0x4b4   :  { %v1233_v4 = vmul.f32 %v16129_v2, %v16117_v27  ;;  %v16131_v5 = vpop.eup %16130 }
 0x4b5   :  { %v1237_v16 = vmul.f32 %v16131_v5, %v17200_v60  ;;  %v1708_v26 = vpop.permute.xlu1 %1707 }
 0x4b6   :  { %14962 = vmatmul.mubr.msk.f32.vlgmr.msra.gmra.mxu0 %vm1155_vm9, %v1233_v4 }
 0x4b7   :  { %v16133_v13 = vpop.eup %16132  ;;  %14970 = vmatpush3.msra.mxu0 %v1554_v53  ;;  %14971 = vmatprep.mubr.msk.f32.mxu0 %vm16737_vm0, %v16736_v1 }
 0x4b8   :  { %14979 = vmatprep.subr.mxu0 %v16736_v1  ;;  %v1235_v8 = vmul.f32 %v16133_v13, %v16119_v20  ;;  %v16135_v14 = vpop.eup %16134  ;;  %v1785_v20 = vpop.permute.xlu0 %1784 }
 0x4b9   :  { %v1241_v60 = vmul.f32 %v16135_v14, %v17205_v22  ;;  %v337_v22 = vld [vmem:[%s16774_s25 + $0x18] sm:$0xff] }
 0x4ba   :  { %14967 = vmatmul.mubr.msk.f32.vlgmr.msra.gmra.mxu1 %vm1155_vm9, %v1235_v8  ;;  %14972 = vmatmul.mubr.msk.f32.vlgmr.msra.gmra.mxu0 %vm1155_vm9, %v1237_v16 }
 0x4bb   :  { %v16137_v27 = vpop.eup %16136  ;;  %14975 = vmatpush3.msra.mxu1 %v1631_v7  ;;  %14980 = vmatpush3.msra.mxu0 %v1708_v26 }
 0x4bc   :  { %14976 = vmatprep.mubr.msk.f32.mxu1 %vm16737_vm0, %v16736_v1  ;;  %14981 = vmatprep.mubr.msk.f32.mxu0 %vm16737_vm0, %v16736_v1  ;;  %v1239_v31 = vmul.f32 %v16137_v27, %v17211_v36 }
 0x4bd   :  { %14984 = vmatprep.subr.mxu1 %v16736_v1  ;;  %14989 = vmatprep.subr.mxu0 %v16736_v1 }
 0x4be   :  { %14977 = vmatmul.mubr.msk.f32.vlgmr.msra.gmra.mxu1 %vm1155_vm9, %v1239_v31  ;;  %14982 = vmatmul.mubr.msk.f32.vlgmr.msra.gmra.mxu0 %vm1155_vm9, %v1241_v60 }
 0x4bf   :  { %v16139_v34 = vpop.eup %16138  ;;  %14985 = vmatpush3.msra.mxu1 %v1785_v20  ;;  %14986 = vmatprep.mubr.msk.f32.mxu1 %vm16737_vm0, %v16736_v1  ;;  %v14102_v20 = vld [vmem:[%s16779_s29] ss:$0 sm:$0xff] }
 0x4c0   :  { %v1243_v36 = vmul.f32 %v16139_v34, %v17215_v42  ;;  %14997 = vmatprep.mubr.msk.f32.mxu0 %vm16737_vm0, %v16736_v1  ;;  %15000 = vmatprep.subr.mxu1 %v16736_v1  ;;  %v334_v42 = vld [vmem:[%s16774_s25] sm:$0xff] }
 0x4c1   :  { %14990 = vmatpush3.msra.mxu0 %v337_v22 }
 0x4c2   :  { %14987 = vmatmul.mubr.msk.f32.vlgmr.msra.gmra.mxu1 %vm1155_vm9, %v1243_v36  ;;  %14991 = vmatprep.subr.mxu0 %v16736_v1 }
 0x4c3   :  { %15008 = vmatprep.mubr.msk.f32.mxu1 %vm16737_vm0, %v16736_v1  ;;  %14992 = vmatpush3.msra.mxu0 %v336_v23 }
 0x4c4   :  { %14993 = vmatprep.subr.mxu0 %v16736_v1 }
 0x4c5   :  { %14994 = vmatpush3.msra.mxu0 %v335_v43 }
 0x4c6   :  { %14995 = vmatprep.subr.mxu0 %v16736_v1 }
 0x4c7   :  { %14996 = vmatpush3.msra.mxu0 %v334_v42 }
 0x51a   :  { %v1317_v40 = vpop.f32.mrf.mxu0 }
 0x51b   :  { %v1860_v49 = vsel %vm436_vm10, %v1317_v40, 0.0 }
 0x51c   :  { %v14953_v44 = vpop.f32.mrf.mxu0 }
 0x56e   :  { %v1394_v45 = vpop.f32.mrf.mxu1 }
 0x56f   :  { %v1861_v47 = vsel %vm436_vm10, %v1394_v45, 0.0 }
 0x570   :  { %v14958_v46 = vpop.f32.mrf.mxu1  ;;  %v1862_v51 = vadd.f32 %v1861_v47, %v1860_v49  ;;  %v347_v47 = vld [vmem:[%s16794_s14 + $0x18] sm:$0xff]  ;;  %v427_v49 = vld [vmem:[%s16754_s9] sm:$0xff] }
 0x571   :  { %15011 = vmatprep.subr.mxu0 %v347_v47 }
 0x576   :  { %v1471_v48 = vpop.f32.mrf.mxu0 }
 0x577   :  { %v1863_v50 = vsel %vm436_vm10, %v1471_v48, 0.0  ;;  %v346_v48 = vld [vmem:[%s16794_s14 + $0x10] sm:$0xff] }
 0x578   :  { %v14963_v15 = vpop.f32.mrf.mxu0  ;;  %v1864_v52 = vadd.f32 %v1863_v50, %v1862_v51  ;;  %v342_v50 = vld [vmem:[%s19338_s12 + $0x18] sm:$0xff]  ;;  %v341_v51 = vld [vmem:[%s19338_s12 + $0x10] sm:$0xff] }
 0x579   :  { %15001 = vmatpush3.msra.mxu1 %v342_v50  ;;  %v344_v15 = vld [vmem:[%s16794_s14] sm:$0xff] }
 0x57a   :  { %v1548_v53 = vpop.f32.mrf.mxu1  ;;  %v1625_v54 = vpop.f32.mrf.mxu0  ;;  %15002 = vmatprep.subr.mxu1 %v16736_v1 }
 0x57b   :  { %v1865_v55 = vsel %vm436_vm10, %v1548_v53, 0.0  ;;  %v1867_v63 = vsel %vm436_vm10, %v1625_v54, 0.0  ;;  %15003 = vmatpush3.msra.mxu1 %v341_v51  ;;  %v428_v53 = vld [vmem:[%s16754_s9 + $0x8] sm:$0x3]  ;;  %v339_v54 = vld [vmem:[%s19338_s12] sm:$0xff] }
 0x57c   :  { %v1866_v57 = vadd.f32 %v1865_v55, %v1864_v52  ;;  %v14968_v37 = vpop.f32.mrf.mxu1  ;;  %v14973_v58 = vpop.f32.mrf.mxu0  ;;  %v340_v52 = vld [vmem:[%s19338_s12 + $0x8] sm:$0xff]  ;;  %15004 = vmatprep.subr.mxu1 %v16736_v1  ;;  %v16093_v55 = vpack.i.bf16 %v17026_v9, %v17015_v6  ;;  %v14104_v9 = vld [vmem:[%s19339_s4] ss:$0 sm:$0xff] }
 0x57d   :  { %15005 = vmatpush3.msra.mxu1 %v340_v52  ;;  %v16098_v37 = vpack.i.bf16 %v17116_v30, %v17039_v11  ;;  %v16103_v58 = vpack.i.bf16 %v17129_v33, %v17047_v12  ;;  %v14108_v11 = vld [vmem:[%s19341_s26] ss:$0 sm:$0xff] }
 0x57e   :  { %v1868_v0 = vadd.f32 %v1867_v63, %v1866_v57  ;;  %v1702_v2 = vpop.f32.mrf.mxu1  ;;  %v1779_v4 = vpop.f32.mrf.mxu0  ;;  %15006 = vmatprep.subr.mxu1 %v16736_v1  ;;  %v16088_v57 = vpack.i.bf16 %v17065_v19, %v17006_v3  ;;  %v14105_v3 = vld [vmem:[%s19340_s23] ss:$0 sm:$0xff] }
 0x57f   :  { %v1869_v5 = vsel %vm436_vm10, %v1702_v2, 0.0  ;;  %v1871_v16 = vsel %vm436_vm10, %v1779_v4, 0.0  ;;  %15007 = vmatpush3.msra.mxu1 %v339_v54 }
 0x580   :  { %v1870_v13 = vadd.f32 %v1869_v5, %v1868_v0  ;;  %v14978_v7 = vpop.f32.mrf.mxu1  ;;  %v14983_v8 = vpop.f32.mrf.mxu0  ;;  %15022 = vmatprep.subr.mxu1 %v16736_v1 }
 0x581   :  { %v14106_v7 = vld [vmem:[%s19342_s28] ss:$0 sm:$0xff] }
 0x582   :  { %v1872_v14 = vadd.f32 %v1871_v16, %v1870_v13  ;;  %v1856_v26 = vpop.f32.mrf.mxu1 }
 0x583   :  { %v1873_v27 = vsel %vm436_vm10, %v1856_v26, 0.0 }
 0x584   :  { %v1874_v31 = vadd.f32 %v1873_v27, %v1872_v14  ;;  %v14988_v60 = vpop.f32.mrf.mxu1 }
 0x586   :  { %14998 = vmatmul.mubr.msk.f32.vlgmr.msra.gmra.mxu0 %vm436_vm10, %v1874_v31 }
 0x587   :  { %15012 = vmatpush3.msra.mxu0 %v347_v47  ;;  %15019 = vmatprep.mubr.msk.f32.mxu0 %vm436_vm10, %v427_v49 }
 0x588   :  { %15013 = vmatprep.subr.mxu0 %v346_v48 }
 0x589   :  { %15014 = vmatpush3.msra.mxu0 %v346_v48 }
 0x646   :  { %v1950_v34 = vpop.f32.mrf.mxu0 }
 0x647   :  { %v1951_v36 = vadd.f32 %v14102_v20, %v1950_v34 }
 0x648   :  { %v14999_v22 = vpop.f32.mrf.mxu0 }
 0x649   :  { %v1954_v23 = vadd.f32 %v1951_v36, %v17029_v10  ;;  %v345_v10 = vld [vmem:[%s16794_s14 + $0x8] sm:$0xff] }
 0x64a   :  { %15015 = vmatprep.subr.mxu0 %v345_v10 }
 0x64b   :  { %v1955_v43 = vsel %vm436_vm10, %v1954_v23, 0.0  ;;  %15016 = vmatpush3.msra.mxu0 %v345_v10 }
 0x64c   :  { %1956 = vadd.xlane.f32.xlu1 %v1955_v43  ;;  %15017 = vmatprep.subr.mxu0 %v344_v15 }
 0x64d   :  { %15018 = vmatpush3.msra.mxu0 %v344_v15 }
 0x64e   :  { %15020 = vmatmul.mubr.msk.f32.vlgmr.msra.gmra.mxu0 %vm436_vm10, %v428_v53  ;;  %15029 = vmatprep.subr.mxu0 %v16736_v1 }
 0x64f   :  { %15033 = vmatprep.mubr.msk.f32.mxu0 %vm16737_vm0, %v16736_v1 }
 0x65d   :  { %16094 = vrot.lane.b32.xlu1 %v16093_v55, %s16740_s24 }
 0x661   :  { %16099 = vrot.lane.b32.xlu1 %v16098_v37, %s16740_s24 }
 0x6d5   :  { %v1957_v42 = vpop.xlane.xlu1 %1956 }
 0x6d6   :  { %v1959_v40 = vmul.f32 0.03125, %v1957_v42 }
 0x6d8   :  { %v1960_v44 = vsub.f32 %v1954_v23, %v1959_v40 }
 0x6da   :  { %v1961_v45 = vmul.f32 %v1960_v44, %v1960_v44 }
 0x6dc   :  { %v1962_v46 = vsel %vm436_vm10, %v1961_v45, 0.0 }
 0x6dd   :  { %1963 = vadd.xlane.f32.xlu0 %v1962_v46 }
 0x6f3   :  { %16089 = vrot.lane.b32.xlu0 %v16088_v57, %s16740_s24 }
 0x6f7   :  { %16104 = vrot.lane.b32.xlu0 %v16103_v58, %s16740_s24  ;;  %s19356_s24 = sld [smem:[#allocation41_spill]] }
 0x70e   :  { %v15021_v12 = vpop.f32.mrf.mxu0 }
 0x70f   :  { %v17322_v30 = vadd.f32 %v15021_v12, %v14108_v11 }
 0x710   :  { %v2140_v33 = vpop.f32.mrf.mxu0 }
 0x711   :  { %15030 = vmatpush3.xpose.msk.msra.mxu0 %vm436_vm10, %v17322_v30  ;;  %v17328_v13 = vadd.f32 %v14108_v11, %v2140_v33  ;;  %v16095_v11 = vpop.permute.xlu1 %16094 }
 0x712   :  { %15031 = vmatprep.subr.mxu0 %v16736_v1  ;;  %v17450_v12 = vunpack.i.l.bf16 %v16095_v11 }
 0x715   :  { %15032 = vmatpush3.xpose.msk.msra.mxu0 %vm436_vm10, %v17328_v13 }
 0x716   :  { %15043 = vmatprep.subr.mxu0 %v16736_v1 }
 0x766   :  { %v1964_v63 = vpop.xlane.xlu0 %1963 }
 0x767   :  { %v1965_v0 = vmul.f32 0.03125, %v1964_v63 }
 0x769   :  { %v1966_v2 = vadd.f32 1e-05, %v1965_v0 }
 0x76b   :  { %16140 = vrsqrt.f32 %v1966_v2  ;;  %v16090_v2 = vpop.permute.xlu0 %16089 }
 0x778   :  { %v16141_v6 = vpop.eup %16140 }
 0x779   :  { %v1968_v4 = vmul.f32 %v16141_v6, %v1960_v44  ;;  %v17437_v6 = vunpack.i.l.bf16 %v16090_v2 }
 0x77b   :  { %v1975_v19 = vmul.f32 %v14104_v9, %v1968_v4  ;;  %v17439_v9 = vunpack.i.h.bf16 %v16090_v2  ;;  %v2181_v4 = vmul.f32 %v17437_v6, %v17328_v13 }
 0x77d   :  { %v17315_v5 = vadd.f32 %v14105_v3, %v1975_v19  ;;  %v2184_v3 = vmul.f32 %v17439_v9, %v17322_v30  ;;  %v2182_v19 = vmul.f32 %v17437_v6, %v17322_v30  ;;  %v2183_v33 = vmul.f32 %v17439_v9, %v17328_v13 }
 0x77f   :  { %15009 = vmatmul.mubr.msk.f32.vlgmr.msra.gmra.mxu1 %vm436_vm10, %v17315_v5 }
 0x780   :  { %15026 = vmatprep.mubr.msk.f32.mxu1 %vm16737_vm0, %v16736_v1  ;;  %15023 = vmatpush3.xpose.msk.msra.mxu1 %vm436_vm10, %v17322_v30 }
 0x781   :  { %15024 = vmatprep.subr.mxu1 %v16736_v1 }
 0x784   :  { %15025 = vmatpush3.xpose.msk.msra.mxu1 %vm436_vm10, %v17328_v13 }
 0x785   :  { %15036 = vmatprep.subr.mxu1 %v16736_v1 }
 0x83f   :  { %v2058_v8 = vpop.f32.mrf.mxu1 }
 0x840   :  { %v2059_v16 = vadd.f32 %v14106_v7, %v2058_v8  ;;  %v17455_v7 = vunpack.i.h.bf16 %v16095_v11  ;;  %v2185_v8 = vmul.f32 %v17450_v12, %v17328_v13 }
 0x841   :  { %v15010_v14 = vpop.f32.mrf.mxu1 }
 0x842   :  { %v2149_v26 = vmul.f32 %v2059_v16, %v17059_v17  ;;  %v2150_v27 = vmul.f32 %v2059_v16, %v17079_v24  ;;  %v2151_v31 = vmul.f32 %v2059_v16, %v17088_v25  ;;  %v2152_v60 = vmul.f32 %v2059_v16, %v17108_v28 }
 0x843   :  { %v2153_v20 = vmul.f32 %v2059_v16, %v17062_v18  ;;  %v2154_v34 = vmul.f32 %v2059_v16, %v17126_v32  ;;  %v2155_v36 = vmul.f32 %v2059_v16, %v17070_v21  ;;  %v2156_v22 = vmul.f32 %v2059_v16, %v17139_v35  ;;  %v16100_v16 = vpop.permute.xlu1 %16099 }
 0x844   :  { %15027 = vmatmul.mubr.msk.f32.vlgmr.msra.gmra.mxu1 %vm436_vm10, %v2149_v26  ;;  %15034 = vmatmul.mubr.msk.f32.vlgmr.msra.gmra.mxu0 %vm436_vm10, %v2150_v27  ;;  %v17460_v14 = vunpack.i.l.bf16 %v16100_v16  ;;  %v2187_v26 = vmul.f32 %v17455_v7, %v17328_v13  ;;  %v17465_v27 = vunpack.i.h.bf16 %v16100_v16 }
 0x845   :  { %15037 = vmatpush3.xpose.msk.msra.mxu1 %vm436_vm10, %v17322_v30  ;;  %15044 = vmatpush3.xpose.msk.msra.mxu0 %vm436_vm10, %v17322_v30 }
 0x846   :  { %15038 = vmatprep.subr.mxu1 %v16736_v1  ;;  %15045 = vmatprep.subr.mxu0 %v16736_v1 }
 0x847   :  { %15040 = vmatprep.mubr.msk.f32.mxu1 %vm16737_vm0, %v16736_v1  ;;  %15047 = vmatprep.mubr.msk.f32.mxu0 %vm16737_vm0, %v16736_v1 }
 0x849   :  { %15039 = vmatpush3.xpose.msk.msra.mxu1 %vm436_vm10, %v17328_v13  ;;  %15046 = vmatpush3.xpose.msk.msra.mxu0 %vm436_vm10, %v17328_v13 }
 0x84a   :  { %15050 = vmatprep.subr.mxu1 %v16736_v1  ;;  %15057 = vmatprep.subr.mxu0 %v16736_v1 }
 0x84c   :  { %15041 = vmatmul.mubr.msk.f32.vlgmr.msra.gmra.mxu1 %vm436_vm10, %v2151_v31  ;;  %15048 = vmatmul.mubr.msk.f32.vlgmr.msra.gmra.mxu0 %vm436_vm10, %v2152_v60  ;;  %v2189_v31 = vmul.f32 %v17460_v14, %v17328_v13  ;;  %v17469_v60 = vpop.permute.xlu0 %16104 }
 0x84d   :  { %15051 = vmatpush3.xpose.msk.msra.mxu1 %vm436_vm10, %v17322_v30  ;;  %15058 = vmatpush3.xpose.msk.msra.mxu0 %vm436_vm10, %v17322_v30 }
 0x84e   :  { %15052 = vmatprep.subr.mxu1 %v16736_v1  ;;  %15059 = vmatprep.subr.mxu0 %v16736_v1 }
 0x84f   :  { %15054 = vmatprep.mubr.msk.f32.mxu1 %vm16737_vm0, %v16736_v1  ;;  %15061 = vmatprep.mubr.msk.f32.mxu0 %vm16737_vm0, %v16736_v1 }
 0x851   :  { %15053 = vmatpush3.xpose.msk.msra.mxu1 %vm436_vm10, %v17328_v13  ;;  %15060 = vmatpush3.xpose.msk.msra.mxu0 %vm436_vm10, %v17328_v13 }
 0x852   :  { %15064 = vmatprep.subr.mxu1 %v16736_v1  ;;  %15071 = vmatprep.subr.mxu0 %v16736_v1 }
 0x854   :  { %15055 = vmatmul.mubr.msk.f32.vlgmr.msra.gmra.mxu1 %vm436_vm10, %v2153_v20  ;;  %15062 = vmatmul.mubr.msk.f32.vlgmr.msra.gmra.mxu0 %vm436_vm10, %v2154_v34  ;;  %v17473_v20 = vunpack.i.l.bf16 %v17469_v60  ;;  %v2191_v34 = vmul.f32 %v17465_v27, %v17328_v13 }
 0x855   :  { %15065 = vmatpush3.xpose.msk.msra.mxu1 %vm436_vm10, %v17322_v30  ;;  %15072 = vmatpush3.xpose.msk.msra.mxu0 %vm436_vm10, %v17322_v30 }
 0x856   :  { %15066 = vmatprep.subr.mxu1 %v16736_v1  ;;  %15073 = vmatprep.subr.mxu0 %v16736_v1 }
 0x857   :  { %15068 = vmatprep.mubr.msk.f32.mxu1 %vm16737_vm0, %v16736_v1  ;;  %15075 = vmatprep.mubr.msk.f32.mxu0 %vm16737_vm0, %v16736_v1 }
 0x859   :  { %15067 = vmatpush3.xpose.msk.msra.mxu1 %vm436_vm10, %v17328_v13  ;;  %15074 = vmatpush3.xpose.msk.msra.mxu0 %vm436_vm10, %v17328_v13 }
 0x85a   :  { %15078 = vmatprep.subr.mxu1 %v16736_v1  ;;  %15092 = vmatprep.subr.mxu0 %v16736_v1 }
 0x85c   :  { %15069 = vmatmul.mubr.msk.f32.vlgmr.msra.gmra.mxu1 %vm436_vm10, %v2155_v36  ;;  %15076 = vmatmul.mubr.msk.f32.vlgmr.msra.gmra.mxu0 %vm436_vm10, %v2156_v22  ;;  %v2193_v36 = vmul.f32 %v17473_v20, %v17328_v13 }
 0x85d   :  { %15082 = vmatprep.mubr.msk.f32.mxu1 %vm16737_vm0, %v16736_v1  ;;  %15096 = vmatprep.mubr.msk.f32.mxu0 %vm16737_vm0, %v16736_v1 }
 0x904   :  { %v17407_v23 = vpop.f32.mrf.mxu1  ;;  %v17409_v43 = vpop.f32.mrf.mxu0 }
 0x905   :  { %v2791_v42 = vsel %vm2787_vm11, %v17409_v43, -inf  ;;  %v2788_v40 = vsel %vm2787_vm11, %v17407_v23, -inf }
 0x906   :  { %2792 = vmax.xlane.f32.xlu1 %v2791_v42  ;;  %v15035_v44 = vpop.f32.mrf.mxu0  ;;  %2789 = vmax.xlane.f32.xlu0 %v2788_v40  ;;  %v15028_v45 = vpop.f32.mrf.mxu1  ;;  %v2186_v42 = vmul.f32 %v17450_v12, %v17322_v30  ;;  %v2188_v40 = vmul.f32 %v17455_v7, %v17322_v30 }
 0x907   :  { %v2190_v44 = vmul.f32 %v17460_v14, %v17322_v30  ;;  %v2192_v45 = vmul.f32 %v17465_v27, %v17322_v30 }
 0x90c   :  { %v17415_v46 = vpop.f32.mrf.mxu1  ;;  %v17417_v47 = vpop.f32.mrf.mxu0 }
 0x90d   :  { %v2797_v48 = vsel %vm2787_vm11, %v17417_v47, -inf  ;;  %v2794_v49 = vsel %vm2787_vm11, %v17415_v46, -inf }
 0x90e   :  { %2798 = vmax.xlane.f32.xlu1 %v2797_v48  ;;  %v15049_v10 = vpop.f32.mrf.mxu0  ;;  %2795 = vmax.xlane.f32.xlu0 %v2794_v49  ;;  %v15042_v50 = vpop.f32.mrf.mxu1  ;;  %v2194_v48 = vmul.f32 %v17473_v20, %v17322_v30 }
 0x914   :  { %v17423_v51 = vpop.f32.mrf.mxu1  ;;  %v17425_v15 = vpop.f32.mrf.mxu0 }
 0x915   :  { %v2803_v52 = vsel %vm2787_vm11, %v17425_v15, -inf  ;;  %v2800_v53 = vsel %vm2787_vm11, %v17423_v51, -inf }
 0x916   :  { %2804 = vmax.xlane.f32.xlu1 %v2803_v52  ;;  %v15063_v54 = vpop.f32.mrf.mxu0  ;;  %2801 = vmax.xlane.f32.xlu0 %v2800_v53  ;;  %v15056_v55 = vpop.f32.mrf.mxu1 }
 0x91c   :  { %v17431_v57 = vpop.f32.mrf.mxu1  ;;  %v17433_v37 = vpop.f32.mrf.mxu0 }
 0x91d   :  { %v2806_v58 = vsel %vm2787_vm11, %v17431_v57, -inf  ;;  %v2809_v22 = vsel %vm2787_vm11, %v17433_v37, -inf }
 0x91e   :  { %v15077_v63 = vpop.f32.mrf.mxu0  ;;  %2807 = vmax.xlane.f32.xlu0 %v2806_v58  ;;  %v15070_v0 = vpop.f32.mrf.mxu1 }
 0x927   :  { %2878 = vrot.lane.b32.xlu1 %v2181_v4, %s19302_s6 }
 0x92b   :  { %2963 = vrot.lane.b32.xlu1 %v2184_v3, %s19302_s6 }
 0x934   :  { %2880 = vrot.lane.b32.xlu0 %v2182_v19, %s19302_s6 }
 0x938   :  { %2961 = vrot.lane.b32.xlu0 %v2183_v33, %s19302_s6 }
 0x93c   :  { %3043 = vrot.lane.b32.xlu0 %v2185_v8, %s19302_s6 }
 0x940   :  { %3125 = vrot.lane.b32.xlu0 %v2187_v26, %s19302_s6 }
 0x944   :  { %3207 = vrot.lane.b32.xlu0 %v2189_v31, %s19302_s6 }
 0x948   :  { %3289 = vrot.lane.b32.xlu0 %v2191_v34, %s19302_s6 }
 0x94c   :  { %3371 = vrot.lane.b32.xlu0 %v2193_v36, %s19302_s6 }
 0x94f   :  { %2810 = vmax.xlane.f32.xlu1 %v2809_v22 }
 0x960   :  { %3045 = vrot.lane.b32.xlu1 %v2186_v42, %s19302_s6 }
 0x964   :  { %3127 = vrot.lane.b32.xlu1 %v2188_v40, %s19302_s6 }
 0x968   :  { %3209 = vrot.lane.b32.xlu1 %v2190_v44, %s19302_s6 }
 0x96c   :  { %3291 = vrot.lane.b32.xlu1 %v2192_v45, %s19302_s6 }
 0x970   :  { %3373 = vrot.lane.b32.xlu1 %v2194_v48, %s19302_s6 }
 0x98f   :  { %v2793_v49 = vpop.xlane.xlu1 %2792  ;;  %v2790_v10 = vpop.xlane.xlu0 %2789 }
 0x990   :  { %v2813_v50 = vsub.f32 %v17409_v43, %v2793_v49  ;;  %v2812_v52 = vsub.f32 %v17407_v23, %v2790_v10 }
 0x992   :  { %v2822_v53 = vmul.f32 1.442695, %v2813_v50  ;;  %v2820_v54 = vmul.f32 1.442695, %v2812_v52  ;;  %v17537_v50 = vunpack.i.h.bf16 %v17469_v60 }
 0x994   :  { %16142 = vpow2.f32 %v2822_v53  ;;  %v2195_v52 = vmul.f32 %v17537_v50, %v17328_v13 }
 0x995   :  { %16144 = vpow2.f32 %v2820_v54 }
 0x997   :  { %v2799_v55 = vpop.xlane.xlu1 %2798  ;;  %v2796_v58 = vpop.xlane.xlu0 %2795 }
 0x998   :  { %v2815_v63 = vsub.f32 %v17417_v47, %v2799_v55  ;;  %v2814_v0 = vsub.f32 %v17415_v46, %v2796_v58 }
 0x99a   :  { %v2826_v2 = vmul.f32 1.442695, %v2815_v63  ;;  %v2824_v4 = vmul.f32 1.442695, %v2814_v0 }
 0x99c   :  { %16146 = vpow2.f32 %v2826_v2 }
 0x99d   :  { %16148 = vpow2.f32 %v2824_v4 }
 0x99f   :  { %v2805_v3 = vpop.xlane.xlu1 %2804  ;;  %v2802_v19 = vpop.xlane.xlu0 %2801 }
 0x9a0   :  { %v2817_v43 = vsub.f32 %v17425_v15, %v2805_v3  ;;  %v2816_v23 = vsub.f32 %v17423_v51, %v2802_v19 }
 0x9a1   :  { %v17504_v11 = vpop.eup %16142 }
 0x9a2   :  { %v17506_v33 = vpop.eup %16144  ;;  %v2830_v8 = vmul.f32 1.442695, %v2817_v43  ;;  %v2828_v16 = vmul.f32 1.442695, %v2816_v23  ;;  %v2839_v47 = vsel %vm2787_vm11, %v17504_v11, 0.0 }
 0x9a3   :  { %2840 = vadd.xlane.f32.xlu0 %v2839_v47  ;;  %v2836_v46 = vsel %vm2787_vm11, %v17506_v33, 0.0  ;;  %v2879_v40 = vpop.permute.xlu1 %2878 }
 0x9a4   :  { %16150 = vpow2.f32 %v2830_v8  ;;  %2837 = vadd.xlane.f32.xlu1 %v2836_v46 }
 0x9a5   :  { %16152 = vpow2.f32 %v2828_v16 }
 0x9a7   :  { %v2808_v26 = vpop.xlane.xlu0 %2807  ;;  %v2964_v53 = vpop.permute.xlu1 %2963 }
 0x9a8   :  { %v2818_v15 = vsub.f32 %v17431_v57, %v2808_v26 }
 0x9a9   :  { %v17513_v51 = vpop.eup %16146 }
 0x9aa   :  { %v17515_v31 = vpop.eup %16148  ;;  %v2832_v34 = vmul.f32 1.442695, %v2818_v15  ;;  %v2845_v36 = vsel %vm2787_vm11, %v17513_v51, 0.0 }
 0x9ab   :  { %v2881_v22 = vpop.permute.xlu0 %2880  ;;  %v2842_v42 = vsel %vm2787_vm11, %v17515_v31, 0.0  ;;  %2846 = vadd.xlane.f32.xlu1 %v2845_v36 }
 0x9ac   :  { %16154 = vpow2.f32 %v2832_v34  ;;  %2843 = vadd.xlane.f32.xlu0 %v2842_v42  ;;  %15079 = vmatpush3.msk.msra.mxu1 %vm2886_vm12, %v2881_v22 }
 0x9ad   :  { %15080 = vmatprep.subr.mxu1 %v16736_v1 }
 0x9ae   :  { %15081 = vmatpush3.msra.mxu1 %v2879_v40 }
 0x9af   :  { %15085 = vmatprep.subr.mxu1 %v16736_v1  ;;  %v2962_v54 = vpop.permute.xlu0 %2961 }
 0x9b1   :  { %v17524_v57 = vpop.eup %16150 }
 0x9b2   :  { %v17526_v44 = vpop.eup %16152  ;;  %v2851_v45 = vsel %vm2787_vm11, %v17524_v57, 0.0 }
 0x9b3   :  { %v2848_v48 = vsel %vm2787_vm11, %v17526_v44, 0.0  ;;  %2852 = vadd.xlane.f32.xlu1 %v2851_v45  ;;  %v3044_v2 = vpop.permute.xlu0 %3043 }
 0x9b4   :  { %2849 = vadd.xlane.f32.xlu0 %v2848_v48 }
 0x9b7   :  { %v3126_v4 = vpop.permute.xlu0 %3125 }
 0x9b9   :  { %v17532_v49 = vpop.eup %16154 }
 0x9ba   :  { %v2854_v10 = vsel %vm2787_vm11, %v17532_v49, 0.0 }
 0x9bb   :  { %2855 = vadd.xlane.f32.xlu0 %v2854_v10  ;;  %v3208_v19 = vpop.permute.xlu0 %3207 }
 0x9bf   :  { %v3290_v23 = vpop.permute.xlu0 %3289 }
 0x9c3   :  { %v3372_v16 = vpop.permute.xlu0 %3371 }
 0x9d1   :  { %3453 = vrot.lane.b32.xlu0 %v2195_v52, %s19302_s6 }
 0x9d8   :  { %v2811_v55 = vpop.xlane.xlu1 %2810 }
 0x9d9   :  { %v2819_v58 = vsub.f32 %v17433_v37, %v2811_v55  ;;  %v2196_v37 = vmul.f32 %v17537_v50, %v17322_v30 }
 0x9db   :  { %v2834_v63 = vmul.f32 1.442695, %v2819_v58 }
 0x9dc   :  { %v3046_v0 = vpop.permute.xlu1 %3045 }
 0x9dd   :  { %16156 = vpow2.f32 %v2834_v63  ;;  %15093 = vmatpush3.msk.msra.mxu0 %vm2886_vm12, %v3046_v0 }
 0x9de   :  { %15094 = vmatprep.subr.mxu0 %v16736_v1 }
 0x9df   :  { %15095 = vmatpush3.msra.mxu0 %v3044_v2  ;;  %v352_v2 = vld [vmem:[%s19343_s1 + $0x18] sm:$0xff] }
 0x9e0   :  { %15106 = vmatprep.subr.mxu0 %v16736_v1  ;;  %v3128_v3 = vpop.permute.xlu1 %3127 }
 0x9e4   :  { %v3210_v43 = vpop.permute.xlu1 %3209 }
 0x9e8   :  { %v3292_v8 = vpop.permute.xlu1 %3291 }
 0x9ea   :  { %v17546_v60 = vpop.eup %16156 }
 0x9eb   :  { %v2857_v13 = vsel %vm2787_vm11, %v17546_v60, 0.0 }
 0x9ec   :  { %2858 = vadd.xlane.f32.xlu1 %v2857_v13  ;;  %v3374_v47 = vpop.permute.xlu1 %3373  ;;  %v351_v13 = vld [vmem:[%s19343_s1 + $0x10] sm:$0xff] }
 0x9fd   :  { %3455 = vrot.lane.b32.xlu1 %v2196_v37, %s19302_s6  ;;  %v350_v37 = vld [vmem:[%s19343_s1 + $0x8] sm:$0xff] }
 0xa2c   :  { %v2841_v46 = vpop.xlane.xlu0 %2840 }
 0xa2d   :  { %v2838_v26 = vpop.xlane.xlu1 %2837 }
 0xa2e   :  { %16158 = vrcp.f32 %v2838_v26 }
 0xa2f   :  { %16160 = vrcp.f32 %v2841_v46 }
 0xa34   :  { %v2847_v15 = vpop.xlane.xlu1 %2846 }
 0xa35   :  { %v2844_v34 = vpop.xlane.xlu0 %2843  ;;  %16162 = vrcp.f32 %v2847_v15 }
 0xa36   :  { %16164 = vrcp.f32 %v2844_v34 }
 0xa3b   :  { %v16159_v36 = vpop.eup %16158 }
 0xa3c   :  { %v2853_v30 = vpop.xlane.xlu1 %2852  ;;  %v2861_v22 = vmul.f32 %v16159_v36, %v17506_v33  ;;  %v16161_v42 = vpop.eup %16160 }
 0xa3d   :  { %v2850_v40 = vpop.xlane.xlu0 %2849  ;;  %16166 = vrcp.f32 %v2853_v30  ;;  %v2863_v45 = vmul.f32 %v16161_v42, %v17504_v11 }
 0xa3e   :  { %16168 = vrcp.f32 %v2850_v40  ;;  %15083 = vmatmul.mubr.msk.f32.vlgmr.msra.gmra.mxu1 %vm2787_vm11, %v2861_v22 }
 0xa3f   :  { %15086 = vmatpush3.msk.msra.mxu1 %vm2886_vm12, %v2964_v53  ;;  %15089 = vmatprep.mubr.msk.f32.mxu1 %vm16737_vm0, %v16736_v1 }
 0xa40   :  { %15087 = vmatprep.subr.mxu1 %v16736_v1 }
 0xa41   :  { %15088 = vmatpush3.msra.mxu1 %v2962_v54 }
 0xa42   :  { %v16163_v48 = vpop.eup %16162  ;;  %15099 = vmatprep.subr.mxu1 %v16736_v1  ;;  %15090 = vmatmul.mubr.msk.f32.vlgmr.msra.gmra.mxu1 %vm2787_vm11, %v2863_v45 }
 0xa43   :  { %v16165_v33 = vpop.eup %16164  ;;  %15100 = vmatpush3.msk.msra.mxu1 %vm2886_vm12, %v3128_v3  ;;  %15103 = vmatprep.mubr.msk.f32.mxu1 %vm16737_vm0, %v16736_v1  ;;  %v2867_v10 = vmul.f32 %v16163_v48, %v17513_v51 }
 0xa44   :  { %15101 = vmatprep.subr.mxu1 %v16736_v1  ;;  %v2856_v52 = vpop.xlane.xlu0 %2855  ;;  %v2865_v53 = vmul.f32 %v16165_v33, %v17515_v31 }
 0xa45   :  { %16170 = vrcp.f32 %v2856_v52  ;;  %15102 = vmatpush3.msra.mxu1 %v3126_v4  ;;  %v349_v4 = vld [vmem:[%s19343_s1] sm:$0xff] }
 0xa46   :  { %15097 = vmatmul.mubr.msk.f32.vlgmr.msra.gmra.mxu0 %vm2787_vm11, %v2865_v53  ;;  %15113 = vmatprep.subr.mxu1 %v16736_v1 }
 0xa47   :  { %15107 = vmatpush3.msk.msra.mxu0 %vm2886_vm12, %v3210_v43  ;;  %15104 = vmatmul.mubr.msk.f32.vlgmr.msra.gmra.mxu1 %vm2787_vm11, %v2867_v10 }
 0xa48   :  { %15108 = vmatprep.subr.mxu0 %v16736_v1  ;;  %15114 = vmatpush3.msk.msra.mxu1 %vm2886_vm12, %v3292_v8  ;;  %v3454_v63 = vpop.permute.xlu0 %3453 }
 0xa49   :  { %15109 = vmatpush3.msra.mxu0 %v3208_v19  ;;  %15115 = vmatprep.subr.mxu1 %v16736_v1 }
 0xa4a   :  { %v16167_v11 = vpop.eup %16166  ;;  %15116 = vmatpush3.msra.mxu1 %v3290_v23  ;;  %15110 = vmatprep.mubr.msk.f32.mxu0 %vm16737_vm0, %v16736_v1 }
 0xa4b   :  { %v16169_v51 = vpop.eup %16168  ;;  %15117 = vmatprep.mubr.msk.f32.mxu1 %vm16737_vm0, %v16736_v1  ;;  %15120 = vmatprep.subr.mxu0 %v16736_v1  ;;  %v2871_v31 = vmul.f32 %v16167_v11, %v17524_v57 }
 0xa4c   :  { %v2869_v54 = vmul.f32 %v16169_v51, %v17526_v44  ;;  %15127 = vmatprep.subr.mxu1 %v16736_v1 }
 0xa4d   :  { %15118 = vmatmul.mubr.msk.f32.vlgmr.msra.gmra.mxu1 %vm2787_vm11, %v2871_v31 }
 0xa4e   :  { %15111 = vmatmul.mubr.msk.f32.vlgmr.msra.gmra.mxu0 %vm2787_vm11, %v2869_v54  ;;  %15131 = vmatprep.mubr.msk.f32.mxu1 %vm16737_vm0, %v16736_v1 }
 0xa4f   :  { %15121 = vmatpush3.msk.msra.mxu0 %vm2886_vm12, %v3374_v47  ;;  %15124 = vmatprep.mubr.msk.f32.mxu0 %vm16737_vm0, %v16736_v1 }
 0xa50   :  { %15122 = vmatprep.subr.mxu0 %v16736_v1 }
 0xa51   :  { %15123 = vmatpush3.msra.mxu0 %v3372_v16 }
 0xa52   :  { %v16171_v57 = vpop.eup %16170  ;;  %15134 = vmatprep.subr.mxu0 %v16736_v1 }
 0xa53   :  { %v2873_v44 = vmul.f32 %v16171_v57, %v17532_v49 }
 0xa55   :  { %15125 = vmatmul.mubr.msk.f32.vlgmr.msra.gmra.mxu0 %vm2787_vm11, %v2873_v44 }
 0xa56   :  { %15142 = vmatprep.mubr.msk.f32.mxu0 %vm16737_vm0, %v16736_v1  ;;  %15135 = vmatpush3.msra.mxu0 %v352_v2 }
 0xa57   :  { %15136 = vmatprep.subr.mxu0 %v16736_v1 }
 0xa58   :  { %15137 = vmatpush3.msra.mxu0 %v351_v13 }
 0xa59   :  { %15138 = vmatprep.subr.mxu0 %v16736_v1 }
 0xa5a   :  { %15139 = vmatpush3.msra.mxu0 %v350_v37 }
 0xa5b   :  { %15140 = vmatprep.subr.mxu0 %v16736_v1 }
 0xa5c   :  { %15141 = vmatpush3.msra.mxu0 %v349_v4 }
 0xa5d   :  { %15156 = vmatprep.subr.mxu0 %v16736_v1 }
 0xa75   :  { %v2859_v55 = vpop.xlane.xlu1 %2858 }
 0xa76   :  { %16172 = vrcp.f32 %v2859_v55 }
 0xa79   :  { %v3456_v58 = vpop.permute.xlu1 %3455 }
 0xa7a   :  { %15128 = vmatpush3.msk.msra.mxu1 %vm2886_vm12, %v3456_v58 }
 0xa7b   :  { %15129 = vmatprep.subr.mxu1 %v16736_v1 }
 0xa7c   :  { %15130 = vmatpush3.msra.mxu1 %v3454_v63  ;;  %v14151_v63 = vld [vmem:[%s19344_s2] ss:$0 sm:$0xff] }
 0xa7d   :  { %15145 = vmatprep.subr.mxu1 %v16736_v1 }
 0xa83   :  { %v16173_v49 = vpop.eup %16172 }
 0xa84   :  { %v2875_v0 = vmul.f32 %v16173_v49, %v17546_v60 }
 0xa86   :  { %15132 = vmatmul.mubr.msk.f32.vlgmr.msra.gmra.mxu1 %vm2787_vm11, %v2875_v0 }
 0xa87   :  { %15153 = vmatprep.mubr.msk.f32.mxu1 %vm16737_vm0, %v16736_v1 }
 0xafe   :  { %v2955_v60 = vpop.f32.mrf.mxu1 }
 0xaff   :  { %v3533_v42 = vsel %vm436_vm10, %v2955_v60, 0.0 }
 0xb00   :  { %v15084_v3 = vpop.f32.mrf.mxu1 }
 0xb02   :  { %v3037_v19 = vpop.f32.mrf.mxu1 }
 0xb03   :  { %v3534_v22 = vsel %vm436_vm10, %v3037_v19, 0.0 }
 0xb04   :  { %v15091_v43 = vpop.f32.mrf.mxu1  ;;  %v3535_v40 = vadd.f32 %v3534_v22, %v3533_v42 }
 0xb06   :  { %v3119_v23 = vpop.f32.mrf.mxu0 }
 0xb07   :  { %v3201_v8 = vpop.f32.mrf.mxu1  ;;  %v3536_v45 = vsel %vm436_vm10, %v3119_v23, 0.0  ;;  %v363_v23 = vld [vmem:[%s19345_s0 + $0x18] sm:$0xff] }
 0xb08   :  { %v15098_v16 = vpop.f32.mrf.mxu0  ;;  %v3537_v48 = vadd.f32 %v3536_v45, %v3535_v40  ;;  %v3538_v33 = vsel %vm436_vm10, %v3201_v8, 0.0  ;;  %v362_v8 = vld [vmem:[%s19345_s0 + $0x10] sm:$0xff]  ;;  %15146 = vmatpush3.msra.mxu1 %v363_v23  ;;  %v372_v40 = vld [vmem:[%s19348_s27 + $0x38] sm:$0xff] }
 0xb09   :  { %v15105_v47 = vpop.f32.mrf.mxu1  ;;  %15147 = vmatprep.subr.mxu1 %v16736_v1  ;;  %v361_v16 = vld [vmem:[%s19345_s0 + $0x8] sm:$0xff]  ;;  %v371_v45 = vld [vmem:[%s19348_s27 + $0x30] sm:$0xff] }
 0xb0a   :  { %v3539_v52 = vadd.f32 %v3538_v33, %v3537_v48  ;;  %15148 = vmatpush3.msra.mxu1 %v362_v8  ;;  %v370_v48 = vld [vmem:[%s19348_s27 + $0x28] sm:$0xff]  ;;  %v369_v33 = vld [vmem:[%s19348_s27 + $0x20] sm:$0xff] }
 0xb0b   :  { %15149 = vmatprep.subr.mxu1 %v16736_v1 }
 0xb0c   :  { %15150 = vmatpush3.msra.mxu1 %v361_v16 }
 0xb0d   :  { %v3365_v46 = vpop.f32.mrf.mxu1  ;;  %15151 = vmatprep.subr.mxu1 %v16736_v1 }
 0xb0e   :  { %v3283_v26 = vpop.f32.mrf.mxu0  ;;  %v3542_v11 = vsel %vm436_vm10, %v3365_v46, 0.0 }
 0xb0f   :  { %v15119_v15 = vpop.f32.mrf.mxu1  ;;  %v3540_v10 = vsel %vm436_vm10, %v3283_v26, 0.0 }
 0xb10   :  { %v15112_v34 = vpop.f32.mrf.mxu0  ;;  %v3541_v53 = vadd.f32 %v3540_v10, %v3539_v52  ;;  %v368_v10 = vld [vmem:[%s19348_s27 + $0x18] sm:$0xff]  ;;  %v367_v52 = vld [vmem:[%s19348_s27 + $0x10] sm:$0xff] }
 0xb11   :  { %v14153_v34 = vld [vmem:[%s19346_s20] ss:$0 sm:$0xff] }
 0xb12   :  { %v3543_v31 = vadd.f32 %v3542_v11, %v3541_v53  ;;  %v366_v53 = vld [vmem:[%s19348_s27 + $0x8] sm:$0xff]  ;;  %v365_v11 = vld [vmem:[%s19348_s27] sm:$0xff] }
 0xb15   :  { %v3447_v36 = vpop.f32.mrf.mxu0 }
 0xb16   :  { %v3544_v51 = vsel %vm436_vm10, %v3447_v36, 0.0 }
 0xb17   :  { %v15126_v30 = vpop.f32.mrf.mxu0  ;;  %v3545_v54 = vadd.f32 %v3544_v51, %v3543_v31  ;;  %v14155_v51 = vld [vmem:[%s19349_s10] ss:$0 sm:$0xff] }
 0xb18   :  { %v14154_v30 = vld [vmem:[%s19347_s7] ss:$0 sm:$0xff] }
 0xb46   :  { %v3529_v57 = vpop.f32.mrf.mxu1 }
 0xb47   :  { %v3546_v44 = vsel %vm436_vm10, %v3529_v57, 0.0 }
 0xb48   :  { %v3547_v55 = vadd.f32 %v3546_v44, %v3545_v54  ;;  %v15133_v58 = vpop.f32.mrf.mxu1 }
 0xb4a   :  { %15143 = vmatmul.mubr.msk.f32.vlgmr.msra.gmra.mxu0 %vm436_vm10, %v3547_v55 }
 0xb4b   :  { %15172 = vmatprep.mubr.msk.f32.mxu0 %vm16737_vm0, %v16736_v1  ;;  %15157 = vmatpush3.msra.mxu0 %v372_v40 }
 0xb4c   :  { %15158 = vmatprep.subr.mxu0 %v16736_v1 }
 0xb4d   :  { %15159 = vmatpush3.msra.mxu0 %v371_v45 }
 0xb4e   :  { %15160 = vmatprep.subr.mxu0 %v16736_v1 }
 0xb4f   :  { %15161 = vmatpush3.msra.mxu0 %v370_v48 }
 0xb50   :  { %15162 = vmatprep.subr.mxu0 %v16736_v1 }
 0xb51   :  { %15163 = vmatpush3.msra.mxu0 %v369_v33 }
 0xb52   :  { %15164 = vmatprep.subr.mxu0 %v16736_v1 }
 0xb53   :  { %15165 = vmatpush3.msra.mxu0 %v368_v10 }
 0xb54   :  { %15166 = vmatprep.subr.mxu0 %v16736_v1 }
 0xb55   :  { %15167 = vmatpush3.msra.mxu0 %v367_v52 }
 0xb56   :  { %15168 = vmatprep.subr.mxu0 %v16736_v1 }
 0xb57   :  { %15169 = vmatpush3.msra.mxu0 %v366_v53 }
 0xb58   :  { %15170 = vmatprep.subr.mxu0 %v16736_v1 }
 0xb59   :  { %15171 = vmatpush3.msra.mxu0 %v365_v11 }
 0xb5a   :  { %15196 = vmatprep.subr.mxu0 %v16736_v1 }
 0xc0a   :  { %v3623_v49 = vpop.f32.mrf.mxu0 }
 0xc0b   :  { %v3624_v0 = vadd.f32 %v14151_v63, %v3623_v49 }
 0xc0c   :  { %v15144_v2 = vpop.f32.mrf.mxu0 }
 0xc0d   :  { %v3627_v13 = vadd.f32 %v3624_v0, %v17315_v5  ;;  %v360_v5 = vld [vmem:[%s19345_s0] sm:$0xff] }
 0xc0e   :  { %15152 = vmatpush3.msra.mxu1 %v360_v5 }
 0xc0f   :  { %v3628_v37 = vsel %vm436_vm10, %v3627_v13, 0.0  ;;  %15175 = vmatprep.subr.mxu1 %v16736_v1 }
 0xc10   :  { %3629 = vadd.xlane.f32.xlu1 %v3628_v37 }
 0xc99   :  { %v3630_v4 = vpop.xlane.xlu1 %3629 }
 0xc9a   :  { %v3631_v60 = vmul.f32 0.03125, %v3630_v4 }
 0xc9c   :  { %v3632_v3 = vsub.f32 %v3627_v13, %v3631_v60 }
 0xc9e   :  { %v3633_v19 = vmul.f32 %v3632_v3, %v3632_v3 }
 0xca0   :  { %v3634_v43 = vsel %vm436_vm10, %v3633_v19, 0.0 }
 0xca1   :  { %3635 = vadd.xlane.f32.xlu0 %v3634_v43 }
 0xd2a   :  { %v3636_v47 = vpop.xlane.xlu0 %3635 }
 0xd2b   :  { %v3637_v46 = vmul.f32 0.03125, %v3636_v47 }
 0xd2d   :  { %v3638_v26 = vadd.f32 1e-05, %v3637_v46 }
 0xd2f   :  { %16174 = vrsqrt.f32 %v3638_v26 }
 0xd3c   :  { %v16175_v15 = vpop.eup %16174 }
 0xd3d   :  { %v3640_v36 = vmul.f32 %v16175_v15, %v3632_v3 }
 0xd3f   :  { %v3647_v22 = vmul.f32 %v14153_v34, %v3640_v36 }
 0xd41   :  { %v17636_v42 = vadd.f32 %v14154_v30, %v3647_v22  ;;  %v14159_v22 = vld [vmem:[%s19350_s11] ss:$0 sm:$0xff] }
 0xd43   :  { %15154 = vmatmul.mubr.msk.f32.vlgmr.msra.gmra.mxu1 %vm436_vm10, %v17636_v42 }
 0xd44   :  { %15183 = vmatprep.mubr.msk.f32.mxu1 %vm16737_vm0, %v16736_v1 }
 0xe03   :  { %v3730_v31 = vpop.f32.mrf.mxu1 }
 0xe04   :  { %v3731_v54 = vadd.f32 %v14155_v51, %v3730_v31 }
 0xe05   :  { %v15155_v57 = vpop.f32.mrf.mxu1 }
 0xe06   :  { %v3735_v44 = vmul.f32 0.70710677, %v3731_v54  ;;  %v3734_v34 = vmul.f32 0.5, %v3731_v54  ;;  %v377_v54 = vld [vmem:[%s19351_s15 + $0x18] sm:$0xff]  ;;  %v376_v57 = vld [vmem:[%s19351_s15 + $0x10] sm:$0xff] }
 0xe07   :  { %15176 = vmatpush3.msra.mxu1 %v377_v54 }
 0xe08   :  { %v3736_v55 = vand.u32 2147483647, %v3735_v44  ;;  %vm3756_vm13 = vcmp.ge.f32.partialorder %v3735_v44, 0.0  ;;  %15177 = vmatprep.subr.mxu1 %v16736_v1  ;;  %v375_v44 = vld [vmem:[%s19351_s15 + $0x8] sm:$0xff] }
 0xe09   :  { %15178 = vmatpush3.msra.mxu1 %v376_v57 }
 0xe0a   :  { %v3737_v58 = vmul.f32 0.3275911, %v3736_v55  ;;  %v3750_v49 = vsub.f32 0.0, %v3736_v55  ;;  %15179 = vmatprep.subr.mxu1 %v16736_v1 }
 0xe0b   :  { %15180 = vmatpush3.msra.mxu1 %v375_v44 }
 0xe0c   :  { %v3738_v63 = vadd.f32 1.0, %v3737_v58  ;;  %v3751_v0 = vmul.f32 %v3750_v49, %v3736_v55  ;;  %15181 = vmatprep.subr.mxu1 %v16736_v1 }
 0xe0e   :  { %16176 = vrcp.f32 %v3738_v63  ;;  %v3752_v37 = vmul.f32 1.442695, %v3751_v0  ;;  %v14161_v0 = vld [vmem:[%s19352_s16] ss:$0 sm:$0xff] }
 0xe10   :  { %16178 = vpow2.f32 %v3752_v37 }
 0xe1b   :  { %v16177_v2 = vpop.eup %16176 }
 0xe1c   :  { %v3741_v13 = vmul.f32 1.0614054, %v16177_v2 }
 0xe1d   :  { %v16179_v5 = vpop.eup %16178 }
 0xe1e   :  { %v14157_v4 = vadd.f32 -1.4531521, %v3741_v13  ;;  %v14162_v13 = vld [vmem:[%s19353_s18] ss:$0 sm:$0xff] }
 0xe20   :  { %v3743_v60 = vmul.f32 %v16177_v2, %v14157_v4 }
 0xe22   :  { %v3744_v3 = vadd.f32 1.4214138, %v3743_v60  ;;  %v14163_v60 = vld [vmem:[%s19354_s30] ss:$0 sm:$0xff] }
 0xe24   :  { %v3745_v19 = vmul.f32 %v16177_v2, %v3744_v3 }
 0xe26   :  { %v14158_v43 = vadd.f32 -0.28449672, %v3745_v19 }
 0xe28   :  { %v3747_v23 = vmul.f32 %v16177_v2, %v14158_v43 }
 0xe2a   :  { %v3748_v8 = vadd.f32 0.2548296, %v3747_v23 }
 0xe2c   :  { %v3749_v16 = vmul.f32 %v16177_v2, %v3748_v8 }
 0xe2e   :  { %v3754_v47 = vmul.f32 %v16179_v5, %v3749_v16 }
 0xe30   :  { %v3755_v46 = vsub.f32 1.0, %v3754_v47 }
 0xe32   :  { %v3757_v26 = vsub.f32 0.0, %v3755_v46 }
 0xe34   :  { %v3758_v15 = vsel %vm3756_vm13, %v3755_v46, %v3757_v26 }
 0xe35   :  { %v3759_v36 = vadd.f32 1.0, %v3758_v15 }
 0xe37   :  { %v3760_v30 = vmul.f32 %v3759_v36, %v3734_v34 }
 0xe39   :  { %15173 = vmatmul.mubr.msk.f32.vlgmr.msra.gmra.mxu0 %vm3767_vm14, %v3760_v30 }
 0xe3a   :  { %15198 = vmatprep.mubr.msk.f32.mxu0 %vm16737_vm0, %v16736_v1 }
 0xef9   :  { %v3837_v40 = vpop.f32.mrf.mxu0 }
 0xefa   :  { %v3838_v45 = vadd.f32 %v14159_v22, %v3837_v40  ;;  %v16408_v22 = vld [vmem:[%s16759_s13] sm:$0xff] }
 0xefb   :  { %v15174_v48 = vpop.f32.mrf.mxu0 }
 0xefc   :  { %v3841_v33 = vadd.f32 %v3838_v45, %v17636_v42  ;;  %v374_v42 = vld [vmem:[%s19351_s15] sm:$0xff] }
 0xefd   :  { %15182 = vmatpush3.msra.mxu1 %v374_v42 }
 0xefe   :  { %v3842_v10 = vsel %vm436_vm10, %v3841_v33, 0.0  ;;  %15186 = vmatprep.subr.mxu1 %v16736_v1 }
 0xeff   :  { %3843 = vadd.xlane.f32.xlu0 %v3842_v10 }
 0xf88   :  { %v3844_v52 = vpop.xlane.xlu0 %3843 }
 0xf89   :  { %v3845_v53 = vmul.f32 0.03125, %v3844_v52 }
 0xf8b   :  { %v3846_v11 = vsub.f32 %v3841_v33, %v3845_v53 }
 0xf8d   :  { %v3847_v51 = vmul.f32 %v3846_v11, %v3846_v11 }
 0xf8f   :  { %v3848_v31 = vsel %vm436_vm10, %v3847_v51, 0.0 }
 0xf90   :  { %3849 = vadd.xlane.f32.xlu1 %v3848_v31 }
0x1019   :  { %v3850_v55 = vpop.xlane.xlu1 %3849 }
0x101a   :  { %v3851_v58 = vmul.f32 0.03125, %v3850_v55 }
0x101c   :  { %v3852_v63 = vadd.f32 1e-05, %v3851_v58 }
0x101e   :  { %16180 = vrsqrt.f32 %v3852_v63 }
0x102b   :  { %v16181_v49 = vpop.eup %16180 }
0x102c   :  { %v3854_v2 = vmul.f32 %v16181_v49, %v3846_v11 }
0x102e   :  { %v3861_v37 = vmul.f32 %v14161_v0, %v3854_v2 }
0x1030   :  { %v17676_v4 = vadd.f32 %v14162_v13, %v3861_v37 }
0x1032   :  { %15184 = vmatmul.mubr.msk.f32.vlgmr.msra.gmra.mxu1 %vm436_vm10, %v17676_v4 }
0x1033   :  { %15188 = vmatprep.mubr.msk.f32.mxu1 %vm16737_vm0, %v16736_v1 }
0x10f2   :  { %v3944_v3 = vpop.f32.mrf.mxu1 }
0x10f3   :  { %v17683_v19 = vadd.f32 %v14163_v60, %v3944_v3 }
0x10f4   :  { %v15185_v43 = vpop.f32.mrf.mxu1 }
0x10f5   :  { %3965 = vrot.lane.b32.xlu0 %v17683_v19, %s19302_s6  ;;  %v3948_v8 = vmul.f32 %v17683_v19, %v17059_v17  ;;  %v3950_v16 = vmul.f32 %v17683_v19, %v17088_v25  ;;  %v3949_v5 = vmul.f32 %v17683_v19, %v17079_v24  ;;  %v3952_v47 = vmul.f32 %v17683_v19, %v17062_v18  ;;  %s19358_s6 = sld [smem:[#allocation42_spill]] }
0x10f6   :  { %v3951_v46 = vmul.f32 %v17683_v19, %v17108_v28  ;;  %v3954_v26 = vmul.f32 %v17683_v19, %v17070_v21  ;;  %v3953_v15 = vmul.f32 %v17683_v19, %v17126_v32  ;;  %v3955_v34 = vmul.f32 %v17683_v19, %v17139_v35 }
0x1167   :  { %v3966_v23 = vpop.permute.xlu0 %3965 }
0x1168   :  { %15187 = vmatpush3.xpose.msk.msra.mxu1 %vm436_vm10, %v3966_v23  ;;  %15197 = vmatpush3.xpose.msk.msra.mxu0 %vm436_vm10, %v3966_v23 }
0x1169   :  { %15191 = vmatprep.subr.mxu1 %v16736_v1  ;;  %15206 = vmatprep.subr.mxu0 %v16736_v1 }
0x116b   :  { %15189 = vmatmul.mubr.msk.f32.vlgmr.msra.gmra.mxu1 %vm436_vm10, %v3948_v8  ;;  %15199 = vmatmul.mubr.msk.f32.vlgmr.msra.gmra.mxu0 %vm436_vm10, %v3950_v16  ;;  %v3956_v8 = vmul.f32 %v17683_v19, %v17159_v56  ;;  %v3957_v16 = vmul.f32 %v17683_v19, %v17164_v59 }
0x116c   :  { %15192 = vmatpush3.xpose.msk.msra.mxu1 %vm436_vm10, %v3966_v23  ;;  %15207 = vmatpush3.xpose.msk.msra.mxu0 %vm436_vm10, %v3966_v23 }
0x116d   :  { %15193 = vmatprep.mubr.msk.f32.mxu1 %vm16737_vm0, %v16736_v1  ;;  %15208 = vmatprep.mubr.msk.f32.mxu0 %vm16737_vm0, %v16736_v1 }
0x116e   :  { %15201 = vmatprep.subr.mxu1 %v16736_v1  ;;  %15216 = vmatprep.subr.mxu0 %v16736_v1 }
0x116f   :  { %15194 = vmatmul.mubr.msk.f32.vlgmr.msra.gmra.mxu1 %vm436_vm10, %v3949_v5  ;;  %15209 = vmatmul.mubr.msk.f32.vlgmr.msra.gmra.mxu0 %vm436_vm10, %v3952_v47  ;;  %v3960_v5 = vmul.f32 %v17683_v19, %v17188_v39  ;;  %v3958_v47 = vmul.f32 %v17683_v19, %v17181_v29 }
0x1170   :  { %15202 = vmatpush3.xpose.msk.msra.mxu1 %vm436_vm10, %v3966_v23  ;;  %15217 = vmatpush3.xpose.msk.msra.mxu0 %vm436_vm10, %v3966_v23 }
0x1171   :  { %15203 = vmatprep.mubr.msk.f32.mxu1 %vm16737_vm0, %v16736_v1  ;;  %15218 = vmatprep.mubr.msk.f32.mxu0 %vm16737_vm0, %v16736_v1 }
0x1172   :  { %15211 = vmatprep.subr.mxu1 %v16736_v1  ;;  %15226 = vmatprep.subr.mxu0 %v16736_v1 }
0x1173   :  { %15204 = vmatmul.mubr.msk.f32.vlgmr.msra.gmra.mxu1 %vm436_vm10, %v3951_v46  ;;  %15219 = vmatmul.mubr.msk.f32.vlgmr.msra.gmra.mxu0 %vm436_vm10, %v3954_v26 }
0x1174   :  { %15212 = vmatpush3.xpose.msk.msra.mxu1 %vm436_vm10, %v3966_v23  ;;  %15213 = vmatprep.mubr.msk.f32.mxu1 %vm16737_vm0, %v16736_v1 }
0x1175   :  { %15221 = vmatprep.subr.mxu1 %v16736_v1  ;;  %15228 = vmatprep.mubr.msk.f32.mxu0 %vm16737_vm0, %v16736_v1 }
0x1177   :  { %15214 = vmatmul.mubr.msk.f32.vlgmr.msra.gmra.mxu1 %vm436_vm10, %v3953_v15 }
0x1178   :  { %15222 = vmatpush3.xpose.msk.msra.mxu1 %vm436_vm10, %v3966_v23  ;;  %15223 = vmatprep.mubr.msk.f32.mxu1 %vm16737_vm0, %v16736_v1 }
0x1179   :  { %15231 = vmatprep.subr.mxu1 %v16736_v1 }
0x117b   :  { %15224 = vmatmul.mubr.msk.f32.vlgmr.msra.gmra.mxu1 %vm436_vm10, %v3955_v34 }
0x117c   :  { %15233 = vmatprep.mubr.msk.f32.mxu1 %vm16737_vm0, %v16736_v1 }
0x122b   :  { %v4038_v36 = vpop.f32.mrf.mxu1  ;;  %v4184_v30 = vpop.f32.mrf.mxu0 }
0x122c   :  { %v4039_v40 = vadd.f32 %v16408_v22, %v4038_v36  ;;  %v4185_v33 = vadd.f32 %v16408_v22, %v4184_v30  ;;  %v3959_v36 = vmul.f32 %v17683_v19, %v17186_v38  ;;  %v3961_v30 = vmul.f32 %v17683_v19, %v17169_v61 }
0x122d   :  { %v15190_v45 = vpop.f32.mrf.mxu1  ;;  %v15200_v48 = vpop.f32.mrf.mxu0 }
0x122e   :  { %v4553_v10 = vsel %vm1155_vm9, %v4039_v40, -inf  ;;  %v4559_v54 = vsel %vm1155_vm9, %v4185_v33, -inf }
0x122f   :  { %v4330_v52 = vpop.f32.mrf.mxu0  ;;  %4554 = vmax.xlane.f32.xlu1 %v4553_v10  ;;  %v4111_v53 = vpop.f32.mrf.mxu1 }
0x1230   :  { %v4112_v31 = vadd.f32 %v16408_v22, %v4111_v53  ;;  %v4331_v63 = vadd.f32 %v16408_v22, %v4330_v52 }
0x1231   :  { %v15195_v11 = vpop.f32.mrf.mxu1  ;;  %v15210_v51 = vpop.f32.mrf.mxu0 }
0x1232   :  { %v4556_v0 = vsel %vm1155_vm9, %v4112_v31, -inf  ;;  %v4565_v60 = vsel %vm1155_vm9, %v4331_v63, -inf }
0x1233   :  { %v4476_v57 = vpop.f32.mrf.mxu0  ;;  %4560 = vmax.xlane.f32.xlu1 %v4559_v54  ;;  %v4257_v44 = vpop.f32.mrf.mxu1 }
0x1234   :  { %v4477_v42 = vadd.f32 %v16408_v22, %v4476_v57  ;;  %v4258_v37 = vadd.f32 %v16408_v22, %v4257_v44 }
0x1235   :  { %v15205_v55 = vpop.f32.mrf.mxu1  ;;  %v15220_v58 = vpop.f32.mrf.mxu0 }
0x1236   :  { %v4571_v49 = vsel %vm1155_vm9, %v4477_v42, -inf  ;;  %v4562_v23 = vsel %vm1155_vm9, %v4258_v37, -inf }
0x1237   :  { %4572 = vmax.xlane.f32.xlu0 %v4571_v49  ;;  %4557 = vmax.xlane.f32.xlu1 %v4556_v0  ;;  %v4403_v2 = vpop.f32.mrf.mxu1 }
0x1238   :  { %v17762_v46 = vadd.f32 %v16408_v22, %v4403_v2 }
0x1239   :  { %v15215_v13 = vpop.f32.mrf.mxu1 }
0x123a   :  { %v4568_v15 = vsel %vm1155_vm9, %v17762_v46, -inf }
0x123b   :  { %4566 = vmax.xlane.f32.xlu1 %v4565_v60  ;;  %v4549_v3 = vpop.f32.mrf.mxu1 }
0x123c   :  { %v17764_v26 = vadd.f32 %v16408_v22, %v4549_v3 }
0x123d   :  { %v15225_v43 = vpop.f32.mrf.mxu1 }
0x123e   :  { %v4574_v34 = vsel %vm1155_vm9, %v17764_v26, -inf }
0x123f   :  { %4563 = vmax.xlane.f32.xlu1 %v4562_v23 }
0x124d   :  { %4642 = vrot.lane.b32.xlu0 %v3956_v8, %s19300_s19 }
0x1250   :  { %4719 = vrot.lane.b32.xlu1 %v3957_v16, %s19300_s19 }
0x1251   :  { %4950 = vrot.lane.b32.xlu0 %v3960_v5, %s19300_s19 }
0x1254   :  { %4796 = vrot.lane.b32.xlu1 %v3958_v47, %s19300_s19 }
0x1278   :  { %4569 = vmax.xlane.f32.xlu1 %v4568_v15 }
0x127c   :  { %4575 = vmax.xlane.f32.xlu1 %v4574_v34  ;;  %v3962_v34 = vmul.f32 %v17683_v19, %v17192_v41 }
0x128d   :  { %4873 = vrot.lane.b32.xlu1 %v3959_v36, %s19300_s19 }
0x1291   :  { %5027 = vrot.lane.b32.xlu1 %v3961_v30, %s19300_s19 }
0x12b8   :  { %v4555_v22 = vpop.xlane.xlu1 %4554 }
0x12b9   :  { %v4577_v45 = vsub.f32 %v4039_v40, %v4555_v22 }
0x12bb   :  { %v4585_v48 = vmul.f32 1.442695, %v4577_v45 }
0x12bc   :  { %v4561_v10 = vpop.xlane.xlu1 %4560 }
0x12bd   :  { %16182 = vpow2.f32 %v4585_v48  ;;  %v4579_v52 = vsub.f32 %v4185_v33, %v4561_v10 }
0x12bf   :  { %v4589_v53 = vmul.f32 1.442695, %v4579_v52 }
0x12c0   :  { %v4573_v11 = vpop.xlane.xlu0 %4572  ;;  %v4558_v51 = vpop.xlane.xlu1 %4557 }
0x12c1   :  { %16184 = vpow2.f32 %v4589_v53  ;;  %v4583_v54 = vsub.f32 %v4477_v42, %v4573_v11  ;;  %v4578_v57 = vsub.f32 %v4112_v31, %v4558_v51 }
0x12c3   :  { %v4597_v44 = vmul.f32 1.442695, %v4583_v54  ;;  %v4587_v55 = vmul.f32 1.442695, %v4578_v57 }
0x12c4   :  { %v4643_v58 = vpop.permute.xlu0 %4642  ;;  %v4567_v49 = vpop.xlane.xlu1 %4566 }
0x12c5   :  { %16186 = vpow2.f32 %v4597_v44  ;;  %v4581_v0 = vsub.f32 %v4331_v63, %v4567_v49  ;;  %15227 = vmatpush3.msra.mxu0 %v4643_v58 }
0x12c6   :  { %16188 = vpow2.f32 %v4587_v55  ;;  %15236 = vmatprep.subr.mxu0 %v16736_v1 }
0x12c7   :  { %v4593_v40 = vmul.f32 1.442695, %v4581_v0 }
0x12c8   :  { %v4564_v2 = vpop.xlane.xlu1 %4563  ;;  %v4951_v58 = vpop.permute.xlu0 %4950 }
0x12c9   :  { %16190 = vpow2.f32 %v4593_v40  ;;  %v4580_v33 = vsub.f32 %v4258_v37, %v4564_v2 }
0x12ca   :  { %v16183_v13 = vpop.eup %16182 }
0x12cb   :  { %v4591_v60 = vmul.f32 1.442695, %v4580_v33  ;;  %v4601_v3 = vsel %vm1155_vm9, %v16183_v13, 0.0 }
0x12cc   :  { %v4720_v42 = vpop.permute.xlu1 %4719  ;;  %4602 = vadd.xlane.f32.xlu1 %v4601_v3 }
0x12cd   :  { %16192 = vpow2.f32 %v4591_v60  ;;  %15232 = vmatpush3.msra.mxu1 %v4720_v42 }
0x12ce   :  { %v16185_v31 = vpop.eup %16184  ;;  %15241 = vmatprep.subr.mxu1 %v16736_v1 }
0x12cf   :  { %v4607_v63 = vsel %vm1155_vm9, %v16185_v31, 0.0 }
0x12d0   :  { %4608 = vadd.xlane.f32.xlu1 %v4607_v63  ;;  %v4797_v36 = vpop.permute.xlu1 %4796 }
0x12d2   :  { %v17780_v43 = vpop.eup %16186 }
0x12d3   :  { %v16189_v23 = vpop.eup %16188  ;;  %v4619_v37 = vsel %vm1155_vm9, %v17780_v43, 0.0 }
0x12d4   :  { %4620 = vadd.xlane.f32.xlu0 %v4619_v37  ;;  %v4604_v8 = vsel %vm1155_vm9, %v16189_v23, 0.0 }
0x12d5   :  { %4605 = vadd.xlane.f32.xlu1 %v4604_v8 }
0x12d6   :  { %v16191_v16 = vpop.eup %16190 }
0x12d7   :  { %v4613_v5 = vsel %vm1155_vm9, %v16191_v16, 0.0 }
0x12d9   :  { %4614 = vadd.xlane.f32.xlu1 %v4613_v5 }
0x12da   :  { %v17786_v47 = vpop.eup %16192 }
0x12db   :  { %v4610_v15 = vsel %vm1155_vm9, %v17786_v47, 0.0 }
0x12dd   :  { %4611 = vadd.xlane.f32.xlu1 %v4610_v15 }
0x12ea   :  { %5104 = vrot.lane.b32.xlu0 %v3962_v34, %s19300_s19 }
0x1301   :  { %v4570_v30 = vpop.xlane.xlu1 %4569 }
0x1302   :  { %v4582_v22 = vsub.f32 %v17762_v46, %v4570_v30  ;;  %v3963_v46 = vmul.f32 %v17683_v19, %v17171_v62 }
0x1304   :  { %v4595_v45 = vmul.f32 1.442695, %v4582_v22 }
0x1305   :  { %v4576_v48 = vpop.xlane.xlu1 %4575 }
0x1306   :  { %16194 = vpow2.f32 %v4595_v45  ;;  %v4584_v10 = vsub.f32 %v17764_v26, %v4576_v48  ;;  %v382_v45 = vld [vmem:[%s19355_s22 + $0x18] sm:$0xff]  ;;  %v381_v48 = vld [vmem:[%s19355_s22 + $0x10] sm:$0xff] }
0x1308   :  { %v4599_v52 = vmul.f32 1.442695, %v4584_v10  ;;  %v380_v10 = vld [vmem:[%s19355_s22 + $0x8] sm:$0xff] }
0x1309   :  { %v4874_v26 = vpop.permute.xlu1 %4873 }
0x130a   :  { %16196 = vpow2.f32 %v4599_v52  ;;  %v379_v52 = vld [vmem:[%s19355_s22] sm:$0xff]  ;;  %s19362_s22 = sld [smem:[#allocation40_spill]] }
0x130d   :  { %v5028_v57 = vpop.permute.xlu1 %5027 }
0x1313   :  { %v17795_v53 = vpop.eup %16194 }
0x1314   :  { %v4616_v11 = vsel %vm1155_vm9, %v17795_v53, 0.0 }
0x1315   :  { %4617 = vadd.xlane.f32.xlu1 %v4616_v11 }
0x1317   :  { %v17799_v51 = vpop.eup %16196 }
0x1318   :  { %v4622_v54 = vsel %vm1155_vm9, %v17799_v51, 0.0 }
0x1319   :  { %4623 = vadd.xlane.f32.xlu1 %v4622_v54 }
0x132a   :  { %5181 = vrot.lane.b32.xlu1 %v3963_v46, %s19300_s19  ;;  %s19357_s19 = sld [smem:[#allocation38_spill]] }
0x1355   :  { %v4603_v44 = vpop.xlane.xlu1 %4602 }
0x1356   :  { %16198 = vrcp.f32 %v4603_v44 }
0x1359   :  { %v4609_v55 = vpop.xlane.xlu1 %4608 }
0x135a   :  { %16200 = vrcp.f32 %v4609_v55 }
0x135d   :  { %v4621_v0 = vpop.xlane.xlu0 %4620 }
0x135e   :  { %v4606_v49 = vpop.xlane.xlu1 %4605 }
0x135f   :  { %16202 = vrcp.f32 %v4606_v49 }
0x1361   :  { %v5105_v8 = vpop.permute.xlu0 %5104 }
0x1362   :  { %v4615_v40 = vpop.xlane.xlu1 %4614 }
0x1363   :  { %v16199_v2 = vpop.eup %16198  ;;  %16204 = vrcp.f32 %v4615_v40 }
0x1364   :  { %v4626_v33 = vmul.f32 %v16199_v2, %v16183_v13  ;;  %16206 = vrcp.f32 %v4621_v0 }
0x1366   :  { %v4612_v60 = vpop.xlane.xlu1 %4611  ;;  %15229 = vmatmul.mubr.msk.f32.vlgmr.msra.gmra.mxu0 %vm1155_vm9, %v4626_v33 }
0x1367   :  { %v16201_v19 = vpop.eup %16200  ;;  %16208 = vrcp.f32 %v4612_v60  ;;  %15237 = vmatpush3.msra.mxu0 %v4797_v36  ;;  %15238 = vmatprep.mubr.msk.f32.mxu0 %vm16737_vm0, %v16736_v1 }
0x1368   :  { %15246 = vmatprep.subr.mxu0 %v16736_v1  ;;  %v4630_v3 = vmul.f32 %v16201_v19, %v16185_v31 }
0x136a   :  { %15239 = vmatmul.mubr.msk.f32.vlgmr.msra.gmra.mxu0 %vm1155_vm9, %v4630_v3 }
0x136b   :  { %15247 = vmatpush3.msra.mxu0 %v4951_v58  ;;  %15248 = vmatprep.mubr.msk.f32.mxu0 %vm16737_vm0, %v16736_v1 }
0x136c   :  { %v16203_v13 = vpop.eup %16202  ;;  %15256 = vmatprep.subr.mxu0 %v16736_v1 }
0x136d   :  { %v4628_v42 = vmul.f32 %v16203_v13, %v16189_v23 }
0x136f   :  { %15234 = vmatmul.mubr.msk.f32.vlgmr.msra.gmra.mxu1 %vm1155_vm9, %v4628_v42 }
0x1370   :  { %v16205_v63 = vpop.eup %16204  ;;  %15242 = vmatpush3.msra.mxu1 %v4874_v26  ;;  %15243 = vmatprep.mubr.msk.f32.mxu1 %vm16737_vm0, %v16736_v1 }
0x1371   :  { %v4634_v37 = vmul.f32 %v16205_v63, %v16191_v16  ;;  %15251 = vmatprep.subr.mxu1 %v16736_v1  ;;  %v16207_v31 = vpop.eup %16206 }
0x1372   :  { %v4638_v15 = vmul.f32 %v16207_v31, %v17780_v43 }
0x1373   :  { %15249 = vmatmul.mubr.msk.f32.vlgmr.msra.gmra.mxu0 %vm1155_vm9, %v4634_v37 }
0x1374   :  { %v16209_v5 = vpop.eup %16208  ;;  %15257 = vmatpush3.msra.mxu0 %v5105_v8  ;;  %15258 = vmatprep.mubr.msk.f32.mxu0 %vm16737_vm0, %v16736_v1 }
0x1375   :  { %v4632_v23 = vmul.f32 %v16209_v5, %v17786_v47  ;;  %15266 = vmatprep.subr.mxu0 %v16736_v1 }
0x1377   :  { %15244 = vmatmul.mubr.msk.f32.vlgmr.msra.gmra.mxu1 %vm1155_vm9, %v4632_v23  ;;  %15259 = vmatmul.mubr.msk.f32.vlgmr.msra.gmra.mxu0 %vm1155_vm9, %v4638_v15 }
0x1378   :  { %15252 = vmatpush3.msra.mxu1 %v5028_v57  ;;  %15253 = vmatprep.mubr.msk.f32.mxu1 %vm16737_vm0, %v16736_v1 }
0x1379   :  { %15261 = vmatprep.subr.mxu1 %v16736_v1  ;;  %15274 = vmatprep.mubr.msk.f32.mxu0 %vm16737_vm0, %v16736_v1 }
0x137a   :  { %15267 = vmatpush3.msra.mxu0 %v382_v45  ;;  %v16409_v45 = vld [vmem:[%s16754_s9] sm:$0xff] }
0x137b   :  { %15268 = vmatprep.subr.mxu0 %v16736_v1 }
0x137c   :  { %15269 = vmatpush3.msra.mxu0 %v381_v48  ;;  %v389_v48 = vld [vmem:[%s19356_s24] sm:$0xff] }
0x137d   :  { %15270 = vmatprep.subr.mxu0 %v16736_v1 }
0x137e   :  { %15271 = vmatpush3.msra.mxu0 %v380_v10  ;;  %v16410_v10 = vld [vmem:[%s16754_s9 + $0x8] sm:$0x3] }
0x137f   :  { %15272 = vmatprep.subr.mxu0 %v16736_v1 }
0x1380   :  { %15273 = vmatpush3.msra.mxu0 %v379_v52  ;;  %v14189_v52 = vld [vmem:[%s19357_s19] ss:$0 sm:$0xff]  ;;  %s19361_s19 = sld [smem:[#allocation46_spill]] }
0x139e   :  { %v4618_v16 = vpop.xlane.xlu1 %4617 }
0x139f   :  { %16210 = vrcp.f32 %v4618_v16 }
0x13a2   :  { %v4624_v43 = vpop.xlane.xlu1 %4623 }
0x13a3   :  { %16212 = vrcp.f32 %v4624_v43 }
0x13a6   :  { %v5182_v36 = vpop.permute.xlu1 %5181 }
0x13ac   :  { %v16211_v47 = vpop.eup %16210 }
0x13ad   :  { %v4636_v34 = vmul.f32 %v16211_v47, %v17795_v53  ;;  %v392_v53 = vld [vmem:[%s19356_s24 + $0x18] sm:$0xff] }
0x13ae   :  { %15288 = vmatprep.subr.mxu0 %v392_v53 }
0x13af   :  { %15254 = vmatmul.mubr.msk.f32.vlgmr.msra.gmra.mxu1 %vm1155_vm9, %v4636_v34 }
0x13b0   :  { %v16213_v30 = vpop.eup %16212  ;;  %15262 = vmatpush3.msra.mxu1 %v5182_v36  ;;  %15263 = vmatprep.mubr.msk.f32.mxu1 %vm16737_vm0, %v16736_v1 }
0x13b1   :  { %v4640_v22 = vmul.f32 %v16213_v30, %v17799_v51  ;;  %15277 = vmatprep.subr.mxu1 %v16736_v1  ;;  %v391_v30 = vld [vmem:[%s19356_s24 + $0x10] sm:$0xff] }
0x13b3   :  { %15264 = vmatmul.mubr.msk.f32.vlgmr.msra.gmra.mxu1 %vm1155_vm9, %v4640_v22  ;;  %v390_v22 = vld [vmem:[%s19356_s24 + $0x8] sm:$0xff]  ;;  %s19359_s24 = sld [smem:[#allocation39_spill]] }
0x13b4   :  { %15285 = vmatprep.mubr.msk.f32.mxu1 %vm16737_vm0, %v16736_v1 }
0x1426   :  { %v4714_v11 = vpop.f32.mrf.mxu0 }
0x1427   :  { %v5257_v33 = vsel %vm436_vm10, %v4714_v11, 0.0 }
0x1428   :  { %v15230_v51 = vpop.f32.mrf.mxu0 }
0x142a   :  { %v4868_v54 = vpop.f32.mrf.mxu0 }
0x142b   :  { %v5260_v19 = vsel %vm436_vm10, %v4868_v54, 0.0 }
0x142c   :  { %v15240_v46 = vpop.f32.mrf.mxu0 }
0x142f   :  { %v4791_v26 = vpop.f32.mrf.mxu1 }
0x1430   :  { %v5258_v2 = vsel %vm436_vm10, %v4791_v26, 0.0  ;;  %v14195_v26 = vld [vmem:[%s19358_s6] ss:$0 sm:$0xff]  ;;  %s19360_s6 = sld [smem:[#allocation45_spill]] }
0x1431   :  { %v15235_v57 = vpop.f32.mrf.mxu1  ;;  %v5259_v60 = vadd.f32 %v5258_v2, %v5257_v33  ;;  %v387_v33 = vld [vmem:[%s19359_s24 + $0x18] sm:$0xff] }
0x1432   :  { %15278 = vmatpush3.msra.mxu1 %v387_v33 }
0x1433   :  { %v5022_v44 = vpop.f32.mrf.mxu0  ;;  %v5261_v13 = vadd.f32 %v5260_v19, %v5259_v60  ;;  %v386_v60 = vld [vmem:[%s19359_s24 + $0x10] sm:$0xff]  ;;  %15279 = vmatprep.subr.mxu1 %v16736_v1  ;;  %v385_v19 = vld [vmem:[%s19359_s24 + $0x8] sm:$0xff] }
0x1434   :  { %v5264_v63 = vsel %vm436_vm10, %v5022_v44, 0.0  ;;  %15280 = vmatpush3.msra.mxu1 %v386_v60 }
0x1435   :  { %v15250_v55 = vpop.f32.mrf.mxu0  ;;  %15281 = vmatprep.subr.mxu1 %v16736_v1 }
0x1436   :  { %15282 = vmatpush3.msra.mxu1 %v385_v19 }
0x1437   :  { %v4945_v58 = vpop.f32.mrf.mxu1  ;;  %v5176_v49 = vpop.f32.mrf.mxu0  ;;  %15283 = vmatprep.subr.mxu1 %v16736_v1 }
0x1438   :  { %v5262_v3 = vsel %vm436_vm10, %v4945_v58, 0.0  ;;  %v5268_v15 = vsel %vm436_vm10, %v5176_v49, 0.0 }
0x1439   :  { %v15245_v0 = vpop.f32.mrf.mxu1  ;;  %v15260_v40 = vpop.f32.mrf.mxu0  ;;  %v5263_v42 = vadd.f32 %v5262_v3, %v5261_v13  ;;  %v384_v3 = vld [vmem:[%s19359_s24] sm:$0xff]  ;;  %s19368_s24 = sld [smem:[#allocation49_spill]] }
0x143a   :  { %15284 = vmatpush3.msra.mxu1 %v384_v3 }
0x143b   :  { %v5265_v31 = vadd.f32 %v5264_v63, %v5263_v42  ;;  %15299 = vmatprep.subr.mxu1 %v16736_v1 }
0x146f   :  { %v5099_v37 = vpop.f32.mrf.mxu1 }
0x1470   :  { %v5266_v8 = vsel %vm436_vm10, %v5099_v37, 0.0 }
0x1471   :  { %v5267_v5 = vadd.f32 %v5266_v8, %v5265_v31  ;;  %v15255_v23 = vpop.f32.mrf.mxu1  ;;  %v14191_v31 = vld [vmem:[%s19360_s6] ss:$0 sm:$0xff]  ;;  %s19366_s6 = sld [smem:[#allocation48_spill]] }
0x1473   :  { %v5253_v16 = vpop.f32.mrf.mxu1  ;;  %v5269_v43 = vadd.f32 %v5268_v15, %v5267_v5  ;;  %v14192_v5 = vld [vmem:[%s19361_s19] ss:$0 sm:$0xff]  ;;  %s19364_s19 = sld [smem:[#allocation43_spill]] }
0x1474   :  { %v5270_v47 = vsel %vm436_vm10, %v5253_v16, 0.0  ;;  %v14193_v16 = vld [vmem:[%s19362_s22] ss:$0 sm:$0xff]  ;;  %s19363_s22 = smov 96  }
0x1475   :  { %v5271_v34 = vadd.f32 %v5270_v47, %v5269_v43  ;;  %v15265_v36 = vpop.f32.mrf.mxu1 }
0x1477   :  { %15275 = vmatmul.mubr.msk.f32.vlgmr.msra.gmra.mxu0 %vm436_vm10, %v5271_v34 }
0x1478   :  { %15289 = vmatpush3.msra.mxu0 %v392_v53  ;;  %15296 = vmatprep.mubr.msk.f32.mxu0 %vm436_vm10, %v16409_v45 }
0x1479   :  { %15290 = vmatprep.subr.mxu0 %v391_v30 }
0x147a   :  { %15291 = vmatpush3.msra.mxu0 %v391_v30 }
0x147b   :  { %15292 = vmatprep.subr.mxu0 %v390_v22 }
0x147c   :  { %15293 = vmatpush3.msra.mxu0 %v390_v22 }
0x147d   :  { %15294 = vmatprep.subr.mxu0 %v389_v48 }
0x147e   :  { %15295 = vmatpush3.msra.mxu0 %v389_v48 }
0x147f   :  { %15297 = vmatmul.mubr.msk.f32.vlgmr.msra.gmra.mxu0 %vm436_vm10, %v16410_v10  ;;  %15306 = vmatprep.subr.mxu0 %v16736_v1 }
0x1480   :  { %15310 = vmatprep.mubr.msk.f32.mxu0 %vm16737_vm0, %v16736_v1 }
0x1537   :  { %v5347_v53 = vpop.f32.mrf.mxu0 }
0x1538   :  { %v5348_v11 = vadd.f32 %v14189_v52, %v5347_v53 }
0x1539   :  { %v15276_v51 = vpop.f32.mrf.mxu0 }
0x153a   :  { %v5351_v54 = vadd.f32 %v5348_v11, %v17676_v4 }
0x153c   :  { %v5352_v46 = vsel %vm436_vm10, %v5351_v54, 0.0 }
0x153d   :  { %5353 = vadd.xlane.f32.xlu0 %v5352_v46 }
0x153f   :  { %v15298_v57 = vpop.f32.mrf.mxu0 }
0x1540   :  { %v17871_v44 = vadd.f32 %v15298_v57, %v14195_v26 }
0x1541   :  { %v5530_v55 = vpop.f32.mrf.mxu0 }
0x1542   :  { %15307 = vmatpush3.xpose.msk.msra.mxu0 %vm436_vm10, %v17871_v44  ;;  %v17876_v58 = vadd.f32 %v14195_v26, %v5530_v55 }
0x1543   :  { %15308 = vmatprep.subr.mxu0 %v16736_v1 }
0x1546   :  { %15309 = vmatpush3.xpose.msk.msra.mxu0 %vm436_vm10, %v17876_v58 }
0x1547   :  { %15320 = vmatprep.subr.mxu0 %v16736_v1 }
0x15c6   :  { %v5354_v4 = vpop.xlane.xlu0 %5353 }
0x15c7   :  { %v5355_v49 = vmul.f32 0.03125, %v5354_v4 }
0x15c9   :  { %v5356_v0 = vsub.f32 %v5351_v54, %v5355_v49 }
0x15cb   :  { %v5357_v40 = vmul.f32 %v5356_v0, %v5356_v0 }
0x15cd   :  { %v5358_v2 = vsel %vm436_vm10, %v5357_v40, 0.0 }
0x15ce   :  { %5359 = vadd.xlane.f32.xlu1 %v5358_v2 }
0x1657   :  { %v5360_v13 = vpop.xlane.xlu1 %5359 }
0x1658   :  { %v5361_v42 = vmul.f32 0.03125, %v5360_v13 }
0x165a   :  { %v5362_v63 = vadd.f32 1e-05, %v5361_v42 }
0x165c   :  { %16214 = vrsqrt.f32 %v5362_v63 }
0x1669   :  { %v16215_v37 = vpop.eup %16214 }
0x166a   :  { %v5364_v8 = vmul.f32 %v16215_v37, %v5356_v0 }
0x166c   :  { %v5371_v23 = vmul.f32 %v14191_v31, %v5364_v8 }
0x166e   :  { %v17892_v15 = vadd.f32 %v14192_v5, %v5371_v23  ;;  %v5547_v23 = vmul.f32 %v17437_v6, %v17876_v58 }
0x1670   :  { %15286 = vmatmul.mubr.msk.f32.vlgmr.msra.gmra.mxu1 %vm436_vm10, %v17892_v15 }
0x1671   :  { %15300 = vmatpush3.xpose.msk.msra.mxu1 %vm436_vm10, %v17871_v44  ;;  %15303 = vmatprep.mubr.msk.f32.mxu1 %vm16737_vm0, %v16736_v1 }
0x1672   :  { %15301 = vmatprep.subr.mxu1 %v16736_v1 }
0x1675   :  { %15302 = vmatpush3.xpose.msk.msra.mxu1 %vm436_vm10, %v17876_v58 }
0x1676   :  { %15313 = vmatprep.subr.mxu1 %v16736_v1 }
0x1730   :  { %v5454_v43 = vpop.f32.mrf.mxu1 }
0x1731   :  { %v5455_v47 = vadd.f32 %v14193_v16, %v5454_v43  ;;  %v5550_v16 = vmul.f32 %v17439_v9, %v17871_v44  ;;  %v5549_v43 = vmul.f32 %v17439_v9, %v17876_v58 }
0x1732   :  { %v15287_v34 = vpop.f32.mrf.mxu1 }
0x1733   :  { %v5539_v36 = vmul.f32 %v5455_v47, %v17059_v17  ;;  %v5540_v30 = vmul.f32 %v5455_v47, %v17079_v24  ;;  %v5541_v22 = vmul.f32 %v5455_v47, %v17088_v25  ;;  %v5542_v45 = vmul.f32 %v5455_v47, %v17108_v28 }
0x1734   :  { %v5543_v48 = vmul.f32 %v5455_v47, %v17062_v18  ;;  %v5544_v10 = vmul.f32 %v5455_v47, %v17126_v32  ;;  %v5545_v52 = vmul.f32 %v5455_v47, %v17070_v21  ;;  %v5546_v53 = vmul.f32 %v5455_v47, %v17139_v35 }
0x1735   :  { %15304 = vmatmul.mubr.msk.f32.vlgmr.msra.gmra.mxu1 %vm436_vm10, %v5539_v36  ;;  %15311 = vmatmul.mubr.msk.f32.vlgmr.msra.gmra.mxu0 %vm436_vm10, %v5540_v30  ;;  %v5548_v47 = vmul.f32 %v17437_v6, %v17871_v44  ;;  %v5552_v34 = vmul.f32 %v17450_v12, %v17871_v44  ;;  %v5554_v36 = vmul.f32 %v17455_v7, %v17871_v44 }
0x1736   :  { %15314 = vmatpush3.xpose.msk.msra.mxu1 %vm436_vm10, %v17871_v44  ;;  %15321 = vmatpush3.xpose.msk.msra.mxu0 %vm436_vm10, %v17871_v44  ;;  %v5556_v30 = vmul.f32 %v17460_v14, %v17871_v44 }
0x1737   :  { %15315 = vmatprep.subr.mxu1 %v16736_v1  ;;  %15322 = vmatprep.subr.mxu0 %v16736_v1 }
0x1738   :  { %15317 = vmatprep.mubr.msk.f32.mxu1 %vm16737_vm0, %v16736_v1  ;;  %15324 = vmatprep.mubr.msk.f32.mxu0 %vm16737_vm0, %v16736_v1 }
0x173a   :  { %15316 = vmatpush3.xpose.msk.msra.mxu1 %vm436_vm10, %v17876_v58  ;;  %15323 = vmatpush3.xpose.msk.msra.mxu0 %vm436_vm10, %v17876_v58 }
0x173b   :  { %15327 = vmatprep.subr.mxu1 %v16736_v1  ;;  %15334 = vmatprep.subr.mxu0 %v16736_v1 }
0x173d   :  { %15318 = vmatmul.mubr.msk.f32.vlgmr.msra.gmra.mxu1 %vm436_vm10, %v5541_v22  ;;  %15325 = vmatmul.mubr.msk.f32.vlgmr.msra.gmra.mxu0 %vm436_vm10, %v5542_v45  ;;  %v5558_v22 = vmul.f32 %v17465_v27, %v17871_v44  ;;  %v5560_v45 = vmul.f32 %v17473_v20, %v17871_v44 }
0x173e   :  { %15328 = vmatpush3.xpose.msk.msra.mxu1 %vm436_vm10, %v17871_v44  ;;  %15335 = vmatpush3.xpose.msk.msra.mxu0 %vm436_vm10, %v17871_v44 }
0x173f   :  { %15329 = vmatprep.subr.mxu1 %v16736_v1  ;;  %15336 = vmatprep.subr.mxu0 %v16736_v1 }
0x1740   :  { %15331 = vmatprep.mubr.msk.f32.mxu1 %vm16737_vm0, %v16736_v1  ;;  %15338 = vmatprep.mubr.msk.f32.mxu0 %vm16737_vm0, %v16736_v1 }
0x1742   :  { %15330 = vmatpush3.xpose.msk.msra.mxu1 %vm436_vm10, %v17876_v58  ;;  %15337 = vmatpush3.xpose.msk.msra.mxu0 %vm436_vm10, %v17876_v58 }
0x1743   :  { %15341 = vmatprep.subr.mxu1 %v16736_v1  ;;  %15348 = vmatprep.subr.mxu0 %v16736_v1 }
0x1745   :  { %15332 = vmatmul.mubr.msk.f32.vlgmr.msra.gmra.mxu1 %vm436_vm10, %v5543_v48  ;;  %15339 = vmatmul.mubr.msk.f32.vlgmr.msra.gmra.mxu0 %vm436_vm10, %v5544_v10  ;;  %v5551_v10 = vmul.f32 %v17450_v12, %v17876_v58 }
0x1746   :  { %15342 = vmatpush3.xpose.msk.msra.mxu1 %vm436_vm10, %v17871_v44  ;;  %15349 = vmatpush3.xpose.msk.msra.mxu0 %vm436_vm10, %v17871_v44 }
0x1747   :  { %15343 = vmatprep.subr.mxu1 %v16736_v1  ;;  %15350 = vmatprep.subr.mxu0 %v16736_v1 }
0x1748   :  { %15345 = vmatprep.mubr.msk.f32.mxu1 %vm16737_vm0, %v16736_v1  ;;  %15352 = vmatprep.mubr.msk.f32.mxu0 %vm16737_vm0, %v16736_v1 }
0x174a   :  { %15344 = vmatpush3.xpose.msk.msra.mxu1 %vm436_vm10, %v17876_v58  ;;  %15351 = vmatpush3.xpose.msk.msra.mxu0 %vm436_vm10, %v17876_v58 }
0x174b   :  { %15355 = vmatprep.subr.mxu1 %v16736_v1  ;;  %15369 = vmatprep.subr.mxu0 %v16736_v1 }
0x174d   :  { %15346 = vmatmul.mubr.msk.f32.vlgmr.msra.gmra.mxu1 %vm436_vm10, %v5545_v52  ;;  %15353 = vmatmul.mubr.msk.f32.vlgmr.msra.gmra.mxu0 %vm436_vm10, %v5546_v53  ;;  %v5553_v52 = vmul.f32 %v17455_v7, %v17876_v58  ;;  %v5555_v53 = vmul.f32 %v17460_v14, %v17876_v58 }
0x174e   :  { %15359 = vmatprep.mubr.msk.f32.mxu1 %vm16737_vm0, %v16736_v1  ;;  %15373 = vmatprep.mubr.msk.f32.mxu0 %vm16737_vm0, %v16736_v1 }
0x17f5   :  { %v5638_v11 = vpop.f32.mrf.mxu1  ;;  %v17973_v51 = vpop.f32.mrf.mxu0 }
0x17f6   :  { %v6153_v54 = vsel %vm2787_vm11, %v5638_v11, -inf  ;;  %v6156_v57 = vsel %vm2787_vm11, %v17973_v51, -inf }
0x17f7   :  { %v15312_v46 = vpop.f32.mrf.mxu0  ;;  %6154 = vmax.xlane.f32.xlu0 %v6153_v54  ;;  %v15305_v26 = vpop.f32.mrf.mxu1  ;;  %v5557_v54 = vmul.f32 %v17465_v27, %v17876_v58 }
0x17f8   :  { %v5559_v46 = vmul.f32 %v17473_v20, %v17876_v58 }
0x17fb   :  { %6157 = vmax.xlane.f32.xlu0 %v6156_v57 }
0x17fd   :  { %v17978_v55 = vpop.f32.mrf.mxu1  ;;  %v17980_v4 = vpop.f32.mrf.mxu0 }
0x17fe   :  { %v6162_v49 = vsel %vm2787_vm11, %v17980_v4, -inf  ;;  %v6159_v0 = vsel %vm2787_vm11, %v17978_v55, -inf }
0x17ff   :  { %6163 = vmax.xlane.f32.xlu1 %v6162_v49  ;;  %v15319_v40 = vpop.f32.mrf.mxu1  ;;  %v15326_v2 = vpop.f32.mrf.mxu0  ;;  %6160 = vmax.xlane.f32.xlu0 %v6159_v0 }
0x1805   :  { %v17986_v33 = vpop.f32.mrf.mxu1  ;;  %v17988_v60 = vpop.f32.mrf.mxu0 }
0x1806   :  { %v6168_v19 = vsel %vm2787_vm11, %v17988_v60, -inf  ;;  %v6165_v3 = vsel %vm2787_vm11, %v17986_v33, -inf }
0x1807   :  { %6169 = vmax.xlane.f32.xlu1 %v6168_v19  ;;  %v15340_v13 = vpop.f32.mrf.mxu0  ;;  %6166 = vmax.xlane.f32.xlu0 %v6165_v3  ;;  %v15333_v42 = vpop.f32.mrf.mxu1 }
0x180d   :  { %v17994_v63 = vpop.f32.mrf.mxu1  ;;  %v17996_v37 = vpop.f32.mrf.mxu0 }
0x180e   :  { %v6171_v31 = vsel %vm2787_vm11, %v17994_v63, -inf  ;;  %v6174_v48 = vsel %vm2787_vm11, %v17996_v37, -inf }
0x180f   :  { %v15354_v8 = vpop.f32.mrf.mxu0  ;;  %6172 = vmax.xlane.f32.xlu0 %v6171_v31  ;;  %v15347_v5 = vpop.f32.mrf.mxu1 }
0x1818   :  { %6243 = vrot.lane.b32.xlu1 %v5547_v23, %s19363_s22 }
0x181c   :  { %6327 = vrot.lane.b32.xlu1 %v5550_v16, %s19363_s22 }
0x1820   :  { %6325 = vrot.lane.b32.xlu1 %v5549_v43, %s19363_s22 }
0x1825   :  { %6245 = vrot.lane.b32.xlu0 %v5548_v47, %s19363_s22 }
0x1829   :  { %6409 = vrot.lane.b32.xlu0 %v5552_v34, %s19363_s22 }
0x182d   :  { %6491 = vrot.lane.b32.xlu0 %v5554_v36, %s19363_s22 }
0x1831   :  { %6573 = vrot.lane.b32.xlu0 %v5556_v30, %s19363_s22 }
0x1835   :  { %6655 = vrot.lane.b32.xlu0 %v5558_v22, %s19363_s22 }
0x1839   :  { %6737 = vrot.lane.b32.xlu0 %v5560_v45, %s19363_s22 }
0x1844   :  { %6175 = vmax.xlane.f32.xlu1 %v6174_v48 }
0x1855   :  { %6407 = vrot.lane.b32.xlu1 %v5551_v10, %s19363_s22 }
0x1859   :  { %6489 = vrot.lane.b32.xlu1 %v5553_v52, %s19363_s22 }
0x185d   :  { %6571 = vrot.lane.b32.xlu1 %v5555_v53, %s19363_s22 }
0x1861   :  { %6653 = vrot.lane.b32.xlu1 %v5557_v54, %s19363_s22 }
0x1865   :  { %6735 = vrot.lane.b32.xlu1 %v5559_v46, %s19363_s22 }
0x1880   :  { %v6155_v26 = vpop.xlane.xlu0 %6154 }
0x1881   :  { %v6177_v57 = vsub.f32 %v5638_v11, %v6155_v26 }
0x1883   :  { %v6185_v49 = vmul.f32 1.442695, %v6177_v57 }
0x1884   :  { %v6158_v0 = vpop.xlane.xlu0 %6157 }
0x1885   :  { %16216 = vpow2.f32 %v6185_v49  ;;  %v6178_v40 = vsub.f32 %v17973_v51, %v6158_v0  ;;  %v5562_v0 = vmul.f32 %v17537_v50, %v17871_v44  ;;  %v5561_v44 = vmul.f32 %v17537_v50, %v17876_v58 }
0x1887   :  { %v6187_v2 = vmul.f32 1.442695, %v6178_v40 }
0x1888   :  { %v6164_v19 = vpop.xlane.xlu1 %6163  ;;  %v6161_v3 = vpop.xlane.xlu0 %6160 }
0x1889   :  { %16218 = vpow2.f32 %v6187_v2  ;;  %v6180_v13 = vsub.f32 %v17980_v4, %v6164_v19  ;;  %v6179_v42 = vsub.f32 %v17978_v55, %v6161_v3 }
0x188b   :  { %v6191_v31 = vmul.f32 1.442695, %v6180_v13  ;;  %v6189_v8 = vmul.f32 1.442695, %v6179_v42 }
0x188d   :  { %16220 = vpow2.f32 %v6191_v31 }
0x188e   :  { %16222 = vpow2.f32 %v6189_v8 }
0x1890   :  { %v6170_v5 = vpop.xlane.xlu1 %6169  ;;  %v6167_v23 = vpop.xlane.xlu0 %6166 }
0x1891   :  { %v6182_v11 = vsub.f32 %v17988_v60, %v6170_v5  ;;  %v6181_v16 = vsub.f32 %v17986_v33, %v6167_v23 }
0x1892   :  { %v18049_v43 = vpop.eup %16216 }
0x1893   :  { %v6195_v51 = vmul.f32 1.442695, %v6182_v11  ;;  %v6193_v47 = vmul.f32 1.442695, %v6181_v16  ;;  %v6201_v34 = vsel %vm2787_vm11, %v18049_v43, 0.0 }
0x1894   :  { %6202 = vadd.xlane.f32.xlu0 %v6201_v34  ;;  %v6244_v52 = vpop.permute.xlu1 %6243 }
0x1895   :  { %16224 = vpow2.f32 %v6195_v51 }
0x1896   :  { %v18053_v55 = vpop.eup %16218  ;;  %16226 = vpow2.f32 %v6193_v47 }
0x1897   :  { %v6204_v4 = vsel %vm2787_vm11, %v18053_v55, 0.0 }
0x1898   :  { %v6173_v36 = vpop.xlane.xlu0 %6172  ;;  %6205 = vadd.xlane.f32.xlu1 %v6204_v4  ;;  %v6328_v40 = vpop.permute.xlu1 %6327 }
0x1899   :  { %v6183_v60 = vsub.f32 %v17994_v63, %v6173_v36 }
0x189a   :  { %v18058_v33 = vpop.eup %16220 }
0x189b   :  { %v18060_v30 = vpop.eup %16222  ;;  %v6197_v22 = vmul.f32 1.442695, %v6183_v60  ;;  %v6210_v45 = vsel %vm2787_vm11, %v18058_v33, 0.0 }
0x189c   :  { %v6246_v48 = vpop.permute.xlu0 %6245  ;;  %6211 = vadd.xlane.f32.xlu1 %v6210_v45  ;;  %v6207_v10 = vsel %vm2787_vm11, %v18060_v30, 0.0  ;;  %v6326_v2 = vpop.permute.xlu1 %6325 }
0x189d   :  { %16228 = vpow2.f32 %v6197_v22  ;;  %6208 = vadd.xlane.f32.xlu0 %v6207_v10  ;;  %15356 = vmatpush3.msk.msra.mxu1 %vm2886_vm12, %v6246_v48 }
0x189e   :  { %15357 = vmatprep.subr.mxu1 %v16736_v1 }
0x189f   :  { %15358 = vmatpush3.msra.mxu1 %v6244_v52 }
0x18a0   :  { %v6410_v63 = vpop.permute.xlu0 %6409  ;;  %15362 = vmatprep.subr.mxu1 %v16736_v1 }
0x18a1   :  { %15370 = vmatpush3.msk.msra.mxu0 %vm2886_vm12, %v6410_v63 }
0x18a2   :  { %v18070_v53 = vpop.eup %16224  ;;  %15371 = vmatprep.subr.mxu0 %v16736_v1 }
0x18a3   :  { %v18073_v54 = vpop.eup %16226  ;;  %v6216_v46 = vsel %vm2787_vm11, %v18070_v53, 0.0 }
0x18a4   :  { %6217 = vadd.xlane.f32.xlu1 %v6216_v46  ;;  %v6213_v26 = vsel %vm2787_vm11, %v18073_v54, 0.0  ;;  %v6492_v5 = vpop.permute.xlu0 %6491 }
0x18a5   :  { %6214 = vadd.xlane.f32.xlu0 %v6213_v26 }
0x18aa   :  { %v18079_v57 = vpop.eup %16228 }
0x18ab   :  { %v6219_v49 = vsel %vm2787_vm11, %v18079_v57, 0.0 }
0x18ac   :  { %6220 = vadd.xlane.f32.xlu0 %v6219_v49 }
0x18c2   :  { %6819 = vrot.lane.b32.xlu0 %v5562_v0, %s19363_s22 }
0x18cd   :  { %v6176_v19 = vpop.xlane.xlu1 %6175 }
0x18ce   :  { %v6184_v3 = vsub.f32 %v17996_v37, %v6176_v19  ;;  %v6574_v37 = vpop.permute.xlu0 %6573 }
0x18d0   :  { %v6199_v13 = vmul.f32 1.442695, %v6184_v3 }
0x18d1   :  { %v6408_v42 = vpop.permute.xlu1 %6407 }
0x18d2   :  { %16230 = vpow2.f32 %v6199_v13  ;;  %15372 = vmatpush3.msra.mxu0 %v6408_v42  ;;  %v6656_v16 = vpop.permute.xlu0 %6655 }
0x18d3   :  { %15383 = vmatprep.subr.mxu0 %v16736_v1 }
0x18d5   :  { %v6490_v23 = vpop.permute.xlu1 %6489 }
0x18d6   :  { %v6738_v47 = vpop.permute.xlu0 %6737 }
0x18d9   :  { %v6572_v11 = vpop.permute.xlu1 %6571 }
0x18dd   :  { %v6654_v51 = vpop.permute.xlu1 %6653 }
0x18df   :  { %v18088_v31 = vpop.eup %16230 }
0x18e0   :  { %v6222_v8 = vsel %vm2787_vm11, %v18088_v31, 0.0 }
0x18e1   :  { %6223 = vadd.xlane.f32.xlu1 %v6222_v8  ;;  %v6736_v34 = vpop.permute.xlu1 %6735  ;;  %v396_v8 = vld [vmem:[%s19364_s19 + $0x10] sm:$0xff] }
0x18f2   :  { %6817 = vrot.lane.b32.xlu1 %v5561_v44, %s19363_s22  ;;  %v395_v44 = vld [vmem:[%s19364_s19 + $0x8] sm:$0xff] }
0x191d   :  { %v6203_v4 = vpop.xlane.xlu0 %6202 }
0x191e   :  { %16232 = vrcp.f32 %v6203_v4 }
0x1921   :  { %v6206_v36 = vpop.xlane.xlu1 %6205 }
0x1922   :  { %16234 = vrcp.f32 %v6206_v36 }
0x1925   :  { %v6212_v60 = vpop.xlane.xlu1 %6211 }
0x1926   :  { %16236 = vrcp.f32 %v6212_v60  ;;  %v6209_v22 = vpop.xlane.xlu0 %6208 }
0x1927   :  { %16238 = vrcp.f32 %v6209_v22 }
0x192b   :  { %v16233_v45 = vpop.eup %16232 }
0x192c   :  { %v6226_v58 = vmul.f32 %v16233_v45, %v18049_v43 }
0x192d   :  { %v6218_v48 = vpop.xlane.xlu1 %6217 }
0x192e   :  { %16240 = vrcp.f32 %v6218_v48  ;;  %v6215_v10 = vpop.xlane.xlu0 %6214  ;;  %15360 = vmatmul.mubr.msk.f32.vlgmr.msra.gmra.mxu1 %vm2787_vm11, %v6226_v58 }
0x192f   :  { %v16235_v52 = vpop.eup %16234  ;;  %16242 = vrcp.f32 %v6215_v10  ;;  %15363 = vmatpush3.msk.msra.mxu1 %vm2886_vm12, %v6328_v40  ;;  %15366 = vmatprep.mubr.msk.f32.mxu1 %vm16737_vm0, %v16736_v1 }
0x1930   :  { %15364 = vmatprep.subr.mxu1 %v16736_v1  ;;  %v6228_v63 = vmul.f32 %v16235_v52, %v18053_v55 }
0x1931   :  { %15365 = vmatpush3.msra.mxu1 %v6326_v2 }
0x1932   :  { %15376 = vmatprep.subr.mxu1 %v16736_v1  ;;  %15367 = vmatmul.mubr.msk.f32.vlgmr.msra.gmra.mxu1 %vm2787_vm11, %v6228_v63 }
0x1933   :  { %v16237_v43 = vpop.eup %16236  ;;  %15377 = vmatpush3.msk.msra.mxu1 %vm2886_vm12, %v6492_v5  ;;  %15380 = vmatprep.mubr.msk.f32.mxu1 %vm16737_vm0, %v16736_v1  ;;  %v394_v5 = vld [vmem:[%s19364_s19] sm:$0xff] }
0x1934   :  { %v16239_v46 = vpop.eup %16238  ;;  %15378 = vmatprep.subr.mxu1 %v16736_v1  ;;  %v6232_v26 = vmul.f32 %v16237_v43, %v18058_v33 }
0x1935   :  { %15379 = vmatpush3.msra.mxu1 %v6490_v23  ;;  %v6221_v49 = vpop.xlane.xlu0 %6220  ;;  %v6230_v55 = vmul.f32 %v16239_v46, %v18060_v30 }
0x1936   :  { %16244 = vrcp.f32 %v6221_v49  ;;  %15390 = vmatprep.subr.mxu1 %v16736_v1  ;;  %15381 = vmatmul.mubr.msk.f32.vlgmr.msra.gmra.mxu1 %vm2787_vm11, %v6232_v26 }
0x1937   :  { %15374 = vmatmul.mubr.msk.f32.vlgmr.msra.gmra.mxu0 %vm2787_vm11, %v6230_v55  ;;  %15391 = vmatpush3.msk.msra.mxu1 %vm2886_vm12, %v6656_v16 }
0x1938   :  { %15384 = vmatpush3.msk.msra.mxu0 %vm2886_vm12, %v6574_v37  ;;  %15392 = vmatprep.subr.mxu1 %v16736_v1 }
0x1939   :  { %15385 = vmatprep.subr.mxu0 %v16736_v1  ;;  %15393 = vmatpush3.msra.mxu1 %v6654_v51  ;;  %v6820_v2 = vpop.permute.xlu0 %6819 }
0x193a   :  { %15386 = vmatpush3.msra.mxu0 %v6572_v11  ;;  %15387 = vmatprep.mubr.msk.f32.mxu0 %vm16737_vm0, %v16736_v1 }
0x193b   :  { %v16241_v33 = vpop.eup %16240  ;;  %15394 = vmatprep.mubr.msk.f32.mxu1 %vm16737_vm0, %v16736_v1  ;;  %15397 = vmatprep.subr.mxu0 %v16736_v1 }
0x193c   :  { %v16243_v30 = vpop.eup %16242  ;;  %15404 = vmatprep.subr.mxu1 %v16736_v1  ;;  %v6236_v0 = vmul.f32 %v16241_v33, %v18070_v53 }
0x193d   :  { %v6234_v40 = vmul.f32 %v16243_v30, %v18073_v54 }
0x193e   :  { %15395 = vmatmul.mubr.msk.f32.vlgmr.msra.gmra.mxu1 %vm2787_vm11, %v6236_v0 }
0x193f   :  { %15388 = vmatmul.mubr.msk.f32.vlgmr.msra.gmra.mxu0 %vm2787_vm11, %v6234_v40  ;;  %15405 = vmatpush3.msk.msra.mxu1 %vm2886_vm12, %v6820_v2 }
0x1940   :  { %15398 = vmatpush3.msk.msra.mxu0 %vm2886_vm12, %v6738_v47  ;;  %15401 = vmatprep.mubr.msk.f32.mxu0 %vm16737_vm0, %v16736_v1 }
0x1941   :  { %15399 = vmatprep.subr.mxu0 %v16736_v1  ;;  %15406 = vmatprep.subr.mxu1 %v16736_v1 }
0x1942   :  { %15400 = vmatpush3.msra.mxu0 %v6736_v34  ;;  %15408 = vmatprep.mubr.msk.f32.mxu1 %vm16737_vm0, %v16736_v1 }
0x1943   :  { %v16245_v53 = vpop.eup %16244  ;;  %15411 = vmatprep.subr.mxu0 %v16736_v1 }
0x1944   :  { %v6238_v54 = vmul.f32 %v16245_v53, %v18079_v57  ;;  %v397_v57 = vld [vmem:[%s19364_s19 + $0x18] sm:$0xff]  ;;  %s19365_s19 = sld [smem:[#allocation44_spill]] }
0x1946   :  { %15402 = vmatmul.mubr.msk.f32.vlgmr.msra.gmra.mxu0 %vm2787_vm11, %v6238_v54 }
0x1947   :  { %15419 = vmatprep.mubr.msk.f32.mxu0 %vm16737_vm0, %v16736_v1  ;;  %15412 = vmatpush3.msra.mxu0 %v397_v57 }
0x1948   :  { %15413 = vmatprep.subr.mxu0 %v16736_v1 }
0x1949   :  { %15414 = vmatpush3.msra.mxu0 %v396_v8 }
0x194a   :  { %15415 = vmatprep.subr.mxu0 %v16736_v1 }
0x194b   :  { %15416 = vmatpush3.msra.mxu0 %v395_v44 }
0x194c   :  { %15417 = vmatprep.subr.mxu0 %v16736_v1 }
0x194d   :  { %15418 = vmatpush3.msra.mxu0 %v394_v5 }
0x194e   :  { %15433 = vmatprep.subr.mxu0 %v16736_v1 }
0x196a   :  { %v6224_v19 = vpop.xlane.xlu1 %6223 }
0x196b   :  { %16246 = vrcp.f32 %v6224_v19 }
0x196e   :  { %v6818_v3 = vpop.permute.xlu1 %6817 }
0x196f   :  { %15407 = vmatpush3.msra.mxu1 %v6818_v3  ;;  %v14238_v3 = vld [vmem:[%s19365_s19] ss:$0 sm:$0xff]  ;;  %s19367_s19 = sld [smem:[#allocation47_spill]] }
0x1970   :  { %15422 = vmatprep.subr.mxu1 %v16736_v1 }
0x1978   :  { %v16247_v13 = vpop.eup %16246 }
0x1979   :  { %v6240_v42 = vmul.f32 %v16247_v13, %v18088_v31 }
0x197b   :  { %15409 = vmatmul.mubr.msk.f32.vlgmr.msra.gmra.mxu1 %vm2787_vm11, %v6240_v42 }
0x197c   :  { %15430 = vmatprep.mubr.msk.f32.mxu1 %vm16737_vm0, %v16736_v1 }
0x19ee   :  { %v6319_v31 = vpop.f32.mrf.mxu1 }
0x19ef   :  { %v6897_v10 = vsel %vm436_vm10, %v6319_v31, 0.0 }
0x19f0   :  { %v15361_v23 = vpop.f32.mrf.mxu1 }
0x19f2   :  { %v6401_v37 = vpop.f32.mrf.mxu1 }
0x19f3   :  { %v6898_v48 = vsel %vm436_vm10, %v6401_v37, 0.0 }
0x19f4   :  { %v15368_v11 = vpop.f32.mrf.mxu1  ;;  %v6899_v63 = vadd.f32 %v6898_v48, %v6897_v10 }
0x19f6   :  { %v6565_v16 = vpop.f32.mrf.mxu1 }
0x19f7   :  { %v6483_v51 = vpop.f32.mrf.mxu0  ;;  %v6902_v46 = vsel %vm436_vm10, %v6565_v16, 0.0  ;;  %v408_v16 = vld [vmem:[%s19366_s6 + $0x18] sm:$0xff] }
0x19f8   :  { %v15382_v47 = vpop.f32.mrf.mxu1  ;;  %v6900_v52 = vsel %vm436_vm10, %v6483_v51, 0.0  ;;  %v407_v51 = vld [vmem:[%s19366_s6 + $0x10] sm:$0xff]  ;;  %15423 = vmatpush3.msra.mxu1 %v408_v16 }
0x19f9   :  { %v15375_v34 = vpop.f32.mrf.mxu0  ;;  %v6901_v43 = vadd.f32 %v6900_v52, %v6899_v63  ;;  %15424 = vmatprep.subr.mxu1 %v16736_v1  ;;  %v406_v47 = vld [vmem:[%s19366_s6 + $0x8] sm:$0xff]  ;;  %v417_v52 = vld [vmem:[%s19368_s24 + $0x38] sm:$0xff]  ;;  %v416_v63 = vld [vmem:[%s19368_s24 + $0x30] sm:$0xff] }
0x19fa   :  { %15425 = vmatpush3.msra.mxu1 %v407_v51 }
0x19fb   :  { %v6903_v49 = vadd.f32 %v6902_v46, %v6901_v43  ;;  %15426 = vmatprep.subr.mxu1 %v16736_v1  ;;  %v415_v43 = vld [vmem:[%s19368_s24 + $0x28] sm:$0xff]  ;;  %v414_v46 = vld [vmem:[%s19368_s24 + $0x20] sm:$0xff] }
0x19fc   :  { %15427 = vmatpush3.msra.mxu1 %v406_v47 }
0x19fd   :  { %15428 = vmatprep.subr.mxu1 %v16736_v1 }
0x19fe   :  { %v6729_v4 = vpop.f32.mrf.mxu1 }
0x19ff   :  { %v6647_v36 = vpop.f32.mrf.mxu0  ;;  %v6906_v33 = vsel %vm436_vm10, %v6729_v4, 0.0 }
0x1a00   :  { %v15396_v60 = vpop.f32.mrf.mxu1  ;;  %v6904_v26 = vsel %vm436_vm10, %v6647_v36, 0.0 }
0x1a01   :  { %v15389_v22 = vpop.f32.mrf.mxu0  ;;  %v6905_v55 = vadd.f32 %v6904_v26, %v6903_v49  ;;  %v413_v26 = vld [vmem:[%s19368_s24 + $0x18] sm:$0xff]  ;;  %v412_v49 = vld [vmem:[%s19368_s24 + $0x10] sm:$0xff] }
0x1a02   :  { %v14240_v22 = vld [vmem:[%s19367_s19] ss:$0 sm:$0xff] }
0x1a03   :  { %v6907_v0 = vadd.f32 %v6906_v33, %v6905_v55  ;;  %v411_v55 = vld [vmem:[%s19368_s24 + $0x8] sm:$0xff]  ;;  %v410_v33 = vld [vmem:[%s19368_s24] sm:$0xff] }
0x1a06   :  { %v6811_v45 = vpop.f32.mrf.mxu0 }
0x1a07   :  { %v6908_v30 = vsel %vm436_vm10, %v6811_v45, 0.0 }
0x1a08   :  { %v15403_v58 = vpop.f32.mrf.mxu0  ;;  %v6909_v40 = vadd.f32 %v6908_v30, %v6907_v0  ;;  %v14242_v30 = vld [vmem:[#allocation7] ss:$0 sm:$0xff] }
0x1a09   :  { %v14241_v58 = vld [vmem:[#allocation2] ss:$0 sm:$0xff] }
0x1a3b   :  { %v6893_v2 = vpop.f32.mrf.mxu1 }
0x1a3c   :  { %v6910_v53 = vsel %vm436_vm10, %v6893_v2, 0.0 }
0x1a3d   :  { %v6911_v54 = vadd.f32 %v6910_v53, %v6909_v40  ;;  %v15410_v19 = vpop.f32.mrf.mxu1 }
0x1a3f   :  { %15420 = vmatmul.mubr.msk.f32.vlgmr.msra.gmra.mxu0 %vm436_vm10, %v6911_v54 }
0x1a40   :  { %15449 = vmatprep.mubr.msk.f32.mxu0 %vm16737_vm0, %v16736_v1  ;;  %15434 = vmatpush3.msra.mxu0 %v417_v52 }
0x1a41   :  { %15435 = vmatprep.subr.mxu0 %v16736_v1 }
0x1a42   :  { %15436 = vmatpush3.msra.mxu0 %v416_v63 }
0x1a43   :  { %15437 = vmatprep.subr.mxu0 %v16736_v1 }
0x1a44   :  { %15438 = vmatpush3.msra.mxu0 %v415_v43 }
0x1a45   :  { %15439 = vmatprep.subr.mxu0 %v16736_v1 }
0x1a46   :  { %15440 = vmatpush3.msra.mxu0 %v414_v46 }
0x1a47   :  { %15441 = vmatprep.subr.mxu0 %v16736_v1 }
0x1a48   :  { %15442 = vmatpush3.msra.mxu0 %v413_v26 }
0x1a49   :  { %15443 = vmatprep.subr.mxu0 %v16736_v1 }
0x1a4a   :  { %15444 = vmatpush3.msra.mxu0 %v412_v49 }
0x1a4b   :  { %15445 = vmatprep.subr.mxu0 %v16736_v1 }
0x1a4c   :  { %15446 = vmatpush3.msra.mxu0 %v411_v55 }
0x1a4d   :  { %15447 = vmatprep.subr.mxu0 %v16736_v1 }
0x1a4e   :  { %15448 = vmatpush3.msra.mxu0 %v410_v33 }
0x1a4f   :  { %15474 = vmatprep.subr.mxu0 %v16736_v1 }
0x1aff   :  { %v6987_v13 = vpop.f32.mrf.mxu0 }
0x1b00   :  { %v6988_v42 = vadd.f32 %v14238_v3, %v6987_v13 }
0x1b01   :  { %v15421_v57 = vpop.f32.mrf.mxu0 }
0x1b02   :  { %v6991_v8 = vadd.f32 %v6988_v42, %v17892_v15  ;;  %v405_v15 = vld [vmem:[%s19366_s6] sm:$0xff] }
0x1b03   :  { %15429 = vmatpush3.msra.mxu1 %v405_v15 }
0x1b04   :  { %v6992_v44 = vsel %vm436_vm10, %v6991_v8, 0.0  ;;  %15452 = vmatprep.subr.mxu1 %v16736_v1 }
0x1b05   :  { %6993 = vadd.xlane.f32.xlu0 %v6992_v44 }
0x1b8e   :  { %v6994_v5 = vpop.xlane.xlu0 %6993 }
0x1b8f   :  { %v6995_v31 = vmul.f32 0.03125, %v6994_v5 }
0x1b91   :  { %v6996_v23 = vsub.f32 %v6991_v8, %v6995_v31 }
0x1b93   :  { %v6997_v37 = vmul.f32 %v6996_v23, %v6996_v23 }
0x1b95   :  { %v6998_v11 = vsel %vm436_vm10, %v6997_v37, 0.0 }
0x1b96   :  { %6999 = vadd.xlane.f32.xlu1 %v6998_v11 }
0x1c1f   :  { %v7000_v34 = vpop.xlane.xlu1 %6999 }
0x1c20   :  { %v7001_v4 = vmul.f32 0.03125, %v7000_v34 }
0x1c22   :  { %v7002_v36 = vadd.f32 1e-05, %v7001_v4 }
0x1c24   :  { %16248 = vrsqrt.f32 %v7002_v36 }
0x1c31   :  { %v16249_v60 = vpop.eup %16248 }
0x1c32   :  { %v7004_v45 = vmul.f32 %v16249_v60, %v6996_v23 }
0x1c34   :  { %v7011_v48 = vmul.f32 %v14240_v22, %v7004_v45 }
0x1c36   :  { %v18177_v10 = vadd.f32 %v14241_v58, %v7011_v48  ;;  %v14246_v48 = vld [vmem:[#allocation9] ss:$0 sm:$0xff] }
0x1c38   :  { %15431 = vmatmul.mubr.msk.f32.vlgmr.msra.gmra.mxu1 %vm436_vm10, %v18177_v10 }
0x1c39   :  { %15460 = vmatprep.mubr.msk.f32.mxu1 %vm16737_vm0, %v16736_v1 }
0x1cf8   :  { %v7094_v0 = vpop.f32.mrf.mxu1 }
0x1cf9   :  { %v7095_v40 = vadd.f32 %v14242_v30, %v7094_v0 }
0x1cfa   :  { %v15432_v2 = vpop.f32.mrf.mxu1 }
0x1cfb   :  { %v7099_v53 = vmul.f32 0.70710677, %v7095_v40  ;;  %v7098_v22 = vmul.f32 0.5, %v7095_v40 }
0x1cfd   :  { %v7100_v54 = vand.u32 2147483647, %v7099_v53  ;;  %vm7120_vm15 = vcmp.ge.f32.partialorder %v7099_v53, 0.0 }
0x1cff   :  { %v7101_v19 = vmul.f32 0.3275911, %v7100_v54  ;;  %v7114_v13 = vsub.f32 0.0, %v7100_v54 }
0x1d01   :  { %v7102_v3 = vadd.f32 1.0, %v7101_v19  ;;  %v7115_v42 = vmul.f32 %v7114_v13, %v7100_v54  ;;  %v14248_v19 = vld [vmem:[#allocation4] ss:$0 sm:$0xff] }
0x1d03   :  { %16250 = vrcp.f32 %v7102_v3  ;;  %v7116_v44 = vmul.f32 1.442695, %v7115_v42 }
0x1d05   :  { %16252 = vpow2.f32 %v7116_v44 }
0x1d10   :  { %v16251_v57 = vpop.eup %16250 }
0x1d11   :  { %v7105_v8 = vmul.f32 1.0614054, %v16251_v57 }
0x1d12   :  { %v16253_v15 = vpop.eup %16252 }
0x1d13   :  { %v14244_v5 = vadd.f32 -1.4531521, %v7105_v8 }
0x1d15   :  { %v7107_v31 = vmul.f32 %v16251_v57, %v14244_v5 }
0x1d17   :  { %v7108_v23 = vadd.f32 1.4214138, %v7107_v31 }
0x1d19   :  { %v7109_v37 = vmul.f32 %v16251_v57, %v7108_v23 }
0x1d1b   :  { %v14245_v11 = vadd.f32 -0.28449672, %v7109_v37  ;;  %v424_v37 = vld [vmem:[%s16974_s8 + $0x18] sm:$0xff] }
0x1d1c   :  { %15453 = vmatpush3.msra.mxu1 %v424_v37 }
0x1d1d   :  { %v7111_v16 = vmul.f32 %v16251_v57, %v14245_v11  ;;  %v423_v11 = vld [vmem:[%s16974_s8 + $0x10] sm:$0xff]  ;;  %15454 = vmatprep.subr.mxu1 %v16736_v1 }
0x1d1e   :  { %15455 = vmatpush3.msra.mxu1 %v423_v11 }
0x1d1f   :  { %v7112_v51 = vadd.f32 0.2548296, %v7111_v16  ;;  %v422_v16 = vld [vmem:[%s16974_s8 + $0x8] sm:$0xff]  ;;  %15456 = vmatprep.subr.mxu1 %v16736_v1 }
0x1d20   :  { %15457 = vmatpush3.msra.mxu1 %v422_v16 }
0x1d21   :  { %v7113_v47 = vmul.f32 %v16251_v57, %v7112_v51  ;;  %v421_v51 = vld [vmem:[%s16974_s8] sm:$0xff]  ;;  %15458 = vmatprep.subr.mxu1 %v16736_v1 }
0x1d22   :  { %15459 = vmatpush3.msra.mxu1 %v421_v51 }
0x1d23   :  { %v7118_v34 = vmul.f32 %v16253_v15, %v7113_v47  ;;  %15463 = vmatprep.subr.mxu1 %v16736_v1 }
0x1d25   :  { %v7119_v4 = vsub.f32 1.0, %v7118_v34 }
0x1d27   :  { %v7121_v36 = vsub.f32 0.0, %v7119_v4 }
0x1d29   :  { %v7122_v60 = vsel %vm7120_vm15, %v7119_v4, %v7121_v36  ;;  %v14250_v36 = vld [vmem:[#allocation10] ss:$0 sm:$0xff] }
0x1d2a   :  { %v7123_v45 = vadd.f32 1.0, %v7122_v60 }
0x1d2c   :  { %v7124_v58 = vmul.f32 %v7123_v45, %v7098_v22  ;;  %v14251_v22 = vld [vmem:[#allocation12] ss:$0 sm:$0xff] }
0x1d2e   :  { %15450 = vmatmul.mubr.msk.f32.vlgmr.msra.gmra.mxu0 %vm3767_vm14, %v7124_v58 }
0x1d2f   :  { %15476 = vmatprep.mubr.msk.f32.mxu0 %vm16737_vm0, %v16736_v1 }
0x1dee   :  { %v7200_v52 = vpop.f32.mrf.mxu0 }
0x1def   :  { %v7201_v63 = vadd.f32 %v14246_v48, %v7200_v52  ;;  %v16411_v48 = vld [vmem:[%s16764_s17 + $0x18] sm:$0xff]  ;;  %v16412_v52 = vld [vmem:[%s16764_s17 + $0x10] sm:$0xff] }
0x1df0   :  { %v15451_v43 = vpop.f32.mrf.mxu0 }
0x1df1   :  { %v7204_v46 = vadd.f32 %v7201_v63, %v18177_v10  ;;  %v14249_v10 = vld [vmem:[#allocation6] ss:$0 sm:$0xff]  ;;  %v16413_v63 = vld [vmem:[%s16764_s17 + $0x8] sm:$0xff] }
0x1df2   :  { %v18224_v43 = vld [vmem:[%s16749_s5 + $0x8] sm:$0xff]  ;;  %s19369_s5 = smov 64  }
0x1df3   :  { %v7205_v26 = vsel %vm436_vm10, %v7204_v46, 0.0 }
0x1df4   :  { %7206 = vadd.xlane.f32.xlu0 %v7205_v26  ;;  %v14252_v26 = vld [vmem:[#allocation13] ss:$0 sm:$0xff] }
0x1e7d   :  { %v7207_v49 = vpop.xlane.xlu0 %7206 }
0x1e7e   :  { %v7208_v55 = vmul.f32 0.03125, %v7207_v49 }
0x1e80   :  { %v7209_v33 = vsub.f32 %v7204_v46, %v7208_v55  ;;  %v16414_v46 = vld [vmem:[%s16764_s17] sm:$0xff]  ;;  %s19371_s17 = sld [smem:[#allocation41_spill]] }
0x1e82   :  { %v7210_v30 = vmul.f32 %v7209_v33, %v7209_v33 }
0x1e84   :  { %v7211_v0 = vsel %vm436_vm10, %v7210_v30, 0.0 }
0x1e85   :  { %7212 = vadd.xlane.f32.xlu0 %v7211_v0  ;;  %v16415_v0 = vld [vmem:[%s16769_s21] ss:$0 sm:$0xff]  ;;  %s19372_s21 = sld [smem:[#allocation39_spill]] }
0x1f0e   :  { %v7213_v40 = vpop.xlane.xlu0 %7212 }
0x1f0f   :  { %v7214_v2 = vmul.f32 0.03125, %v7213_v40 }
0x1f11   :  { %v7215_v53 = vadd.f32 1e-05, %v7214_v2 }
0x1f13   :  { %16254 = vrsqrt.f32 %v7215_v53 }
0x1f20   :  { %v16255_v54 = vpop.eup %16254 }
0x1f21   :  { %v7217_v3 = vmul.f32 %v16255_v54, %v7209_v33 }
0x1f23   :  { %v7224_v13 = vmul.f32 %v14248_v19, %v7217_v3 }
0x1f25   :  { %v7231_v42 = vadd.f32 %v14249_v10, %v7224_v13 }
0x1f27   :  { %v7232_v57 = vsel %vm436_vm10, %v7231_v42, 0.0 }
0x1f28   :  { %7233 = vadd.xlane.f32.xlu0 %v7232_v57 }
0x1fb1   :  { %v7234_v8 = vpop.xlane.xlu0 %7233 }
0x1fb2   :  { %v7235_v44 = vmul.f32 0.03125, %v7234_v8 }
0x1fb4   :  { %v7236_v5 = vsub.f32 %v7231_v42, %v7235_v44  ;;  %v14257_v44 = vld [vmem:[%s16759_s13 + $0x8] sm:$0xff] }
0x1fb6   :  { %v7237_v31 = vmul.f32 %v7236_v5, %v7236_v5 }
0x1fb8   :  { %v7238_v23 = vsel %vm436_vm10, %v7237_v31, 0.0 }
0x1fb9   :  { %7239 = vadd.xlane.f32.xlu1 %v7238_v23 }
0x2042   :  { %v7240_v47 = vpop.xlane.xlu1 %7239 }
0x2043   :  { %v7241_v15 = vmul.f32 0.03125, %v7240_v47 }
0x2045   :  { %v7242_v34 = vadd.f32 1e-05, %v7241_v15 }
0x2047   :  { %16256 = vrsqrt.f32 %v7242_v34 }
0x2054   :  { %v16257_v4 = vpop.eup %16256 }
0x2055   :  { %v7244_v60 = vmul.f32 %v16257_v4, %v7236_v5 }
0x2057   :  { %v7251_v45 = vmul.f32 %v14250_v36, %v7244_v60 }
0x2059   :  { %v7258_v58 = vadd.f32 %v14251_v22, %v7251_v45 }
0x205b   :  { %15461 = vmatmul.mubr.msk.f32.vlgmr.msra.gmra.mxu1 %vm436_vm10, %v7258_v58 }
0x205c   :  { %15464 = vmatpush3.msra.mxu1 %v16411_v48  ;;  %15471 = vmatprep.mubr.msk.f32.mxu1 %vm16737_vm0, %v16736_v1 }
0x205d   :  { %15465 = vmatprep.subr.mxu1 %v16736_v1 }
0x205e   :  { %15466 = vmatpush3.msra.mxu1 %v16412_v52 }
0x205f   :  { %15467 = vmatprep.subr.mxu1 %v16736_v1 }
0x2060   :  { %15468 = vmatpush3.msra.mxu1 %v16413_v63 }
0x2061   :  { %15469 = vmatprep.subr.mxu1 %v16736_v1 }
0x2062   :  { %15470 = vmatpush3.msra.mxu1 %v16414_v46 }
0x2063   :  { %15472 = vmatmul.mubr.msk.f32.vlgmr.msra.gmra.mxu1 %vm436_vm10, %v18224_v43  ;;  %15479 = vmatprep.subr.mxu1 %v16736_v1 }
0x2064   :  { %15481 = vmatprep.mubr.msk.f32.mxu1 %vm16737_vm0, %v16736_v1 }
0x211b   :  { %v7334_v49 = vpop.f32.mrf.mxu1 }
0x211c   :  { %v7335_v55 = vadd.f32 %v14252_v26, %v7334_v49 }
0x211d   :  { %v15462_v33 = vpop.f32.mrf.mxu1 }
0x211e   :  { %7338 = vst.msk [vmem:[%s16984_s3] sm:$0xff] %vm3767_vm14, %v7335_v55 }
0x2123   :  { %v7415_v30 = vpop.f32.mrf.mxu1 }
0x2124   :  { %v18236_v40 = vadd.f32 %v16415_v0, %v7415_v30 }
0x2125   :  { %v15473_v2 = vpop.f32.mrf.mxu1 }
0x2126   :  { %7436 = vrot.lane.b32.xlu0 %v18236_v40, %s19363_s22  ;;  %v7419_v54 = vmul.f32 %v18236_v40, %v17059_v17  ;;  %v7420_v19 = vmul.f32 %v18236_v40, %v17079_v24  ;;  %v7421_v3 = vmul.f32 %v18236_v40, %v17088_v25  ;;  %v7422_v10 = vmul.f32 %v18236_v40, %v17108_v28 }
0x2127   :  { %v7423_v13 = vmul.f32 %v18236_v40, %v17062_v18  ;;  %v7424_v42 = vmul.f32 %v18236_v40, %v17126_v32  ;;  %v7425_v57 = vmul.f32 %v18236_v40, %v17070_v21  ;;  %v7426_v8 = vmul.f32 %v18236_v40, %v17139_v35 }
0x2198   :  { %v7437_v53 = vpop.permute.xlu0 %7436 }
0x2199   :  { %15475 = vmatpush3.xpose.msk.msra.mxu0 %vm436_vm10, %v7437_v53  ;;  %15480 = vmatpush3.xpose.msk.msra.mxu1 %vm436_vm10, %v7437_v53 }
0x219a   :  { %15484 = vmatprep.subr.mxu0 %v16736_v1  ;;  %15489 = vmatprep.subr.mxu1 %v16736_v1 }
0x219c   :  { %15477 = vmatmul.mubr.msk.f32.vlgmr.msra.gmra.mxu0 %vm436_vm10, %v7419_v54  ;;  %15482 = vmatmul.mubr.msk.f32.vlgmr.msra.gmra.mxu1 %vm436_vm10, %v7420_v19 }
0x219d   :  { %15485 = vmatpush3.xpose.msk.msra.mxu0 %vm436_vm10, %v7437_v53  ;;  %15490 = vmatpush3.xpose.msk.msra.mxu1 %vm436_vm10, %v7437_v53 }
0x219e   :  { %15486 = vmatprep.mubr.msk.f32.mxu0 %vm16737_vm0, %v16736_v1  ;;  %15491 = vmatprep.mubr.msk.f32.mxu1 %vm16737_vm0, %v16736_v1 }
0x219f   :  { %15494 = vmatprep.subr.mxu0 %v16736_v1  ;;  %15499 = vmatprep.subr.mxu1 %v16736_v1 }
0x21a0   :  { %15487 = vmatmul.mubr.msk.f32.vlgmr.msra.gmra.mxu0 %vm436_vm10, %v7421_v3  ;;  %15492 = vmatmul.mubr.msk.f32.vlgmr.msra.gmra.mxu1 %vm436_vm10, %v7422_v10  ;;  %v7428_v3 = vmul.f32 %v18236_v40, %v17164_v59  ;;  %v7427_v10 = vmul.f32 %v18236_v40, %v17159_v56 }
0x21a1   :  { %15495 = vmatpush3.xpose.msk.msra.mxu0 %vm436_vm10, %v7437_v53  ;;  %15500 = vmatpush3.xpose.msk.msra.mxu1 %vm436_vm10, %v7437_v53 }
0x21a2   :  { %15496 = vmatprep.mubr.msk.f32.mxu0 %vm16737_vm0, %v16736_v1  ;;  %15501 = vmatprep.mubr.msk.f32.mxu1 %vm16737_vm0, %v16736_v1 }
0x21a3   :  { %15504 = vmatprep.subr.mxu0 %v16736_v1  ;;  %15509 = vmatprep.subr.mxu1 %v16736_v1 }
0x21a4   :  { %15497 = vmatmul.mubr.msk.f32.vlgmr.msra.gmra.mxu0 %vm436_vm10, %v7423_v13  ;;  %15502 = vmatmul.mubr.msk.f32.vlgmr.msra.gmra.mxu1 %vm436_vm10, %v7424_v42  ;;  %v7431_v13 = vmul.f32 %v18236_v40, %v17188_v39  ;;  %v7429_v42 = vmul.f32 %v18236_v40, %v17181_v29 }
0x21a5   :  { %15505 = vmatpush3.xpose.msk.msra.mxu0 %vm436_vm10, %v7437_v53  ;;  %15510 = vmatpush3.xpose.msk.msra.mxu1 %vm436_vm10, %v7437_v53 }
0x21a6   :  { %15506 = vmatprep.mubr.msk.f32.mxu0 %vm16737_vm0, %v16736_v1  ;;  %15511 = vmatprep.mubr.msk.f32.mxu1 %vm16737_vm0, %v16736_v1 }
0x21a7   :  { %15519 = vmatprep.subr.mxu1 %v16736_v1  ;;  %15514 = vmatprep.subr.mxu0 %v16736_v1 }
0x21a8   :  { %15507 = vmatmul.mubr.msk.f32.vlgmr.msra.gmra.mxu0 %vm436_vm10, %v7425_v57  ;;  %15512 = vmatmul.mubr.msk.f32.vlgmr.msra.gmra.mxu1 %vm436_vm10, %v7426_v8 }
0x21a9   :  { %15516 = vmatprep.mubr.msk.f32.mxu0 %vm16737_vm0, %v16736_v1  ;;  %15521 = vmatprep.mubr.msk.f32.mxu1 %vm16737_vm0, %v16736_v1 }
0x225c   :  { %v7509_v5 = vpop.f32.mrf.mxu0  ;;  %v7582_v31 = vpop.f32.mrf.mxu1 }
0x225d   :  { %v7510_v23 = vadd.f32 %v14257_v44, %v7509_v5  ;;  %v7583_v16 = vadd.f32 %v14257_v44, %v7582_v31  ;;  %v7430_v5 = vmul.f32 %v18236_v40, %v17186_v38  ;;  %v7432_v31 = vmul.f32 %v18236_v40, %v17169_v61 }
0x225e   :  { %v15478_v37 = vpop.f32.mrf.mxu0  ;;  %v15483_v11 = vpop.f32.mrf.mxu1 }
0x225f   :  { %v8024_v51 = vsel %vm1155_vm9, %v7510_v23, -inf  ;;  %v8027_v60 = vsel %vm1155_vm9, %v7583_v16, -inf }
0x2260   :  { %8025 = vmax.xlane.f32.xlu1 %v8024_v51  ;;  %v7655_v47 = vpop.f32.mrf.mxu0  ;;  %v7728_v15 = vpop.f32.mrf.mxu1 }
0x2261   :  { %v7656_v36 = vadd.f32 %v14257_v44, %v7655_v47  ;;  %v7729_v52 = vadd.f32 %v14257_v44, %v7728_v15 }
0x2262   :  { %v15488_v34 = vpop.f32.mrf.mxu0  ;;  %v15493_v4 = vpop.f32.mrf.mxu1 }
0x2263   :  { %v8030_v63 = vsel %vm1155_vm9, %v7656_v36, -inf  ;;  %v8033_v2 = vsel %vm1155_vm9, %v7729_v52, -inf }
0x2264   :  { %v7801_v22 = vpop.f32.mrf.mxu0  ;;  %8028 = vmax.xlane.f32.xlu1 %v8027_v60  ;;  %v7874_v45 = vpop.f32.mrf.mxu1 }
0x2265   :  { %v7802_v30 = vadd.f32 %v14257_v44, %v7801_v22  ;;  %v7875_v53 = vadd.f32 %v14257_v44, %v7874_v45 }
0x2266   :  { %v15498_v58 = vpop.f32.mrf.mxu0  ;;  %v15503_v48 = vpop.f32.mrf.mxu1 }
0x2267   :  { %v8036_v54 = vsel %vm1155_vm9, %v7802_v30, -inf  ;;  %v8039_v19 = vsel %vm1155_vm9, %v7875_v53, -inf }
0x2268   :  { %v7947_v46 = vpop.f32.mrf.mxu0  ;;  %8031 = vmax.xlane.f32.xlu1 %v8030_v63  ;;  %v8020_v26 = vpop.f32.mrf.mxu1 }
0x2269   :  { %v7948_v49 = vadd.f32 %v14257_v44, %v7947_v46  ;;  %v18316_v57 = vadd.f32 %v14257_v44, %v8020_v26 }
0x226a   :  { %v15508_v55 = vpop.f32.mrf.mxu0  ;;  %v15513_v33 = vpop.f32.mrf.mxu1 }
0x226b   :  { %v8042_v0 = vsel %vm1155_vm9, %v7948_v49, -inf  ;;  %v8045_v8 = vsel %vm1155_vm9, %v18316_v57, -inf }
0x226c   :  { %8043 = vmax.xlane.f32.xlu0 %v8042_v0  ;;  %8034 = vmax.xlane.f32.xlu1 %v8033_v2 }
0x2270   :  { %8037 = vmax.xlane.f32.xlu1 %v8036_v54 }
0x2274   :  { %8040 = vmax.xlane.f32.xlu1 %v8039_v19 }
0x2282   :  { %8190 = vrot.lane.b32.xlu0 %v7428_v3, %s19369_s5 }
0x2285   :  { %8113 = vrot.lane.b32.xlu1 %v7427_v10, %s19369_s5 }
0x2286   :  { %8421 = vrot.lane.b32.xlu0 %v7431_v13, %s19369_s5 }
0x2289   :  { %8267 = vrot.lane.b32.xlu1 %v7429_v42, %s19369_s5 }
0x22ad   :  { %8046 = vmax.xlane.f32.xlu1 %v8045_v8 }
0x22be   :  { %8344 = vrot.lane.b32.xlu1 %v7430_v5, %s19369_s5 }
0x22c2   :  { %8498 = vrot.lane.b32.xlu1 %v7432_v31, %s19369_s5 }
0x22e9   :  { %v8026_v37 = vpop.xlane.xlu1 %8025 }
0x22ea   :  { %v8048_v11 = vsub.f32 %v7510_v23, %v8026_v37 }
0x22ec   :  { %v8056_v51 = vmul.f32 1.442695, %v8048_v11  ;;  %v7434_v11 = vmul.f32 %v18236_v40, %v17171_v62 }
0x22ed   :  { %v8029_v47 = vpop.xlane.xlu1 %8028 }
0x22ee   :  { %16258 = vpow2.f32 %v8056_v51  ;;  %v8049_v44 = vsub.f32 %v7583_v16, %v8029_v47 }
0x22f0   :  { %v8058_v15 = vmul.f32 1.442695, %v8049_v44 }
0x22f1   :  { %v8032_v34 = vpop.xlane.xlu1 %8031 }
0x22f2   :  { %16260 = vpow2.f32 %v8058_v15  ;;  %v8050_v4 = vsub.f32 %v7656_v36, %v8032_v34 }
0x22f4   :  { %v8060_v60 = vmul.f32 1.442695, %v8050_v4 }
0x22f5   :  { %v8044_v22 = vpop.xlane.xlu0 %8043  ;;  %v8035_v45 = vpop.xlane.xlu1 %8034 }
0x22f6   :  { %16262 = vpow2.f32 %v8060_v60  ;;  %v8051_v58 = vsub.f32 %v7729_v52, %v8035_v45  ;;  %v8054_v33 = vsub.f32 %v7948_v49, %v8044_v22  ;;  %v7433_v60 = vmul.f32 %v18236_v40, %v17192_v41 }
0x22f8   :  { %v8062_v48 = vmul.f32 1.442695, %v8051_v58  ;;  %v8068_v19 = vmul.f32 1.442695, %v8054_v33 }
0x22f9   :  { %v8191_v63 = vpop.permute.xlu0 %8190  ;;  %v8038_v46 = vpop.xlane.xlu1 %8037 }
0x22fa   :  { %v8052_v26 = vsub.f32 %v7802_v30, %v8038_v46  ;;  %15520 = vmatpush3.msra.mxu1 %v8191_v63  ;;  %16264 = vpow2.f32 %v8062_v48 }
0x22fb   :  { %v16259_v55 = vpop.eup %16258  ;;  %15529 = vmatprep.subr.mxu1 %v16736_v1 }
0x22fc   :  { %v8064_v23 = vmul.f32 1.442695, %v8052_v26  ;;  %v8072_v16 = vsel %vm1155_vm9, %v16259_v55, 0.0 }
0x22fd   :  { %v8041_v0 = vpop.xlane.xlu1 %8040  ;;  %8073 = vadd.xlane.f32.xlu1 %v8072_v16 }
0x22fe   :  { %16266 = vpow2.f32 %v8064_v23  ;;  %v8053_v36 = vsub.f32 %v7875_v53, %v8041_v0 }
0x22ff   :  { %v16261_v2 = vpop.eup %16260 }
0x2300   :  { %v8066_v54 = vmul.f32 1.442695, %v8053_v36  ;;  %v8075_v52 = vsel %vm1155_vm9, %v16261_v2, 0.0  ;;  %v8422_v36 = vpop.permute.xlu0 %8421 }
0x2301   :  { %v8114_v3 = vpop.permute.xlu1 %8113  ;;  %8076 = vadd.xlane.f32.xlu1 %v8075_v52 }
0x2302   :  { %16268 = vpow2.f32 %v8066_v54  ;;  %15515 = vmatpush3.msra.mxu0 %v8114_v3 }
0x2303   :  { %v16263_v30 = vpop.eup %16262  ;;  %15524 = vmatprep.subr.mxu0 %v16736_v1  ;;  %16270 = vpow2.f32 %v8068_v19 }
0x2304   :  { %v8078_v10 = vsel %vm1155_vm9, %v16263_v30, 0.0 }
0x2305   :  { %8079 = vadd.xlane.f32.xlu1 %v8078_v10  ;;  %v8268_v51 = vpop.permute.xlu1 %8267 }
0x2307   :  { %v16265_v49 = vpop.eup %16264 }
0x2308   :  { %v8081_v13 = vsel %vm1155_vm9, %v16265_v49, 0.0 }
0x2309   :  { %8082 = vadd.xlane.f32.xlu1 %v8081_v13 }
0x230b   :  { %v16267_v53 = vpop.eup %16266 }
0x230c   :  { %v8084_v42 = vsel %vm1155_vm9, %v16267_v53, 0.0 }
0x230d   :  { %8085 = vadd.xlane.f32.xlu1 %v8084_v42 }
0x230f   :  { %v18333_v8 = vpop.eup %16268 }
0x2310   :  { %v8087_v5 = vsel %vm1155_vm9, %v18333_v8, 0.0  ;;  %v18337_v31 = vpop.eup %16270 }
0x2311   :  { %8088 = vadd.xlane.f32.xlu1 %v8087_v5  ;;  %v8090_v37 = vsel %vm1155_vm9, %v18337_v31, 0.0 }
0x2315   :  { %8091 = vadd.xlane.f32.xlu1 %v8090_v37  ;;  %v16417_v37 = vld [vmem:[%s16774_s25 + $0x10] sm:$0xff] }
0x2326   :  { %8652 = vrot.lane.b32.xlu1 %v7434_v11, %s19369_s5  ;;  %v16419_v11 = vld [vmem:[%s16774_s25] sm:$0xff] }
0x2336   :  { %v8047_v47 = vpop.xlane.xlu1 %8046 }
0x2337   :  { %v8055_v44 = vsub.f32 %v18316_v57, %v8047_v47  ;;  %v16420_v47 = vld [vmem:[%s16794_s14 + $0x18] sm:$0xff] }
0x2339   :  { %v8070_v15 = vmul.f32 1.442695, %v8055_v44 }
0x233a   :  { %v8345_v22 = vpop.permute.xlu1 %8344 }
0x233b   :  { %16272 = vpow2.f32 %v8070_v15  ;;  %v16421_v15 = vld [vmem:[%s19338_s12 + $0x18] sm:$0xff] }
0x233e   :  { %v8499_v45 = vpop.permute.xlu1 %8498 }
0x2348   :  { %v18345_v34 = vpop.eup %16272 }
0x2349   :  { %v8093_v4 = vsel %vm1155_vm9, %v18345_v34, 0.0 }
0x234a   :  { %8094 = vadd.xlane.f32.xlu0 %v8093_v4  ;;  %v16422_v4 = vld [vmem:[%s19338_s12 + $0x10] sm:$0xff] }
0x2360   :  { %8575 = vrot.lane.b32.xlu0 %v7433_v60, %s19369_s5  ;;  %v16423_v60 = vld [vmem:[%s19338_s12 + $0x8] sm:$0xff] }
0x2386   :  { %v8074_v58 = vpop.xlane.xlu1 %8073 }
0x2387   :  { %16274 = vrcp.f32 %v8074_v58 }
0x238a   :  { %v8077_v48 = vpop.xlane.xlu1 %8076 }
0x238b   :  { %16276 = vrcp.f32 %v8077_v48 }
0x238e   :  { %v8080_v57 = vpop.xlane.xlu1 %8079 }
0x238f   :  { %16278 = vrcp.f32 %v8080_v57 }
0x2392   :  { %v8083_v63 = vpop.xlane.xlu1 %8082 }
0x2393   :  { %16280 = vrcp.f32 %v8083_v63 }
0x2394   :  { %v16275_v46 = vpop.eup %16274 }
0x2395   :  { %v8097_v26 = vmul.f32 %v16275_v46, %v16259_v55 }
0x2396   :  { %v8086_v23 = vpop.xlane.xlu1 %8085 }
0x2397   :  { %15517 = vmatmul.mubr.msk.f32.vlgmr.msra.gmra.mxu0 %vm1155_vm9, %v8097_v26  ;;  %16282 = vrcp.f32 %v8086_v23 }
0x2398   :  { %v16277_v16 = vpop.eup %16276  ;;  %15525 = vmatpush3.msra.mxu0 %v8268_v51  ;;  %15526 = vmatprep.mubr.msk.f32.mxu0 %vm16737_vm0, %v16736_v1 }
0x2399   :  { %v8099_v40 = vmul.f32 %v16277_v16, %v16261_v2  ;;  %15534 = vmatprep.subr.mxu0 %v16736_v1 }
0x239a   :  { %v8089_v33 = vpop.xlane.xlu1 %8088 }
0x239b   :  { %15522 = vmatmul.mubr.msk.f32.vlgmr.msra.gmra.mxu1 %vm1155_vm9, %v8099_v40  ;;  %16284 = vrcp.f32 %v8089_v33 }
0x239c   :  { %v16279_v0 = vpop.eup %16278  ;;  %15530 = vmatpush3.msra.mxu1 %v8345_v22  ;;  %15531 = vmatprep.mubr.msk.f32.mxu1 %vm16737_vm0, %v16736_v1  ;;  %v16424_v22 = vld [vmem:[%s19338_s12] sm:$0xff]  ;;  %s19377_s12 = sld [smem:[#allocation40_spill]] }
0x239d   :  { %v8101_v55 = vmul.f32 %v16279_v0, %v16263_v30  ;;  %15539 = vmatprep.subr.mxu1 %v16736_v1 }
0x239e   :  { %v8092_v19 = vpop.xlane.xlu1 %8091 }
0x239f   :  { %15527 = vmatmul.mubr.msk.f32.vlgmr.msra.gmra.mxu0 %vm1155_vm9, %v8101_v55  ;;  %16286 = vrcp.f32 %v8092_v19 }
0x23a0   :  { %15535 = vmatpush3.msra.mxu0 %v8422_v36  ;;  %15536 = vmatprep.mubr.msk.f32.mxu0 %vm16737_vm0, %v16736_v1  ;;  %v16281_v2 = vpop.eup %16280 }
0x23a1   :  { %15544 = vmatprep.subr.mxu0 %v16736_v1  ;;  %v8103_v54 = vmul.f32 %v16281_v2, %v16265_v49 }
0x23a2   :  { %v8653_v49 = vpop.permute.xlu1 %8652 }
0x23a3   :  { %15532 = vmatmul.mubr.msk.f32.vlgmr.msra.gmra.mxu1 %vm1155_vm9, %v8103_v54 }
0x23a4   :  { %v16283_v52 = vpop.eup %16282  ;;  %15540 = vmatpush3.msra.mxu1 %v8499_v45  ;;  %15541 = vmatprep.mubr.msk.f32.mxu1 %vm16737_vm0, %v16736_v1 }
0x23a5   :  { %v8105_v3 = vmul.f32 %v16283_v52, %v16267_v53  ;;  %15549 = vmatprep.subr.mxu1 %v16736_v1 }
0x23a7   :  { %15537 = vmatmul.mubr.msk.f32.vlgmr.msra.gmra.mxu0 %vm1155_vm9, %v8105_v3 }
0x23a8   :  { %v16285_v30 = vpop.eup %16284  ;;  %15546 = vmatprep.mubr.msk.f32.mxu0 %vm16737_vm0, %v16736_v1 }
0x23a9   :  { %v8107_v10 = vmul.f32 %v16285_v30, %v18333_v8  ;;  %v16416_v8 = vld [vmem:[%s16774_s25 + $0x18] sm:$0xff] }
0x23ab   :  { %15542 = vmatmul.mubr.msk.f32.vlgmr.msra.gmra.mxu1 %vm1155_vm9, %v8107_v10 }
0x23ac   :  { %15550 = vmatpush3.msra.mxu1 %v8653_v49  ;;  %15551 = vmatprep.mubr.msk.f32.mxu1 %vm16737_vm0, %v16736_v1  ;;  %v16287_v53 = vpop.eup %16286 }
0x23ad   :  { %15565 = vmatprep.subr.mxu1 %v16736_v1  ;;  %v8109_v5 = vmul.f32 %v16287_v53, %v18337_v31  ;;  %v16418_v31 = vld [vmem:[%s16774_s25 + $0x8] sm:$0xff]  ;;  %s19373_s25 = sld [smem:[#allocation38_spill]] }
0x23d3   :  { %v8095_v13 = vpop.xlane.xlu0 %8094 }
0x23d4   :  { %16288 = vrcp.f32 %v8095_v13 }
0x23d7   :  { %v8576_v42 = vpop.permute.xlu0 %8575 }
0x23d8   :  { %15545 = vmatpush3.msra.mxu0 %v8576_v42 }
0x23d9   :  { %15547 = vmatmul.mubr.msk.f32.vlgmr.msra.gmra.mxu0 %vm1155_vm9, %v8109_v5  ;;  %15554 = vmatprep.subr.mxu0 %v16736_v1 }
0x23da   :  { %15555 = vmatpush3.msra.mxu0 %v16416_v8  ;;  %15562 = vmatprep.mubr.msk.f32.mxu0 %vm16737_vm0, %v16736_v1 }
0x23db   :  { %15556 = vmatprep.subr.mxu0 %v16736_v1 }
0x23dc   :  { %15557 = vmatpush3.msra.mxu0 %v16417_v37 }
0x23dd   :  { %15558 = vmatprep.subr.mxu0 %v16736_v1 }
0x23de   :  { %15559 = vmatpush3.msra.mxu0 %v16418_v31 }
0x23df   :  { %15560 = vmatprep.subr.mxu0 %v16736_v1 }
0x23e0   :  { %15561 = vmatpush3.msra.mxu0 %v16419_v11 }
0x23e1   :  { %v16289_v51 = vpop.eup %16288  ;;  %15576 = vmatprep.subr.mxu0 %v16420_v47 }
0x23e2   :  { %v8111_v44 = vmul.f32 %v16289_v51, %v18345_v34  ;;  %v14255_v51 = vld [vmem:[%s16754_s9 + $0x10] sm:$0xff] }
0x23e4   :  { %15552 = vmatmul.mubr.msk.f32.vlgmr.msra.gmra.mxu1 %vm1155_vm9, %v8111_v44  ;;  %v16425_v44 = vld [vmem:[%s16794_s14 + $0x10] sm:$0xff] }
0x23e5   :  { %15566 = vmatpush3.msra.mxu1 %v16421_v15  ;;  %15573 = vmatprep.mubr.msk.f32.mxu1 %vm16737_vm0, %v16736_v1  ;;  %v16426_v15 = vld [vmem:[%s16794_s14 + $0x8] sm:$0xff] }
0x23e6   :  { %15567 = vmatprep.subr.mxu1 %v16736_v1 }
0x23e7   :  { %15568 = vmatpush3.msra.mxu1 %v16422_v4  ;;  %v14256_v4 = vld [vmem:[%s16754_s9 + $0x18] sm:$0x3] }
0x23e8   :  { %15569 = vmatprep.subr.mxu1 %v16736_v1 }
0x23e9   :  { %15570 = vmatpush3.msra.mxu1 %v16423_v60  ;;  %v16427_v60 = vld [vmem:[%s16794_s14] sm:$0xff]  ;;  %s19376_s14 = sld [smem:[#allocation46_spill]] }
0x23ea   :  { %15571 = vmatprep.subr.mxu1 %v16736_v1 }
0x23eb   :  { %15572 = vmatpush3.msra.mxu1 %v16424_v22  ;;  %v16428_v22 = vld [vmem:[%s16779_s29] ss:$0 sm:$0xff]  ;;  %s19374_s29 = sld [smem:[#allocation42_spill]] }
0x23ec   :  { %15587 = vmatprep.subr.mxu1 %v16736_v1 }
0x2457   :  { %v8185_v34 = vpop.f32.mrf.mxu0 }
0x2458   :  { %v8728_v55 = vsel %vm436_vm10, %v8185_v34, 0.0 }
0x2459   :  { %v15518_v45 = vpop.f32.mrf.mxu0 }
0x245b   :  { %v8262_v58 = vpop.f32.mrf.mxu1 }
0x245c   :  { %v8729_v0 = vsel %vm436_vm10, %v8262_v58, 0.0 }
0x245d   :  { %v15523_v48 = vpop.f32.mrf.mxu1  ;;  %v8730_v54 = vadd.f32 %v8729_v0, %v8728_v55 }
0x245f   :  { %v8339_v57 = vpop.f32.mrf.mxu0 }
0x2460   :  { %v8731_v36 = vsel %vm436_vm10, %v8339_v57, 0.0 }
0x2461   :  { %v15528_v63 = vpop.f32.mrf.mxu0  ;;  %v8732_v3 = vadd.f32 %v8731_v36, %v8730_v54 }
0x2462   :  { %v16429_v63 = vld [vmem:[%s19341_s26] ss:$0 sm:$0xff] }
0x2463   :  { %v8416_v46 = vpop.f32.mrf.mxu1 }
0x2464   :  { %v8733_v52 = vsel %vm436_vm10, %v8416_v46, 0.0 }
0x2465   :  { %v15533_v26 = vpop.f32.mrf.mxu1  ;;  %v8734_v10 = vadd.f32 %v8733_v52, %v8732_v3  ;;  %v16430_v3 = vld [vmem:[%s19339_s4] ss:$0 sm:$0xff]  ;;  %s19378_s4 = sld [smem:[#allocation43_spill]] }
0x2467   :  { %v8493_v23 = vpop.f32.mrf.mxu0 }
0x2468   :  { %v8735_v30 = vsel %vm436_vm10, %v8493_v23, 0.0 }
0x2469   :  { %v15538_v16 = vpop.f32.mrf.mxu0  ;;  %v8736_v13 = vadd.f32 %v8735_v30, %v8734_v10  ;;  %v16431_v10 = vld [vmem:[%s19340_s23] ss:$0 sm:$0xff] }
0x246b   :  { %v8570_v40 = vpop.f32.mrf.mxu1 }
0x246c   :  { %v8737_v49 = vsel %vm436_vm10, %v8570_v40, 0.0 }
0x246d   :  { %v15543_v33 = vpop.f32.mrf.mxu1  ;;  %v8738_v42 = vadd.f32 %v8737_v49, %v8736_v13 }
0x2499   :  { %v8647_v2 = vpop.f32.mrf.mxu0 }
0x249a   :  { %v8739_v53 = vsel %vm436_vm10, %v8647_v2, 0.0 }
0x249b   :  { %v15548_v19 = vpop.f32.mrf.mxu0  ;;  %v8740_v5 = vadd.f32 %v8739_v53, %v8738_v42  ;;  %v16432_v53 = vld [vmem:[%s19342_s28] ss:$0 sm:$0xff] }
0x24a4   :  { %v8724_v8 = vpop.f32.mrf.mxu1 }
0x24a5   :  { %v8741_v37 = vsel %vm436_vm10, %v8724_v8, 0.0 }
0x24a6   :  { %v8742_v31 = vadd.f32 %v8741_v37, %v8740_v5  ;;  %v15553_v11 = vpop.f32.mrf.mxu1 }
0x24a8   :  { %15563 = vmatmul.mubr.msk.f32.vlgmr.msra.gmra.mxu0 %vm436_vm10, %v8742_v31 }
0x24a9   :  { %15577 = vmatpush3.msra.mxu0 %v16420_v47  ;;  %15584 = vmatprep.mubr.msk.f32.mxu0 %vm436_vm10, %v14255_v51 }
0x24aa   :  { %15578 = vmatprep.subr.mxu0 %v16425_v44 }
0x24ab   :  { %15579 = vmatpush3.msra.mxu0 %v16425_v44 }
0x24ac   :  { %15580 = vmatprep.subr.mxu0 %v16426_v15 }
0x24ad   :  { %15581 = vmatpush3.msra.mxu0 %v16426_v15 }
0x24ae   :  { %15582 = vmatprep.subr.mxu0 %v16427_v60 }
0x24af   :  { %15583 = vmatpush3.msra.mxu0 %v16427_v60 }
0x24b0   :  { %15585 = vmatmul.mubr.msk.f32.vlgmr.msra.gmra.mxu0 %vm436_vm10, %v14256_v4  ;;  %15594 = vmatprep.subr.mxu0 %v16736_v1 }
0x24b1   :  { %15598 = vmatprep.mubr.msk.f32.mxu0 %vm16737_vm0, %v16736_v1 }
0x2568   :  { %v8812_v47 = vpop.f32.mrf.mxu0 }
0x2569   :  { %v8813_v34 = vadd.f32 %v16428_v22, %v8812_v47 }
0x256a   :  { %v15564_v45 = vpop.f32.mrf.mxu0 }
0x256b   :  { %v8816_v58 = vadd.f32 %v18224_v43, %v8813_v34 }
0x256d   :  { %v8817_v48 = vsel %vm436_vm10, %v8816_v58, 0.0 }
0x256e   :  { %8818 = vadd.xlane.f32.xlu0 %v8817_v48 }
0x2570   :  { %v15586_v57 = vpop.f32.mrf.mxu0 }
0x2571   :  { %v18424_v46 = vadd.f32 %v16429_v63, %v15586_v57 }
0x2572   :  { %v8977_v26 = vpop.f32.mrf.mxu0 }
0x2573   :  { %15595 = vmatpush3.xpose.msk.msra.mxu0 %vm436_vm10, %v18424_v46  ;;  %v18429_v23 = vadd.f32 %v16429_v63, %v8977_v26  ;;  %v8995_v55 = vmul.f32 %v17437_v6, %v18424_v46 }
0x2574   :  { %15596 = vmatprep.subr.mxu0 %v16736_v1 }
0x2577   :  { %15597 = vmatpush3.xpose.msk.msra.mxu0 %vm436_vm10, %v18429_v23 }
0x2578   :  { %15608 = vmatprep.subr.mxu0 %v16736_v1 }
0x25f7   :  { %v8819_v43 = vpop.xlane.xlu0 %8818 }
0x25f8   :  { %v8820_v16 = vmul.f32 0.03125, %v8819_v43 }
0x25fa   :  { %v8821_v40 = vsub.f32 %v8816_v58, %v8820_v16 }
0x25fc   :  { %v8822_v33 = vmul.f32 %v8821_v40, %v8821_v40 }
0x25fe   :  { %v8823_v0 = vsel %vm436_vm10, %v8822_v33, 0.0 }
0x25ff   :  { %8824 = vadd.xlane.f32.xlu1 %v8823_v0 }
0x2610   :  { %9692 = vrot.lane.b32.xlu1 %v8995_v55, %s19363_s22 }
0x2688   :  { %v8825_v36 = vpop.xlane.xlu1 %8824 }
0x2689   :  { %v8826_v2 = vmul.f32 0.03125, %v8825_v36 }
0x268b   :  { %v8827_v54 = vadd.f32 1e-05, %v8826_v2 }
0x268c   :  { %v9693_v60 = vpop.permute.xlu1 %9692 }
0x268d   :  { %16290 = vrsqrt.f32 %v8827_v54 }
0x269a   :  { %v16291_v52 = vpop.eup %16290 }
0x269b   :  { %v8829_v19 = vmul.f32 %v16291_v52, %v8821_v40 }
0x269d   :  { %v8830_v30 = vmul.f32 %v16430_v3, %v8829_v19 }
0x269f   :  { %v18440_v49 = vadd.f32 %v16431_v10, %v8830_v30 }
0x26a1   :  { %15574 = vmatmul.mubr.msk.f32.vlgmr.msra.gmra.mxu1 %vm436_vm10, %v18440_v49 }
0x26a2   :  { %15588 = vmatpush3.xpose.msk.msra.mxu1 %vm436_vm10, %v18424_v46  ;;  %15591 = vmatprep.mubr.msk.f32.mxu1 %vm16737_vm0, %v16736_v1 }
0x26a3   :  { %15589 = vmatprep.subr.mxu1 %v16736_v1 }
0x26a6   :  { %15590 = vmatpush3.xpose.msk.msra.mxu1 %vm436_vm10, %v18429_v23 }
0x26a7   :  { %15601 = vmatprep.subr.mxu1 %v16736_v1 }
0x2761   :  { %v8901_v13 = vpop.f32.mrf.mxu1 }
0x2762   :  { %v8902_v42 = vadd.f32 %v16432_v53, %v8901_v13  ;;  %v8997_v53 = vmul.f32 %v17439_v9, %v18424_v46 }
0x2763   :  { %v15575_v5 = vpop.f32.mrf.mxu1 }
0x2764   :  { %v8986_v8 = vmul.f32 %v8902_v42, %v17059_v17  ;;  %v8987_v37 = vmul.f32 %v8902_v42, %v17079_v24  ;;  %v8988_v31 = vmul.f32 %v8902_v42, %v17088_v25  ;;  %v8989_v11 = vmul.f32 %v8902_v42, %v17108_v28 }
0x2765   :  { %v8990_v51 = vmul.f32 %v8902_v42, %v17062_v18  ;;  %v8991_v44 = vmul.f32 %v8902_v42, %v17126_v32  ;;  %v8992_v15 = vmul.f32 %v8902_v42, %v17070_v21  ;;  %v8993_v4 = vmul.f32 %v8902_v42, %v17139_v35 }
0x2766   :  { %15592 = vmatmul.mubr.msk.f32.vlgmr.msra.gmra.mxu1 %vm436_vm10, %v8986_v8  ;;  %15599 = vmatmul.mubr.msk.f32.vlgmr.msra.gmra.mxu0 %vm436_vm10, %v8987_v37  ;;  %v8996_v42 = vmul.f32 %v17439_v9, %v18429_v23  ;;  %v8994_v5 = vmul.f32 %v17437_v6, %v18429_v23  ;;  %v8998_v8 = vmul.f32 %v17450_v12, %v18429_v23 }
0x2767   :  { %15602 = vmatpush3.xpose.msk.msra.mxu1 %vm436_vm10, %v18424_v46  ;;  %15609 = vmatpush3.xpose.msk.msra.mxu0 %vm436_vm10, %v18424_v46  ;;  %v8999_v37 = vmul.f32 %v17450_v12, %v18424_v46 }
0x2768   :  { %15603 = vmatprep.subr.mxu1 %v16736_v1  ;;  %15610 = vmatprep.subr.mxu0 %v16736_v1 }
0x2769   :  { %15605 = vmatprep.mubr.msk.f32.mxu1 %vm16737_vm0, %v16736_v1  ;;  %15612 = vmatprep.mubr.msk.f32.mxu0 %vm16737_vm0, %v16736_v1 }
0x276b   :  { %15604 = vmatpush3.xpose.msk.msra.mxu1 %vm436_vm10, %v18429_v23  ;;  %15611 = vmatpush3.xpose.msk.msra.mxu0 %vm436_vm10, %v18429_v23 }
0x276c   :  { %15615 = vmatprep.subr.mxu1 %v16736_v1  ;;  %15622 = vmatprep.subr.mxu0 %v16736_v1 }
0x276e   :  { %15606 = vmatmul.mubr.msk.f32.vlgmr.msra.gmra.mxu1 %vm436_vm10, %v8988_v31  ;;  %15613 = vmatmul.mubr.msk.f32.vlgmr.msra.gmra.mxu0 %vm436_vm10, %v8989_v11  ;;  %v9000_v31 = vmul.f32 %v17455_v7, %v18429_v23  ;;  %v9001_v11 = vmul.f32 %v17455_v7, %v18424_v46 }
0x276f   :  { %15616 = vmatpush3.xpose.msk.msra.mxu1 %vm436_vm10, %v18424_v46  ;;  %15623 = vmatpush3.xpose.msk.msra.mxu0 %vm436_vm10, %v18424_v46 }
0x2770   :  { %15617 = vmatprep.subr.mxu1 %v16736_v1  ;;  %15624 = vmatprep.subr.mxu0 %v16736_v1 }
0x2771   :  { %15619 = vmatprep.mubr.msk.f32.mxu1 %vm16737_vm0, %v16736_v1  ;;  %15626 = vmatprep.mubr.msk.f32.mxu0 %vm16737_vm0, %v16736_v1 }
0x2773   :  { %15618 = vmatpush3.xpose.msk.msra.mxu1 %vm436_vm10, %v18429_v23  ;;  %15625 = vmatpush3.xpose.msk.msra.mxu0 %vm436_vm10, %v18429_v23 }
0x2774   :  { %15629 = vmatprep.subr.mxu1 %v16736_v1  ;;  %15636 = vmatprep.subr.mxu0 %v16736_v1 }
0x2776   :  { %15620 = vmatmul.mubr.msk.f32.vlgmr.msra.gmra.mxu1 %vm436_vm10, %v8990_v51  ;;  %15627 = vmatmul.mubr.msk.f32.vlgmr.msra.gmra.mxu0 %vm436_vm10, %v8991_v44  ;;  %v9002_v51 = vmul.f32 %v17460_v14, %v18429_v23  ;;  %v9003_v44 = vmul.f32 %v17460_v14, %v18424_v46 }
0x2777   :  { %15630 = vmatpush3.xpose.msk.msra.mxu1 %vm436_vm10, %v18424_v46  ;;  %15637 = vmatpush3.xpose.msk.msra.mxu0 %vm436_vm10, %v18424_v46 }
0x2778   :  { %15631 = vmatprep.subr.mxu1 %v16736_v1  ;;  %15638 = vmatprep.subr.mxu0 %v16736_v1 }
0x2779   :  { %15633 = vmatprep.mubr.msk.f32.mxu1 %vm16737_vm0, %v16736_v1  ;;  %15640 = vmatprep.mubr.msk.f32.mxu0 %vm16737_vm0, %v16736_v1 }
0x277b   :  { %15632 = vmatpush3.xpose.msk.msra.mxu1 %vm436_vm10, %v18429_v23  ;;  %15639 = vmatpush3.xpose.msk.msra.mxu0 %vm436_vm10, %v18429_v23 }
0x277c   :  { %15643 = vmatprep.subr.mxu1 %v16736_v1  ;;  %15657 = vmatprep.subr.mxu0 %v16736_v1 }
0x277e   :  { %15634 = vmatmul.mubr.msk.f32.vlgmr.msra.gmra.mxu1 %vm436_vm10, %v8992_v15  ;;  %15641 = vmatmul.mubr.msk.f32.vlgmr.msra.gmra.mxu0 %vm436_vm10, %v8993_v4  ;;  %v9004_v15 = vmul.f32 %v17465_v27, %v18429_v23  ;;  %v9005_v4 = vmul.f32 %v17465_v27, %v18424_v46 }
0x277f   :  { %15644 = vmatpush3.msk.msra.mxu1 %vm2886_vm12, %v9693_v60  ;;  %15647 = vmatprep.mubr.msk.f32.mxu1 %vm16737_vm0, %v16736_v1  ;;  %v9006_v60 = vmul.f32 %v17473_v20, %v18429_v23 }
0x2780   :  { %15645 = vmatprep.subr.mxu1 %v16736_v1  ;;  %15661 = vmatprep.mubr.msk.f32.mxu0 %vm16737_vm0, %v16736_v1 }
0x2826   :  { %v9085_v47 = vpop.f32.mrf.mxu1  ;;  %v18523_v22 = vpop.f32.mrf.mxu0 }
0x2827   :  { %v9600_v34 = vsel %vm2787_vm11, %v9085_v47, -inf  ;;  %v9603_v48 = vsel %vm2787_vm11, %v18523_v22, -inf }
0x2828   :  { %v15600_v45 = vpop.f32.mrf.mxu0  ;;  %9601 = vmax.xlane.f32.xlu0 %v9600_v34  ;;  %v15593_v58 = vpop.f32.mrf.mxu1  ;;  %v9007_v34 = vmul.f32 %v17473_v20, %v18424_v46 }
0x282c   :  { %9604 = vmax.xlane.f32.xlu0 %v9603_v48 }
0x282e   :  { %v9231_v57 = vpop.f32.mrf.mxu1  ;;  %v9304_v63 = vpop.f32.mrf.mxu0 }
0x282f   :  { %v9606_v26 = vsel %vm2787_vm11, %v9231_v57, -inf  ;;  %v9609_v43 = vsel %vm2787_vm11, %v9304_v63, -inf }
0x2830   :  { %v15614_v16 = vpop.f32.mrf.mxu0  ;;  %9607 = vmax.xlane.f32.xlu1 %v9606_v26  ;;  %v15607_v40 = vpop.f32.mrf.mxu1  ;;  %9610 = vmax.xlane.f32.xlu0 %v9609_v43 }
0x2836   :  { %v18530_v33 = vpop.f32.mrf.mxu1  ;;  %v9450_v0 = vpop.f32.mrf.mxu0 }
0x2837   :  { %v9615_v55 = vsel %vm2787_vm11, %v9450_v0, -inf  ;;  %v9612_v36 = vsel %vm2787_vm11, %v18530_v33, -inf }
0x2838   :  { %v15628_v2 = vpop.f32.mrf.mxu0  ;;  %9616 = vmax.xlane.f32.xlu0 %v9615_v55  ;;  %9613 = vmax.xlane.f32.xlu1 %v9612_v36  ;;  %v15621_v54 = vpop.f32.mrf.mxu1 }
0x283e   :  { %v18535_v52 = vpop.f32.mrf.mxu1  ;;  %v18537_v19 = vpop.f32.mrf.mxu0 }
0x283f   :  { %v9621_v3 = vsel %vm2787_vm11, %v18537_v19, -inf  ;;  %v9618_v30 = vsel %vm2787_vm11, %v18535_v52, -inf }
0x2840   :  { %v15642_v10 = vpop.f32.mrf.mxu0  ;;  %9622 = vmax.xlane.f32.xlu0 %v9621_v3  ;;  %9619 = vmax.xlane.f32.xlu1 %v9618_v30  ;;  %v15635_v13 = vpop.f32.mrf.mxu1 }
0x2851   :  { %9774 = vrot.lane.b32.xlu1 %v8997_v53, %s19363_s22 }
0x2855   :  { %9772 = vrot.lane.b32.xlu1 %v8996_v42, %s19363_s22 }
0x2856   :  { %9690 = vrot.lane.b32.xlu0 %v8994_v5, %s19363_s22 }
0x2859   :  { %9854 = vrot.lane.b32.xlu1 %v8998_v8, %s19363_s22 }
0x285a   :  { %9856 = vrot.lane.b32.xlu0 %v8999_v37, %s19363_s22 }
0x285d   :  { %9936 = vrot.lane.b32.xlu1 %v9000_v31, %s19363_s22 }
0x285e   :  { %9938 = vrot.lane.b32.xlu0 %v9001_v11, %s19363_s22 }
0x2861   :  { %10018 = vrot.lane.b32.xlu1 %v9002_v51, %s19363_s22 }
0x2862   :  { %10020 = vrot.lane.b32.xlu0 %v9003_v44, %s19363_s22 }
0x2865   :  { %10100 = vrot.lane.b32.xlu1 %v9004_v15, %s19363_s22 }
0x2866   :  { %10102 = vrot.lane.b32.xlu0 %v9005_v4, %s19363_s22 }
0x2869   :  { %10182 = vrot.lane.b32.xlu1 %v9006_v60, %s19363_s22 }
0x286a   :  { %10184 = vrot.lane.b32.xlu0 %v9007_v34, %s19363_s22 }
0x28b1   :  { %v9602_v45 = vpop.xlane.xlu0 %9601 }
0x28b2   :  { %v9624_v58 = vsub.f32 %v9085_v47, %v9602_v45 }
0x28b4   :  { %v9632_v48 = vmul.f32 1.442695, %v9624_v58 }
0x28b5   :  { %v9605_v26 = vpop.xlane.xlu0 %9604 }
0x28b6   :  { %16292 = vpow2.f32 %v9632_v48  ;;  %v9625_v43 = vsub.f32 %v18523_v22, %v9605_v26 }
0x28b8   :  { %v9634_v16 = vmul.f32 1.442695, %v9625_v43 }
0x28b9   :  { %v9608_v40 = vpop.xlane.xlu1 %9607  ;;  %v9611_v55 = vpop.xlane.xlu0 %9610 }
0x28ba   :  { %16294 = vpow2.f32 %v9634_v16  ;;  %v9626_v36 = vsub.f32 %v9231_v57, %v9608_v40  ;;  %v9627_v2 = vsub.f32 %v9304_v63, %v9611_v55 }
0x28bc   :  { %v9636_v54 = vmul.f32 1.442695, %v9626_v36  ;;  %v9638_v3 = vmul.f32 1.442695, %v9627_v2  ;;  %v9008_v2 = vmul.f32 %v17537_v50, %v18429_v23 }
0x28be   :  { %16296 = vpow2.f32 %v9636_v54  ;;  %v9009_v54 = vmul.f32 %v17537_v50, %v18424_v46 }
0x28bf   :  { %16298 = vpow2.f32 %v9638_v3 }
0x28c1   :  { %v9617_v30 = vpop.xlane.xlu0 %9616  ;;  %v9614_v10 = vpop.xlane.xlu1 %9613 }
0x28c2   :  { %v9629_v13 = vsub.f32 %v9450_v0, %v9617_v30  ;;  %v9628_v47 = vsub.f32 %v18530_v33, %v9614_v10 }
0x28c3   :  { %v18584_v53 = vpop.eup %16292 }
0x28c4   :  { %v9642_v42 = vmul.f32 1.442695, %v9629_v13  ;;  %v9640_v5 = vmul.f32 1.442695, %v9628_v47  ;;  %v9648_v22 = vsel %vm2787_vm11, %v18584_v53, 0.0 }
0x28c5   :  { %9649 = vadd.xlane.f32.xlu1 %v9648_v22 }
0x28c6   :  { %16300 = vpow2.f32 %v9642_v42 }
0x28c7   :  { %v18588_v57 = vpop.eup %16294  ;;  %16302 = vpow2.f32 %v9640_v5 }
0x28c8   :  { %v9651_v63 = vsel %vm2787_vm11, %v18588_v57, 0.0 }
0x28c9   :  { %v9623_v8 = vpop.xlane.xlu0 %9622  ;;  %v9620_v37 = vpop.xlane.xlu1 %9619  ;;  %9652 = vadd.xlane.f32.xlu0 %v9651_v63 }
0x28ca   :  { %v9631_v33 = vsub.f32 %v18537_v19, %v9623_v8  ;;  %v9630_v0 = vsub.f32 %v18535_v52, %v9620_v37 }
0x28cb   :  { %v18594_v31 = vpop.eup %16296 }
0x28cc   :  { %v18596_v11 = vpop.eup %16298  ;;  %v9646_v51 = vmul.f32 1.442695, %v9631_v33  ;;  %v9644_v44 = vmul.f32 1.442695, %v9630_v0  ;;  %v9654_v15 = vsel %vm2787_vm11, %v18594_v31, 0.0 }
0x28cd   :  { %v9691_v4 = vpop.permute.xlu0 %9690  ;;  %9655 = vadd.xlane.f32.xlu1 %v9654_v15  ;;  %v9775_v60 = vpop.permute.xlu1 %9774  ;;  %v9657_v34 = vsel %vm2787_vm11, %v18596_v11, 0.0 }
0x28ce   :  { %16304 = vpow2.f32 %v9646_v51  ;;  %9658 = vadd.xlane.f32.xlu0 %v9657_v34  ;;  %15646 = vmatpush3.msra.mxu1 %v9691_v4 }
0x28cf   :  { %16306 = vpow2.f32 %v9644_v44  ;;  %15650 = vmatprep.subr.mxu1 %v16736_v1 }
0x28d1   :  { %v9857_v52 = vpop.permute.xlu0 %9856  ;;  %v9773_v19 = vpop.permute.xlu1 %9772 }
0x28d2   :  { %15658 = vmatpush3.msk.msra.mxu0 %vm2886_vm12, %v9857_v52 }
0x28d3   :  { %v18604_v45 = vpop.eup %16300  ;;  %15659 = vmatprep.subr.mxu0 %v16736_v1 }
0x28d4   :  { %v18607_v58 = vpop.eup %16302  ;;  %v9663_v48 = vsel %vm2787_vm11, %v18604_v45, 0.0 }
0x28d5   :  { %9664 = vadd.xlane.f32.xlu0 %v9663_v48  ;;  %v9660_v26 = vsel %vm2787_vm11, %v18607_v58, 0.0  ;;  %v9855_v43 = vpop.permute.xlu1 %9854  ;;  %v9939_v30 = vpop.permute.xlu0 %9938 }
0x28d6   :  { %9661 = vadd.xlane.f32.xlu1 %v9660_v26  ;;  %15660 = vmatpush3.msra.mxu0 %v9855_v43 }
0x28d7   :  { %15671 = vmatprep.subr.mxu0 %v16736_v1 }
0x28d9   :  { %v9937_v3 = vpop.permute.xlu1 %9936  ;;  %v10021_v13 = vpop.permute.xlu0 %10020 }
0x28db   :  { %v18614_v16 = vpop.eup %16304 }
0x28dc   :  { %v18616_v40 = vpop.eup %16306  ;;  %v9669_v55 = vsel %vm2787_vm11, %v18614_v16, 0.0 }
0x28dd   :  { %9670 = vadd.xlane.f32.xlu0 %v9669_v55  ;;  %v9666_v36 = vsel %vm2787_vm11, %v18616_v40, 0.0  ;;  %v10019_v10 = vpop.permute.xlu1 %10018  ;;  %v10103_v42 = vpop.permute.xlu0 %10102 }
0x28de   :  { %9667 = vadd.xlane.f32.xlu1 %v9666_v36 }
0x28e1   :  { %v10101_v47 = vpop.permute.xlu1 %10100  ;;  %v10185_v22 = vpop.permute.xlu0 %10184 }
0x28e5   :  { %v10183_v5 = vpop.permute.xlu1 %10182 }
0x28ef   :  { %10264 = vrot.lane.b32.xlu1 %v9008_v2, %s19363_s22  ;;  %v16433_v2 = vld [vmem:[%s19345_s0 + $0x18] sm:$0xff] }
0x28f3   :  { %10266 = vrot.lane.b32.xlu0 %v9009_v54, %s19363_s22  ;;  %v16434_v54 = vld [vmem:[%s19343_s1 + $0x18] sm:$0xff] }
0x294e   :  { %v9650_v63 = vpop.xlane.xlu1 %9649 }
0x294f   :  { %16308 = vrcp.f32 %v9650_v63 }
0x2952   :  { %v9653_v8 = vpop.xlane.xlu0 %9652 }
0x2953   :  { %16310 = vrcp.f32 %v9653_v8 }
0x2956   :  { %v9656_v23 = vpop.xlane.xlu1 %9655 }
0x2957   :  { %16312 = vrcp.f32 %v9656_v23  ;;  %v9659_v37 = vpop.xlane.xlu0 %9658 }
0x2958   :  { %16314 = vrcp.f32 %v9659_v37 }
0x295c   :  { %v16309_v33 = vpop.eup %16308 }
0x295d   :  { %v9673_v46 = vmul.f32 %v16309_v33, %v18584_v53 }
0x295e   :  { %v9665_v0 = vpop.xlane.xlu0 %9664 }
0x295f   :  { %16316 = vrcp.f32 %v9665_v0  ;;  %v9662_v51 = vpop.xlane.xlu1 %9661  ;;  %15648 = vmatmul.mubr.msk.f32.vlgmr.msra.gmra.mxu1 %vm2787_vm11, %v9673_v46 }
0x2960   :  { %v16311_v44 = vpop.eup %16310  ;;  %16318 = vrcp.f32 %v9662_v51  ;;  %15651 = vmatpush3.msk.msra.mxu1 %vm2886_vm12, %v9775_v60  ;;  %15654 = vmatprep.mubr.msk.f32.mxu1 %vm16737_vm0, %v16736_v1 }
0x2961   :  { %v9675_v15 = vmul.f32 %v16311_v44, %v18588_v57  ;;  %15652 = vmatprep.subr.mxu1 %v16736_v1 }
0x2962   :  { %15653 = vmatpush3.msra.mxu1 %v9773_v19 }
0x2963   :  { %15664 = vmatprep.subr.mxu1 %v16736_v1  ;;  %15655 = vmatmul.mubr.msk.f32.vlgmr.msra.gmra.mxu1 %vm2787_vm11, %v9675_v15 }
0x2964   :  { %v16313_v53 = vpop.eup %16312  ;;  %15665 = vmatpush3.msk.msra.mxu1 %vm2886_vm12, %v9939_v30  ;;  %15668 = vmatprep.mubr.msk.f32.mxu1 %vm16737_vm0, %v16736_v1  ;;  %v16438_v30 = vld [vmem:[%s19345_s0 + $0x8] sm:$0xff] }
0x2965   :  { %v16315_v4 = vpop.eup %16314  ;;  %15666 = vmatprep.subr.mxu1 %v16736_v1  ;;  %v9677_v60 = vmul.f32 %v16313_v53, %v18594_v31 }
0x2966   :  { %v9679_v57 = vmul.f32 %v16315_v4, %v18596_v11  ;;  %v9671_v34 = vpop.xlane.xlu0 %9670  ;;  %15667 = vmatpush3.msra.mxu1 %v9937_v3  ;;  %v16437_v3 = vld [vmem:[%s19343_s1 + $0x8] sm:$0xff] }
0x2967   :  { %16320 = vrcp.f32 %v9671_v34  ;;  %v9668_v52 = vpop.xlane.xlu1 %9667  ;;  %15662 = vmatmul.mubr.msk.f32.vlgmr.msra.gmra.mxu0 %vm2787_vm11, %v9677_v60  ;;  %15678 = vmatprep.subr.mxu1 %v16736_v1 }
0x2968   :  { %16322 = vrcp.f32 %v9668_v52  ;;  %15672 = vmatpush3.msk.msra.mxu0 %vm2886_vm12, %v10021_v13  ;;  %15669 = vmatmul.mubr.msk.f32.vlgmr.msra.gmra.mxu1 %vm2787_vm11, %v9679_v57  ;;  %v16440_v13 = vld [vmem:[%s19345_s0] sm:$0xff] }
0x2969   :  { %15673 = vmatprep.subr.mxu0 %v16736_v1  ;;  %15679 = vmatpush3.msk.msra.mxu1 %vm2886_vm12, %v10103_v42 }
0x296a   :  { %15674 = vmatpush3.msra.mxu0 %v10019_v10  ;;  %15680 = vmatprep.subr.mxu1 %v16736_v1  ;;  %v10267_v26 = vpop.permute.xlu0 %10266  ;;  %v16439_v10 = vld [vmem:[%s19343_s1] sm:$0xff] }
0x296b   :  { %15681 = vmatpush3.msra.mxu1 %v10101_v47  ;;  %15675 = vmatprep.mubr.msk.f32.mxu0 %vm16737_vm0, %v16736_v1  ;;  %v10265_v43 = vpop.permute.xlu1 %10264 }
0x296c   :  { %v16317_v31 = vpop.eup %16316  ;;  %15682 = vmatprep.mubr.msk.f32.mxu1 %vm16737_vm0, %v16736_v1  ;;  %15685 = vmatprep.subr.mxu0 %v16736_v1 }
0x296d   :  { %v16319_v11 = vpop.eup %16318  ;;  %v9683_v19 = vmul.f32 %v16317_v31, %v18604_v45  ;;  %15692 = vmatprep.subr.mxu1 %v16736_v1 }
0x296e   :  { %v9681_v48 = vmul.f32 %v16319_v11, %v18607_v58 }
0x296f   :  { %15683 = vmatmul.mubr.msk.f32.vlgmr.msra.gmra.mxu1 %vm2787_vm11, %v9683_v19 }
0x2970   :  { %15676 = vmatmul.mubr.msk.f32.vlgmr.msra.gmra.mxu0 %vm2787_vm11, %v9681_v48  ;;  %15693 = vmatpush3.msk.msra.mxu1 %vm2886_vm12, %v10267_v26 }
0x2971   :  { %15686 = vmatpush3.msk.msra.mxu0 %vm2886_vm12, %v10185_v22  ;;  %15694 = vmatprep.subr.mxu1 %v16736_v1 }
0x2972   :  { %15687 = vmatprep.subr.mxu0 %v16736_v1  ;;  %15695 = vmatpush3.msra.mxu1 %v10265_v43 }
0x2973   :  { %15688 = vmatpush3.msra.mxu0 %v10183_v5  ;;  %15689 = vmatprep.mubr.msk.f32.mxu0 %vm16737_vm0, %v16736_v1 }
0x2974   :  { %v16321_v45 = vpop.eup %16320  ;;  %15696 = vmatprep.mubr.msk.f32.mxu1 %vm16737_vm0, %v16736_v1  ;;  %15699 = vmatprep.subr.mxu0 %v16736_v1 }
0x2975   :  { %v16323_v58 = vpop.eup %16322  ;;  %v9687_v55 = vmul.f32 %v16321_v45, %v18614_v16  ;;  %15710 = vmatprep.subr.mxu1 %v16736_v1  ;;  %v16435_v16 = vld [vmem:[%s19343_s1 + $0x10] sm:$0xff] }
0x2976   :  { %v9685_v36 = vmul.f32 %v16323_v58, %v18616_v40  ;;  %v16436_v40 = vld [vmem:[%s19345_s0 + $0x10] sm:$0xff] }
0x2977   :  { %15697 = vmatmul.mubr.msk.f32.vlgmr.msra.gmra.mxu1 %vm2787_vm11, %v9687_v55 }
0x2978   :  { %15690 = vmatmul.mubr.msk.f32.vlgmr.msra.gmra.mxu0 %vm2787_vm11, %v9685_v36  ;;  %15711 = vmatpush3.msra.mxu1 %v16433_v2 }
0x2979   :  { %15700 = vmatpush3.msra.mxu0 %v16434_v54  ;;  %15707 = vmatprep.mubr.msk.f32.mxu0 %vm16737_vm0, %v16736_v1  ;;  %v16441_v54 = vld [vmem:[%s19348_s27 + $0x38] sm:$0xff] }
0x297a   :  { %15701 = vmatprep.subr.mxu0 %v16736_v1  ;;  %15712 = vmatprep.subr.mxu1 %v16736_v1 }
0x297b   :  { %15702 = vmatpush3.msra.mxu0 %v16435_v16  ;;  %15713 = vmatpush3.msra.mxu1 %v16436_v40  ;;  %v16442_v16 = vld [vmem:[%s19348_s27 + $0x30] sm:$0xff]  ;;  %v16443_v40 = vld [vmem:[%s19348_s27 + $0x28] sm:$0xff] }
0x297c   :  { %15703 = vmatprep.subr.mxu0 %v16736_v1  ;;  %15714 = vmatprep.subr.mxu1 %v16736_v1 }
0x297d   :  { %15704 = vmatpush3.msra.mxu0 %v16437_v3  ;;  %15715 = vmatpush3.msra.mxu1 %v16438_v30  ;;  %v16444_v3 = vld [vmem:[%s19348_s27 + $0x20] sm:$0xff]  ;;  %v16445_v30 = vld [vmem:[%s19348_s27 + $0x18] sm:$0xff] }
0x297e   :  { %15705 = vmatprep.subr.mxu0 %v16736_v1  ;;  %15716 = vmatprep.subr.mxu1 %v16736_v1 }
0x297f   :  { %15706 = vmatpush3.msra.mxu0 %v16439_v10  ;;  %15717 = vmatpush3.msra.mxu1 %v16440_v13  ;;  %v16446_v10 = vld [vmem:[%s19348_s27 + $0x10] sm:$0xff]  ;;  %v16447_v13 = vld [vmem:[%s19348_s27 + $0x8] sm:$0xff] }
0x2980   :  { %15718 = vmatprep.mubr.msk.f32.mxu1 %vm16737_vm0, %v16736_v1  ;;  %15721 = vmatprep.subr.mxu0 %v16736_v1 }
0x2981   :  { %15740 = vmatprep.subr.mxu1 %v16736_v1 }
0x2a1f   :  { %v9766_v47 = vpop.f32.mrf.mxu1 }
0x2a20   :  { %v10344_v37 = vsel %vm436_vm10, %v9766_v47, 0.0  ;;  %v16448_v47 = vld [vmem:[%s19348_s27] sm:$0xff] }
0x2a21   :  { %v15649_v42 = vpop.f32.mrf.mxu1 }
0x2a23   :  { %v9848_v5 = vpop.f32.mrf.mxu1 }
0x2a24   :  { %v10345_v63 = vsel %vm436_vm10, %v9848_v5, 0.0  ;;  %v16449_v5 = vld [vmem:[%s19344_s2] ss:$0 sm:$0xff] }
0x2a25   :  { %v15656_v22 = vpop.f32.mrf.mxu1  ;;  %v10346_v46 = vadd.f32 %v10345_v63, %v10344_v37 }
0x2a27   :  { %v9930_v8 = vpop.f32.mrf.mxu0 }
0x2a28   :  { %v10012_v23 = vpop.f32.mrf.mxu1  ;;  %v10347_v51 = vsel %vm436_vm10, %v9930_v8, 0.0 }
0x2a29   :  { %v15663_v33 = vpop.f32.mrf.mxu0  ;;  %v10348_v44 = vadd.f32 %v10347_v51, %v10346_v46  ;;  %v10349_v15 = vsel %vm436_vm10, %v10012_v23, 0.0 }
0x2a2a   :  { %v15670_v0 = vpop.f32.mrf.mxu1 }
0x2a2b   :  { %v10350_v34 = vadd.f32 %v10349_v15, %v10348_v44 }
0x2a2f   :  { %v10176_v53 = vpop.f32.mrf.mxu1 }
0x2a30   :  { %v10094_v4 = vpop.f32.mrf.mxu0  ;;  %v10353_v11 = vsel %vm436_vm10, %v10176_v53, 0.0 }
0x2a31   :  { %v10351_v60 = vsel %vm436_vm10, %v10094_v4, 0.0  ;;  %v15684_v57 = vpop.f32.mrf.mxu1 }
0x2a32   :  { %v15677_v52 = vpop.f32.mrf.mxu0  ;;  %v10352_v31 = vadd.f32 %v10351_v60, %v10350_v34  ;;  %v16450_v60 = vld [vmem:[%s19346_s20] ss:$0 sm:$0xff] }
0x2a33   :  { %v16451_v34 = vld [vmem:[%s19347_s7] ss:$0 sm:$0xff] }
0x2a34   :  { %v10354_v48 = vadd.f32 %v10353_v11, %v10352_v31  ;;  %v16452_v31 = vld [vmem:[%s19351_s15 + $0x18] sm:$0xff]  ;;  %v16453_v11 = vld [vmem:[%s19351_s15 + $0x10] sm:$0xff] }
0x2a37   :  { %v10340_v19 = vpop.f32.mrf.mxu1 }
0x2a38   :  { %v10258_v26 = vpop.f32.mrf.mxu0  ;;  %v10357_v36 = vsel %vm436_vm10, %v10340_v19, 0.0  ;;  %v16454_v19 = vld [vmem:[%s19351_s15 + $0x8] sm:$0xff] }
0x2a39   :  { %v10355_v43 = vsel %vm436_vm10, %v10258_v26, 0.0  ;;  %v15698_v45 = vpop.f32.mrf.mxu1 }
0x2a3a   :  { %v10356_v58 = vadd.f32 %v10355_v43, %v10354_v48  ;;  %v15691_v55 = vpop.f32.mrf.mxu0  ;;  %v16455_v48 = vld [vmem:[%s19351_s15] sm:$0xff] }
0x2a3b   :  { %v16456_v43 = vld [vmem:[%s19349_s10] ss:$0 sm:$0xff] }
0x2a3c   :  { %v10358_v2 = vadd.f32 %v10357_v36, %v10356_v58 }
0x2a3e   :  { %15708 = vmatmul.mubr.msk.f32.vlgmr.msra.gmra.mxu0 %vm436_vm10, %v10358_v2 }
0x2a3f   :  { %15722 = vmatpush3.msra.mxu0 %v16441_v54  ;;  %15737 = vmatprep.mubr.msk.f32.mxu0 %vm16737_vm0, %v16736_v1 }
0x2a40   :  { %15723 = vmatprep.subr.mxu0 %v16736_v1 }
0x2a41   :  { %15724 = vmatpush3.msra.mxu0 %v16442_v16 }
0x2a42   :  { %15725 = vmatprep.subr.mxu0 %v16736_v1 }
0x2a43   :  { %15726 = vmatpush3.msra.mxu0 %v16443_v40 }
0x2a44   :  { %15727 = vmatprep.subr.mxu0 %v16736_v1 }
0x2a45   :  { %15728 = vmatpush3.msra.mxu0 %v16444_v3 }
0x2a46   :  { %15729 = vmatprep.subr.mxu0 %v16736_v1 }
0x2a47   :  { %15730 = vmatpush3.msra.mxu0 %v16445_v30 }
0x2a48   :  { %15731 = vmatprep.subr.mxu0 %v16736_v1 }
0x2a49   :  { %15732 = vmatpush3.msra.mxu0 %v16446_v10 }
0x2a4a   :  { %15733 = vmatprep.subr.mxu0 %v16736_v1 }
0x2a4b   :  { %15734 = vmatpush3.msra.mxu0 %v16447_v13 }
0x2a4c   :  { %15735 = vmatprep.subr.mxu0 %v16736_v1 }
0x2a4d   :  { %15736 = vmatpush3.msra.mxu0 %v16448_v47 }
0x2a4e   :  { %15761 = vmatprep.subr.mxu0 %v16736_v1 }
0x2afe   :  { %v10428_v42 = vpop.f32.mrf.mxu0 }
0x2aff   :  { %v10429_v22 = vadd.f32 %v16449_v5, %v10428_v42 }
0x2b00   :  { %v15709_v63 = vpop.f32.mrf.mxu0 }
0x2b01   :  { %v10432_v8 = vadd.f32 %v10429_v22, %v18440_v49 }
0x2b03   :  { %v10433_v23 = vsel %vm436_vm10, %v10432_v8, 0.0 }
0x2b04   :  { %10434 = vadd.xlane.f32.xlu0 %v10433_v23 }
0x2b8d   :  { %v10435_v37 = vpop.xlane.xlu0 %10434 }
0x2b8e   :  { %v10436_v33 = vmul.f32 0.03125, %v10435_v37 }
0x2b90   :  { %v10437_v46 = vsub.f32 %v10432_v8, %v10436_v33 }
0x2b92   :  { %v10438_v0 = vmul.f32 %v10437_v46, %v10437_v46 }
0x2b94   :  { %v10439_v51 = vsel %vm436_vm10, %v10438_v0, 0.0 }
0x2b95   :  { %10440 = vadd.xlane.f32.xlu1 %v10439_v51 }
0x2c1e   :  { %v10441_v44 = vpop.xlane.xlu1 %10440 }
0x2c1f   :  { %v10442_v15 = vmul.f32 0.03125, %v10441_v44 }
0x2c21   :  { %v10443_v53 = vadd.f32 1e-05, %v10442_v15 }
0x2c23   :  { %16324 = vrsqrt.f32 %v10443_v53 }
0x2c30   :  { %v16325_v4 = vpop.eup %16324 }
0x2c31   :  { %v10445_v49 = vmul.f32 %v16325_v4, %v10437_v46 }
0x2c33   :  { %v10446_v57 = vmul.f32 %v16450_v60, %v10445_v49  ;;  %v16457_v49 = vld [vmem:[%s19350_s11] ss:$0 sm:$0xff] }
0x2c35   :  { %v10447_v52 = vadd.f32 %v16451_v34, %v10446_v57 }
0x2c37   :  { %15719 = vmatmul.mubr.msk.f32.vlgmr.msra.gmra.mxu1 %vm436_vm10, %v10447_v52 }
0x2c38   :  { %15741 = vmatpush3.msra.mxu1 %v16452_v31  ;;  %15748 = vmatprep.mubr.msk.f32.mxu1 %vm16737_vm0, %v16736_v1 }
0x2c39   :  { %15742 = vmatprep.subr.mxu1 %v16736_v1 }
0x2c3a   :  { %15743 = vmatpush3.msra.mxu1 %v16453_v11 }
0x2c3b   :  { %15744 = vmatprep.subr.mxu1 %v16736_v1 }
0x2c3c   :  { %15745 = vmatpush3.msra.mxu1 %v16454_v19 }
0x2c3d   :  { %15746 = vmatprep.subr.mxu1 %v16736_v1 }
0x2c3e   :  { %15747 = vmatpush3.msra.mxu1 %v16455_v48 }
0x2c3f   :  { %15751 = vmatprep.subr.mxu1 %v16736_v1 }
0x2cf7   :  { %v10517_v26 = vpop.f32.mrf.mxu1 }
0x2cf8   :  { %v10518_v45 = vadd.f32 %v16456_v43, %v10517_v26 }
0x2cf9   :  { %v15720_v58 = vpop.f32.mrf.mxu1 }
0x2cfa   :  { %v10522_v55 = vmul.f32 0.70710677, %v10518_v45  ;;  %v10521_v44 = vmul.f32 0.5, %v10518_v45 }
0x2cfc   :  { %v10523_v36 = vand.u32 2147483647, %v10522_v55  ;;  %vm10543_vm1 = vcmp.ge.f32.partialorder %v10522_v55, 0.0 }
0x2cfe   :  { %v10524_v2 = vmul.f32 0.3275911, %v10523_v36  ;;  %v10537_v16 = vsub.f32 0.0, %v10523_v36 }
0x2d00   :  { %v10525_v54 = vadd.f32 1.0, %v10524_v2  ;;  %v10538_v40 = vmul.f32 %v10537_v16, %v10523_v36  ;;  %v16459_v16 = vld [vmem:[%s19353_s18] ss:$0 sm:$0xff] }
0x2d02   :  { %16326 = vrcp.f32 %v10525_v54  ;;  %v10539_v10 = vmul.f32 1.442695, %v10538_v40  ;;  %v16458_v54 = vld [vmem:[%s19352_s16] ss:$0 sm:$0xff] }
0x2d04   :  { %16328 = vpow2.f32 %v10539_v10 }
0x2d0f   :  { %v16327_v3 = vpop.eup %16326 }
0x2d10   :  { %v10528_v30 = vmul.f32 1.0614054, %v16327_v3 }
0x2d11   :  { %v16329_v37 = vpop.eup %16328 }
0x2d12   :  { %v14329_v13 = vadd.f32 -1.4531521, %v10528_v30  ;;  %v16460_v30 = vld [vmem:[%s19354_s30] ss:$0 sm:$0xff] }
0x2d14   :  { %v10530_v47 = vmul.f32 %v16327_v3, %v14329_v13 }
0x2d16   :  { %v10531_v42 = vadd.f32 1.4214138, %v10530_v47 }
0x2d18   :  { %v10532_v5 = vmul.f32 %v16327_v3, %v10531_v42 }
0x2d1a   :  { %v14330_v22 = vadd.f32 -0.28449672, %v10532_v5 }
0x2d1c   :  { %v10534_v63 = vmul.f32 %v16327_v3, %v14330_v22 }
0x2d1e   :  { %v10535_v8 = vadd.f32 0.2548296, %v10534_v63 }
0x2d20   :  { %v10536_v23 = vmul.f32 %v16327_v3, %v10535_v8 }
0x2d22   :  { %v10541_v33 = vmul.f32 %v16329_v37, %v10536_v23 }
0x2d24   :  { %v10542_v46 = vsub.f32 1.0, %v10541_v33 }
0x2d26   :  { %v10544_v0 = vsub.f32 0.0, %v10542_v46 }
0x2d28   :  { %v10545_v51 = vsel %vm10543_vm1, %v10542_v46, %v10544_v0 }
0x2d29   :  { %v10546_v15 = vadd.f32 1.0, %v10545_v51  ;;  %v16461_v51 = vld [vmem:[%s16759_s13 + $0x8] sm:$0xff]  ;;  %s19370_s13 = sld [smem:[#allocation37_spill]] }
0x2d2b   :  { %v10547_v53 = vmul.f32 %v10546_v15, %v10521_v44 }
0x2d2d   :  { %15738 = vmatmul.mubr.msk.f32.vlgmr.msra.gmra.mxu0 %vm3767_vm14, %v10547_v53 }
0x2d2e   :  { %15763 = vmatprep.mubr.msk.f32.mxu0 %vm16737_vm0, %v16736_v1 }
0x2ded   :  { %v10617_v4 = vpop.f32.mrf.mxu0 }
0x2dee   :  { %v10618_v60 = vadd.f32 %v16457_v49, %v10617_v4 }
0x2def   :  { %v15739_v57 = vpop.f32.mrf.mxu0 }
0x2df0   :  { %v10621_v34 = vadd.f32 %v10618_v60, %v10447_v52 }
0x2df2   :  { %v10622_v31 = vsel %vm436_vm10, %v10621_v34, 0.0 }
0x2df3   :  { %10623 = vadd.xlane.f32.xlu0 %v10622_v31 }
0x2e7c   :  { %v10624_v11 = vpop.xlane.xlu0 %10623 }
0x2e7d   :  { %v10625_v19 = vmul.f32 0.03125, %v10624_v11 }
0x2e7f   :  { %v10626_v48 = vsub.f32 %v10621_v34, %v10625_v19 }
0x2e81   :  { %v10627_v26 = vmul.f32 %v10626_v48, %v10626_v48 }
0x2e83   :  { %v10628_v43 = vsel %vm436_vm10, %v10627_v26, 0.0 }
0x2e84   :  { %10629 = vadd.xlane.f32.xlu0 %v10628_v43 }
0x2f0d   :  { %v10630_v45 = vpop.xlane.xlu0 %10629 }
0x2f0e   :  { %v10631_v58 = vmul.f32 0.03125, %v10630_v45 }
0x2f10   :  { %v10632_v55 = vadd.f32 1e-05, %v10631_v58 }
0x2f12   :  { %16330 = vrsqrt.f32 %v10632_v55 }
0x2f1f   :  { %v16331_v36 = vpop.eup %16330 }
0x2f20   :  { %v10634_v2 = vmul.f32 %v16331_v36, %v10626_v48 }
0x2f22   :  { %v10635_v52 = vmul.f32 %v16458_v54, %v10634_v2 }
0x2f24   :  { %v18747_v40 = vadd.f32 %v16459_v16, %v10635_v52 }
0x2f26   :  { %15749 = vmatmul.mubr.msk.f32.vlgmr.msra.gmra.mxu1 %vm436_vm10, %v18747_v40 }
0x2f27   :  { %15753 = vmatprep.mubr.msk.f32.mxu1 %vm16737_vm0, %v16736_v1 }
0x2fe6   :  { %v10706_v3 = vpop.f32.mrf.mxu1 }
0x2fe7   :  { %v18754_v10 = vadd.f32 %v16460_v30, %v10706_v3 }
0x2fe8   :  { %v15750_v13 = vpop.f32.mrf.mxu1 }
0x2fe9   :  { %10727 = vrot.lane.b32.xlu1 %v18754_v10, %s19363_s22  ;;  %v10710_v42 = vmul.f32 %v18754_v10, %v17059_v17  ;;  %v10712_v5 = vmul.f32 %v18754_v10, %v17088_v25  ;;  %v10711_v22 = vmul.f32 %v18754_v10, %v17079_v24  ;;  %v10714_v63 = vmul.f32 %v18754_v10, %v17062_v18 }
0x2fea   :  { %v10713_v8 = vmul.f32 %v18754_v10, %v17108_v28  ;;  %v10716_v23 = vmul.f32 %v18754_v10, %v17070_v21  ;;  %v10715_v37 = vmul.f32 %v18754_v10, %v17126_v32  ;;  %v10717_v33 = vmul.f32 %v18754_v10, %v17139_v35 }
0x305b   :  { %v10728_v47 = vpop.permute.xlu1 %10727 }
0x305c   :  { %15752 = vmatpush3.xpose.msk.msra.mxu1 %vm436_vm10, %v10728_v47  ;;  %15762 = vmatpush3.xpose.msk.msra.mxu0 %vm436_vm10, %v10728_v47 }
0x305d   :  { %15756 = vmatprep.subr.mxu1 %v16736_v1  ;;  %15771 = vmatprep.subr.mxu0 %v16736_v1 }
0x305f   :  { %15754 = vmatmul.mubr.msk.f32.vlgmr.msra.gmra.mxu1 %vm436_vm10, %v10710_v42  ;;  %15764 = vmatmul.mubr.msk.f32.vlgmr.msra.gmra.mxu0 %vm436_vm10, %v10712_v5 }
0x3060   :  { %15757 = vmatpush3.xpose.msk.msra.mxu1 %vm436_vm10, %v10728_v47  ;;  %15772 = vmatpush3.xpose.msk.msra.mxu0 %vm436_vm10, %v10728_v47 }
0x3061   :  { %15758 = vmatprep.mubr.msk.f32.mxu1 %vm16737_vm0, %v16736_v1  ;;  %15773 = vmatprep.mubr.msk.f32.mxu0 %vm16737_vm0, %v16736_v1 }
0x3062   :  { %15766 = vmatprep.subr.mxu1 %v16736_v1  ;;  %15781 = vmatprep.subr.mxu0 %v16736_v1 }
0x3063   :  { %15759 = vmatmul.mubr.msk.f32.vlgmr.msra.gmra.mxu1 %vm436_vm10, %v10711_v22  ;;  %15774 = vmatmul.mubr.msk.f32.vlgmr.msra.gmra.mxu0 %vm436_vm10, %v10714_v63 }
0x3064   :  { %15767 = vmatpush3.xpose.msk.msra.mxu1 %vm436_vm10, %v10728_v47  ;;  %15782 = vmatpush3.xpose.msk.msra.mxu0 %vm436_vm10, %v10728_v47 }
0x3065   :  { %15768 = vmatprep.mubr.msk.f32.mxu1 %vm16737_vm0, %v16736_v1  ;;  %15783 = vmatprep.mubr.msk.f32.mxu0 %vm16737_vm0, %v16736_v1 }
0x3066   :  { %15776 = vmatprep.subr.mxu1 %v16736_v1  ;;  %15791 = vmatprep.subr.mxu0 %v16736_v1 }
0x3067   :  { %15769 = vmatmul.mubr.msk.f32.vlgmr.msra.gmra.mxu1 %vm436_vm10, %v10713_v8  ;;  %15784 = vmatmul.mubr.msk.f32.vlgmr.msra.gmra.mxu0 %vm436_vm10, %v10716_v23  ;;  %v10719_v8 = vmul.f32 %v18754_v10, %v17164_v59  ;;  %v10720_v23 = vmul.f32 %v18754_v10, %v17181_v29  ;;  %v10718_v59 = vmul.f32 %v18754_v10, %v17159_v56 }
0x3068   :  { %15777 = vmatpush3.xpose.msk.msra.mxu1 %vm436_vm10, %v10728_v47  ;;  %15778 = vmatprep.mubr.msk.f32.mxu1 %vm16737_vm0, %v16736_v1  ;;  %v10722_v29 = vmul.f32 %v18754_v10, %v17188_v39 }
0x3069   :  { %15786 = vmatprep.subr.mxu1 %v16736_v1  ;;  %15793 = vmatprep.mubr.msk.f32.mxu0 %vm16737_vm0, %v16736_v1 }
0x306b   :  { %15779 = vmatmul.mubr.msk.f32.vlgmr.msra.gmra.mxu1 %vm436_vm10, %v10715_v37  ;;  %v10721_v37 = vmul.f32 %v18754_v10, %v17186_v38 }
0x306c   :  { %15787 = vmatpush3.xpose.msk.msra.mxu1 %vm436_vm10, %v10728_v47  ;;  %15788 = vmatprep.mubr.msk.f32.mxu1 %vm16737_vm0, %v16736_v1 }
0x306d   :  { %15796 = vmatprep.subr.mxu1 %v16736_v1 }
0x306f   :  { %15789 = vmatmul.mubr.msk.f32.vlgmr.msra.gmra.mxu1 %vm436_vm10, %v10717_v33  ;;  %v10723_v33 = vmul.f32 %v18754_v10, %v17169_v61 }
0x3070   :  { %15798 = vmatprep.mubr.msk.f32.mxu1 %vm16737_vm0, %v16736_v1 }
0x311f   :  { %v10800_v46 = vpop.f32.mrf.mxu1  ;;  %v10946_v0 = vpop.f32.mrf.mxu0 }
0x3120   :  { %v10801_v44 = vadd.f32 %v16461_v51, %v10800_v46  ;;  %v10947_v4 = vadd.f32 %v16461_v51, %v10946_v0 }
0x3121   :  { %v15755_v15 = vpop.f32.mrf.mxu1  ;;  %v15765_v53 = vpop.f32.mrf.mxu0 }
0x3122   :  { %v11315_v49 = vsel %vm1155_vm9, %v10801_v44, -inf  ;;  %v11321_v19 = vsel %vm1155_vm9, %v10947_v4, -inf }
0x3123   :  { %v11092_v60 = vpop.f32.mrf.mxu0  ;;  %11316 = vmax.xlane.f32.xlu0 %v11315_v49  ;;  %v10873_v57 = vpop.f32.mrf.mxu1 }
0x3124   :  { %v10874_v11 = vadd.f32 %v16461_v51, %v10873_v57  ;;  %v11093_v58 = vadd.f32 %v16461_v51, %v11092_v60 }
0x3125   :  { %v15760_v34 = vpop.f32.mrf.mxu1  ;;  %v15775_v31 = vpop.f32.mrf.mxu0 }
0x3126   :  { %v11318_v55 = vsel %vm1155_vm9, %v10874_v11, -inf  ;;  %v11327_v16 = vsel %vm1155_vm9, %v11093_v58, -inf }
0x3127   :  { %v11238_v48 = vpop.f32.mrf.mxu0  ;;  %11322 = vmax.xlane.f32.xlu0 %v11321_v19  ;;  %v11019_v26 = vpop.f32.mrf.mxu1 }
0x3128   :  { %v11020_v52 = vadd.f32 %v16461_v51, %v11019_v26  ;;  %v11239_v47 = vadd.f32 %v16461_v51, %v11238_v48 }
0x3129   :  { %v15770_v43 = vpop.f32.mrf.mxu1  ;;  %v15785_v45 = vpop.f32.mrf.mxu0 }
0x312a   :  { %v11324_v42 = vsel %vm1155_vm9, %v11020_v52, -inf  ;;  %v11333_v22 = vsel %vm1155_vm9, %v11239_v47, -inf }
0x312b   :  { %11319 = vmax.xlane.f32.xlu0 %v11318_v55  ;;  %v11165_v36 = vpop.f32.mrf.mxu1 }
0x312c   :  { %v11166_v2 = vadd.f32 %v16461_v51, %v11165_v36 }
0x312d   :  { %v15780_v54 = vpop.f32.mrf.mxu1 }
0x312e   :  { %v11330_v3 = vsel %vm1155_vm9, %v11166_v2, -inf }
0x312f   :  { %11328 = vmax.xlane.f32.xlu0 %v11327_v16  ;;  %11331 = vmax.xlane.f32.xlu1 %v11330_v3  ;;  %v11311_v30 = vpop.f32.mrf.mxu1 }
0x3130   :  { %v11312_v5 = vadd.f32 %v16461_v51, %v11311_v30 }
0x3131   :  { %v15790_v13 = vpop.f32.mrf.mxu1 }
0x3132   :  { %v11336_v63 = vsel %vm1155_vm9, %v11312_v5, -inf }
0x3133   :  { %11325 = vmax.xlane.f32.xlu0 %v11324_v42 }
0x3137   :  { %11334 = vmax.xlane.f32.xlu0 %v11333_v22 }
0x313b   :  { %11337 = vmax.xlane.f32.xlu0 %v11336_v63 }
0x3140   :  { %11481 = vrot.lane.b32.xlu1 %v10719_v8, %s19369_s5 }
0x3144   :  { %11558 = vrot.lane.b32.xlu1 %v10720_v23, %s19369_s5 }
0x3148   :  { %11635 = vrot.lane.b32.xlu1 %v10721_v37, %s19369_s5 }
0x314c   :  { %11789 = vrot.lane.b32.xlu1 %v10723_v33, %s19369_s5 }
0x3151   :  { %11404 = vrot.lane.b32.xlu0 %v10718_v59, %s19369_s5 }
0x3155   :  { %11712 = vrot.lane.b32.xlu0 %v10722_v29, %s19369_s5  ;;  %v10725_v29 = vmul.f32 %v18754_v10, %v17171_v62 }
0x31ac   :  { %v11317_v46 = vpop.xlane.xlu0 %11316 }
0x31ad   :  { %v11339_v0 = vsub.f32 %v10801_v44, %v11317_v46  ;;  %v10724_v46 = vmul.f32 %v18754_v10, %v17192_v41 }
0x31af   :  { %v11347_v38 = vmul.f32 1.442695, %v11339_v0 }
0x31b0   :  { %v11323_v51 = vpop.xlane.xlu0 %11322 }
0x31b1   :  { %16332 = vpow2.f32 %v11347_v38  ;;  %v11341_v15 = vsub.f32 %v10947_v4, %v11323_v51 }
0x31b3   :  { %v11351_v53 = vmul.f32 1.442695, %v11341_v15 }
0x31b4   :  { %v11320_v61 = vpop.xlane.xlu0 %11319 }
0x31b5   :  { %16334 = vpow2.f32 %v11351_v53  ;;  %v11340_v49 = vsub.f32 %v10874_v11, %v11320_v61 }
0x31b7   :  { %v11349_v60 = vmul.f32 1.442695, %v11340_v49 }
0x31b8   :  { %v11329_v57 = vpop.xlane.xlu0 %11328  ;;  %v11332_v56 = vpop.xlane.xlu1 %11331 }
0x31b9   :  { %16336 = vpow2.f32 %v11349_v60  ;;  %v11343_v34 = vsub.f32 %v11093_v58, %v11329_v57  ;;  %v11344_v26 = vsub.f32 %v11166_v2, %v11332_v56 }
0x31bb   :  { %v11355_v31 = vmul.f32 1.442695, %v11343_v34  ;;  %v11357_v36 = vmul.f32 1.442695, %v11344_v26 }
0x31bc   :  { %v11326_v19 = vpop.xlane.xlu0 %11325  ;;  %v11482_v39 = vpop.permute.xlu1 %11481 }
0x31bd   :  { %16338 = vpow2.f32 %v11355_v31  ;;  %v11342_v48 = vsub.f32 %v11020_v52, %v11326_v19  ;;  %15797 = vmatpush3.msra.mxu1 %v11482_v39 }
0x31be   :  { %v16333_v44 = vpop.eup %16332  ;;  %15806 = vmatprep.subr.mxu1 %v16736_v1 }
0x31bf   :  { %v11353_v4 = vmul.f32 1.442695, %v11342_v48  ;;  %v11363_v43 = vsel %vm1155_vm9, %v16333_v44, 0.0 }
0x31c0   :  { %v11335_v45 = vpop.xlane.xlu0 %11334  ;;  %11364 = vadd.xlane.f32.xlu0 %v11363_v43  ;;  %v11559_v53 = vpop.permute.xlu1 %11558 }
0x31c1   :  { %16340 = vpow2.f32 %v11353_v4  ;;  %v11345_v11 = vsub.f32 %v11239_v47, %v11335_v45 }
0x31c2   :  { %v16335_v55 = vpop.eup %16334 }
0x31c3   :  { %v11359_v58 = vmul.f32 1.442695, %v11345_v11  ;;  %v11369_v54 = vsel %vm1155_vm9, %v16335_v55, 0.0 }
0x31c4   :  { %11370 = vadd.xlane.f32.xlu0 %v11369_v54  ;;  %v11338_v16 = vpop.xlane.xlu0 %11337  ;;  %v11636_v60 = vpop.permute.xlu1 %11635 }
0x31c5   :  { %16342 = vpow2.f32 %v11359_v58  ;;  %v11346_v52 = vsub.f32 %v11312_v5, %v11338_v16  ;;  %v16463_v16 = vld [vmem:[%s19370_s13 + $0x10] sm:$0xff] }
0x31c6   :  { %v16337_v3 = vpop.eup %16336  ;;  %16344 = vpow2.f32 %v11357_v36  ;;  %v16462_v36 = vld [vmem:[%s19370_s13 + $0x18] sm:$0xff] }
0x31c7   :  { %v11361_v30 = vmul.f32 1.442695, %v11346_v52  ;;  %v11366_v2 = vsel %vm1155_vm9, %v16337_v3, 0.0 }
0x31c8   :  { %11367 = vadd.xlane.f32.xlu0 %v11366_v2  ;;  %v11405_v13 = vpop.permute.xlu0 %11404  ;;  %v11790_v34 = vpop.permute.xlu1 %11789 }
0x31c9   :  { %16346 = vpow2.f32 %v11361_v30  ;;  %15792 = vmatpush3.msra.mxu0 %v11405_v13  ;;  %v16464_v30 = vld [vmem:[%s19370_s13 + $0x8] sm:$0xff]  ;;  %v16465_v13 = vld [vmem:[%s19370_s13] sm:$0xff] }
0x31ca   :  { %v16339_v42 = vpop.eup %16338  ;;  %15801 = vmatprep.subr.mxu0 %v16736_v1 }
0x31cb   :  { %v11375_v47 = vsel %vm1155_vm9, %v16339_v42, 0.0 }
0x31cc   :  { %11376 = vadd.xlane.f32.xlu0 %v11375_v47  ;;  %v11713_v0 = vpop.permute.xlu0 %11712  ;;  %v16467_v47 = vld [vmem:[%s19372_s21 + $0x18] sm:$0xff] }
0x31ce   :  { %v16341_v22 = vpop.eup %16340 }
0x31cf   :  { %v11372_v63 = vsel %vm1155_vm9, %v16341_v22, 0.0 }
0x31d0   :  { %11373 = vadd.xlane.f32.xlu0 %v11372_v63  ;;  %v16469_v63 = vld [vmem:[%s19372_s21 + $0x8] sm:$0xff] }
0x31d2   :  { %v18848_v5 = vpop.eup %16342 }
0x31d3   :  { %v11381_v8 = vsel %vm1155_vm9, %v18848_v5, 0.0  ;;  %v18852_v23 = vpop.eup %16344 }
0x31d4   :  { %11382 = vadd.xlane.f32.xlu0 %v11381_v8  ;;  %v11378_v33 = vsel %vm1155_vm9, %v18852_v23, 0.0 }
0x31d6   :  { %v18854_v37 = vpop.eup %16346 }
0x31d7   :  { %v11384_v59 = vsel %vm1155_vm9, %v18854_v37, 0.0 }
0x31d8   :  { %11379 = vadd.xlane.f32.xlu0 %v11378_v33  ;;  %11385 = vadd.xlane.f32.xlu1 %v11384_v59 }
0x31e9   :  { %11943 = vrot.lane.b32.xlu1 %v10725_v29, %s19369_s5 }
0x31ee   :  { %11866 = vrot.lane.b32.xlu0 %v10724_v46, %s19369_s5 }
0x3249   :  { %v11365_v38 = vpop.xlane.xlu0 %11364 }
0x324a   :  { %16348 = vrcp.f32 %v11365_v38 }
0x324d   :  { %v11371_v51 = vpop.xlane.xlu0 %11370 }
0x324e   :  { %16350 = vrcp.f32 %v11371_v51 }
0x3251   :  { %v11368_v15 = vpop.xlane.xlu0 %11367 }
0x3252   :  { %16352 = vrcp.f32 %v11368_v15 }
0x3255   :  { %v11377_v61 = vpop.xlane.xlu0 %11376 }
0x3256   :  { %16354 = vrcp.f32 %v11377_v61 }
0x3257   :  { %v16349_v49 = vpop.eup %16348 }
0x3258   :  { %v11388_v62 = vmul.f32 %v16349_v49, %v16333_v44 }
0x3259   :  { %v11374_v57 = vpop.xlane.xlu0 %11373 }
0x325a   :  { %16356 = vrcp.f32 %v11374_v57  ;;  %15794 = vmatmul.mubr.msk.f32.vlgmr.msra.gmra.mxu0 %vm1155_vm9, %v11388_v62 }
0x325b   :  { %v16351_v41 = vpop.eup %16350  ;;  %15802 = vmatpush3.msra.mxu0 %v11559_v53  ;;  %15803 = vmatprep.mubr.msk.f32.mxu0 %vm16737_vm0, %v16736_v1 }
0x325c   :  { %v11392_v10 = vmul.f32 %v16351_v41, %v16335_v55  ;;  %15811 = vmatprep.subr.mxu0 %v16736_v1 }
0x325d   :  { %v11383_v56 = vpop.xlane.xlu0 %11382 }
0x325e   :  { %16358 = vrcp.f32 %v11383_v56  ;;  %15804 = vmatmul.mubr.msk.f32.vlgmr.msra.gmra.mxu0 %vm1155_vm9, %v11392_v10 }
0x325f   :  { %v16353_v31 = vpop.eup %16352  ;;  %15812 = vmatpush3.msra.mxu0 %v11713_v0  ;;  %15813 = vmatprep.mubr.msk.f32.mxu0 %vm16737_vm0, %v16736_v1 }
0x3260   :  { %v11390_v19 = vmul.f32 %v16353_v31, %v16337_v3  ;;  %15821 = vmatprep.subr.mxu0 %v16736_v1 }
0x3261   :  { %v11380_v39 = vpop.xlane.xlu0 %11379  ;;  %v11386_v48 = vpop.xlane.xlu1 %11385 }
0x3262   :  { %15799 = vmatmul.mubr.msk.f32.vlgmr.msra.gmra.mxu1 %vm1155_vm9, %v11390_v19  ;;  %16360 = vrcp.f32 %v11380_v39 }
0x3263   :  { %v16355_v44 = vpop.eup %16354  ;;  %15807 = vmatpush3.msra.mxu1 %v11636_v60  ;;  %15808 = vmatprep.mubr.msk.f32.mxu1 %vm16737_vm0, %v16736_v1  ;;  %16362 = vrcp.f32 %v11386_v48 }
0x3264   :  { %v11396_v26 = vmul.f32 %v16355_v44, %v16339_v42  ;;  %15816 = vmatprep.subr.mxu1 %v16736_v1  ;;  %v16466_v42 = vld [vmem:[%s19371_s17 + $0x18] sm:$0xff] }
0x3265   :  { %v11867_v4 = vpop.permute.xlu0 %11866  ;;  %v11944_v3 = vpop.permute.xlu1 %11943 }
0x3266   :  { %15814 = vmatmul.mubr.msk.f32.vlgmr.msra.gmra.mxu0 %vm1155_vm9, %v11396_v26 }
0x3267   :  { %v16357_v43 = vpop.eup %16356  ;;  %15822 = vmatpush3.msra.mxu0 %v11867_v4  ;;  %15823 = vmatprep.mubr.msk.f32.mxu0 %vm16737_vm0, %v16736_v1 }
0x3268   :  { %v11394_v45 = vmul.f32 %v16357_v43, %v16341_v22  ;;  %15831 = vmatprep.subr.mxu0 %v16736_v1  ;;  %v16468_v22 = vld [vmem:[%s19372_s21 + $0x10] sm:$0xff] }
0x326a   :  { %15809 = vmatmul.mubr.msk.f32.vlgmr.msra.gmra.mxu1 %vm1155_vm9, %v11394_v45 }
0x326b   :  { %v16359_v11 = vpop.eup %16358  ;;  %15817 = vmatpush3.msra.mxu1 %v11790_v34  ;;  %15818 = vmatprep.mubr.msk.f32.mxu1 %vm16737_vm0, %v16736_v1 }
0x326c   :  { %v11400_v55 = vmul.f32 %v16359_v11, %v18848_v5  ;;  %15826 = vmatprep.subr.mxu1 %v16736_v1  ;;  %v16470_v5 = vld [vmem:[%s19372_s21] sm:$0xff] }
0x326e   :  { %15824 = vmatmul.mubr.msk.f32.vlgmr.msra.gmra.mxu0 %vm1155_vm9, %v11400_v55  ;;  %v16471_v55 = vld [vmem:[%s16754_s9 + $0x10] sm:$0xff] }
0x326f   :  { %15832 = vmatpush3.msra.mxu0 %v16462_v36  ;;  %15839 = vmatprep.mubr.msk.f32.mxu0 %vm16737_vm0, %v16736_v1  ;;  %v16361_v58 = vpop.eup %16360  ;;  %v16472_v36 = vld [vmem:[%s19371_s17 + $0x10] sm:$0xff] }
0x3270   :  { %15833 = vmatprep.subr.mxu0 %v16736_v1  ;;  %v11398_v54 = vmul.f32 %v16361_v58, %v18852_v23  ;;  %v16363_v52 = vpop.eup %16362  ;;  %v16473_v58 = vld [vmem:[%s19371_s17 + $0x8] sm:$0xff] }
0x3271   :  { %15834 = vmatpush3.msra.mxu0 %v16463_v16  ;;  %v11402_v2 = vmul.f32 %v16363_v52, %v18854_v37  ;;  %v16475_v16 = vld [vmem:[%s16754_s9 + $0x18] sm:$0x3]  ;;  %s19375_s9 = sld [smem:[#allocation45_spill]] }
0x3272   :  { %15835 = vmatprep.subr.mxu0 %v16736_v1  ;;  %15819 = vmatmul.mubr.msk.f32.vlgmr.msra.gmra.mxu1 %vm1155_vm9, %v11398_v54  ;;  %v16474_v54 = vld [vmem:[%s19371_s17] sm:$0xff] }
0x3273   :  { %15836 = vmatpush3.msra.mxu0 %v16464_v30  ;;  %15827 = vmatpush3.msra.mxu1 %v11944_v3  ;;  %v16476_v3 = vld [vmem:[%s19373_s25] ss:$0 sm:$0xff] }
0x3274   :  { %15828 = vmatprep.mubr.msk.f32.mxu1 %vm16737_vm0, %v16736_v1  ;;  %15837 = vmatprep.subr.mxu0 %v16736_v1 }
0x3275   :  { %15842 = vmatprep.subr.mxu1 %v16736_v1  ;;  %15838 = vmatpush3.msra.mxu0 %v16465_v13 }
0x3276   :  { %15829 = vmatmul.mubr.msk.f32.vlgmr.msra.gmra.mxu1 %vm1155_vm9, %v11402_v2  ;;  %15853 = vmatprep.subr.mxu0 %v16466_v42 }
0x3277   :  { %15843 = vmatpush3.msra.mxu1 %v16467_v47  ;;  %15850 = vmatprep.mubr.msk.f32.mxu1 %vm16737_vm0, %v16736_v1 }
0x3278   :  { %15844 = vmatprep.subr.mxu1 %v16736_v1 }
0x3279   :  { %15845 = vmatpush3.msra.mxu1 %v16468_v22  ;;  %v16477_v22 = vld [vmem:[%s19374_s29] ss:$0 sm:$0xff] }
0x327a   :  { %15846 = vmatprep.subr.mxu1 %v16736_v1 }
0x327b   :  { %15847 = vmatpush3.msra.mxu1 %v16469_v63 }
0x327c   :  { %15848 = vmatprep.subr.mxu1 %v16736_v1 }
0x327d   :  { %15849 = vmatpush3.msra.mxu1 %v16470_v5 }
0x327e   :  { %15864 = vmatprep.subr.mxu1 %v16736_v1 }
0x331a   :  { %v11476_v8 = vpop.f32.mrf.mxu0 }
0x331b   :  { %v12019_v38 = vsel %vm436_vm10, %v11476_v8, 0.0 }
0x331c   :  { %v15795_v23 = vpop.f32.mrf.mxu0 }
0x331e   :  { %v11630_v37 = vpop.f32.mrf.mxu0 }
0x331f   :  { %v12022_v61 = vsel %vm436_vm10, %v11630_v37, 0.0 }
0x3320   :  { %v15805_v33 = vpop.f32.mrf.mxu0 }
0x3322   :  { %v11553_v59 = vpop.f32.mrf.mxu1 }
0x3323   :  { %v12020_v46 = vsel %vm436_vm10, %v11553_v59, 0.0 }
0x3324   :  { %v15800_v29 = vpop.f32.mrf.mxu1  ;;  %v12021_v15 = vadd.f32 %v12020_v46, %v12019_v38 }
0x3326   :  { %v11784_v0 = vpop.f32.mrf.mxu0  ;;  %v12023_v62 = vadd.f32 %v12022_v61, %v12021_v15  ;;  %v16478_v15 = vld [vmem:[%s19375_s9] ss:$0 sm:$0xff] }
0x3327   :  { %v12026_v56 = vsel %vm436_vm10, %v11784_v0, 0.0  ;;  %v16479_v61 = vld [vmem:[%s19376_s14] ss:$0 sm:$0xff] }
0x3328   :  { %v15815_v51 = vpop.f32.mrf.mxu0 }
0x332a   :  { %v11707_v53 = vpop.f32.mrf.mxu1 }
0x332b   :  { %v12024_v49 = vsel %vm436_vm10, %v11707_v53, 0.0 }
0x332c   :  { %v15810_v60 = vpop.f32.mrf.mxu1  ;;  %v12025_v41 = vadd.f32 %v12024_v49, %v12023_v62  ;;  %v16480_v62 = vld [vmem:[%s19377_s12] ss:$0 sm:$0xff] }
0x332e   :  { %v11938_v57 = vpop.f32.mrf.mxu0  ;;  %v12027_v31 = vadd.f32 %v12026_v56, %v12025_v41 }
0x332f   :  { %v12030_v44 = vsel %vm436_vm10, %v11938_v57, 0.0 }
0x3330   :  { %v15825_v10 = vpop.f32.mrf.mxu0 }
0x3332   :  { %v11861_v34 = vpop.f32.mrf.mxu1 }
0x3333   :  { %v12028_v19 = vsel %vm436_vm10, %v11861_v34, 0.0 }
0x3334   :  { %v12029_v39 = vadd.f32 %v12028_v19, %v12027_v31  ;;  %v15820_v48 = vpop.f32.mrf.mxu1 }
0x3336   :  { %v12015_v26 = vpop.f32.mrf.mxu1  ;;  %v12031_v4 = vadd.f32 %v12030_v44, %v12029_v39 }
0x3337   :  { %v12032_v43 = vsel %vm436_vm10, %v12015_v26, 0.0 }
0x3338   :  { %v12033_v45 = vadd.f32 %v12032_v43, %v12031_v4  ;;  %v15830_v11 = vpop.f32.mrf.mxu1 }
0x333a   :  { %15840 = vmatmul.mubr.msk.f32.vlgmr.msra.gmra.mxu0 %vm436_vm10, %v12033_v45 }
0x333b   :  { %15854 = vmatpush3.msra.mxu0 %v16466_v42  ;;  %15861 = vmatprep.mubr.msk.f32.mxu0 %vm436_vm10, %v16471_v55 }
0x333c   :  { %15855 = vmatprep.subr.mxu0 %v16472_v36 }
0x333d   :  { %15856 = vmatpush3.msra.mxu0 %v16472_v36 }
0x333e   :  { %15857 = vmatprep.subr.mxu0 %v16473_v58 }
0x333f   :  { %15858 = vmatpush3.msra.mxu0 %v16473_v58 }
0x3340   :  { %15859 = vmatprep.subr.mxu0 %v16474_v54 }
0x3341   :  { %15860 = vmatpush3.msra.mxu0 %v16474_v54 }
0x3342   :  { %15862 = vmatmul.mubr.msk.f32.vlgmr.msra.gmra.mxu0 %vm436_vm10, %v16475_v16  ;;  %15871 = vmatprep.subr.mxu0 %v16736_v1 }
0x3343   :  { %15875 = vmatprep.mubr.msk.f32.mxu0 %vm16737_vm0, %v16736_v1 }
0x33fa   :  { %v12103_v52 = vpop.f32.mrf.mxu0 }
0x33fb   :  { %v12104_v30 = vadd.f32 %v16476_v3, %v12103_v52 }
0x33fc   :  { %v15841_v2 = vpop.f32.mrf.mxu0 }
0x33fd   :  { %v12107_v13 = vadd.f32 %v12104_v30, %v18747_v40 }
0x33ff   :  { %v12108_v42 = vsel %vm436_vm10, %v12107_v13, 0.0 }
0x3400   :  { %12109 = vadd.xlane.f32.xlu0 %v12108_v42 }
0x3402   :  { %v15863_v47 = vpop.f32.mrf.mxu0 }
0x3403   :  { %v18938_v63 = vadd.f32 %v16477_v22, %v15863_v47 }
0x3404   :  { %v12262_v5 = vpop.f32.mrf.mxu0 }
0x3405   :  { %15872 = vmatpush3.xpose.msk.msra.mxu0 %vm436_vm10, %v18938_v63  ;;  %v18943_v8 = vadd.f32 %v16477_v22, %v12262_v5  ;;  %v12282_v47 = vmul.f32 %v17439_v9, %v18938_v63  ;;  %v12280_v5 = vmul.f32 %v17437_v6, %v18938_v63 }
0x3406   :  { %15873 = vmatprep.subr.mxu0 %v16736_v1 }
0x3407   :  { %v12279_v42 = vmul.f32 %v17437_v6, %v18943_v8  ;;  %v12281_v22 = vmul.f32 %v17439_v9, %v18943_v8  ;;  %v12288_v9 = vmul.f32 %v17460_v14, %v18938_v63  ;;  %v12290_v6 = vmul.f32 %v17465_v27, %v18938_v63 }
0x3409   :  { %15874 = vmatpush3.xpose.msk.msra.mxu0 %vm436_vm10, %v18943_v8 }
0x340a   :  { %15885 = vmatprep.subr.mxu0 %v16736_v1 }
0x3489   :  { %v12110_v40 = vpop.xlane.xlu0 %12109 }
0x348a   :  { %v12111_v23 = vmul.f32 0.03125, %v12110_v40  ;;  %v12284_v40 = vmul.f32 %v17450_v12, %v18938_v63 }
0x348c   :  { %v12112_v37 = vsub.f32 %v12107_v13, %v12111_v23  ;;  %v12286_v23 = vmul.f32 %v17455_v7, %v18938_v63 }
0x348e   :  { %v12113_v33 = vmul.f32 %v12112_v37, %v12112_v37 }
0x3490   :  { %v12114_v59 = vsel %vm436_vm10, %v12113_v33, 0.0 }
0x3491   :  { %12115 = vadd.xlane.f32.xlu1 %v12114_v59  ;;  %v12283_v59 = vmul.f32 %v17450_v12, %v18943_v8  ;;  %v12291_v12 = vmul.f32 %v17473_v20, %v18943_v8 }
0x351a   :  { %v12116_v29 = vpop.xlane.xlu1 %12115 }
0x351b   :  { %v12117_v46 = vmul.f32 0.03125, %v12116_v29  ;;  %v12285_v29 = vmul.f32 %v17455_v7, %v18943_v8 }
0x351d   :  { %v12118_v0 = vadd.f32 1e-05, %v12117_v46  ;;  %v12287_v46 = vmul.f32 %v17460_v14, %v18943_v8 }
0x351f   :  { %16364 = vrsqrt.f32 %v12118_v0  ;;  %v12289_v0 = vmul.f32 %v17465_v27, %v18943_v8 }
0x352c   :  { %v16365_v38 = vpop.eup %16364 }
0x352d   :  { %v12120_v51 = vmul.f32 %v16365_v38, %v12112_v37  ;;  %v12292_v37 = vmul.f32 %v17473_v20, %v18938_v63 }
0x352f   :  { %v12121_v53 = vmul.f32 %v16478_v15, %v12120_v51 }
0x3531   :  { %v18951_v49 = vadd.f32 %v16479_v61, %v12121_v53 }
0x3533   :  { %15851 = vmatmul.mubr.msk.f32.vlgmr.msra.gmra.mxu1 %vm436_vm10, %v18951_v49 }
0x3534   :  { %15865 = vmatpush3.xpose.msk.msra.mxu1 %vm436_vm10, %v18938_v63  ;;  %15868 = vmatprep.mubr.msk.f32.mxu1 %vm16737_vm0, %v16736_v1 }
0x3535   :  { %15866 = vmatprep.subr.mxu1 %v16736_v1 }
0x3538   :  { %15867 = vmatpush3.xpose.msk.msra.mxu1 %vm436_vm10, %v18943_v8 }
0x3539   :  { %15878 = vmatprep.subr.mxu1 %v16736_v1 }
0x35f3   :  { %v12192_v60 = vpop.f32.mrf.mxu1 }
0x35f4   :  { %v12193_v57 = vadd.f32 %v16480_v62, %v12192_v60 }
0x35f5   :  { %v15852_v41 = vpop.f32.mrf.mxu1 }
0x35f6   :  { %v12271_v10 = vmul.f32 %v12193_v57, %v17059_v17  ;;  %v12272_v56 = vmul.f32 %v12193_v57, %v17079_v24  ;;  %v12273_v17 = vmul.f32 %v12193_v57, %v17088_v25  ;;  %v12274_v24 = vmul.f32 %v12193_v57, %v17108_v28 }
0x35f7   :  { %v12275_v25 = vmul.f32 %v12193_v57, %v17062_v18  ;;  %v12276_v28 = vmul.f32 %v12193_v57, %v17126_v32  ;;  %v12277_v18 = vmul.f32 %v12193_v57, %v17070_v21  ;;  %v12278_v32 = vmul.f32 %v12193_v57, %v17139_v35 }
0x35f8   :  { %15869 = vmatmul.mubr.msk.f32.vlgmr.msra.gmra.mxu1 %vm436_vm10, %v12271_v10  ;;  %15876 = vmatmul.mubr.msk.f32.vlgmr.msra.gmra.mxu0 %vm436_vm10, %v12272_v56 }
0x35f9   :  { %15879 = vmatpush3.xpose.msk.msra.mxu1 %vm436_vm10, %v18938_v63  ;;  %15886 = vmatpush3.xpose.msk.msra.mxu0 %vm436_vm10, %v18938_v63 }
0x35fa   :  { %15880 = vmatprep.subr.mxu1 %v16736_v1  ;;  %15887 = vmatprep.subr.mxu0 %v16736_v1 }
0x35fb   :  { %15882 = vmatprep.mubr.msk.f32.mxu1 %vm16737_vm0, %v16736_v1  ;;  %15889 = vmatprep.mubr.msk.f32.mxu0 %vm16737_vm0, %v16736_v1 }
0x35fd   :  { %15881 = vmatpush3.xpose.msk.msra.mxu1 %vm436_vm10, %v18943_v8  ;;  %15888 = vmatpush3.xpose.msk.msra.mxu0 %vm436_vm10, %v18943_v8 }
0x35fe   :  { %15892 = vmatprep.subr.mxu1 %v16736_v1  ;;  %15899 = vmatprep.subr.mxu0 %v16736_v1 }
0x3600   :  { %15883 = vmatmul.mubr.msk.f32.vlgmr.msra.gmra.mxu1 %vm436_vm10, %v12273_v17  ;;  %15890 = vmatmul.mubr.msk.f32.vlgmr.msra.gmra.mxu0 %vm436_vm10, %v12274_v24 }
0x3601   :  { %15893 = vmatpush3.xpose.msk.msra.mxu1 %vm436_vm10, %v18938_v63  ;;  %15900 = vmatpush3.xpose.msk.msra.mxu0 %vm436_vm10, %v18938_v63 }
0x3602   :  { %15894 = vmatprep.subr.mxu1 %v16736_v1  ;;  %15901 = vmatprep.subr.mxu0 %v16736_v1 }
0x3603   :  { %15896 = vmatprep.mubr.msk.f32.mxu1 %vm16737_vm0, %v16736_v1  ;;  %15903 = vmatprep.mubr.msk.f32.mxu0 %vm16737_vm0, %v16736_v1 }
0x3605   :  { %15895 = vmatpush3.xpose.msk.msra.mxu1 %vm436_vm10, %v18943_v8  ;;  %15902 = vmatpush3.xpose.msk.msra.mxu0 %vm436_vm10, %v18943_v8 }
0x3606   :  { %15906 = vmatprep.subr.mxu1 %v16736_v1  ;;  %15913 = vmatprep.subr.mxu0 %v16736_v1 }
0x3608   :  { %15897 = vmatmul.mubr.msk.f32.vlgmr.msra.gmra.mxu1 %vm436_vm10, %v12275_v25  ;;  %15904 = vmatmul.mubr.msk.f32.vlgmr.msra.gmra.mxu0 %vm436_vm10, %v12276_v28 }
0x3609   :  { %15907 = vmatpush3.xpose.msk.msra.mxu1 %vm436_vm10, %v18938_v63  ;;  %15914 = vmatpush3.xpose.msk.msra.mxu0 %vm436_vm10, %v18938_v63 }
0x360a   :  { %15908 = vmatprep.subr.mxu1 %v16736_v1  ;;  %15915 = vmatprep.subr.mxu0 %v16736_v1 }
0x360b   :  { %15910 = vmatprep.mubr.msk.f32.mxu1 %vm16737_vm0, %v16736_v1  ;;  %15917 = vmatprep.mubr.msk.f32.mxu0 %vm16737_vm0, %v16736_v1 }
0x360d   :  { %15909 = vmatpush3.xpose.msk.msra.mxu1 %vm436_vm10, %v18943_v8  ;;  %15916 = vmatpush3.xpose.msk.msra.mxu0 %vm436_vm10, %v18943_v8 }
0x360e   :  { %15920 = vmatprep.subr.mxu1 %v16736_v1  ;;  %15934 = vmatprep.subr.mxu0 %v16736_v1 }
0x3610   :  { %15911 = vmatmul.mubr.msk.f32.vlgmr.msra.gmra.mxu1 %vm436_vm10, %v12277_v18  ;;  %15918 = vmatmul.mubr.msk.f32.vlgmr.msra.gmra.mxu0 %vm436_vm10, %v12278_v32 }
0x3611   :  { %15924 = vmatprep.mubr.msk.f32.mxu1 %vm16737_vm0, %v16736_v1  ;;  %15938 = vmatprep.mubr.msk.f32.mxu0 %vm16737_vm0, %v16736_v1 }
0x36b8   :  { %v12370_v34 = vpop.f32.mrf.mxu1  ;;  %v19032_v31 = vpop.f32.mrf.mxu0 }
0x36b9   :  { %v12885_v21 = vsel %vm2787_vm11, %v12370_v34, -inf  ;;  %v12888_v39 = vsel %vm2787_vm11, %v19032_v31, -inf }
0x36ba   :  { %v15877_v35 = vpop.f32.mrf.mxu0  ;;  %12886 = vmax.xlane.f32.xlu0 %v12885_v21  ;;  %v15870_v19 = vpop.f32.mrf.mxu1 }
0x36be   :  { %12889 = vmax.xlane.f32.xlu0 %v12888_v39 }
0x36c0   :  { %v19037_v48 = vpop.f32.mrf.mxu1  ;;  %v19039_v44 = vpop.f32.mrf.mxu0 }
0x36c1   :  { %v12894_v26 = vsel %vm2787_vm11, %v19039_v44, -inf  ;;  %v12891_v4 = vsel %vm2787_vm11, %v19037_v48, -inf }
0x36c2   :  { %12895 = vmax.xlane.f32.xlu1 %v12894_v26  ;;  %v15884_v43 = vpop.f32.mrf.mxu1  ;;  %v15891_v45 = vpop.f32.mrf.mxu0  ;;  %12892 = vmax.xlane.f32.xlu0 %v12891_v4 }
0x36c8   :  { %v19045_v11 = vpop.f32.mrf.mxu1  ;;  %v19047_v55 = vpop.f32.mrf.mxu0 }
0x36c9   :  { %v12900_v36 = vsel %vm2787_vm11, %v19047_v55, -inf  ;;  %v12897_v58 = vsel %vm2787_vm11, %v19045_v11, -inf }
0x36ca   :  { %12901 = vmax.xlane.f32.xlu1 %v12900_v36  ;;  %v15905_v54 = vpop.f32.mrf.mxu0  ;;  %12898 = vmax.xlane.f32.xlu0 %v12897_v58  ;;  %v15898_v16 = vpop.f32.mrf.mxu1 }
0x36cb   :  { %v12294_v16 = vmul.f32 %v17537_v50, %v18938_v63  ;;  %v12293_v63 = vmul.f32 %v17537_v50, %v18943_v8 }
0x36d0   :  { %v19053_v52 = vpop.f32.mrf.mxu1  ;;  %v19055_v3 = vpop.f32.mrf.mxu0 }
0x36d1   :  { %v12903_v30 = vsel %vm2787_vm11, %v19053_v52, -inf  ;;  %v12906_v33 = vsel %vm2787_vm11, %v19055_v3, -inf }
0x36d2   :  { %v15919_v2 = vpop.f32.mrf.mxu0  ;;  %12904 = vmax.xlane.f32.xlu0 %v12903_v30  ;;  %v15912_v13 = vpop.f32.mrf.mxu1 }
0x36db   :  { %12975 = vrot.lane.b32.xlu1 %v12279_v42, %s19363_s22 }
0x36df   :  { %13059 = vrot.lane.b32.xlu1 %v12282_v47, %s19363_s22 }
0x36e3   :  { %13057 = vrot.lane.b32.xlu1 %v12281_v22, %s19363_s22 }
0x36e8   :  { %12977 = vrot.lane.b32.xlu0 %v12280_v5, %s19363_s22 }
0x36ec   :  { %13141 = vrot.lane.b32.xlu0 %v12284_v40, %s19363_s22 }
0x36f0   :  { %13223 = vrot.lane.b32.xlu0 %v12286_v23, %s19363_s22 }
0x36f4   :  { %13305 = vrot.lane.b32.xlu0 %v12288_v9, %s19363_s22 }
0x36f8   :  { %13387 = vrot.lane.b32.xlu0 %v12290_v6, %s19363_s22 }
0x36fc   :  { %13469 = vrot.lane.b32.xlu0 %v12292_v37, %s19363_s22 }
0x3707   :  { %12907 = vmax.xlane.f32.xlu1 %v12906_v33 }
0x3718   :  { %13139 = vrot.lane.b32.xlu1 %v12283_v59, %s19363_s22 }
0x371c   :  { %13221 = vrot.lane.b32.xlu1 %v12285_v29, %s19363_s22 }
0x3720   :  { %13303 = vrot.lane.b32.xlu1 %v12287_v46, %s19363_s22 }
0x3724   :  { %13385 = vrot.lane.b32.xlu1 %v12289_v0, %s19363_s22 }
0x3728   :  { %13467 = vrot.lane.b32.xlu1 %v12291_v12, %s19363_s22 }
0x3743   :  { %v12887_v38 = vpop.xlane.xlu0 %12886 }
0x3744   :  { %v12909_v51 = vsub.f32 %v12370_v34, %v12887_v38 }
0x3746   :  { %v12917_v7 = vmul.f32 1.442695, %v12909_v51 }
0x3747   :  { %v12890_v15 = vpop.xlane.xlu0 %12889 }
0x3748   :  { %16366 = vpow2.f32 %v12917_v7  ;;  %v12910_v53 = vsub.f32 %v19032_v31, %v12890_v15 }
0x374a   :  { %v12919_v14 = vmul.f32 1.442695, %v12910_v53 }
0x374b   :  { %v12896_v61 = vpop.xlane.xlu1 %12895  ;;  %v12893_v60 = vpop.xlane.xlu0 %12892 }
0x374c   :  { %16368 = vpow2.f32 %v12919_v14  ;;  %v12912_v27 = vsub.f32 %v19039_v44, %v12896_v61  ;;  %v12911_v62 = vsub.f32 %v19037_v48, %v12893_v60 }
0x374e   :  { %v12923_v57 = vmul.f32 1.442695, %v12912_v27  ;;  %v12921_v41 = vmul.f32 1.442695, %v12911_v62 }
0x3750   :  { %16370 = vpow2.f32 %v12923_v57 }
0x3751   :  { %16372 = vpow2.f32 %v12921_v41 }
0x3753   :  { %v12902_v20 = vpop.xlane.xlu1 %12901  ;;  %v12899_v10 = vpop.xlane.xlu0 %12898 }
0x3754   :  { %v12914_v56 = vsub.f32 %v19047_v55, %v12902_v20  ;;  %v12913_v17 = vsub.f32 %v19045_v11, %v12899_v10 }
0x3755   :  { %v19108_v24 = vpop.eup %16366 }
0x3756   :  { %v12927_v25 = vmul.f32 1.442695, %v12914_v56  ;;  %v12925_v28 = vmul.f32 1.442695, %v12913_v17  ;;  %v12933_v18 = vsel %vm2787_vm11, %v19108_v24, 0.0 }
0x3757   :  { %12934 = vadd.xlane.f32.xlu0 %v12933_v18  ;;  %v12976_v4 = vpop.permute.xlu1 %12975  ;;  %v16484_v18 = vld [vmem:[%s19378_s4] sm:$0xff] }
0x3758   :  { %16374 = vpow2.f32 %v12927_v25  ;;  %v16482_v25 = vld [vmem:[%s19378_s4 + $0x10] sm:$0xff] }
0x3759   :  { %v19112_v32 = vpop.eup %16368  ;;  %16376 = vpow2.f32 %v12925_v28  ;;  %v16483_v28 = vld [vmem:[%s19378_s4 + $0x8] sm:$0xff] }
0x375a   :  { %v12936_v34 = vsel %vm2787_vm11, %v19112_v32, 0.0 }
0x375b   :  { %v12905_v31 = vpop.xlane.xlu0 %12904  ;;  %12937 = vadd.xlane.f32.xlu1 %v12936_v34 }
0x375c   :  { %v12915_v21 = vsub.f32 %v19053_v52, %v12905_v31  ;;  %v13060_v52 = vpop.permute.xlu1 %13059 }
0x375d   :  { %v19117_v35 = vpop.eup %16370 }
0x375e   :  { %v19119_v19 = vpop.eup %16372  ;;  %v12929_v39 = vmul.f32 1.442695, %v12915_v21  ;;  %v12942_v48 = vsel %vm2787_vm11, %v19117_v35, 0.0 }
0x375f   :  { %v12978_v44 = vpop.permute.xlu0 %12977  ;;  %12943 = vadd.xlane.f32.xlu1 %v12942_v48  ;;  %v12939_v26 = vsel %vm2787_vm11, %v19119_v19, 0.0  ;;  %v16488_v48 = vld [vmem:[%s19366_s6] sm:$0xff] }
0x3760   :  { %16378 = vpow2.f32 %v12929_v39  ;;  %12940 = vadd.xlane.f32.xlu0 %v12939_v26  ;;  %15921 = vmatpush3.msk.msra.mxu1 %vm2886_vm12, %v12978_v44  ;;  %v13058_v30 = vpop.permute.xlu1 %13057  ;;  %v16487_v39 = vld [vmem:[%s19366_s6 + $0x8] sm:$0xff] }
0x3761   :  { %15922 = vmatprep.subr.mxu1 %v16736_v1 }
0x3762   :  { %15923 = vmatpush3.msra.mxu1 %v12976_v4 }
0x3763   :  { %v13142_v43 = vpop.permute.xlu0 %13141  ;;  %15927 = vmatprep.subr.mxu1 %v16736_v1 }
0x3764   :  { %15935 = vmatpush3.msk.msra.mxu0 %vm2886_vm12, %v13142_v43 }
0x3765   :  { %v19129_v45 = vpop.eup %16374  ;;  %15936 = vmatprep.subr.mxu0 %v16736_v1 }
0x3766   :  { %v19132_v11 = vpop.eup %16376  ;;  %v12948_v55 = vsel %vm2787_vm11, %v19129_v45, 0.0 }
0x3767   :  { %12949 = vadd.xlane.f32.xlu1 %v12948_v55  ;;  %v12945_v36 = vsel %vm2787_vm11, %v19132_v11, 0.0  ;;  %v13224_v40 = vpop.permute.xlu0 %13223 }
0x3768   :  { %12946 = vadd.xlane.f32.xlu0 %v12945_v36 }
0x376d   :  { %v19138_v58 = vpop.eup %16378 }
0x376e   :  { %v12951_v54 = vsel %vm2787_vm11, %v19138_v58, 0.0 }
0x376f   :  { %12952 = vadd.xlane.f32.xlu0 %v12951_v54 }
0x3785   :  { %13551 = vrot.lane.b32.xlu0 %v12294_v16, %s19363_s22 }
0x3790   :  { %v12908_v2 = vpop.xlane.xlu1 %12907 }
0x3791   :  { %v12916_v13 = vsub.f32 %v19055_v3, %v12908_v2  ;;  %v13306_v3 = vpop.permute.xlu0 %13305 }
0x3793   :  { %v12931_v42 = vmul.f32 1.442695, %v12916_v13 }
0x3794   :  { %v13140_v47 = vpop.permute.xlu1 %13139 }
0x3795   :  { %16380 = vpow2.f32 %v12931_v42  ;;  %15937 = vmatpush3.msra.mxu0 %v13140_v47  ;;  %v13388_v6 = vpop.permute.xlu0 %13387 }
0x3796   :  { %15948 = vmatprep.subr.mxu0 %v16736_v1 }
0x3798   :  { %v13222_v23 = vpop.permute.xlu1 %13221 }
0x3799   :  { %v13470_v33 = vpop.permute.xlu0 %13469 }
0x379c   :  { %v13304_v9 = vpop.permute.xlu1 %13303 }
0x37a0   :  { %v13386_v37 = vpop.permute.xlu1 %13385 }
0x37a2   :  { %v19147_v22 = vpop.eup %16380 }
0x37a3   :  { %v12954_v5 = vsel %vm2787_vm11, %v19147_v22, 0.0 }
0x37a4   :  { %12955 = vadd.xlane.f32.xlu1 %v12954_v5  ;;  %v13468_v59 = vpop.permute.xlu1 %13467 }
0x37b5   :  { %13549 = vrot.lane.b32.xlu1 %v12293_v63, %s19363_s22 }
0x37e0   :  { %v12935_v29 = vpop.xlane.xlu0 %12934 }
0x37e1   :  { %16382 = vrcp.f32 %v12935_v29 }
0x37e4   :  { %v12938_v46 = vpop.xlane.xlu1 %12937 }
0x37e5   :  { %16384 = vrcp.f32 %v12938_v46 }
0x37e8   :  { %v12944_v0 = vpop.xlane.xlu1 %12943 }
0x37e9   :  { %16386 = vrcp.f32 %v12944_v0  ;;  %v12941_v12 = vpop.xlane.xlu0 %12940 }
0x37ea   :  { %16388 = vrcp.f32 %v12941_v12  ;;  %v16489_v12 = vld [vmem:[%s19368_s24 + $0x38] sm:$0xff] }
0x37ee   :  { %v16383_v38 = vpop.eup %16382 }
0x37ef   :  { %v12958_v50 = vmul.f32 %v16383_v38, %v19108_v24  ;;  %v16481_v24 = vld [vmem:[%s19378_s4 + $0x18] sm:$0xff]  ;;  %v16490_v38 = vld [vmem:[%s19368_s24 + $0x30] sm:$0xff] }
0x37f0   :  { %v12950_v8 = vpop.xlane.xlu1 %12949 }
0x37f1   :  { %16390 = vrcp.f32 %v12950_v8  ;;  %v12947_v51 = vpop.xlane.xlu0 %12946  ;;  %15925 = vmatmul.mubr.msk.f32.vlgmr.msra.gmra.mxu1 %vm2787_vm11, %v12958_v50  ;;  %v16491_v50 = vld [vmem:[%s19368_s24 + $0x28] sm:$0xff]  ;;  %v16492_v8 = vld [vmem:[%s19368_s24 + $0x20] sm:$0xff] }
0x37f2   :  { %v16385_v7 = vpop.eup %16384  ;;  %16392 = vrcp.f32 %v12947_v51  ;;  %15928 = vmatpush3.msk.msra.mxu1 %vm2886_vm12, %v13060_v52  ;;  %15931 = vmatprep.mubr.msk.f32.mxu1 %vm16737_vm0, %v16736_v1  ;;  %v16493_v51 = vld [vmem:[%s19368_s24 + $0x18] sm:$0xff] }
0x37f3   :  { %v12960_v15 = vmul.f32 %v16385_v7, %v19112_v32  ;;  %15929 = vmatprep.subr.mxu1 %v16736_v1  ;;  %v16494_v7 = vld [vmem:[%s19368_s24 + $0x10] sm:$0xff] }
0x37f4   :  { %15930 = vmatpush3.msra.mxu1 %v13058_v30 }
0x37f5   :  { %15941 = vmatprep.subr.mxu1 %v16736_v1  ;;  %15932 = vmatmul.mubr.msk.f32.vlgmr.msra.gmra.mxu1 %vm2787_vm11, %v12960_v15  ;;  %v16495_v15 = vld [vmem:[%s19368_s24 + $0x8] sm:$0xff] }
0x37f6   :  { %v16387_v53 = vpop.eup %16386  ;;  %15942 = vmatpush3.msk.msra.mxu1 %vm2886_vm12, %v13224_v40  ;;  %15945 = vmatprep.mubr.msk.f32.mxu1 %vm16737_vm0, %v16736_v1 }
0x37f7   :  { %v16389_v14 = vpop.eup %16388  ;;  %v12964_v61 = vmul.f32 %v16387_v53, %v19117_v35  ;;  %15943 = vmatprep.subr.mxu1 %v16736_v1  ;;  %v16485_v35 = vld [vmem:[%s19366_s6 + $0x18] sm:$0xff]  ;;  %v16496_v53 = vld [vmem:[%s19368_s24] sm:$0xff] }
0x37f8   :  { %v12962_v60 = vmul.f32 %v16389_v14, %v19119_v19  ;;  %15944 = vmatpush3.msra.mxu1 %v13222_v23  ;;  %v12953_v27 = vpop.xlane.xlu0 %12952  ;;  %v16486_v19 = vld [vmem:[%s19366_s6 + $0x10] sm:$0xff]  ;;  %s19379_s6 = sld [smem:[#allocation44_spill]] }
0x37f9   :  { %16394 = vrcp.f32 %v12953_v27  ;;  %15955 = vmatprep.subr.mxu1 %v16736_v1  ;;  %15946 = vmatmul.mubr.msk.f32.vlgmr.msra.gmra.mxu1 %vm2787_vm11, %v12964_v61 }
0x37fa   :  { %15939 = vmatmul.mubr.msk.f32.vlgmr.msra.gmra.mxu0 %vm2787_vm11, %v12962_v60  ;;  %15956 = vmatpush3.msk.msra.mxu1 %vm2886_vm12, %v13388_v6 }
0x37fb   :  { %15949 = vmatpush3.msk.msra.mxu0 %vm2886_vm12, %v13306_v3  ;;  %15957 = vmatprep.subr.mxu1 %v16736_v1 }
0x37fc   :  { %15950 = vmatprep.subr.mxu0 %v16736_v1  ;;  %15958 = vmatpush3.msra.mxu1 %v13386_v37  ;;  %v13552_v10 = vpop.permute.xlu0 %13551 }
0x37fd   :  { %15951 = vmatpush3.msra.mxu0 %v13304_v9  ;;  %15952 = vmatprep.mubr.msk.f32.mxu0 %vm16737_vm0, %v16736_v1 }
0x37fe   :  { %v16391_v62 = vpop.eup %16390  ;;  %15959 = vmatprep.mubr.msk.f32.mxu1 %vm16737_vm0, %v16736_v1  ;;  %15962 = vmatprep.subr.mxu0 %v16736_v1  ;;  %v16497_v61 = vld [vmem:[%s19379_s6] ss:$0 sm:$0xff] }
0x37ff   :  { %v16393_v57 = vpop.eup %16392  ;;  %v12968_v41 = vmul.f32 %v16391_v62, %v19129_v45  ;;  %15969 = vmatprep.subr.mxu1 %v16736_v1 }
0x3800   :  { %v12966_v20 = vmul.f32 %v16393_v57, %v19132_v11 }
0x3801   :  { %15960 = vmatmul.mubr.msk.f32.vlgmr.msra.gmra.mxu1 %vm2787_vm11, %v12968_v41 }
0x3802   :  { %15953 = vmatmul.mubr.msk.f32.vlgmr.msra.gmra.mxu0 %vm2787_vm11, %v12966_v20  ;;  %15970 = vmatpush3.msk.msra.mxu1 %vm2886_vm12, %v13552_v10 }
0x3803   :  { %15963 = vmatpush3.msk.msra.mxu0 %vm2886_vm12, %v13470_v33  ;;  %15966 = vmatprep.mubr.msk.f32.mxu0 %vm16737_vm0, %v16736_v1 }
0x3804   :  { %15964 = vmatprep.subr.mxu0 %v16736_v1  ;;  %15971 = vmatprep.subr.mxu1 %v16736_v1 }
0x3805   :  { %15965 = vmatpush3.msra.mxu0 %v13468_v59  ;;  %15973 = vmatprep.mubr.msk.f32.mxu1 %vm16737_vm0, %v16736_v1 }
0x3806   :  { %v16395_v56 = vpop.eup %16394  ;;  %15976 = vmatprep.subr.mxu0 %v16736_v1 }
0x3807   :  { %v12970_v17 = vmul.f32 %v16395_v56, %v19138_v58 }
0x3809   :  { %15967 = vmatmul.mubr.msk.f32.vlgmr.msra.gmra.mxu0 %vm2787_vm11, %v12970_v17 }
0x380a   :  { %15977 = vmatpush3.msra.mxu0 %v16481_v24  ;;  %15984 = vmatprep.mubr.msk.f32.mxu0 %vm16737_vm0, %v16736_v1 }
0x380b   :  { %15978 = vmatprep.subr.mxu0 %v16736_v1 }
0x380c   :  { %15979 = vmatpush3.msra.mxu0 %v16482_v25 }
0x380d   :  { %15980 = vmatprep.subr.mxu0 %v16736_v1 }
0x380e   :  { %15981 = vmatpush3.msra.mxu0 %v16483_v28 }
0x380f   :  { %15982 = vmatprep.subr.mxu0 %v16736_v1 }
0x3810   :  { %15983 = vmatpush3.msra.mxu0 %v16484_v18 }
0x3811   :  { %15998 = vmatprep.subr.mxu0 %v16736_v1 }
0x382d   :  { %v12956_v32 = vpop.xlane.xlu1 %12955 }
0x382e   :  { %16396 = vrcp.f32 %v12956_v32 }
0x3831   :  { %v13550_v34 = vpop.permute.xlu1 %13549 }
0x3832   :  { %15972 = vmatpush3.msra.mxu1 %v13550_v34 }
0x3833   :  { %15987 = vmatprep.subr.mxu1 %v16736_v1 }
0x383b   :  { %v16397_v31 = vpop.eup %16396 }
0x383c   :  { %v12972_v21 = vmul.f32 %v16397_v31, %v19147_v22  ;;  %v16499_v31 = vld [vmem:[#allocation2] ss:$0 sm:$0xff] }
0x383e   :  { %15974 = vmatmul.mubr.msk.f32.vlgmr.msra.gmra.mxu1 %vm2787_vm11, %v12972_v21 }
0x383f   :  { %15988 = vmatpush3.msra.mxu1 %v16485_v35  ;;  %15995 = vmatprep.mubr.msk.f32.mxu1 %vm16737_vm0, %v16736_v1  ;;  %v16500_v35 = vld [vmem:[%s16974_s8 + $0x18] sm:$0xff] }
0x3840   :  { %15989 = vmatprep.subr.mxu1 %v16736_v1 }
0x3841   :  { %15990 = vmatpush3.msra.mxu1 %v16486_v19  ;;  %v16501_v19 = vld [vmem:[%s16974_s8 + $0x10] sm:$0xff] }
0x3842   :  { %15991 = vmatprep.subr.mxu1 %v16736_v1 }
0x3843   :  { %15992 = vmatpush3.msra.mxu1 %v16487_v39  ;;  %v16502_v39 = vld [vmem:[%s16974_s8 + $0x8] sm:$0xff] }
0x3844   :  { %15993 = vmatprep.subr.mxu1 %v16736_v1 }
0x3845   :  { %15994 = vmatpush3.msra.mxu1 %v16488_v48  ;;  %v16503_v48 = vld [vmem:[%s16974_s8] sm:$0xff] }
0x3846   :  { %16017 = vmatprep.subr.mxu1 %v16736_v1 }
0x38b1   :  { %v13051_v44 = vpop.f32.mrf.mxu1 }
0x38b2   :  { %v13629_v42 = vsel %vm436_vm10, %v13051_v44, 0.0 }
0x38b3   :  { %v15926_v26 = vpop.f32.mrf.mxu1 }
0x38b4   :  { %v16504_v26 = vld [vmem:[#allocation7] ss:$0 sm:$0xff] }
0x38b5   :  { %v13133_v4 = vpop.f32.mrf.mxu1 }
0x38b6   :  { %v13630_v13 = vsel %vm436_vm10, %v13133_v4, 0.0 }
0x38b7   :  { %v15933_v43 = vpop.f32.mrf.mxu1  ;;  %v13631_v22 = vadd.f32 %v13630_v13, %v13629_v42 }
0x38b9   :  { %v13297_v45 = vpop.f32.mrf.mxu1 }
0x38ba   :  { %v13215_v11 = vpop.f32.mrf.mxu0  ;;  %v13634_v63 = vsel %vm436_vm10, %v13297_v45, 0.0 }
0x38bb   :  { %v15947_v55 = vpop.f32.mrf.mxu1  ;;  %v13632_v47 = vsel %vm436_vm10, %v13215_v11, 0.0 }
0x38bc   :  { %v15940_v36 = vpop.f32.mrf.mxu0  ;;  %v13633_v5 = vadd.f32 %v13632_v47, %v13631_v22 }
0x38be   :  { %v13635_v23 = vadd.f32 %v13634_v63, %v13633_v5 }
0x38c1   :  { %v13461_v58 = vpop.f32.mrf.mxu1 }
0x38c2   :  { %v13379_v54 = vpop.f32.mrf.mxu0  ;;  %v13638_v9 = vsel %vm436_vm10, %v13461_v58, 0.0 }
0x38c3   :  { %v15961_v16 = vpop.f32.mrf.mxu1  ;;  %v13636_v40 = vsel %vm436_vm10, %v13379_v54, 0.0 }
0x38c4   :  { %v15954_v52 = vpop.f32.mrf.mxu0  ;;  %v13637_v3 = vadd.f32 %v13636_v40, %v13635_v23 }
0x38c6   :  { %v13639_v37 = vadd.f32 %v13638_v9, %v13637_v3 }
0x38c9   :  { %v13543_v30 = vpop.f32.mrf.mxu0 }
0x38ca   :  { %v13640_v6 = vsel %vm436_vm10, %v13543_v30, 0.0 }
0x38cb   :  { %v15968_v2 = vpop.f32.mrf.mxu0  ;;  %v13641_v33 = vadd.f32 %v13640_v6, %v13639_v37 }
0x38fe   :  { %v13625_v59 = vpop.f32.mrf.mxu1 }
0x38ff   :  { %v13642_v29 = vsel %vm436_vm10, %v13625_v59, 0.0 }
0x3900   :  { %v13643_v46 = vadd.f32 %v13642_v29, %v13641_v33  ;;  %v15975_v0 = vpop.f32.mrf.mxu1 }
0x3902   :  { %15985 = vmatmul.mubr.msk.f32.vlgmr.msra.gmra.mxu0 %vm436_vm10, %v13643_v46  ;;  %v16505_v46 = vld [vmem:[#allocation9] ss:$0 sm:$0xff] }
0x3903   :  { %15999 = vmatpush3.msra.mxu0 %v16489_v12  ;;  %16014 = vmatprep.mubr.msk.f32.mxu0 %vm16737_vm0, %v16736_v1 }
0x3904   :  { %16000 = vmatprep.subr.mxu0 %v16736_v1 }
0x3905   :  { %16001 = vmatpush3.msra.mxu0 %v16490_v38 }
0x3906   :  { %16002 = vmatprep.subr.mxu0 %v16736_v1 }
0x3907   :  { %16003 = vmatpush3.msra.mxu0 %v16491_v50 }
0x3908   :  { %16004 = vmatprep.subr.mxu0 %v16736_v1 }
0x3909   :  { %16005 = vmatpush3.msra.mxu0 %v16492_v8 }
0x390a   :  { %16006 = vmatprep.subr.mxu0 %v16736_v1 }
0x390b   :  { %16007 = vmatpush3.msra.mxu0 %v16493_v51 }
0x390c   :  { %16008 = vmatprep.subr.mxu0 %v16736_v1 }
0x390d   :  { %16009 = vmatpush3.msra.mxu0 %v16494_v7 }
0x390e   :  { %16010 = vmatprep.subr.mxu0 %v16736_v1 }
0x390f   :  { %16011 = vmatpush3.msra.mxu0 %v16495_v15 }
0x3910   :  { %16012 = vmatprep.subr.mxu0 %v16736_v1 }
0x3911   :  { %16013 = vmatpush3.msra.mxu0 %v16496_v53 }
0x39c2   :  { %v13713_v14 = vpop.f32.mrf.mxu0 }
0x39c3   :  { %v13714_v60 = vadd.f32 %v16497_v61, %v13713_v14 }
0x39c4   :  { %v15986_v27 = vpop.f32.mrf.mxu0 }
0x39c5   :  { %v13717_v62 = vadd.f32 %v13714_v60, %v18951_v49  ;;  %v16498_v49 = vld [vmem:[%s19367_s19] ss:$0 sm:$0xff] }
0x39c7   :  { %v13718_v57 = vsel %vm436_vm10, %v13717_v62, 0.0 }
0x39c8   :  { %13719 = vadd.xlane.f32.xlu0 %v13718_v57  ;;  %v16506_v57 = vld [vmem:[#allocation4] ss:$0 sm:$0xff] }
0x3a51   :  { %v13720_v41 = vpop.xlane.xlu0 %13719 }
0x3a52   :  { %v13721_v20 = vmul.f32 0.03125, %v13720_v41 }
0x3a54   :  { %v13722_v10 = vsub.f32 %v13717_v62, %v13721_v20  ;;  %v16507_v20 = vld [vmem:[#allocation6] ss:$0 sm:$0xff] }
0x3a56   :  { %v13723_v56 = vmul.f32 %v13722_v10, %v13722_v10 }
0x3a58   :  { %v13724_v17 = vsel %vm436_vm10, %v13723_v56, 0.0 }
0x3a59   :  { %13725 = vadd.xlane.f32.xlu1 %v13724_v17 }
0x3ae2   :  { %v13726_v24 = vpop.xlane.xlu1 %13725 }
0x3ae3   :  { %v13727_v25 = vmul.f32 0.03125, %v13726_v24 }
0x3ae5   :  { %v13728_v28 = vadd.f32 1e-05, %v13727_v25 }
0x3ae7   :  { %16398 = vrsqrt.f32 %v13728_v28 }
0x3af4   :  { %v16399_v18 = vpop.eup %16398 }
0x3af5   :  { %v13730_v32 = vmul.f32 %v16399_v18, %v13722_v10 }
0x3af7   :  { %v13731_v34 = vmul.f32 %v16498_v49, %v13730_v32 }
0x3af9   :  { %v13732_v21 = vadd.f32 %v16499_v31, %v13731_v34 }
0x3afb   :  { %15996 = vmatmul.mubr.msk.f32.vlgmr.msra.gmra.mxu1 %vm436_vm10, %v13732_v21 }
0x3afc   :  { %16018 = vmatpush3.msra.mxu1 %v16500_v35  ;;  %16025 = vmatprep.mubr.msk.f32.mxu1 %vm16737_vm0, %v16736_v1  ;;  %v16508_v35 = vld [vmem:[#allocation10] ss:$0 sm:$0xff] }
0x3afd   :  { %16019 = vmatprep.subr.mxu1 %v16736_v1 }
0x3afe   :  { %16020 = vmatpush3.msra.mxu1 %v16501_v19 }
0x3aff   :  { %16021 = vmatprep.subr.mxu1 %v16736_v1 }
0x3b00   :  { %16022 = vmatpush3.msra.mxu1 %v16502_v39  ;;  %v16509_v39 = vld [vmem:[#allocation12] ss:$0 sm:$0xff] }
0x3b01   :  { %16023 = vmatprep.subr.mxu1 %v16736_v1 }
0x3b02   :  { %16024 = vmatpush3.msra.mxu1 %v16503_v48 }
0x3bbb   :  { %v13802_v44 = vpop.f32.mrf.mxu1 }
0x3bbc   :  { %v13803_v4 = vadd.f32 %v16504_v26, %v13802_v44  ;;  %v16510_v26 = vld [vmem:[#allocation13] ss:$0 sm:$0xff] }
0x3bbd   :  { %v15997_v43 = vpop.f32.mrf.mxu1 }
0x3bbe   :  { %v13807_v45 = vmul.f32 0.70710677, %v13803_v4  ;;  %v13806_v37 = vmul.f32 0.5, %v13803_v4 }
0x3bc0   :  { %v13808_v11 = vand.u32 2147483647, %v13807_v45  ;;  %vm13828_vm0 = vcmp.ge.f32.partialorder %v13807_v45, 0.0 }
0x3bc2   :  { %v13809_v55 = vmul.f32 0.3275911, %v13808_v11  ;;  %v13822_v58 = vsub.f32 0.0, %v13808_v11 }
0x3bc4   :  { %v13810_v36 = vadd.f32 1.0, %v13809_v55  ;;  %v13823_v54 = vmul.f32 %v13822_v58, %v13808_v11 }
0x3bc6   :  { %16400 = vrcp.f32 %v13810_v36  ;;  %v13824_v30 = vmul.f32 1.442695, %v13823_v54 }
0x3bc8   :  { %16402 = vpow2.f32 %v13824_v30 }
0x3bd3   :  { %v16401_v16 = vpop.eup %16400 }
0x3bd4   :  { %v13813_v52 = vmul.f32 1.0614054, %v16401_v16 }
0x3bd5   :  { %v16403_v40 = vpop.eup %16402 }
0x3bd6   :  { %v14403_v2 = vadd.f32 -1.4531521, %v13813_v52 }
0x3bd8   :  { %v13815_v13 = vmul.f32 %v16401_v16, %v14403_v2 }
0x3bda   :  { %v13816_v1 = vadd.f32 1.4214138, %v13815_v13 }
0x3bdc   :  { %v13817_v42 = vmul.f32 %v16401_v16, %v13816_v1 }
0x3bde   :  { %v14404_v47 = vadd.f32 -0.28449672, %v13817_v42 }
0x3be0   :  { %v13819_v22 = vmul.f32 %v16401_v16, %v14404_v47 }
0x3be2   :  { %v13820_v5 = vadd.f32 0.2548296, %v13819_v22 }
0x3be4   :  { %v13821_v63 = vmul.f32 %v16401_v16, %v13820_v5 }
0x3be6   :  { %v13826_v23 = vmul.f32 %v16403_v40, %v13821_v63 }
0x3be8   :  { %v13827_v3 = vsub.f32 1.0, %v13826_v23 }
0x3bea   :  { %v13829_v9 = vsub.f32 0.0, %v13827_v3 }
0x3bec   :  { %v13830_v6 = vsel %vm13828_vm0, %v13827_v3, %v13829_v9 }
0x3bed   :  { %v13831_v33 = vadd.f32 1.0, %v13830_v6 }
0x3bef   :  { %v13832_v59 = vmul.f32 %v13831_v33, %v13806_v37 }
0x3bf1   :  { %16015 = vmatmul.mubr.msk.f32.vlgmr.msra.gmra.mxu0 %vm3767_vm14, %v13832_v59 }
0x3cb1   :  { %v13902_v29 = vpop.f32.mrf.mxu0 }
0x3cb2   :  { %v13903_v0 = vadd.f32 %v16505_v46, %v13902_v29 }
0x3cb3   :  { %v16016_v12 = vpop.f32.mrf.mxu0 }
0x3cb4   :  { %v13906_v38 = vadd.f32 %v13903_v0, %v13732_v21 }
0x3cb6   :  { %v13907_v50 = vsel %vm436_vm10, %v13906_v38, 0.0 }
0x3cb7   :  { %13908 = vadd.xlane.f32.xlu0 %v13907_v50 }
0x3d40   :  { %v13909_v8 = vpop.xlane.xlu0 %13908 }
0x3d41   :  { %v13910_v51 = vmul.f32 0.03125, %v13909_v8 }
0x3d43   :  { %v13911_v7 = vsub.f32 %v13906_v38, %v13910_v51 }
0x3d45   :  { %v13912_v15 = vmul.f32 %v13911_v7, %v13911_v7 }
0x3d47   :  { %v13913_v53 = vsel %vm436_vm10, %v13912_v15, 0.0 }
0x3d48   :  { %13914 = vadd.xlane.f32.xlu0 %v13913_v53 }
0x3dd1   :  { %v13915_v14 = vpop.xlane.xlu0 %13914 }
0x3dd2   :  { %v13916_v61 = vmul.f32 0.03125, %v13915_v14 }
0x3dd4   :  { %v13917_v60 = vadd.f32 1e-05, %v13916_v61 }
0x3dd6   :  { %16404 = vrsqrt.f32 %v13917_v60 }
0x3de3   :  { %v16405_v27 = vpop.eup %16404 }
0x3de4   :  { %v13919_v62 = vmul.f32 %v16405_v27, %v13911_v7 }
0x3de6   :  { %v13920_v41 = vmul.f32 %v16506_v57, %v13919_v62 }
0x3de8   :  { %v13921_v10 = vadd.f32 %v16507_v20, %v13920_v41 }
0x3dea   :  { %v13922_v56 = vsel %vm436_vm10, %v13921_v10, 0.0 }
0x3deb   :  { %13923 = vadd.xlane.f32.xlu0 %v13922_v56 }
0x3e74   :  { %v13924_v17 = vpop.xlane.xlu0 %13923 }
0x3e75   :  { %v13925_v24 = vmul.f32 0.03125, %v13924_v17 }
0x3e77   :  { %v13926_v25 = vsub.f32 %v13921_v10, %v13925_v24 }
0x3e79   :  { %v13927_v28 = vmul.f32 %v13926_v25, %v13926_v25 }
0x3e7b   :  { %v13928_v18 = vsel %vm436_vm10, %v13927_v28, 0.0 }
0x3e7c   :  { %13929 = vadd.xlane.f32.xlu1 %v13928_v18 }
0x3f05   :  { %v13930_v32 = vpop.xlane.xlu1 %13929 }
0x3f06   :  { %v13931_v49 = vmul.f32 0.03125, %v13930_v32 }
0x3f08   :  { %v13932_v34 = vadd.f32 1e-05, %v13931_v49 }
0x3f0a   :  { %16406 = vrsqrt.f32 %v13932_v34 }
0x3f17   :  { %v16407_v31 = vpop.eup %16406 }
0x3f18   :  { %v13934_v21 = vmul.f32 %v16407_v31, %v13926_v25 }
0x3f1a   :  { %v13935_v19 = vmul.f32 %v16508_v35, %v13934_v21 }
0x3f1c   :  { %v13936_v48 = vadd.f32 %v16509_v39, %v13935_v19 }
0x3f1e   :  { %16026 = vmatmul.mubr.msk.f32.vlgmr.msra.gmra.mxu1 %vm436_vm10, %v13936_v48 }
0x3fde   :  { %v14006_v44 = vpop.f32.mrf.mxu1 }
0x3fdf   :  { %v14007_v4 = vadd.f32 %v16510_v26, %v14006_v44 }
0x3fe0   :  { %v16027_v43 = vpop.f32.mrf.mxu1 }
0x3fe1   :  { %14407 = vst.msk [vmem:[%s16984_s3 + $0x8] sm:$0xff] %vm3767_vm14, %v14007_v4 }
0x3fe2   :  { %14016 = vsyncpa [#allocation3], 1 }
0x3fe3   :  { %14017 = vsyncpa [#allocation5], 1 }
0x3fe4   :  { %14018 = vsyncpa [#allocation8], 1 }
0x3fe5   :  { %14019 = vsyncpa [#allocation11], 1 }
0x3fe6   :  { %14020 = vsyncpa [#allocation14], 1 }

</bundles_post_ra>
